<compile_context>
chip_gen: v7x
topology: tpu7x:2x2x1
jax: 0.10.0
libtpu: 0.0.40
codegen_flags: <defaults>
</compile_context>

<pallas_src>
import functools

import jax
import jax.numpy as jnp
import numpy as np
from jax.experimental import pallas as pl
from jax.experimental.pallas import tpu as pltpu


# -------------------- tiling helpers --------------------

def _pick_tile(M, pref, unit):
    """Pad M to a multiple of `unit`, pick a tile <= pref (multiple of `unit`),
    and keep the grid length >= 2 when M allows (v7x has 2 TensorCores)."""
    Mu = ((M + unit - 1) // unit) * unit
    t = min(pref, Mu)
    t = max(unit, (t // unit) * unit)
    if Mu // t < 2 and Mu >= 2 * unit:
        t = max(unit, ((Mu // 2) // unit) * unit)
    Mp = ((Mu + t - 1) // t) * t
    return Mp, t


# -------------------- Pallas: linear (x @ w + b) --------------------

def _linear_kernel(x_ref, w_ref, b_ref, o_ref):
    acc = jnp.dot(x_ref[...], w_ref[...], preferred_element_type=jnp.float32)
    o_ref[...] = (acc + b_ref[...]).astype(o_ref.dtype)


def linear_pallas(x, w, b, *, tm_pref=512):
    """y = x @ w + b, tiled over tokens with cdiv-padding (no single-block fallback)."""
    M, Kin = x.shape
    _, N = w.shape
    Mp, tm = _pick_tile(M, tm_pref, 8)
    xp = jnp.pad(x, ((0, Mp - M), (0, 0))) if Mp != M else x
    b2 = b.reshape(1, N).astype(jnp.float32)
    out = pl.pallas_call(
        _linear_kernel,
        out_shape=jax.ShapeDtypeStruct((Mp, N), x.dtype),
        grid_spec=pltpu.PrefetchScalarGridSpec(
            num_scalar_prefetch=0,
            grid=(Mp // tm,),
            in_specs=[pl.BlockSpec((tm, Kin), lambda i: (i, 0)),
                      pl.BlockSpec((Kin, N), lambda i: (0, 0)),
                      pl.BlockSpec((1, N), lambda i: (0, 0))],
            out_specs=pl.BlockSpec((tm, N), lambda i: (i, 0))),
        compiler_params=pltpu.CompilerParams(
            dimension_semantics=("parallel",),
            vmem_limit_bytes=32 * 1024 * 1024),
    )(xp, w, b2)
    return out[:M] if Mp != M else out


# -------------------- Pallas: fused attn-logits + softmax + PV --------------------

def _fused_outlook_kernel(xT_ref, wT_ref, bT_ref, v_ref, o_ref, *,
                          scale, num_heads, kk, jpad):
    # logits for every (head, i, j) row against the tn tokens on the lane axis.
    x = xT_ref[...].astype(jnp.float32)                      # (C, tn)
    w = wT_ref[...].astype(jnp.float32)                      # (nh*kk*jpad, C)
    logits = jnp.dot(w, x, preferred_element_type=jnp.float32)   # MXU: (R, tn)
    logits = (logits + bT_ref[...].astype(jnp.float32)) * scale

    for h in range(num_heads):
        for i in range(kk):
            g = h * kk + i
            # 8-aligned static slice of one softmax group: (jpad, tn)
            s = logits[g * jpad:(g + 1) * jpad, :]
            m = jnp.max(s, axis=0, keepdims=True)            # (1, tn)
            e = jnp.exp(s - m)                               # EUP; padded rows -> 0
            p = e * pl.reciprocal(jnp.sum(e, axis=0, keepdims=True), approx=True)
            # PV as unrolled VPU MACs over (hd, tn)-shaped slabs (lane-dense).
            acc = p[0:1, :] * v_ref[h, 0, :, :].astype(jnp.float32)
            for j in range(1, kk):
                acc = acc + p[j:j + 1, :] * v_ref[h, j, :, :].astype(jnp.float32)
            o_ref[h, i, :, :] = acc.astype(o_ref.dtype)


def fused_outlook_attention(xT, wT, bT, v_unf, *, scale, num_heads, kk, jpad, tn):
    C, Mp = xT.shape
    R = wT.shape[0]
    hd = v_unf.shape[2]
    kern = functools.partial(_fused_outlook_kernel, scale=scale,
                             num_heads=num_heads, kk=kk, jpad=jpad)
    return pl.pallas_call(
        kern,
        out_shape=jax.ShapeDtypeStruct((num_heads, kk, hd, Mp), v_unf.dtype),
        grid_spec=pltpu.PrefetchScalarGridSpec(
            num_scalar_prefetch=0,
            grid=(Mp // tn,),
            in_specs=[pl.BlockSpec((C, tn), lambda i: (0, i)),
                      pl.BlockSpec((R, C), lambda i: (0, 0)),
                      pl.BlockSpec((R, 1), lambda i: (0, 0)),
                      pl.BlockSpec((num_heads, kk, hd, tn), lambda i: (0, 0, 0, i))],
            out_specs=pl.BlockSpec((num_heads, kk, hd, tn), lambda i: (0, 0, 0, i))),
        compiler_params=pltpu.CompilerParams(
            dimension_semantics=("parallel",),
            vmem_limit_bytes=32 * 1024 * 1024),
    )(xT, wT, bT, v_unf)


def pack_attn_weights(attn_w, attn_b, num_heads, kk, jpad):
    """Rows ordered (head, i, j) with j zero-padded kk->jpad (sublane aligned);
    padded bias rows get a large negative so they vanish in the softmax."""
    C = attn_w.shape[0]
    w = attn_w.reshape(C, num_heads, kk, kk)
    w = jnp.pad(w, ((0, 0), (0, 0), (0, 0), (0, jpad - kk)))
    wT = w.transpose(1, 2, 3, 0).reshape(num_heads * kk * jpad, C)
    b = attn_b.reshape(num_heads, kk, kk).astype(jnp.float32)
    b = jnp.pad(b, ((0, 0), (0, 0), (0, jpad - kk)), constant_values=-1e30)
    bT = b.reshape(num_heads * kk * jpad, 1)
    return wT, bT


# -------------------- JAX glue: unfold / fold --------------------

def unfold_nhwc(v, K, pad):
    """v: (B,H,W,C) -> patches (B,H,W,K*K,C); patch index k = ki*K + kj."""
    B, H, W, C = v.shape
    vp = jnp.pad(v, ((0, 0), (pad, pad), (pad, pad), (0, 0)))
    patches = [vp[:, ki:ki + H, kj:kj + W, :] for ki in range(K) for kj in range(K)]
    return jnp.stack(patches, axis=3)


def unfold_to_lane_major(v, K, pad, num_heads):
    """v: (B,H,W,C) -> (num_heads, K*K, head_dim, B*H*W), token-last layout."""
    B, H, W, C = v.shape
    hd = C // num_heads
    vp = jnp.pad(v, ((0, 0), (pad, pad), (pad, pad), (0, 0)))
    patches = jnp.stack([vp[:, ki:ki + H, kj:kj + W, :]
                         for ki in range(K) for kj in range(K)], axis=0)   # (KK,B,H,W,C)
    patches = patches.reshape(K * K, B * H * W, num_heads, hd)
    return patches.transpose(2, 0, 3, 1)                                   # (nh,KK,hd,M)


def fold_nhwc(patches, H, W, K, pad):
    """patches: (B,H,W,K*K,C) -> (B,H,W,C) summing overlapping contributions."""
    B = patches.shape[0]
    C = patches.shape[-1]
    acc = jnp.zeros((B, H + 2 * pad, W + 2 * pad, C), patches.dtype)
    for ki in range(K):
        for kj in range(K):
            k = ki * K + kj
            acc = acc.at[:, ki:ki + H, kj:kj + W, :].add(patches[:, :, :, k, :])
    return acc[:, pad:pad + H, pad:pad + W, :]


# -------------------- forward pass --------------------

def outlook_attention_forward(x, params, *, num_heads, kernel_size=3, padding=1,
                              stride=1, use_pallas=True):
    assert stride == 1, "stride=1 only (pool is identity)"
    B, H, W, C = x.shape
    hd = C // num_heads
    K = kernel_size
    KK = K * K
    L = H * W
    M = B * L
    scale = hd ** (-0.5)
    xf = x.reshape(M, C)

    if use_pallas:
        # v projection (qkv_bias=False -> zero bias)
        v = linear_pallas(xf, params["v_w"], params["v_b"]).reshape(B, H, W, C)

        # unfold v straight into the fused kernel's token-last layout
        v_unf = unfold_to_lane_major(v, K, padding, num_heads)        # (nh,KK,hd,M)

        JP = ((KK + 7) // 8) * 8                                      # 9 -> 16
        wT, bT = pack_attn_weights(params["attn_w"], params["attn_b"],
                                   num_heads, KK, JP)

        Mp, tn = _pick_tile(M, 512, 128)
        xT = xf.T                                                     # (C, M)
        if Mp != M:
            xT = jnp.pad(xT, ((0, 0), (0, Mp - M)))
            v_unf = jnp.pad(v_unf, ((0, 0), (0, 0), (0, 0), (0, Mp - M)))

        # fused: logits matmul + scale + softmax + PV  (the hot path)
        o = fused_outlook_attention(xT, wT, bT, v_unf, scale=scale,
                                    num_heads=num_heads, kk=KK, jpad=JP, tn=tn)
        if Mp != M:
            o = o[..., :M]
        o = o.transpose(3, 1, 0, 2).reshape(B, H, W, KK, C)           # (B,H,W,KK,C)
        o = fold_nhwc(o, H, W, K, padding)                            # (B,H,W,C)
        o = linear_pallas(o.reshape(M, C), params["proj_w"], params["proj_b"])
        return o.reshape(B, H, W, C)

    # -------- pure-JAX reference path --------
    v = (xf @ params["v_w"] + params["v_b"]).reshape(B, H, W, C)
    v_p = unfold_nhwc(v, K, padding).reshape(B, L, KK, num_heads, hd)
    v_p = v_p.transpose(0, 3, 1, 2, 4).reshape(B * num_heads * L, KK, hd)
    a = (xf @ params["attn_w"] + params["attn_b"]).reshape(B, L, num_heads, KK, KK)
    a = a.transpose(0, 2, 1, 3, 4).reshape(B * num_heads * L, KK, KK)
    p = jax.nn.softmax(a.astype(jnp.float32) * scale, axis=-1)
    o = jnp.einsum("nij,njd->nid", p, v_p.astype(jnp.float32)).astype(v_p.dtype)
    o = o.reshape(B, num_heads, L, KK, hd).transpose(0, 2, 3, 1, 4)
    o = o.reshape(B, H, W, KK, C)
    o = fold_nhwc(o, H, W, K, padding)
    o = o.reshape(M, C) @ params["proj_w"] + params["proj_b"]
    return o.reshape(B, H, W, C)


# -------------------- parameter init --------------------

def init_params(key, dim, num_heads, kernel_size):
    KK = kernel_size * kernel_size
    k1, k2, k3, k4, k5 = jax.random.split(key, 5)
    return {
        "v_w": 0.02 * jax.random.normal(k1, (dim, dim), jnp.float32),
        "v_b": jnp.zeros((dim,), jnp.float32),             # qkv_bias=False
        "attn_w": 0.02 * jax.random.normal(k2, (dim, num_heads * KK * KK), jnp.float32),
        "attn_b": 0.02 * jax.random.normal(k3, (num_heads * KK * KK,), jnp.float32),
        "proj_w": 0.02 * jax.random.normal(k4, (dim, dim), jnp.float32),
        "proj_b": 0.02 * jax.random.normal(k5, (dim,), jnp.float32),
    }


if __name__ == "__main__":
    B, H, W, C = 2, 8, 8, 32
    num_heads = 2
    kernel_size, padding, stride = 3, 1, 1

    key = jax.random.PRNGKey(0)
    kx, kp = jax.random.split(key)
    x = jax.random.normal(kx, (B, H, W, C), jnp.float32)
    params = init_params(kp, C, num_heads, kernel_size)

    fwd = jax.jit(functools.partial(
        outlook_attention_forward, num_heads=num_heads, kernel_size=kernel_size,
        padding=padding, stride=stride, use_pallas=True))
    out = fwd(x, params)
    out = jax.block_until_ready(out)

    # pure-JAX reference for a numerical sanity check
    ref = outlook_attention_forward(
        x, params, num_heads=num_heads, kernel_size=kernel_size,
        padding=padding, stride=stride, use_pallas=False)
    ref = jax.block_until_ready(ref)

    assert out.shape == (B, H, W, C)
    np.testing.assert_allclose(np.asarray(out), np.asarray(ref), rtol=1e-2, atol=5e-3)
    print("KERNEL_OK")
</pallas_src>

<mosaic_0001>
module attributes {stable_mosaic.version = 11 : i64} {
  func.func @_linear_kernel(%arg0: i32, %arg1: memref<64x32xf32, #tpu.memory_space<vmem>>, %arg2: memref<32x32xf32, #tpu.memory_space<vmem>>, %arg3: memref<1x32xf32, #tpu.memory_space<vmem>>, %arg4: memref<64x32xf32, #tpu.memory_space<vmem>>) attributes {dimension_semantics = [#tpu.dimension_semantics<parallel>], iteration_bounds = array<i64: 2>, scalar_prefetch = 0 : i64, scratch_operands = 0 : i64, tpu.core_type = #tpu.core_type<tc>, window_params = [{transform_indices = @transform_0, window_bounds = array<i64: 64, 32>}, {pipeline_mode = #tpu.pipeline_mode<synchronous>, transform_indices = @transform_1, window_bounds = array<i64: 32, 32>}, {pipeline_mode = #tpu.pipeline_mode<synchronous>, transform_indices = @transform_2, window_bounds = array<i64: 1, 32>}, {transform_indices = @transform_3, window_bounds = array<i64: 64, 32>}]} {
    %c0 = arith.constant 0 : index
    %c0_0 = arith.constant 0 : index
    %0 = vector.load %arg1[%c0, %c0_0] : memref<64x32xf32, #tpu.memory_space<vmem>>, vector<64x32xf32>
    %c0_1 = arith.constant 0 : index
    %c0_2 = arith.constant 0 : index
    %1 = vector.load %arg2[%c0_1, %c0_2] : memref<32x32xf32, #tpu.memory_space<vmem>>, vector<32x32xf32>
    %cst = arith.constant dense<0.000000e+00> : vector<64x32xf32>
    %2 = tpu.matmul %0, %1, %cst {dimension_numbers = #tpu.dot_dimension_numbers<[1], [0], [0], [1], [0, 0, 1, 1], [], []>} : vector<64x32xf32>, vector<32x32xf32>, vector<64x32xf32> -> vector<64x32xf32>
    %c0_3 = arith.constant 0 : index
    %c0_4 = arith.constant 0 : index
    %3 = vector.load %arg3[%c0_3, %c0_4] : memref<1x32xf32, #tpu.memory_space<vmem>>, vector<1x32xf32>
    %4 = vector.broadcast %3 : vector<1x32xf32> to vector<64x32xf32>
    %5 = arith.addf %2, %4 : vector<64x32xf32>
    %c0_5 = arith.constant 0 : index
    %c0_6 = arith.constant 0 : index
    %6 = vector.load %arg4[%c0_5, %c0_6] : memref<64x32xf32, #tpu.memory_space<vmem>>, vector<64x32xf32>
    tpu.vector_store %arg4[%c0_5, %c0_6], %5 {strides = array<i32>} : memref<64x32xf32, #tpu.memory_space<vmem>>, vector<64x32xf32>,
    return
  }
  func.func @transform_0(%arg0: i32) -> (i32, i32) {
    %c0_i32 = arith.constant 0 : i32
    %c0_i32_0 = arith.constant 0 : i32
    return %arg0, %c0_i32 : i32, i32
  }
  func.func @transform_1(%arg0: i32) -> (i32, i32) {
    %c0_i32 = arith.constant 0 : i32
    %c0_i32_0 = arith.constant 0 : i32
    %c0_i32_1 = arith.constant 0 : i32
    return %c0_i32, %c0_i32_0 : i32, i32
  }
  func.func @transform_2(%arg0: i32) -> (i32, i32) {
    %c0_i32 = arith.constant 0 : i32
    %c0_i32_0 = arith.constant 0 : i32
    %c0_i32_1 = arith.constant 0 : i32
    return %c0_i32, %c0_i32_0 : i32, i32
  }
  func.func @transform_3(%arg0: i32) -> (i32, i32) {
    %c0_i32 = arith.constant 0 : i32
    %c0_i32_0 = arith.constant 0 : i32
    return %arg0, %c0_i32 : i32, i32
  }
}

module attributes {stable_mosaic.version = 11 : i64} {
  func.func @_fused_outlook_kernel(%arg0: i32, %arg1: memref<32x128xf32, #tpu.memory_space<vmem>>, %arg2: memref<288x32xf32, #tpu.memory_space<vmem>>, %arg3: memref<288x1xf32, #tpu.memory_space<vmem>>, %arg4: memref<2x9x16x128xf32, #tpu.memory_space<vmem>>, %arg5: memref<2x9x16x128xf32, #tpu.memory_space<vmem>>) attributes {dimension_semantics = [#tpu.dimension_semantics<parallel>], iteration_bounds = array<i64: 1>, scalar_prefetch = 0 : i64, scratch_operands = 0 : i64, tpu.core_type = #tpu.core_type<tc>, window_params = [{transform_indices = @transform_0, window_bounds = array<i64: 32, 128>}, {pipeline_mode = #tpu.pipeline_mode<synchronous>, transform_indices = @transform_1, window_bounds = array<i64: 288, 32>}, {pipeline_mode = #tpu.pipeline_mode<synchronous>, transform_indices = @transform_2, window_bounds = array<i64: 288, 1>}, {transform_indices = @transform_3, window_bounds = array<i64: 2, 9, 16, 128>}, {transform_indices = @transform_4, window_bounds = array<i64: 2, 9, 16, 128>}]} {
    %c0 = arith.constant 0 : index
    %c0_0 = arith.constant 0 : index
    %0 = vector.load %arg1[%c0, %c0_0] : memref<32x128xf32, #tpu.memory_space<vmem>>, vector<32x128xf32>
    %c0_1 = arith.constant 0 : index
    %c0_2 = arith.constant 0 : index
    %1 = vector.load %arg2[%c0_1, %c0_2] : memref<288x32xf32, #tpu.memory_space<vmem>>, vector<288x32xf32>
    %cst = arith.constant dense<0.000000e+00> : vector<288x128xf32>
    %2 = tpu.matmul %1, %0, %cst {dimension_numbers = #tpu.dot_dimension_numbers<[1], [0], [0], [1], [0, 0, 1, 1], [], []>} : vector<288x32xf32>, vector<32x128xf32>, vector<288x128xf32> -> vector<288x128xf32>
    %c0_3 = arith.constant 0 : index
    %c0_4 = arith.constant 0 : index
    %3 = vector.load %arg3[%c0_3, %c0_4] : memref<288x1xf32, #tpu.memory_space<vmem>>, vector<288x1xf32>
    %4 = vector.broadcast %3 : vector<288x1xf32> to vector<288x128xf32>
    %5 = arith.addf %2, %4 : vector<288x128xf32>
    %cst_5 = arith.constant 2.500000e-01 : f32
    %6 = vector.broadcast %cst_5 : f32 to vector<288x128xf32>
    %7 = arith.mulf %5, %6 : vector<288x128xf32>
    %8 = vector.extract_strided_slice %7 {offsets = [0, 0], sizes = [16, 128], strides = [1, 1]} : vector<288x128xf32> to vector<16x128xf32>
    %cst_6 = arith.constant dense<0xFF800000> : vector<128xf32>
    %9 = vector.multi_reduction <maximumf>, %8, %cst_6 [0] : vector<16x128xf32> to vector<128xf32>
    %10 = vector.shape_cast %9 : vector<128xf32> to vector<1x128xf32>
    %11 = vector.broadcast %10 : vector<1x128xf32> to vector<16x128xf32>
    %12 = arith.subf %8, %11 : vector<16x128xf32>
    %13 = math.exp %12 : vector<16x128xf32>
    %cst_7 = arith.constant dense<0.000000e+00> : vector<128xf32>
    %14 = vector.multi_reduction <add>, %13, %cst_7 [0] : vector<16x128xf32> to vector<128xf32>
    %15 = vector.shape_cast %14 : vector<128xf32> to vector<1x128xf32>
    %16 = tpu.reciprocal %15 {approx = true} : vector<1x128xf32> -> vector<1x128xf32>
    %17 = vector.broadcast %16 : vector<1x128xf32> to vector<16x128xf32>
    %18 = arith.mulf %13, %17 : vector<16x128xf32>
    %19 = vector.extract_strided_slice %18 {offsets = [0, 0], sizes = [1, 128], strides = [1, 1]} : vector<16x128xf32> to vector<1x128xf32>
    %c0_8 = arith.constant 0 : index
    %c0_9 = arith.constant 0 : index
    %c0_10 = arith.constant 0 : index
    %c0_11 = arith.constant 0 : index
    %20 = vector.load %arg4[%c0_8, %c0_9, %c0_10, %c0_11] : memref<2x9x16x128xf32, #tpu.memory_space<vmem>>, vector<1x1x16x128xf32>
    %21 = vector.shape_cast %20 : vector<1x1x16x128xf32> to vector<16x128xf32>
    %22 = vector.broadcast %19 : vector<1x128xf32> to vector<16x128xf32>
    %23 = arith.mulf %22, %21 : vector<16x128xf32>
    %24 = vector.extract_strided_slice %18 {offsets = [1, 0], sizes = [1, 128], strides = [1, 1]} : vector<16x128xf32> to vector<1x128xf32>
    %c0_12 = arith.constant 0 : index
    %c1 = arith.constant 1 : index
    %c0_13 = arith.constant 0 : index
    %c0_14 = arith.constant 0 : index
    %25 = vector.load %arg4[%c0_12, %c1, %c0_13, %c0_14] : memref<2x9x16x128xf32, #tpu.memory_space<vmem>>, vector<1x1x16x128xf32>
    %26 = vector.shape_cast %25 : vector<1x1x16x128xf32> to vector<16x128xf32>
    %27 = vector.broadcast %24 : vector<1x128xf32> to vector<16x128xf32>
    %28 = arith.mulf %27, %26 : vector<16x128xf32>
    %29 = arith.addf %23, %28 : vector<16x128xf32>
    %30 = vector.extract_strided_slice %18 {offsets = [2, 0], sizes = [1, 128], strides = [1, 1]} : vector<16x128xf32> to vector<1x128xf32>
    %c0_15 = arith.constant 0 : index
    %c2 = arith.constant 2 : index
    %c0_16 = arith.constant 0 : index
    %c0_17 = arith.constant 0 : index
    %31 = vector.load %arg4[%c0_15, %c2, %c0_16, %c0_17] : memref<2x9x16x128xf32, #tpu.memory_space<vmem>>, vector<1x1x16x128xf32>
    %32 = vector.shape_cast %31 : vector<1x1x16x128xf32> to vector<16x128xf32>
    %33 = vector.broadcast %30 : vector<1x128xf32> to vector<16x128xf32>
    %34 = arith.mulf %33, %32 : vector<16x128xf32>
    %35 = arith.addf %29, %34 : vector<16x128xf32>
    %36 = vector.extract_strided_slice %18 {offsets = [3, 0], sizes = [1, 128], strides = [1, 1]} : vector<16x128xf32> to vector<1x128xf32>
    %c0_18 = arith.constant 0 : index
    %c3 = arith.constant 3 : index
    %c0_19 = arith.constant 0 : index
    %c0_20 = arith.constant 0 : index
    %37 = vector.load %arg4[%c0_18, %c3, %c0_19, %c0_20] : memref<2x9x16x128xf32, #tpu.memory_space<vmem>>, vector<1x1x16x128xf32>
    %38 = vector.shape_cast %37 : vector<1x1x16x128xf32> to vector<16x128xf32>
    %39 = vector.broadcast %36 : vector<1x128xf32> to vector<16x128xf32>
    %40 = arith.mulf %39, %38 : vector<16x128xf32>
    %41 = arith.addf %35, %40 : vector<16x128xf32>
    %42 = vector.extract_strided_slice %18 {offsets = [4, 0], sizes = [1, 128], strides = [1, 1]} : vector<16x128xf32> to vector<1x128xf32>
    %c0_21 = arith.constant 0 : index
    %c4 = arith.constant 4 : index
    %c0_22 = arith.constant 0 : index
    %c0_23 = arith.constant 0 : index
    %43 = vector.load %arg4[%c0_21, %c4, %c0_22, %c0_23] : memref<2x9x16x128xf32, #tpu.memory_space<vmem>>, vector<1x1x16x128xf32>
    %44 = vector.shape_cast %43 : vector<1x1x16x128xf32> to vector<16x128xf32>
    %45 = vector.broadcast %42 : vector<1x128xf32> to vector<16x128xf32>
    %46 = arith.mulf %45, %44 : vector<16x128xf32>
    %47 = arith.addf %41, %46 : vector<16x128xf32>
    %48 = vector.extract_strided_slice %18 {offsets = [5, 0], sizes = [1, 128], strides = [1, 1]} : vector<16x128xf32> to vector<1x128xf32>
    %c0_24 = arith.constant 0 : index
    %c5 = arith.constant 5 : index
    %c0_25 = arith.constant 0 : index
    %c0_26 = arith.constant 0 : index
    %49 = vector.load %arg4[%c0_24, %c5, %c0_25, %c0_26] : memref<2x9x16x128xf32, #tpu.memory_space<vmem>>, vector<1x1x16x128xf32>
    %50 = vector.shape_cast %49 : vector<1x1x16x128xf32> to vector<16x128xf32>
    %51 = vector.broadcast %48 : vector<1x128xf32> to vector<16x128xf32>
    %52 = arith.mulf %51, %50 : vector<16x128xf32>
    %53 = arith.addf %47, %52 : vector<16x128xf32>
    %54 = vector.extract_strided_slice %18 {offsets = [6, 0], sizes = [1, 128], strides = [1, 1]} : vector<16x128xf32> to vector<1x128xf32>
    %c0_27 = arith.constant 0 : index
    %c6 = arith.constant 6 : index
    %c0_28 = arith.constant 0 : index
    %c0_29 = arith.constant 0 : index
    %55 = vector.load %arg4[%c0_27, %c6, %c0_28, %c0_29] : memref<2x9x16x128xf32, #tpu.memory_space<vmem>>, vector<1x1x16x128xf32>
    %56 = vector.shape_cast %55 : vector<1x1x16x128xf32> to vector<16x128xf32>
    %57 = vector.broadcast %54 : vector<1x128xf32> to vector<16x128xf32>
    %58 = arith.mulf %57, %56 : vector<16x128xf32>
    %59 = arith.addf %53, %58 : vector<16x128xf32>
    %60 = vector.extract_strided_slice %18 {offsets = [7, 0], sizes = [1, 128], strides = [1, 1]} : vector<16x128xf32> to vector<1x128xf32>
    %c0_30 = arith.constant 0 : index
    %c7 = arith.constant 7 : index
    %c0_31 = arith.constant 0 : index
    %c0_32 = arith.constant 0 : index
    %61 = vector.load %arg4[%c0_30, %c7, %c0_31, %c0_32] : memref<2x9x16x128xf32, #tpu.memory_space<vmem>>, vector<1x1x16x128xf32>
    %62 = vector.shape_cast %61 : vector<1x1x16x128xf32> to vector<16x128xf32>
    %63 = vector.broadcast %60 : vector<1x128xf32> to vector<16x128xf32>
    %64 = arith.mulf %63, %62 : vector<16x128xf32>
    %65 = arith.addf %59, %64 : vector<16x128xf32>
    %66 = vector.extract_strided_slice %18 {offsets = [8, 0], sizes = [1, 128], strides = [1, 1]} : vector<16x128xf32> to vector<1x128xf32>
    %c0_33 = arith.constant 0 : index
    %c8 = arith.constant 8 : index
    %c0_34 = arith.constant 0 : index
    %c0_35 = arith.constant 0 : index
    %67 = vector.load %arg4[%c0_33, %c8, %c0_34, %c0_35] : memref<2x9x16x128xf32, #tpu.memory_space<vmem>>, vector<1x1x16x128xf32>
    %68 = vector.shape_cast %67 : vector<1x1x16x128xf32> to vector<16x128xf32>
    %69 = vector.broadcast %66 : vector<1x128xf32> to vector<16x128xf32>
    %70 = arith.mulf %69, %68 : vector<16x128xf32>
    %71 = arith.addf %65, %70 : vector<16x128xf32>
    %c0_36 = arith.constant 0 : index
    %c0_37 = arith.constant 0 : index
    %c0_38 = arith.constant 0 : index
    %c0_39 = arith.constant 0 : index
    %72 = vector.load %arg5[%c0_36, %c0_37, %c0_38, %c0_39] : memref<2x9x16x128xf32, #tpu.memory_space<vmem>>, vector<1x1x16x128xf32>
    %73 = vector.shape_cast %72 : vector<1x1x16x128xf32> to vector<16x128xf32>
    %74 = vector.shape_cast %71 : vector<16x128xf32> to vector<1x1x16x128xf32>
    tpu.vector_store %arg5[%c0_36, %c0_37, %c0_38, %c0_39], %74 {strides = array<i32>} : memref<2x9x16x128xf32, #tpu.memory_space<vmem>>, vector<1x1x16x128xf32>,
    %75 = vector.extract_strided_slice %7 {offsets = [16, 0], sizes = [16, 128], strides = [1, 1]} : vector<288x128xf32> to vector<16x128xf32>
    %cst_40 = arith.constant dense<0xFF800000> : vector<128xf32>
    %76 = vector.multi_reduction <maximumf>, %75, %cst_40 [0] : vector<16x128xf32> to vector<128xf32>
    %77 = vector.shape_cast %76 : vector<128xf32> to vector<1x128xf32>
    %78 = vector.broadcast %77 : vector<1x128xf32> to vector<16x128xf32>
    %79 = arith.subf %75, %78 : vector<16x128xf32>
    %80 = math.exp %79 : vector<16x128xf32>
    %cst_41 = arith.constant dense<0.000000e+00> : vector<128xf32>
    %81 = vector.multi_reduction <add>, %80, %cst_41 [0] : vector<16x128xf32> to vector<128xf32>
    %82 = vector.shape_cast %81 : vector<128xf32> to vector<1x128xf32>
    %83 = tpu.reciprocal %82 {approx = true} : vector<1x128xf32> -> vector<1x128xf32>
    %84 = vector.broadcast %83 : vector<1x128xf32> to vector<16x128xf32>
    %85 = arith.mulf %80, %84 : vector<16x128xf32>
    %86 = vector.extract_strided_slice %85 {offsets = [0, 0], sizes = [1, 128], strides = [1, 1]} : vector<16x128xf32> to vector<1x128xf32>
    %c0_42 = arith.constant 0 : index
    %c0_43 = arith.constant 0 : index
    %c0_44 = arith.constant 0 : index
    %c0_45 = arith.constant 0 : index
    %87 = vector.load %arg4[%c0_42, %c0_43, %c0_44, %c0_45] : memref<2x9x16x128xf32, #tpu.memory_space<vmem>>, vector<1x1x16x128xf32>
    %88 = vector.shape_cast %87 : vector<1x1x16x128xf32> to vector<16x128xf32>
    %89 = vector.broadcast %86 : vector<1x128xf32> to vector<16x128xf32>
    %90 = arith.mulf %89, %88 : vector<16x128xf32>
    %91 = vector.extract_strided_slice %85 {offsets = [1, 0], sizes = [1, 128], strides = [1, 1]} : vector<16x128xf32> to vector<1x128xf32>
    %c0_46 = arith.constant 0 : index
    %c1_47 = arith.constant 1 : index
    %c0_48 = arith.constant 0 : index
    %c0_49 = arith.constant 0 : index
    %92 = vector.load %arg4[%c0_46, %c1_47, %c0_48, %c0_49] : memref<2x9x16x128xf32, #tpu.memory_space<vmem>>, vector<1x1x16x128xf32>
    %93 = vector.shape_cast %92 : vector<1x1x16x128xf32> to vector<16x128xf32>
    %94 = vector.broadcast %91 : vector<1x128xf32> to vector<16x128xf32>
    %95 = arith.mulf %94, %93 : vector<16x128xf32>
    %96 = arith.addf %90, %95 : vector<16x128xf32>
    %97 = vector.extract_strided_slice %85 {offsets = [2, 0], sizes = [1, 128], strides = [1, 1]} : vector<16x128xf32> to vector<1x128xf32>
    %c0_50 = arith.constant 0 : index
    %c2_51 = arith.constant 2 : index
    %c0_52 = arith.constant 0 : index
    %c0_53 = arith.constant 0 : index
    %98 = vector.load %arg4[%c0_50, %c2_51, %c0_52, %c0_53] : memref<2x9x16x128xf32, #tpu.memory_space<vmem>>, vector<1x1x16x128xf32>
    %99 = vector.shape_cast %98 : vector<1x1x16x128xf32> to vector<16x128xf32>
    %100 = vector.broadcast %97 : vector<1x128xf32> to vector<16x128xf32>
    %101 = arith.mulf %100, %99 : vector<16x128xf32>
    %102 = arith.addf %96, %101 : vector<16x128xf32>
    %103 = vector.extract_strided_slice %85 {offsets = [3, 0], sizes = [1, 128], strides = [1, 1]} : vector<16x128xf32> to vector<1x128xf32>
    %c0_54 = arith.constant 0 : index
    %c3_55 = arith.constant 3 : index
    %c0_56 = arith.constant 0 : index
    %c0_57 = arith.constant 0 : index
    %104 = vector.load %arg4[%c0_54, %c3_55, %c0_56, %c0_57] : memref<2x9x16x128xf32, #tpu.memory_space<vmem>>, vector<1x1x16x128xf32>
    %105 = vector.shape_cast %104 : vector<1x1x16x128xf32> to vector<16x128xf32>
    %106 = vector.broadcast %103 : vector<1x128xf32> to vector<16x128xf32>
    %107 = arith.mulf %106, %105 : vector<16x128xf32>
    %108 = arith.addf %102, %107 : vector<16x128xf32>
    %109 = vector.extract_strided_slice %85 {offsets = [4, 0], sizes = [1, 128], strides = [1, 1]} : vector<16x128xf32> to vector<1x128xf32>
    %c0_58 = arith.constant 0 : index
    %c4_59 = arith.constant 4 : index
    %c0_60 = arith.constant 0 : index
    %c0_61 = arith.constant 0 : index
    %110 = vector.load %arg4[%c0_58, %c4_59, %c0_60, %c0_61] : memref<2x9x16x128xf32, #tpu.memory_space<vmem>>, vector<1x1x16x128xf32>
    %111 = vector.shape_cast %110 : vector<1x1x16x128xf32> to vector<16x128xf32>
    %112 = vector.broadcast %109 : vector<1x128xf32> to vector<16x128xf32>
    %113 = arith.mulf %112, %111 : vector<16x128xf32>
    %114 = arith.addf %108, %113 : vector<16x128xf32>
    %115 = vector.extract_strided_slice %85 {offsets = [5, 0], sizes = [1, 128], strides = [1, 1]} : vector<16x128xf32> to vector<1x128xf32>
    %c0_62 = arith.constant 0 : index
    %c5_63 = arith.constant 5 : index
    %c0_64 = arith.constant 0 : index
    %c0_65 = arith.constant 0 : index
    %116 = vector.load %arg4[%c0_62, %c5_63, %c0_64, %c0_65] : memref<2x9x16x128xf32, #tpu.memory_space<vmem>>, vector<1x1x16x128xf32>
    %117 = vector.shape_cast %116 : vector<1x1x16x128xf32> to vector<16x128xf32>
    %118 = vector.broadcast %115 : vector<1x128xf32> to vector<16x128xf32>
    %119 = arith.mulf %118, %117 : vector<16x128xf32>
    %120 = arith.addf %114, %119 : vector<16x128xf32>
    %121 = vector.extract_strided_slice %85 {offsets = [6, 0], sizes = [1, 128], strides = [1, 1]} : vector<16x128xf32> to vector<1x128xf32>
    %c0_66 = arith.constant 0 : index
    %c6_67 = arith.constant 6 : index
    %c0_68 = arith.constant 0 : index
    %c0_69 = arith.constant 0 : index
    %122 = vector.load %arg4[%c0_66, %c6_67, %c0_68, %c0_69] : memref<2x9x16x128xf32, #tpu.memory_space<vmem>>, vector<1x1x16x128xf32>
    %123 = vector.shape_cast %122 : vector<1x1x16x128xf32> to vector<16x128xf32>
    %124 = vector.broadcast %121 : vector<1x128xf32> to vector<16x128xf32>
    %125 = arith.mulf %124, %123 : vector<16x128xf32>
    %126 = arith.addf %120, %125 : vector<16x128xf32>
    %127 = vector.extract_strided_slice %85 {offsets = [7, 0], sizes = [1, 128], strides = [1, 1]} : vector<16x128xf32> to vector<1x128xf32>
    %c0_70 = arith.constant 0 : index
    %c7_71 = arith.constant 7 : index
    %c0_72 = arith.constant 0 : index
    %c0_73 = arith.constant 0 : index
    %128 = vector.load %arg4[%c0_70, %c7_71, %c0_72, %c0_73] : memref<2x9x16x128xf32, #tpu.memory_space<vmem>>, vector<1x1x16x128xf32>
    %129 = vector.shape_cast %128 : vector<1x1x16x128xf32> to vector<16x128xf32>
    %130 = vector.broadcast %127 : vector<1x128xf32> to vector<16x128xf32>
    %131 = arith.mulf %130, %129 : vector<16x128xf32>
    %132 = arith.addf %126, %131 : vector<16x128xf32>
    %133 = vector.extract_strided_slice %85 {offsets = [8, 0], sizes = [1, 128], strides = [1, 1]} : vector<16x128xf32> to vector<1x128xf32>
    %c0_74 = arith.constant 0 : index
    %c8_75 = arith.constant 8 : index
    %c0_76 = arith.constant 0 : index
    %c0_77 = arith.constant 0 : index
    %134 = vector.load %arg4[%c0_74, %c8_75, %c0_76, %c0_77] : memref<2x9x16x128xf32, #tpu.memory_space<vmem>>, vector<1x1x16x128xf32>
    %135 = vector.shape_cast %134 : vector<1x1x16x128xf32> to vector<16x128xf32>
    %136 = vector.broadcast %133 : vector<1x128xf32> to vector<16x128xf32>
    %137 = arith.mulf %136, %135 : vector<16x128xf32>
    %138 = arith.addf %132, %137 : vector<16x128xf32>
    %c0_78 = arith.constant 0 : index
    %c1_79 = arith.constant 1 : index
    %c0_80 = arith.constant 0 : index
    %c0_81 = arith.constant 0 : index
    %139 = vector.load %arg5[%c0_78, %c1_79, %c0_80, %c0_81] : memref<2x9x16x128xf32, #tpu.memory_space<vmem>>, vector<1x1x16x128xf32>
    %140 = vector.shape_cast %139 : vector<1x1x16x128xf32> to vector<16x128xf32>
    %141 = vector.shape_cast %138 : vector<16x128xf32> to vector<1x1x16x128xf32>
    tpu.vector_store %arg5[%c0_78, %c1_79, %c0_80, %c0_81], %141 {strides = array<i32>} : memref<2x9x16x128xf32, #tpu.memory_space<vmem>>, vector<1x1x16x128xf32>,
    %142 = vector.extract_strided_slice %7 {offsets = [32, 0], sizes = [16, 128], strides = [1, 1]} : vector<288x128xf32> to vector<16x128xf32>
    %cst_82 = arith.constant dense<0xFF800000> : vector<128xf32>
    %143 = vector.multi_reduction <maximumf>, %142, %cst_82 [0] : vector<16x128xf32> to vector<128xf32>
    %144 = vector.shape_cast %143 : vector<128xf32> to vector<1x128xf32>
    %145 = vector.broadcast %144 : vector<1x128xf32> to vector<16x128xf32>
    %146 = arith.subf %142, %145 : vector<16x128xf32>
    %147 = math.exp %146 : vector<16x128xf32>
    %cst_83 = arith.constant dense<0.000000e+00> : vector<128xf32>
    %148 = vector.multi_reduction <add>, %147, %cst_83 [0] : vector<16x128xf32> to vector<128xf32>
    %149 = vector.shape_cast %148 : vector<128xf32> to vector<1x128xf32>
    %150 = tpu.reciprocal %149 {approx = true} : vector<1x128xf32> -> vector<1x128xf32>
    %151 = vector.broadcast %150 : vector<1x128xf32> to vector<16x128xf32>
    %152 = arith.mulf %147, %151 : vector<16x128xf32>
    %153 = vector.extract_strided_slice %152 {offsets = [0, 0], sizes = [1, 128], strides = [1, 1]} : vector<16x128xf32> to vector<1x128xf32>
    %c0_84 = arith.constant 0 : index
    %c0_85 = arith.constant 0 : index
    %c0_86 = arith.constant 0 : index
    %c0_87 = arith.constant 0 : index
    %154 = vector.load %arg4[%c0_84, %c0_85, %c0_86, %c0_87] : memref<2x9x16x128xf32, #tpu.memory_space<vmem>>, vector<1x1x16x128xf32>
    %155 = vector.shape_cast %154 : vector<1x1x16x128xf32> to vector<16x128xf32>
    %156 = vector.broadcast %153 : vector<1x128xf32> to vector<16x128xf32>
    %157 = arith.mulf %156, %155 : vector<16x128xf32>
    %158 = vector.extract_strided_slice %152 {offsets = [1, 0], sizes = [1, 128], strides = [1, 1]} : vector<16x128xf32> to vector<1x128xf32>
    %c0_88 = arith.constant 0 : index
    %c1_89 = arith.constant 1 : index
    %c0_90 = arith.constant 0 : index
    %c0_91 = arith.constant 0 : index
    %159 = vector.load %arg4[%c0_88, %c1_89, %c0_90, %c0_91] : memref<2x9x16x128xf32, #tpu.memory_space<vmem>>, vector<1x1x16x128xf32>
    %160 = vector.shape_cast %159 : vector<1x1x16x128xf32> to vector<16x128xf32>
    %161 = vector.broadcast %158 : vector<1x128xf32> to vector<16x128xf32>
    %162 = arith.mulf %161, %160 : vector<16x128xf32>
    %163 = arith.addf %157, %162 : vector<16x128xf32>
    %164 = vector.extract_strided_slice %152 {offsets = [2, 0], sizes = [1, 128], strides = [1, 1]} : vector<16x128xf32> to vector<1x128xf32>
    %c0_92 = arith.constant 0 : index
    %c2_93 = arith.constant 2 : index
    %c0_94 = arith.constant 0 : index
    %c0_95 = arith.constant 0 : index
    %165 = vector.load %arg4[%c0_92, %c2_93, %c0_94, %c0_95] : memref<2x9x16x128xf32, #tpu.memory_space<vmem>>, vector<1x1x16x128xf32>
    %166 = vector.shape_cast %165 : vector<1x1x16x128xf32> to vector<16x128xf32>
    %167 = vector.broadcast %164 : vector<1x128xf32> to vector<16x128xf32>
    %168 = arith.mulf %167, %166 : vector<16x128xf32>
    %169 = arith.addf %163, %168 : vector<16x128xf32>
    %170 = vector.extract_strided_slice %152 {offsets = [3, 0], sizes = [1, 128], strides = [1, 1]} : vector<16x128xf32> to vector<1x128xf32>
    %c0_96 = arith.constant 0 : index
    %c3_97 = arith.constant 3 : index
    %c0_98 = arith.constant 0 : index
    %c0_99 = arith.constant 0 : index
    %171 = vector.load %arg4[%c0_96, %c3_97, %c0_98, %c0_99] : memref<2x9x16x128xf32, #tpu.memory_space<vmem>>, vector<1x1x16x128xf32>
    %172 = vector.shape_cast %171 : vector<1x1x16x128xf32> to vector<16x128xf32>
    %173 = vector.broadcast %170 : vector<1x128xf32> to vector<16x128xf32>
    %174 = arith.mulf %173, %172 : vector<16x128xf32>
    %175 = arith.addf %169, %174 : vector<16x128xf32>
    %176 = vector.extract_strided_slice %152 {offsets = [4, 0], sizes = [1, 128], strides = [1, 1]} : vector<16x128xf32> to vector<1x128xf32>
    %c0_100 = arith.constant 0 : index
    %c4_101 = arith.constant 4 : index
    %c0_102 = arith.constant 0 : index
    %c0_103 = arith.constant 0 : index
    %177 = vector.load %arg4[%c0_100, %c4_101, %c0_102, %c0_103] : memref<2x9x16x128xf32, #tpu.memory_space<vmem>>, vector<1x1x16x128xf32>
    %178 = vector.shape_cast %177 : vector<1x1x16x128xf32> to vector<16x128xf32>
    %179 = vector.broadcast %176 : vector<1x128xf32> to vector<16x128xf32>
    %180 = arith.mulf %179, %178 : vector<16x128xf32>
    %181 = arith.addf %175, %180 : vector<16x128xf32>
    %182 = vector.extract_strided_slice %152 {offsets = [5, 0], sizes = [1, 128], strides = [1, 1]} : vector<16x128xf32> to vector<1x128xf32>
    %c0_104 = arith.constant 0 : index
    %c5_105 = arith.constant 5 : index
    %c0_106 = arith.constant 0 : index
    %c0_107 = arith.constant 0 : index
    %183 = vector.load %arg4[%c0_104, %c5_105, %c0_106, %c0_107] : memref<2x9x16x128xf32, #tpu.memory_space<vmem>>, vector<1x1x16x128xf32>
    %184 = vector.shape_cast %183 : vector<1x1x16x128xf32> to vector<16x128xf32>
    %185 = vector.broadcast %182 : vector<1x128xf32> to vector<16x128xf32>
    %186 = arith.mulf %185, %184 : vector<16x128xf32>
    %187 = arith.addf %181, %186 : vector<16x128xf32>
    %188 = vector.extract_strided_slice %152 {offsets = [6, 0], sizes = [1, 128], strides = [1, 1]} : vector<16x128xf32> to vector<1x128xf32>
    %c0_108 = arith.constant 0 : index
    %c6_109 = arith.constant 6 : index
    %c0_110 = arith.constant 0 : index
    %c0_111 = arith.constant 0 : index
    %189 = vector.load %arg4[%c0_108, %c6_109, %c0_110, %c0_111] : memref<2x9x16x128xf32, #tpu.memory_space<vmem>>, vector<1x1x16x128xf32>
    %190 = vector.shape_cast %189 : vector<1x1x16x128xf32> to vector<16x128xf32>
    %191 = vector.broadcast %188 : vector<1x128xf32> to vector<16x128xf32>
    %192 = arith.mulf %191, %190 : vector<16x128xf32>
    %193 = arith.addf %187, %192 : vector<16x128xf32>
    %194 = vector.extract_strided_slice %152 {offsets = [7, 0], sizes = [1, 128], strides = [1, 1]} : vector<16x128xf32> to vector<1x128xf32>
    %c0_112 = arith.constant 0 : index
    %c7_113 = arith.constant 7 : index
    %c0_114 = arith.constant 0 : index
    %c0_115 = arith.constant 0 : index
    %195 = vector.load %arg4[%c0_112, %c7_113, %c0_114, %c0_115] : memref<2x9x16x128xf32, #tpu.memory_space<vmem>>, vector<1x1x16x128xf32>
    %196 = vector.shape_cast %195 : vector<1x1x16x128xf32> to vector<16x128xf32>
    %197 = vector.broadcast %194 : vector<1x128xf32> to vector<16x128xf32>
    %198 = arith.mulf %197, %196 : vector<16x128xf32>
    %199 = arith.addf %193, %198 : vector<16x128xf32>
    %200 = vector.extract_strided_slice %152 {offsets = [8, 0], sizes = [1, 128], strides = [1, 1]} : vector<16x128xf32> to vector<1x128xf32>
    %c0_116 = arith.constant 0 : index
    %c8_117 = arith.constant 8 : index
    %c0_118 = arith.constant 0 : index
    %c0_119 = arith.constant 0 : index
    %201 = vector.load %arg4[%c0_116, %c8_117, %c0_118, %c0_119] : memref<2x9x16x128xf32, #tpu.memory_space<vmem>>, vector<1x1x16x128xf32>
    %202 = vector.shape_cast %201 : vector<1x1x16x128xf32> to vector<16x128xf32>
    %203 = vector.broadcast %200 : vector<1x128xf32> to vector<16x128xf32>
    %204 = arith.mulf %203, %202 : vector<16x128xf32>
    %205 = arith.addf %199, %204 : vector<16x128xf32>
    %c0_120 = arith.constant 0 : index
    %c2_121 = arith.constant 2 : index
    %c0_122 = arith.constant 0 : index
    %c0_123 = arith.constant 0 : index
    %206 = vector.load %arg5[%c0_120, %c2_121, %c0_122, %c0_123] : memref<2x9x16x128xf32, #tpu.memory_space<vmem>>, vector<1x1x16x128xf32>
    %207 = vector.shape_cast %206 : vector<1x1x16x128xf32> to vector<16x128xf32>
    %208 = vector.shape_cast %205 : vector<16x128xf32> to vector<1x1x16x128xf32>
    tpu.vector_store %arg5[%c0_120, %c2_121, %c0_122, %c0_123], %208 {strides = array<i32>} : memref<2x9x16x128xf32, #tpu.memory_space<vmem>>, vector<1x1x16x128xf32>,
    %209 = vector.extract_strided_slice %7 {offsets = [48, 0], sizes = [16, 128], strides = [1, 1]} : vector<288x128xf32> to vector<16x128xf32>
    %cst_124 = arith.constant dense<0xFF800000> : vector<128xf32>
    %210 = vector.multi_reduction <maximumf>, %209, %cst_124 [0] : vector<16x128xf32> to vector<128xf32>
    %211 = vector.shape_cast %210 : vector<128xf32> to vector<1x128xf32>
    %212 = vector.broadcast %211 : vector<1x128xf32> to vector<16x128xf32>
    %213 = arith.subf %209, %212 : vector<16x128xf32>
    %214 = math.exp %213 : vector<16x128xf32>
    %cst_125 = arith.constant dense<0.000000e+00> : vector<128xf32>
    %215 = vector.multi_reduction <add>, %214, %cst_125 [0] : vector<16x128xf32> to vector<128xf32>
    %216 = vector.shape_cast %215 : vector<128xf32> to vector<1x128xf32>
    %217 = tpu.reciprocal %216 {approx = true} : vector<1x128xf32> -> vector<1x128xf32>
    %218 = vector.broadcast %217 : vector<1x128xf32> to vector<16x128xf32>
    %219 = arith.mulf %214, %218 : vector<16x128xf32>
    %220 = vector.extract_strided_slice %219 {offsets = [0, 0], sizes = [1, 128], strides = [1, 1]} : vector<16x128xf32> to vector<1x128xf32>
    %c0_126 = arith.constant 0 : index
    %c0_127 = arith.constant 0 : index
    %c0_128 = arith.constant 0 : index
    %c0_129 = arith.constant 0 : index
    %221 = vector.load %arg4[%c0_126, %c0_127, %c0_128, %c0_129] : memref<2x9x16x128xf32, #tpu.memory_space<vmem>>, vector<1x1x16x128xf32>
    %222 = vector.shape_cast %221 : vector<1x1x16x128xf32> to vector<16x128xf32>
    %223 = vector.broadcast %220 : vector<1x128xf32> to vector<16x128xf32>
    %224 = arith.mulf %223, %222 : vector<16x128xf32>
    %225 = vector.extract_strided_slice %219 {offsets = [1, 0], sizes = [1, 128], strides = [1, 1]} : vector<16x128xf32> to vector<1x128xf32>
    %c0_130 = arith.constant 0 : index
    %c1_131 = arith.constant 1 : index
    %c0_132 = arith.constant 0 : index
    %c0_133 = arith.constant 0 : index
    %226 = vector.load %arg4[%c0_130, %c1_131, %c0_132, %c0_133] : memref<2x9x16x128xf32, #tpu.memory_space<vmem>>, vector<1x1x16x128xf32>
    %227 = vector.shape_cast %226 : vector<1x1x16x128xf32> to vector<16x128xf32>
    %228 = vector.broadcast %225 : vector<1x128xf32> to vector<16x128xf32>
    %229 = arith.mulf %228, %227 : vector<16x128xf32>
    %230 = arith.addf %224, %229 : vector<16x128xf32>
    %231 = vector.extract_strided_slice %219 {offsets = [2, 0], sizes = [1, 128], strides = [1, 1]} : vector<16x128xf32> to vector<1x128xf32>
    %c0_134 = arith.constant 0 : index
    %c2_135 = arith.constant 2 : index
    %c0_136 = arith.constant 0 : index
    %c0_137 = arith.constant 0 : index
    %232 = vector.load %arg4[%c0_134, %c2_135, %c0_136, %c0_137] : memref<2x9x16x128xf32, #tpu.memory_space<vmem>>, vector<1x1x16x128xf32>
    %233 = vector.shape_cast %232 : vector<1x1x16x128xf32> to vector<16x128xf32>
    %234 = vector.broadcast %231 : vector<1x128xf32> to vector<16x128xf32>
    %235 = arith.mulf %234, %233 : vector<16x128xf32>
    %236 = arith.addf %230, %235 : vector<16x128xf32>
    %237 = vector.extract_strided_slice %219 {offsets = [3, 0], sizes = [1, 128], strides = [1, 1]} : vector<16x128xf32> to vector<1x128xf32>
    %c0_138 = arith.constant 0 : index
    %c3_139 = arith.constant 3 : index
    %c0_140 = arith.constant 0 : index
    %c0_141 = arith.constant 0 : index
    %238 = vector.load %arg4[%c0_138, %c3_139, %c0_140, %c0_141] : memref<2x9x16x128xf32, #tpu.memory_space<vmem>>, vector<1x1x16x128xf32>
    %239 = vector.shape_cast %238 : vector<1x1x16x128xf32> to vector<16x128xf32>
    %240 = vector.broadcast %237 : vector<1x128xf32> to vector<16x128xf32>
    %241 = arith.mulf %240, %239 : vector<16x128xf32>
    %242 = arith.addf %236, %241 : vector<16x128xf32>
    %243 = vector.extract_strided_slice %219 {offsets = [4, 0], sizes = [1, 128], strides = [1, 1]} : vector<16x128xf32> to vector<1x128xf32>
    %c0_142 = arith.constant 0 : index
    %c4_143 = arith.constant 4 : index
    %c0_144 = arith.constant 0 : index
    %c0_145 = arith.constant 0 : index
    %244 = vector.load %arg4[%c0_142, %c4_143, %c0_144, %c0_145] : memref<2x9x16x128xf32, #tpu.memory_space<vmem>>, vector<1x1x16x128xf32>
    %245 = vector.shape_cast %244 : vector<1x1x16x128xf32> to vector<16x128xf32>
    %246 = vector.broadcast %243 : vector<1x128xf32> to vector<16x128xf32>
    %247 = arith.mulf %246, %245 : vector<16x128xf32>
    %248 = arith.addf %242, %247 : vector<16x128xf32>
    %249 = vector.extract_strided_slice %219 {offsets = [5, 0], sizes = [1, 128], strides = [1, 1]} : vector<16x128xf32> to vector<1x128xf32>
    %c0_146 = arith.constant 0 : index
    %c5_147 = arith.constant 5 : index
    %c0_148 = arith.constant 0 : index
    %c0_149 = arith.constant 0 : index
    %250 = vector.load %arg4[%c0_146, %c5_147, %c0_148, %c0_149] : memref<2x9x16x128xf32, #tpu.memory_space<vmem>>, vector<1x1x16x128xf32>
    %251 = vector.shape_cast %250 : vector<1x1x16x128xf32> to vector<16x128xf32>
    %252 = vector.broadcast %249 : vector<1x128xf32> to vector<16x128xf32>
    %253 = arith.mulf %252, %251 : vector<16x128xf32>
    %254 = arith.addf %248, %253 : vector<16x128xf32>
    %255 = vector.extract_strided_slice %219 {offsets = [6, 0], sizes = [1, 128], strides = [1, 1]} : vector<16x128xf32> to vector<1x128xf32>
    %c0_150 = arith.constant 0 : index
    %c6_151 = arith.constant 6 : index
    %c0_152 = arith.constant 0 : index
    %c0_153 = arith.constant 0 : index
    %256 = vector.load %arg4[%c0_150, %c6_151, %c0_152, %c0_153] : memref<2x9x16x128xf32, #tpu.memory_space<vmem>>, vector<1x1x16x128xf32>
    %257 = vector.shape_cast %256 : vector<1x1x16x128xf32> to vector<16x128xf32>
    %258 = vector.broadcast %255 : vector<1x128xf32> to vector<16x128xf32>
    %259 = arith.mulf %258, %257 : vector<16x128xf32>
    %260 = arith.addf %254, %259 : vector<16x128xf32>
    %261 = vector.extract_strided_slice %219 {offsets = [7, 0], sizes = [1, 128], strides = [1, 1]} : vector<16x128xf32> to vector<1x128xf32>
    %c0_154 = arith.constant 0 : index
    %c7_155 = arith.constant 7 : index
    %c0_156 = arith.constant 0 : index
    %c0_157 = arith.constant 0 : index
    %262 = vector.load %arg4[%c0_154, %c7_155, %c0_156, %c0_157] : memref<2x9x16x128xf32, #tpu.memory_space<vmem>>, vector<1x1x16x128xf32>
    %263 = vector.shape_cast %262 : vector<1x1x16x128xf32> to vector<16x128xf32>
    %264 = vector.broadcast %261 : vector<1x128xf32> to vector<16x128xf32>
    %265 = arith.mulf %264, %263 : vector<16x128xf32>
    %266 = arith.addf %260, %265 : vector<16x128xf32>
    %267 = vector.extract_strided_slice %219 {offsets = [8, 0], sizes = [1, 128], strides = [1, 1]} : vector<16x128xf32> to vector<1x128xf32>
    %c0_158 = arith.constant 0 : index
    %c8_159 = arith.constant 8 : index
    %c0_160 = arith.constant 0 : index
    %c0_161 = arith.constant 0 : index
    %268 = vector.load %arg4[%c0_158, %c8_159, %c0_160, %c0_161] : memref<2x9x16x128xf32, #tpu.memory_space<vmem>>, vector<1x1x16x128xf32>
    %269 = vector.shape_cast %268 : vector<1x1x16x128xf32> to vector<16x128xf32>
    %270 = vector.broadcast %267 : vector<1x128xf32> to vector<16x128xf32>
    %271 = arith.mulf %270, %269 : vector<16x128xf32>
    %272 = arith.addf %266, %271 : vector<16x128xf32>
    %c0_162 = arith.constant 0 : index
    %c3_163 = arith.constant 3 : index
    %c0_164 = arith.constant 0 : index
    %c0_165 = arith.constant 0 : index
    %273 = vector.load %arg5[%c0_162, %c3_163, %c0_164, %c0_165] : memref<2x9x16x128xf32, #tpu.memory_space<vmem>>, vector<1x1x16x128xf32>
    %274 = vector.shape_cast %273 : vector<1x1x16x128xf32> to vector<16x128xf32>
    %275 = vector.shape_cast %272 : vector<16x128xf32> to vector<1x1x16x128xf32>
    tpu.vector_store %arg5[%c0_162, %c3_163, %c0_164, %c0_165], %275 {strides = array<i32>} : memref<2x9x16x128xf32, #tpu.memory_space<vmem>>, vector<1x1x16x128xf32>,
    %276 = vector.extract_strided_slice %7 {offsets = [64, 0], sizes = [16, 128], strides = [1, 1]} : vector<288x128xf32> to vector<16x128xf32>
    %cst_166 = arith.constant dense<0xFF800000> : vector<128xf32>
    %277 = vector.multi_reduction <maximumf>, %276, %cst_166 [0] : vector<16x128xf32> to vector<128xf32>
    %278 = vector.shape_cast %277 : vector<128xf32> to vector<1x128xf32>
    %279 = vector.broadcast %278 : vector<1x128xf32> to vector<16x128xf32>
    %280 = arith.subf %276, %279 : vector<16x128xf32>
    %281 = math.exp %280 : vector<16x128xf32>
    %cst_167 = arith.constant dense<0.000000e+00> : vector<128xf32>
    %282 = vector.multi_reduction <add>, %281, %cst_167 [0] : vector<16x128xf32> to vector<128xf32>
    %283 = vector.shape_cast %282 : vector<128xf32> to vector<1x128xf32>
    %284 = tpu.reciprocal %283 {approx = true} : vector<1x128xf32> -> vector<1x128xf32>
    %285 = vector.broadcast %284 : vector<1x128xf32> to vector<16x128xf32>
    %286 = arith.mulf %281, %285 : vector<16x128xf32>
    %287 = vector.extract_strided_slice %286 {offsets = [0, 0], sizes = [1, 128], strides = [1, 1]} : vector<16x128xf32> to vector<1x128xf32>
    %c0_168 = arith.constant 0 : index
    %c0_169 = arith.constant 0 : index
    %c0_170 = arith.constant 0 : index
    %c0_171 = arith.constant 0 : index
    %288 = vector.load %arg4[%c0_168, %c0_169, %c0_170, %c0_171] : memref<2x9x16x128xf32, #tpu.memory_space<vmem>>, vector<1x1x16x128xf32>
    %289 = vector.shape_cast %288 : vector<1x1x16x128xf32> to vector<16x128xf32>
    %290 = vector.broadcast %287 : vector<1x128xf32> to vector<16x128xf32>
    %291 = arith.mulf %290, %289 : vector<16x128xf32>
    %292 = vector.extract_strided_slice %286 {offsets = [1, 0], sizes = [1, 128], strides = [1, 1]} : vector<16x128xf32> to vector<1x128xf32>
    %c0_172 = arith.constant 0 : index
    %c1_173 = arith.constant 1 : index
    %c0_174 = arith.constant 0 : index
    %c0_175 = arith.constant 0 : index
    %293 = vector.load %arg4[%c0_172, %c1_173, %c0_174, %c0_175] : memref<2x9x16x128xf32, #tpu.memory_space<vmem>>, vector<1x1x16x128xf32>
    %294 = vector.shape_cast %293 : vector<1x1x16x128xf32> to vector<16x128xf32>
    %295 = vector.broadcast %292 : vector<1x128xf32> to vector<16x128xf32>
    %296 = arith.mulf %295, %294 : vector<16x128xf32>
    %297 = arith.addf %291, %296 : vector<16x128xf32>
    %298 = vector.extract_strided_slice %286 {offsets = [2, 0], sizes = [1, 128], strides = [1, 1]} : vector<16x128xf32> to vector<1x128xf32>
    %c0_176 = arith.constant 0 : index
    %c2_177 = arith.constant 2 : index
    %c0_178 = arith.constant 0 : index
    %c0_179 = arith.constant 0 : index
    %299 = vector.load %arg4[%c0_176, %c2_177, %c0_178, %c0_179] : memref<2x9x16x128xf32, #tpu.memory_space<vmem>>, vector<1x1x16x128xf32>
    %300 = vector.shape_cast %299 : vector<1x1x16x128xf32> to vector<16x128xf32>
    %301 = vector.broadcast %298 : vector<1x128xf32> to vector<16x128xf32>
    %302 = arith.mulf %301, %300 : vector<16x128xf32>
    %303 = arith.addf %297, %302 : vector<16x128xf32>
    %304 = vector.extract_strided_slice %286 {offsets = [3, 0], sizes = [1, 128], strides = [1, 1]} : vector<16x128xf32> to vector<1x128xf32>
    %c0_180 = arith.constant 0 : index
    %c3_181 = arith.constant 3 : index
    %c0_182 = arith.constant 0 : index
    %c0_183 = arith.constant 0 : index
    %305 = vector.load %arg4[%c0_180, %c3_181, %c0_182, %c0_183] : memref<2x9x16x128xf32, #tpu.memory_space<vmem>>, vector<1x1x16x128xf32>
    %306 = vector.shape_cast %305 : vector<1x1x16x128xf32> to vector<16x128xf32>
    %307 = vector.broadcast %304 : vector<1x128xf32> to vector<16x128xf32>
    %308 = arith.mulf %307, %306 : vector<16x128xf32>
    %309 = arith.addf %303, %308 : vector<16x128xf32>
    %310 = vector.extract_strided_slice %286 {offsets = [4, 0], sizes = [1, 128], strides = [1, 1]} : vector<16x128xf32> to vector<1x128xf32>
    %c0_184 = arith.constant 0 : index
    %c4_185 = arith.constant 4 : index
    %c0_186 = arith.constant 0 : index
    %c0_187 = arith.constant 0 : index
    %311 = vector.load %arg4[%c0_184, %c4_185, %c0_186, %c0_187] : memref<2x9x16x128xf32, #tpu.memory_space<vmem>>, vector<1x1x16x128xf32>
    %312 = vector.shape_cast %311 : vector<1x1x16x128xf32> to vector<16x128xf32>
    %313 = vector.broadcast %310 : vector<1x128xf32> to vector<16x128xf32>
    %314 = arith.mulf %313, %312 : vector<16x128xf32>
    %315 = arith.addf %309, %314 : vector<16x128xf32>
    %316 = vector.extract_strided_slice %286 {offsets = [5, 0], sizes = [1, 128], strides = [1, 1]} : vector<16x128xf32> to vector<1x128xf32>
    %c0_188 = arith.constant 0 : index
    %c5_189 = arith.constant 5 : index
    %c0_190 = arith.constant 0 : index
    %c0_191 = arith.constant 0 : index
    %317 = vector.load %arg4[%c0_188, %c5_189, %c0_190, %c0_191] : memref<2x9x16x128xf32, #tpu.memory_space<vmem>>, vector<1x1x16x128xf32>
    %318 = vector.shape_cast %317 : vector<1x1x16x128xf32> to vector<16x128xf32>
    %319 = vector.broadcast %316 : vector<1x128xf32> to vector<16x128xf32>
    %320 = arith.mulf %319, %318 : vector<16x128xf32>
    %321 = arith.addf %315, %320 : vector<16x128xf32>
    %322 = vector.extract_strided_slice %286 {offsets = [6, 0], sizes = [1, 128], strides = [1, 1]} : vector<16x128xf32> to vector<1x128xf32>
    %c0_192 = arith.constant 0 : index
    %c6_193 = arith.constant 6 : index
    %c0_194 = arith.constant 0 : index
    %c0_195 = arith.constant 0 : index
    %323 = vector.load %arg4[%c0_192, %c6_193, %c0_194, %c0_195] : memref<2x9x16x128xf32, #tpu.memory_space<vmem>>, vector<1x1x16x128xf32>
    %324 = vector.shape_cast %323 : vector<1x1x16x128xf32> to vector<16x128xf32>
    %325 = vector.broadcast %322 : vector<1x128xf32> to vector<16x128xf32>
    %326 = arith.mulf %325, %324 : vector<16x128xf32>
    %327 = arith.addf %321, %326 : vector<16x128xf32>
    %328 = vector.extract_strided_slice %286 {offsets = [7, 0], sizes = [1, 128], strides = [1, 1]} : vector<16x128xf32> to vector<1x128xf32>
    %c0_196 = arith.constant 0 : index
    %c7_197 = arith.constant 7 : index
    %c0_198 = arith.constant 0 : index
    %c0_199 = arith.constant 0 : index
    %329 = vector.load %arg4[%c0_196, %c7_197, %c0_198, %c0_199] : memref<2x9x16x128xf32, #tpu.memory_space<vmem>>, vector<1x1x16x128xf32>
    %330 = vector.shape_cast %329 : vector<1x1x16x128xf32> to vector<16x128xf32>
    %331 = vector.broadcast %328 : vector<1x128xf32> to vector<16x128xf32>
    %332 = arith.mulf %331, %330 : vector<16x128xf32>
    %333 = arith.addf %327, %332 : vector<16x128xf32>
    %334 = vector.extract_strided_slice %286 {offsets = [8, 0], sizes = [1, 128], strides = [1, 1]} : vector<16x128xf32> to vector<1x128xf32>
    %c0_200 = arith.constant 0 : index
    %c8_201 = arith.constant 8 : index
    %c0_202 = arith.constant 0 : index
    %c0_203 = arith.constant 0 : index
    %335 = vector.load %arg4[%c0_200, %c8_201, %c0_202, %c0_203] : memref<2x9x16x128xf32, #tpu.memory_space<vmem>>, vector<1x1x16x128xf32>
    %336 = vector.shape_cast %335 : vector<1x1x16x128xf32> to vector<16x128xf32>
    %337 = vector.broadcast %334 : vector<1x128xf32> to vector<16x128xf32>
    %338 = arith.mulf %337, %336 : vector<16x128xf32>
    %339 = arith.addf %333, %338 : vector<16x128xf32>
    %c0_204 = arith.constant 0 : index
    %c4_205 = arith.constant 4 : index
    %c0_206 = arith.constant 0 : index
    %c0_207 = arith.constant 0 : index
    %340 = vector.load %arg5[%c0_204, %c4_205, %c0_206, %c0_207] : memref<2x9x16x128xf32, #tpu.memory_space<vmem>>, vector<1x1x16x128xf32>
    %341 = vector.shape_cast %340 : vector<1x1x16x128xf32> to vector<16x128xf32>
    %342 = vector.shape_cast %339 : vector<16x128xf32> to vector<1x1x16x128xf32>
    tpu.vector_store %arg5[%c0_204, %c4_205, %c0_206, %c0_207], %342 {strides = array<i32>} : memref<2x9x16x128xf32, #tpu.memory_space<vmem>>, vector<1x1x16x128xf32>,
    %343 = vector.extract_strided_slice %7 {offsets = [80, 0], sizes = [16, 128], strides = [1, 1]} : vector<288x128xf32> to vector<16x128xf32>
    %cst_208 = arith.constant dense<0xFF800000> : vector<128xf32>
    %344 = vector.multi_reduction <maximumf>, %343, %cst_208 [0] : vector<16x128xf32> to vector<128xf32>
    %345 = vector.shape_cast %344 : vector<128xf32> to vector<1x128xf32>
    %346 = vector.broadcast %345 : vector<1x128xf32> to vector<16x128xf32>
    %347 = arith.subf %343, %346 : vector<16x128xf32>
    %348 = math.exp %347 : vector<16x128xf32>
    %cst_209 = arith.constant dense<0.000000e+00> : vector<128xf32>
    %349 = vector.multi_reduction <add>, %348, %cst_209 [0] : vector<16x128xf32> to vector<128xf32>
    %350 = vector.shape_cast %349 : vector<128xf32> to vector<1x128xf32>
    %351 = tpu.reciprocal %350 {approx = true} : vector<1x128xf32> -> vector<1x128xf32>
    %352 = vector.broadcast %351 : vector<1x128xf32> to vector<16x128xf32>
    %353 = arith.mulf %348, %352 : vector<16x128xf32>
    %354 = vector.extract_strided_slice %353 {offsets = [0, 0], sizes = [1, 128], strides = [1, 1]} : vector<16x128xf32> to vector<1x128xf32>
    %c0_210 = arith.constant 0 : index
    %c0_211 = arith.constant 0 : index
    %c0_212 = arith.constant 0 : index
    %c0_213 = arith.constant 0 : index
    %355 = vector.load %arg4[%c0_210, %c0_211, %c0_212, %c0_213] : memref<2x9x16x128xf32, #tpu.memory_space<vmem>>, vector<1x1x16x128xf32>
    %356 = vector.shape_cast %355 : vector<1x1x16x128xf32> to vector<16x128xf32>
    %357 = vector.broadcast %354 : vector<1x128xf32> to vector<16x128xf32>
    %358 = arith.mulf %357, %356 : vector<16x128xf32>
    %359 = vector.extract_strided_slice %353 {offsets = [1, 0], sizes = [1, 128], strides = [1, 1]} : vector<16x128xf32> to vector<1x128xf32>
    %c0_214 = arith.constant 0 : index
    %c1_215 = arith.constant 1 : index
    %c0_216 = arith.constant 0 : index
    %c0_217 = arith.constant 0 : index
    %360 = vector.load %arg4[%c0_214, %c1_215, %c0_216, %c0_217] : memref<2x9x16x128xf32, #tpu.memory_space<vmem>>, vector<1x1x16x128xf32>
    %361 = vector.shape_cast %360 : vector<1x1x16x128xf32> to vector<16x128xf32>
    %362 = vector.broadcast %359 : vector<1x128xf32> to vector<16x128xf32>
    %363 = arith.mulf %362, %361 : vector<16x128xf32>
    %364 = arith.addf %358, %363 : vector<16x128xf32>
    %365 = vector.extract_strided_slice %353 {offsets = [2, 0], sizes = [1, 128], strides = [1, 1]} : vector<16x128xf32> to vector<1x128xf32>
    %c0_218 = arith.constant 0 : index
    %c2_219 = arith.constant 2 : index
    %c0_220 = arith.constant 0 : index
    %c0_221 = arith.constant 0 : index
    %366 = vector.load %arg4[%c0_218, %c2_219, %c0_220, %c0_221] : memref<2x9x16x128xf32, #tpu.memory_space<vmem>>, vector<1x1x16x128xf32>
    %367 = vector.shape_cast %366 : vector<1x1x16x128xf32> to vector<16x128xf32>
    %368 = vector.broadcast %365 : vector<1x128xf32> to vector<16x128xf32>
    %369 = arith.mulf %368, %367 : vector<16x128xf32>
    %370 = arith.addf %364, %369 : vector<16x128xf32>
    %371 = vector.extract_strided_slice %353 {offsets = [3, 0], sizes = [1, 128], strides = [1, 1]} : vector<16x128xf32> to vector<1x128xf32>
    %c0_222 = arith.constant 0 : index
    %c3_223 = arith.constant 3 : index
    %c0_224 = arith.constant 0 : index
    %c0_225 = arith.constant 0 : index
    %372 = vector.load %arg4[%c0_222, %c3_223, %c0_224, %c0_225] : memref<2x9x16x128xf32, #tpu.memory_space<vmem>>, vector<1x1x16x128xf32>
    %373 = vector.shape_cast %372 : vector<1x1x16x128xf32> to vector<16x128xf32>
    %374 = vector.broadcast %371 : vector<1x128xf32> to vector<16x128xf32>
    %375 = arith.mulf %374, %373 : vector<16x128xf32>
    %376 = arith.addf %370, %375 : vector<16x128xf32>
    %377 = vector.extract_strided_slice %353 {offsets = [4, 0], sizes = [1, 128], strides = [1, 1]} : vector<16x128xf32> to vector<1x128xf32>
    %c0_226 = arith.constant 0 : index
    %c4_227 = arith.constant 4 : index
    %c0_228 = arith.constant 0 : index
    %c0_229 = arith.constant 0 : index
    %378 = vector.load %arg4[%c0_226, %c4_227, %c0_228, %c0_229] : memref<2x9x16x128xf32, #tpu.memory_space<vmem>>, vector<1x1x16x128xf32>
    %379 = vector.shape_cast %378 : vector<1x1x16x128xf32> to vector<16x128xf32>
    %380 = vector.broadcast %377 : vector<1x128xf32> to vector<16x128xf32>
    %381 = arith.mulf %380, %379 : vector<16x128xf32>
    %382 = arith.addf %376, %381 : vector<16x128xf32>
    %383 = vector.extract_strided_slice %353 {offsets = [5, 0], sizes = [1, 128], strides = [1, 1]} : vector<16x128xf32> to vector<1x128xf32>
    %c0_230 = arith.constant 0 : index
    %c5_231 = arith.constant 5 : index
    %c0_232 = arith.constant 0 : index
    %c0_233 = arith.constant 0 : index
    %384 = vector.load %arg4[%c0_230, %c5_231, %c0_232, %c0_233] : memref<2x9x16x128xf32, #tpu.memory_space<vmem>>, vector<1x1x16x128xf32>
    %385 = vector.shape_cast %384 : vector<1x1x16x128xf32> to vector<16x128xf32>
    %386 = vector.broadcast %383 : vector<1x128xf32> to vector<16x128xf32>
    %387 = arith.mulf %386, %385 : vector<16x128xf32>
    %388 = arith.addf %382, %387 : vector<16x128xf32>
    %389 = vector.extract_strided_slice %353 {offsets = [6, 0], sizes = [1, 128], strides = [1, 1]} : vector<16x128xf32> to vector<1x128xf32>
    %c0_234 = arith.constant 0 : index
    %c6_235 = arith.constant 6 : index
    %c0_236 = arith.constant 0 : index
    %c0_237 = arith.constant 0 : index
    %390 = vector.load %arg4[%c0_234, %c6_235, %c0_236, %c0_237] : memref<2x9x16x128xf32, #tpu.memory_space<vmem>>, vector<1x1x16x128xf32>
    %391 = vector.shape_cast %390 : vector<1x1x16x128xf32> to vector<16x128xf32>
    %392 = vector.broadcast %389 : vector<1x128xf32> to vector<16x128xf32>
    %393 = arith.mulf %392, %391 : vector<16x128xf32>
    %394 = arith.addf %388, %393 : vector<16x128xf32>
    %395 = vector.extract_strided_slice %353 {offsets = [7, 0], sizes = [1, 128], strides = [1, 1]} : vector<16x128xf32> to vector<1x128xf32>
    %c0_238 = arith.constant 0 : index
    %c7_239 = arith.constant 7 : index
    %c0_240 = arith.constant 0 : index
    %c0_241 = arith.constant 0 : index
    %396 = vector.load %arg4[%c0_238, %c7_239, %c0_240, %c0_241] : memref<2x9x16x128xf32, #tpu.memory_space<vmem>>, vector<1x1x16x128xf32>
    %397 = vector.shape_cast %396 : vector<1x1x16x128xf32> to vector<16x128xf32>
    %398 = vector.broadcast %395 : vector<1x128xf32> to vector<16x128xf32>
    %399 = arith.mulf %398, %397 : vector<16x128xf32>
    %400 = arith.addf %394, %399 : vector<16x128xf32>
    %401 = vector.extract_strided_slice %353 {offsets = [8, 0], sizes = [1, 128], strides = [1, 1]} : vector<16x128xf32> to vector<1x128xf32>
    %c0_242 = arith.constant 0 : index
    %c8_243 = arith.constant 8 : index
    %c0_244 = arith.constant 0 : index
    %c0_245 = arith.constant 0 : index
    %402 = vector.load %arg4[%c0_242, %c8_243, %c0_244, %c0_245] : memref<2x9x16x128xf32, #tpu.memory_space<vmem>>, vector<1x1x16x128xf32>
    %403 = vector.shape_cast %402 : vector<1x1x16x128xf32> to vector<16x128xf32>
    %404 = vector.broadcast %401 : vector<1x128xf32> to vector<16x128xf32>
    %405 = arith.mulf %404, %403 : vector<16x128xf32>
    %406 = arith.addf %400, %405 : vector<16x128xf32>
    %c0_246 = arith.constant 0 : index
    %c5_247 = arith.constant 5 : index
    %c0_248 = arith.constant 0 : index
    %c0_249 = arith.constant 0 : index
    %407 = vector.load %arg5[%c0_246, %c5_247, %c0_248, %c0_249] : memref<2x9x16x128xf32, #tpu.memory_space<vmem>>, vector<1x1x16x128xf32>
    %408 = vector.shape_cast %407 : vector<1x1x16x128xf32> to vector<16x128xf32>
    %409 = vector.shape_cast %406 : vector<16x128xf32> to vector<1x1x16x128xf32>
    tpu.vector_store %arg5[%c0_246, %c5_247, %c0_248, %c0_249], %409 {strides = array<i32>} : memref<2x9x16x128xf32, #tpu.memory_space<vmem>>, vector<1x1x16x128xf32>,
    %410 = vector.extract_strided_slice %7 {offsets = [96, 0], sizes = [16, 128], strides = [1, 1]} : vector<288x128xf32> to vector<16x128xf32>
    %cst_250 = arith.constant dense<0xFF800000> : vector<128xf32>
    %411 = vector.multi_reduction <maximumf>, %410, %cst_250 [0] : vector<16x128xf32> to vector<128xf32>
    %412 = vector.shape_cast %411 : vector<128xf32> to vector<1x128xf32>
    %413 = vector.broadcast %412 : vector<1x128xf32> to vector<16x128xf32>
    %414 = arith.subf %410, %413 : vector<16x128xf32>
    %415 = math.exp %414 : vector<16x128xf32>
    %cst_251 = arith.constant dense<0.000000e+00> : vector<128xf32>
    %416 = vector.multi_reduction <add>, %415, %cst_251 [0] : vector<16x128xf32> to vector<128xf32>
    %417 = vector.shape_cast %416 : vector<128xf32> to vector<1x128xf32>
    %418 = tpu.reciprocal %417 {approx = true} : vector<1x128xf32> -> vector<1x128xf32>
    %419 = vector.broadcast %418 : vector<1x128xf32> to vector<16x128xf32>
    %420 = arith.mulf %415, %419 : vector<16x128xf32>
    %421 = vector.extract_strided_slice %420 {offsets = [0, 0], sizes = [1, 128], strides = [1, 1]} : vector<16x128xf32> to vector<1x128xf32>
    %c0_252 = arith.constant 0 : index
    %c0_253 = arith.constant 0 : index
    %c0_254 = arith.constant 0 : index
    %c0_255 = arith.constant 0 : index
    %422 = vector.load %arg4[%c0_252, %c0_253, %c0_254, %c0_255] : memref<2x9x16x128xf32, #tpu.memory_space<vmem>>, vector<1x1x16x128xf32>
    %423 = vector.shape_cast %422 : vector<1x1x16x128xf32> to vector<16x128xf32>
    %424 = vector.broadcast %421 : vector<1x128xf32> to vector<16x128xf32>
    %425 = arith.mulf %424, %423 : vector<16x128xf32>
    %426 = vector.extract_strided_slice %420 {offsets = [1, 0], sizes = [1, 128], strides = [1, 1]} : vector<16x128xf32> to vector<1x128xf32>
    %c0_256 = arith.constant 0 : index
    %c1_257 = arith.constant 1 : index
    %c0_258 = arith.constant 0 : index
    %c0_259 = arith.constant 0 : index
    %427 = vector.load %arg4[%c0_256, %c1_257, %c0_258, %c0_259] : memref<2x9x16x128xf32, #tpu.memory_space<vmem>>, vector<1x1x16x128xf32>
    %428 = vector.shape_cast %427 : vector<1x1x16x128xf32> to vector<16x128xf32>
    %429 = vector.broadcast %426 : vector<1x128xf32> to vector<16x128xf32>
    %430 = arith.mulf %429, %428 : vector<16x128xf32>
    %431 = arith.addf %425, %430 : vector<16x128xf32>
    %432 = vector.extract_strided_slice %420 {offsets = [2, 0], sizes = [1, 128], strides = [1, 1]} : vector<16x128xf32> to vector<1x128xf32>
    %c0_260 = arith.constant 0 : index
    %c2_261 = arith.constant 2 : index
    %c0_262 = arith.constant 0 : index
    %c0_263 = arith.constant 0 : index
    %433 = vector.load %arg4[%c0_260, %c2_261, %c0_262, %c0_263] : memref<2x9x16x128xf32, #tpu.memory_space<vmem>>, vector<1x1x16x128xf32>
    %434 = vector.shape_cast %433 : vector<1x1x16x128xf32> to vector<16x128xf32>
    %435 = vector.broadcast %432 : vector<1x128xf32> to vector<16x128xf32>
    %436 = arith.mulf %435, %434 : vector<16x128xf32>
    %437 = arith.addf %431, %436 : vector<16x128xf32>
    %438 = vector.extract_strided_slice %420 {offsets = [3, 0], sizes = [1, 128], strides = [1, 1]} : vector<16x128xf32> to vector<1x128xf32>
    %c0_264 = arith.constant 0 : index
    %c3_265 = arith.constant 3 : index
    %c0_266 = arith.constant 0 : index
    %c0_267 = arith.constant 0 : index
    %439 = vector.load %arg4[%c0_264, %c3_265, %c0_266, %c0_267] : memref<2x9x16x128xf32, #tpu.memory_space<vmem>>, vector<1x1x16x128xf32>
    %440 = vector.shape_cast %439 : vector<1x1x16x128xf32> to vector<16x128xf32>
    %441 = vector.broadcast %438 : vector<1x128xf32> to vector<16x128xf32>
    %442 = arith.mulf %441, %440 : vector<16x128xf32>
    %443 = arith.addf %437, %442 : vector<16x128xf32>
    %444 = vector.extract_strided_slice %420 {offsets = [4, 0], sizes = [1, 128], strides = [1, 1]} : vector<16x128xf32> to vector<1x128xf32>
    %c0_268 = arith.constant 0 : index
    %c4_269 = arith.constant 4 : index
    %c0_270 = arith.constant 0 : index
    %c0_271 = arith.constant 0 : index
    %445 = vector.load %arg4[%c0_268, %c4_269, %c0_270, %c0_271] : memref<2x9x16x128xf32, #tpu.memory_space<vmem>>, vector<1x1x16x128xf32>
    %446 = vector.shape_cast %445 : vector<1x1x16x128xf32> to vector<16x128xf32>
    %447 = vector.broadcast %444 : vector<1x128xf32> to vector<16x128xf32>
    %448 = arith.mulf %447, %446 : vector<16x128xf32>
    %449 = arith.addf %443, %448 : vector<16x128xf32>
    %450 = vector.extract_strided_slice %420 {offsets = [5, 0], sizes = [1, 128], strides = [1, 1]} : vector<16x128xf32> to vector<1x128xf32>
    %c0_272 = arith.constant 0 : index
    %c5_273 = arith.constant 5 : index
    %c0_274 = arith.constant 0 : index
    %c0_275 = arith.constant 0 : index
    %451 = vector.load %arg4[%c0_272, %c5_273, %c0_274, %c0_275] : memref<2x9x16x128xf32, #tpu.memory_space<vmem>>, vector<1x1x16x128xf32>
    %452 = vector.shape_cast %451 : vector<1x1x16x128xf32> to vector<16x128xf32>
    %453 = vector.broadcast %450 : vector<1x128xf32> to vector<16x128xf32>
    %454 = arith.mulf %453, %452 : vector<16x128xf32>
    %455 = arith.addf %449, %454 : vector<16x128xf32>
    %456 = vector.extract_strided_slice %420 {offsets = [6, 0], sizes = [1, 128], strides = [1, 1]} : vector<16x128xf32> to vector<1x128xf32>
    %c0_276 = arith.constant 0 : index
    %c6_277 = arith.constant 6 : index
    %c0_278 = arith.constant 0 : index
    %c0_279 = arith.constant 0 : index
    %457 = vector.load %arg4[%c0_276, %c6_277, %c0_278, %c0_279] : memref<2x9x16x128xf32, #tpu.memory_space<vmem>>, vector<1x1x16x128xf32>
    %458 = vector.shape_cast %457 : vector<1x1x16x128xf32> to vector<16x128xf32>
    %459 = vector.broadcast %456 : vector<1x128xf32> to vector<16x128xf32>
    %460 = arith.mulf %459, %458 : vector<16x128xf32>
    %461 = arith.addf %455, %460 : vector<16x128xf32>
    %462 = vector.extract_strided_slice %420 {offsets = [7, 0], sizes = [1, 128], strides = [1, 1]} : vector<16x128xf32> to vector<1x128xf32>
    %c0_280 = arith.constant 0 : index
    %c7_281 = arith.constant 7 : index
    %c0_282 = arith.constant 0 : index
    %c0_283 = arith.constant 0 : index
    %463 = vector.load %arg4[%c0_280, %c7_281, %c0_282, %c0_283] : memref<2x9x16x128xf32, #tpu.memory_space<vmem>>, vector<1x1x16x128xf32>
    %464 = vector.shape_cast %463 : vector<1x1x16x128xf32> to vector<16x128xf32>
    %465 = vector.broadcast %462 : vector<1x128xf32> to vector<16x128xf32>
    %466 = arith.mulf %465, %464 : vector<16x128xf32>
    %467 = arith.addf %461, %466 : vector<16x128xf32>
    %468 = vector.extract_strided_slice %420 {offsets = [8, 0], sizes = [1, 128], strides = [1, 1]} : vector<16x128xf32> to vector<1x128xf32>
    %c0_284 = arith.constant 0 : index
    %c8_285 = arith.constant 8 : index
    %c0_286 = arith.constant 0 : index
    %c0_287 = arith.constant 0 : index
    %469 = vector.load %arg4[%c0_284, %c8_285, %c0_286, %c0_287] : memref<2x9x16x128xf32, #tpu.memory_space<vmem>>, vector<1x1x16x128xf32>
    %470 = vector.shape_cast %469 : vector<1x1x16x128xf32> to vector<16x128xf32>
    %471 = vector.broadcast %468 : vector<1x128xf32> to vector<16x128xf32>
    %472 = arith.mulf %471, %470 : vector<16x128xf32>
    %473 = arith.addf %467, %472 : vector<16x128xf32>
    %c0_288 = arith.constant 0 : index
    %c6_289 = arith.constant 6 : index
    %c0_290 = arith.constant 0 : index
    %c0_291 = arith.constant 0 : index
    %474 = vector.load %arg5[%c0_288, %c6_289, %c0_290, %c0_291] : memref<2x9x16x128xf32, #tpu.memory_space<vmem>>, vector<1x1x16x128xf32>
    %475 = vector.shape_cast %474 : vector<1x1x16x128xf32> to vector<16x128xf32>
    %476 = vector.shape_cast %473 : vector<16x128xf32> to vector<1x1x16x128xf32>
    tpu.vector_store %arg5[%c0_288, %c6_289, %c0_290, %c0_291], %476 {strides = array<i32>} : memref<2x9x16x128xf32, #tpu.memory_space<vmem>>, vector<1x1x16x128xf32>,
    %477 = vector.extract_strided_slice %7 {offsets = [112, 0], sizes = [16, 128], strides = [1, 1]} : vector<288x128xf32> to vector<16x128xf32>
    %cst_292 = arith.constant dense<0xFF800000> : vector<128xf32>
    %478 = vector.multi_reduction <maximumf>, %477, %cst_292 [0] : vector<16x128xf32> to vector<128xf32>
    %479 = vector.shape_cast %478 : vector<128xf32> to vector<1x128xf32>
    %480 = vector.broadcast %479 : vector<1x128xf32> to vector<16x128xf32>
    %481 = arith.subf %477, %480 : vector<16x128xf32>
    %482 = math.exp %481 : vector<16x128xf32>
    %cst_293 = arith.constant dense<0.000000e+00> : vector<128xf32>
    %483 = vector.multi_reduction <add>, %482, %cst_293 [0] : vector<16x128xf32> to vector<128xf32>
    %484 = vector.shape_cast %483 : vector<128xf32> to vector<1x128xf32>
    %485 = tpu.reciprocal %484 {approx = true} : vector<1x128xf32> -> vector<1x128xf32>
    %486 = vector.broadcast %485 : vector<1x128xf32> to vector<16x128xf32>
    %487 = arith.mulf %482, %486 : vector<16x128xf32>
    %488 = vector.extract_strided_slice %487 {offsets = [0, 0], sizes = [1, 128], strides = [1, 1]} : vector<16x128xf32> to vector<1x128xf32>
    %c0_294 = arith.constant 0 : index
    %c0_295 = arith.constant 0 : index
    %c0_296 = arith.constant 0 : index
    %c0_297 = arith.constant 0 : index
    %489 = vector.load %arg4[%c0_294, %c0_295, %c0_296, %c0_297] : memref<2x9x16x128xf32, #tpu.memory_space<vmem>>, vector<1x1x16x128xf32>
    %490 = vector.shape_cast %489 : vector<1x1x16x128xf32> to vector<16x128xf32>
    %491 = vector.broadcast %488 : vector<1x128xf32> to vector<16x128xf32>
    %492 = arith.mulf %491, %490 : vector<16x128xf32>
    %493 = vector.extract_strided_slice %487 {offsets = [1, 0], sizes = [1, 128], strides = [1, 1]} : vector<16x128xf32> to vector<1x128xf32>
    %c0_298 = arith.constant 0 : index
    %c1_299 = arith.constant 1 : index
    %c0_300 = arith.constant 0 : index
    %c0_301 = arith.constant 0 : index
    %494 = vector.load %arg4[%c0_298, %c1_299, %c0_300, %c0_301] : memref<2x9x16x128xf32, #tpu.memory_space<vmem>>, vector<1x1x16x128xf32>
    %495 = vector.shape_cast %494 : vector<1x1x16x128xf32> to vector<16x128xf32>
    %496 = vector.broadcast %493 : vector<1x128xf32> to vector<16x128xf32>
    %497 = arith.mulf %496, %495 : vector<16x128xf32>
    %498 = arith.addf %492, %497 : vector<16x128xf32>
    %499 = vector.extract_strided_slice %487 {offsets = [2, 0], sizes = [1, 128], strides = [1, 1]} : vector<16x128xf32> to vector<1x128xf32>
    %c0_302 = arith.constant 0 : index
    %c2_303 = arith.constant 2 : index
    %c0_304 = arith.constant 0 : index
    %c0_305 = arith.constant 0 : index
    %500 = vector.load %arg4[%c0_302, %c2_303, %c0_304, %c0_305] : memref<2x9x16x128xf32, #tpu.memory_space<vmem>>, vector<1x1x16x128xf32>
    %501 = vector.shape_cast %500 : vector<1x1x16x128xf32> to vector<16x128xf32>
    %502 = vector.broadcast %499 : vector<1x128xf32> to vector<16x128xf32>
    %503 = arith.mulf %502, %501 : vector<16x128xf32>
    %504 = arith.addf %498, %503 : vector<16x128xf32>
    %505 = vector.extract_strided_slice %487 {offsets = [3, 0], sizes = [1, 128], strides = [1, 1]} : vector<16x128xf32> to vector<1x128xf32>
    %c0_306 = arith.constant 0 : index
    %c3_307 = arith.constant 3 : index
    %c0_308 = arith.constant 0 : index
    %c0_309 = arith.constant 0 : index
    %506 = vector.load %arg4[%c0_306, %c3_307, %c0_308, %c0_309] : memref<2x9x16x128xf32, #tpu.memory_space<vmem>>, vector<1x1x16x128xf32>
    %507 = vector.shape_cast %506 : vector<1x1x16x128xf32> to vector<16x128xf32>
    %508 = vector.broadcast %505 : vector<1x128xf32> to vector<16x128xf32>
    %509 = arith.mulf %508, %507 : vector<16x128xf32>
    %510 = arith.addf %504, %509 : vector<16x128xf32>
    %511 = vector.extract_strided_slice %487 {offsets = [4, 0], sizes = [1, 128], strides = [1, 1]} : vector<16x128xf32> to vector<1x128xf32>
    %c0_310 = arith.constant 0 : index
    %c4_311 = arith.constant 4 : index
    %c0_312 = arith.constant 0 : index
    %c0_313 = arith.constant 0 : index
    %512 = vector.load %arg4[%c0_310, %c4_311, %c0_312, %c0_313] : memref<2x9x16x128xf32, #tpu.memory_space<vmem>>, vector<1x1x16x128xf32>
    %513 = vector.shape_cast %512 : vector<1x1x16x128xf32> to vector<16x128xf32>
    %514 = vector.broadcast %511 : vector<1x128xf32> to vector<16x128xf32>
    %515 = arith.mulf %514, %513 : vector<16x128xf32>
    %516 = arith.addf %510, %515 : vector<16x128xf32>
    %517 = vector.extract_strided_slice %487 {offsets = [5, 0], sizes = [1, 128], strides = [1, 1]} : vector<16x128xf32> to vector<1x128xf32>
    %c0_314 = arith.constant 0 : index
    %c5_315 = arith.constant 5 : index
    %c0_316 = arith.constant 0 : index
    %c0_317 = arith.constant 0 : index
    %518 = vector.load %arg4[%c0_314, %c5_315, %c0_316, %c0_317] : memref<2x9x16x128xf32, #tpu.memory_space<vmem>>, vector<1x1x16x128xf32>
    %519 = vector.shape_cast %518 : vector<1x1x16x128xf32> to vector<16x128xf32>
    %520 = vector.broadcast %517 : vector<1x128xf32> to vector<16x128xf32>
    %521 = arith.mulf %520, %519 : vector<16x128xf32>
    %522 = arith.addf %516, %521 : vector<16x128xf32>
    %523 = vector.extract_strided_slice %487 {offsets = [6, 0], sizes = [1, 128], strides = [1, 1]} : vector<16x128xf32> to vector<1x128xf32>
    %c0_318 = arith.constant 0 : index
    %c6_319 = arith.constant 6 : index
    %c0_320 = arith.constant 0 : index
    %c0_321 = arith.constant 0 : index
    %524 = vector.load %arg4[%c0_318, %c6_319, %c0_320, %c0_321] : memref<2x9x16x128xf32, #tpu.memory_space<vmem>>, vector<1x1x16x128xf32>
    %525 = vector.shape_cast %524 : vector<1x1x16x128xf32> to vector<16x128xf32>
    %526 = vector.broadcast %523 : vector<1x128xf32> to vector<16x128xf32>
    %527 = arith.mulf %526, %525 : vector<16x128xf32>
    %528 = arith.addf %522, %527 : vector<16x128xf32>
    %529 = vector.extract_strided_slice %487 {offsets = [7, 0], sizes = [1, 128], strides = [1, 1]} : vector<16x128xf32> to vector<1x128xf32>
    %c0_322 = arith.constant 0 : index
    %c7_323 = arith.constant 7 : index
    %c0_324 = arith.constant 0 : index
    %c0_325 = arith.constant 0 : index
    %530 = vector.load %arg4[%c0_322, %c7_323, %c0_324, %c0_325] : memref<2x9x16x128xf32, #tpu.memory_space<vmem>>, vector<1x1x16x128xf32>
    %531 = vector.shape_cast %530 : vector<1x1x16x128xf32> to vector<16x128xf32>
    %532 = vector.broadcast %529 : vector<1x128xf32> to vector<16x128xf32>
    %533 = arith.mulf %532, %531 : vector<16x128xf32>
    %534 = arith.addf %528, %533 : vector<16x128xf32>
    %535 = vector.extract_strided_slice %487 {offsets = [8, 0], sizes = [1, 128], strides = [1, 1]} : vector<16x128xf32> to vector<1x128xf32>
    %c0_326 = arith.constant 0 : index
    %c8_327 = arith.constant 8 : index
    %c0_328 = arith.constant 0 : index
    %c0_329 = arith.constant 0 : index
    %536 = vector.load %arg4[%c0_326, %c8_327, %c0_328, %c0_329] : memref<2x9x16x128xf32, #tpu.memory_space<vmem>>, vector<1x1x16x128xf32>
    %537 = vector.shape_cast %536 : vector<1x1x16x128xf32> to vector<16x128xf32>
    %538 = vector.broadcast %535 : vector<1x128xf32> to vector<16x128xf32>
    %539 = arith.mulf %538, %537 : vector<16x128xf32>
    %540 = arith.addf %534, %539 : vector<16x128xf32>
    %c0_330 = arith.constant 0 : index
    %c7_331 = arith.constant 7 : index
    %c0_332 = arith.constant 0 : index
    %c0_333 = arith.constant 0 : index
    %541 = vector.load %arg5[%c0_330, %c7_331, %c0_332, %c0_333] : memref<2x9x16x128xf32, #tpu.memory_space<vmem>>, vector<1x1x16x128xf32>
    %542 = vector.shape_cast %541 : vector<1x1x16x128xf32> to vector<16x128xf32>
    %543 = vector.shape_cast %540 : vector<16x128xf32> to vector<1x1x16x128xf32>
    tpu.vector_store %arg5[%c0_330, %c7_331, %c0_332, %c0_333], %543 {strides = array<i32>} : memref<2x9x16x128xf32, #tpu.memory_space<vmem>>, vector<1x1x16x128xf32>,
    %544 = vector.extract_strided_slice %7 {offsets = [128, 0], sizes = [16, 128], strides = [1, 1]} : vector<288x128xf32> to vector<16x128xf32>
    %cst_334 = arith.constant dense<0xFF800000> : vector<128xf32>
    %545 = vector.multi_reduction <maximumf>, %544, %cst_334 [0] : vector<16x128xf32> to vector<128xf32>
    %546 = vector.shape_cast %545 : vector<128xf32> to vector<1x128xf32>
    %547 = vector.broadcast %546 : vector<1x128xf32> to vector<16x128xf32>
    %548 = arith.subf %544, %547 : vector<16x128xf32>
    %549 = math.exp %548 : vector<16x128xf32>
    %cst_335 = arith.constant dense<0.000000e+00> : vector<128xf32>
    %550 = vector.multi_reduction <add>, %549, %cst_335 [0] : vector<16x128xf32> to vector<128xf32>
    %551 = vector.shape_cast %550 : vector<128xf32> to vector<1x128xf32>
    %552 = tpu.reciprocal %551 {approx = true} : vector<1x128xf32> -> vector<1x128xf32>
    %553 = vector.broadcast %552 : vector<1x128xf32> to vector<16x128xf32>
    %554 = arith.mulf %549, %553 : vector<16x128xf32>
    %555 = vector.extract_strided_slice %554 {offsets = [0, 0], sizes = [1, 128], strides = [1, 1]} : vector<16x128xf32> to vector<1x128xf32>
    %c0_336 = arith.constant 0 : index
    %c0_337 = arith.constant 0 : index
    %c0_338 = arith.constant 0 : index
    %c0_339 = arith.constant 0 : index
    %556 = vector.load %arg4[%c0_336, %c0_337, %c0_338, %c0_339] : memref<2x9x16x128xf32, #tpu.memory_space<vmem>>, vector<1x1x16x128xf32>
    %557 = vector.shape_cast %556 : vector<1x1x16x128xf32> to vector<16x128xf32>
    %558 = vector.broadcast %555 : vector<1x128xf32> to vector<16x128xf32>
    %559 = arith.mulf %558, %557 : vector<16x128xf32>
    %560 = vector.extract_strided_slice %554 {offsets = [1, 0], sizes = [1, 128], strides = [1, 1]} : vector<16x128xf32> to vector<1x128xf32>
    %c0_340 = arith.constant 0 : index
    %c1_341 = arith.constant 1 : index
    %c0_342 = arith.constant 0 : index
    %c0_343 = arith.constant 0 : index
    %561 = vector.load %arg4[%c0_340, %c1_341, %c0_342, %c0_343] : memref<2x9x16x128xf32, #tpu.memory_space<vmem>>, vector<1x1x16x128xf32>
    %562 = vector.shape_cast %561 : vector<1x1x16x128xf32> to vector<16x128xf32>
    %563 = vector.broadcast %560 : vector<1x128xf32> to vector<16x128xf32>
    %564 = arith.mulf %563, %562 : vector<16x128xf32>
    %565 = arith.addf %559, %564 : vector<16x128xf32>
    %566 = vector.extract_strided_slice %554 {offsets = [2, 0], sizes = [1, 128], strides = [1, 1]} : vector<16x128xf32> to vector<1x128xf32>
    %c0_344 = arith.constant 0 : index
    %c2_345 = arith.constant 2 : index
    %c0_346 = arith.constant 0 : index
    %c0_347 = arith.constant 0 : index
    %567 = vector.load %arg4[%c0_344, %c2_345, %c0_346, %c0_347] : memref<2x9x16x128xf32, #tpu.memory_space<vmem>>, vector<1x1x16x128xf32>
    %568 = vector.shape_cast %567 : vector<1x1x16x128xf32> to vector<16x128xf32>
    %569 = vector.broadcast %566 : vector<1x128xf32> to vector<16x128xf32>
    %570 = arith.mulf %569, %568 : vector<16x128xf32>
    %571 = arith.addf %565, %570 : vector<16x128xf32>
    %572 = vector.extract_strided_slice %554 {offsets = [3, 0], sizes = [1, 128], strides = [1, 1]} : vector<16x128xf32> to vector<1x128xf32>
    %c0_348 = arith.constant 0 : index
    %c3_349 = arith.constant 3 : index
    %c0_350 = arith.constant 0 : index
    %c0_351 = arith.constant 0 : index
    %573 = vector.load %arg4[%c0_348, %c3_349, %c0_350, %c0_351] : memref<2x9x16x128xf32, #tpu.memory_space<vmem>>, vector<1x1x16x128xf32>
    %574 = vector.shape_cast %573 : vector<1x1x16x128xf32> to vector<16x128xf32>
    %575 = vector.broadcast %572 : vector<1x128xf32> to vector<16x128xf32>
    %576 = arith.mulf %575, %574 : vector<16x128xf32>
    %577 = arith.addf %571, %576 : vector<16x128xf32>
    %578 = vector.extract_strided_slice %554 {offsets = [4, 0], sizes = [1, 128], strides = [1, 1]} : vector<16x128xf32> to vector<1x128xf32>
    %c0_352 = arith.constant 0 : index
    %c4_353 = arith.constant 4 : index
    %c0_354 = arith.constant 0 : index
    %c0_355 = arith.constant 0 : index
    %579 = vector.load %arg4[%c0_352, %c4_353, %c0_354, %c0_355] : memref<2x9x16x128xf32, #tpu.memory_space<vmem>>, vector<1x1x16x128xf32>
    %580 = vector.shape_cast %579 : vector<1x1x16x128xf32> to vector<16x128xf32>
    %581 = vector.broadcast %578 : vector<1x128xf32> to vector<16x128xf32>
    %582 = arith.mulf %581, %580 : vector<16x128xf32>
    %583 = arith.addf %577, %582 : vector<16x128xf32>
    %584 = vector.extract_strided_slice %554 {offsets = [5, 0], sizes = [1, 128], strides = [1, 1]} : vector<16x128xf32> to vector<1x128xf32>
    %c0_356 = arith.constant 0 : index
    %c5_357 = arith.constant 5 : index
    %c0_358 = arith.constant 0 : index
    %c0_359 = arith.constant 0 : index
    %585 = vector.load %arg4[%c0_356, %c5_357, %c0_358, %c0_359] : memref<2x9x16x128xf32, #tpu.memory_space<vmem>>, vector<1x1x16x128xf32>
    %586 = vector.shape_cast %585 : vector<1x1x16x128xf32> to vector<16x128xf32>
    %587 = vector.broadcast %584 : vector<1x128xf32> to vector<16x128xf32>
    %588 = arith.mulf %587, %586 : vector<16x128xf32>
    %589 = arith.addf %583, %588 : vector<16x128xf32>
    %590 = vector.extract_strided_slice %554 {offsets = [6, 0], sizes = [1, 128], strides = [1, 1]} : vector<16x128xf32> to vector<1x128xf32>
    %c0_360 = arith.constant 0 : index
    %c6_361 = arith.constant 6 : index
    %c0_362 = arith.constant 0 : index
    %c0_363 = arith.constant 0 : index
    %591 = vector.load %arg4[%c0_360, %c6_361, %c0_362, %c0_363] : memref<2x9x16x128xf32, #tpu.memory_space<vmem>>, vector<1x1x16x128xf32>
    %592 = vector.shape_cast %591 : vector<1x1x16x128xf32> to vector<16x128xf32>
    %593 = vector.broadcast %590 : vector<1x128xf32> to vector<16x128xf32>
    %594 = arith.mulf %593, %592 : vector<16x128xf32>
    %595 = arith.addf %589, %594 : vector<16x128xf32>
    %596 = vector.extract_strided_slice %554 {offsets = [7, 0], sizes = [1, 128], strides = [1, 1]} : vector<16x128xf32> to vector<1x128xf32>
    %c0_364 = arith.constant 0 : index
    %c7_365 = arith.constant 7 : index
    %c0_366 = arith.constant 0 : index
    %c0_367 = arith.constant 0 : index
    %597 = vector.load %arg4[%c0_364, %c7_365, %c0_366, %c0_367] : memref<2x9x16x128xf32, #tpu.memory_space<vmem>>, vector<1x1x16x128xf32>
    %598 = vector.shape_cast %597 : vector<1x1x16x128xf32> to vector<16x128xf32>
    %599 = vector.broadcast %596 : vector<1x128xf32> to vector<16x128xf32>
    %600 = arith.mulf %599, %598 : vector<16x128xf32>
    %601 = arith.addf %595, %600 : vector<16x128xf32>
    %602 = vector.extract_strided_slice %554 {offsets = [8, 0], sizes = [1, 128], strides = [1, 1]} : vector<16x128xf32> to vector<1x128xf32>
    %c0_368 = arith.constant 0 : index
    %c8_369 = arith.constant 8 : index
    %c0_370 = arith.constant 0 : index
    %c0_371 = arith.constant 0 : index
    %603 = vector.load %arg4[%c0_368, %c8_369, %c0_370, %c0_371] : memref<2x9x16x128xf32, #tpu.memory_space<vmem>>, vector<1x1x16x128xf32>
    %604 = vector.shape_cast %603 : vector<1x1x16x128xf32> to vector<16x128xf32>
    %605 = vector.broadcast %602 : vector<1x128xf32> to vector<16x128xf32>
    %606 = arith.mulf %605, %604 : vector<16x128xf32>
    %607 = arith.addf %601, %606 : vector<16x128xf32>
    %c0_372 = arith.constant 0 : index
    %c8_373 = arith.constant 8 : index
    %c0_374 = arith.constant 0 : index
    %c0_375 = arith.constant 0 : index
    %608 = vector.load %arg5[%c0_372, %c8_373, %c0_374, %c0_375] : memref<2x9x16x128xf32, #tpu.memory_space<vmem>>, vector<1x1x16x128xf32>
    %609 = vector.shape_cast %608 : vector<1x1x16x128xf32> to vector<16x128xf32>
    %610 = vector.shape_cast %607 : vector<16x128xf32> to vector<1x1x16x128xf32>
    tpu.vector_store %arg5[%c0_372, %c8_373, %c0_374, %c0_375], %610 {strides = array<i32>} : memref<2x9x16x128xf32, #tpu.memory_space<vmem>>, vector<1x1x16x128xf32>,
    %611 = vector.extract_strided_slice %7 {offsets = [144, 0], sizes = [16, 128], strides = [1, 1]} : vector<288x128xf32> to vector<16x128xf32>
    %cst_376 = arith.constant dense<0xFF800000> : vector<128xf32>
    %612 = vector.multi_reduction <maximumf>, %611, %cst_376 [0] : vector<16x128xf32> to vector<128xf32>
    %613 = vector.shape_cast %612 : vector<128xf32> to vector<1x128xf32>
    %614 = vector.broadcast %613 : vector<1x128xf32> to vector<16x128xf32>
    %615 = arith.subf %611, %614 : vector<16x128xf32>
    %616 = math.exp %615 : vector<16x128xf32>
    %cst_377 = arith.constant dense<0.000000e+00> : vector<128xf32>
    %617 = vector.multi_reduction <add>, %616, %cst_377 [0] : vector<16x128xf32> to vector<128xf32>
    %618 = vector.shape_cast %617 : vector<128xf32> to vector<1x128xf32>
    %619 = tpu.reciprocal %618 {approx = true} : vector<1x128xf32> -> vector<1x128xf32>
    %620 = vector.broadcast %619 : vector<1x128xf32> to vector<16x128xf32>
    %621 = arith.mulf %616, %620 : vector<16x128xf32>
    %622 = vector.extract_strided_slice %621 {offsets = [0, 0], sizes = [1, 128], strides = [1, 1]} : vector<16x128xf32> to vector<1x128xf32>
    %c1_378 = arith.constant 1 : index
    %c0_379 = arith.constant 0 : index
    %c0_380 = arith.constant 0 : index
    %c0_381 = arith.constant 0 : index
    %623 = vector.load %arg4[%c1_378, %c0_379, %c0_380, %c0_381] : memref<2x9x16x128xf32, #tpu.memory_space<vmem>>, vector<1x1x16x128xf32>
    %624 = vector.shape_cast %623 : vector<1x1x16x128xf32> to vector<16x128xf32>
    %625 = vector.broadcast %622 : vector<1x128xf32> to vector<16x128xf32>
    %626 = arith.mulf %625, %624 : vector<16x128xf32>
    %627 = vector.extract_strided_slice %621 {offsets = [1, 0], sizes = [1, 128], strides = [1, 1]} : vector<16x128xf32> to vector<1x128xf32>
    %c1_382 = arith.constant 1 : index
    %c1_383 = arith.constant 1 : index
    %c0_384 = arith.constant 0 : index
    %c0_385 = arith.constant 0 : index
    %628 = vector.load %arg4[%c1_382, %c1_383, %c0_384, %c0_385] : memref<2x9x16x128xf32, #tpu.memory_space<vmem>>, vector<1x1x16x128xf32>
    %629 = vector.shape_cast %628 : vector<1x1x16x128xf32> to vector<16x128xf32>
    %630 = vector.broadcast %627 : vector<1x128xf32> to vector<16x128xf32>
    %631 = arith.mulf %630, %629 : vector<16x128xf32>
    %632 = arith.addf %626, %631 : vector<16x128xf32>
    %633 = vector.extract_strided_slice %621 {offsets = [2, 0], sizes = [1, 128], strides = [1, 1]} : vector<16x128xf32> to vector<1x128xf32>
    %c1_386 = arith.constant 1 : index
    %c2_387 = arith.constant 2 : index
    %c0_388 = arith.constant 0 : index
    %c0_389 = arith.constant 0 : index
    %634 = vector.load %arg4[%c1_386, %c2_387, %c0_388, %c0_389] : memref<2x9x16x128xf32, #tpu.memory_space<vmem>>, vector<1x1x16x128xf32>
    %635 = vector.shape_cast %634 : vector<1x1x16x128xf32> to vector<16x128xf32>
    %636 = vector.broadcast %633 : vector<1x128xf32> to vector<16x128xf32>
    %637 = arith.mulf %636, %635 : vector<16x128xf32>
    %638 = arith.addf %632, %637 : vector<16x128xf32>
    %639 = vector.extract_strided_slice %621 {offsets = [3, 0], sizes = [1, 128], strides = [1, 1]} : vector<16x128xf32> to vector<1x128xf32>
    %c1_390 = arith.constant 1 : index
    %c3_391 = arith.constant 3 : index
    %c0_392 = arith.constant 0 : index
    %c0_393 = arith.constant 0 : index
    %640 = vector.load %arg4[%c1_390, %c3_391, %c0_392, %c0_393] : memref<2x9x16x128xf32, #tpu.memory_space<vmem>>, vector<1x1x16x128xf32>
    %641 = vector.shape_cast %640 : vector<1x1x16x128xf32> to vector<16x128xf32>
    %642 = vector.broadcast %639 : vector<1x128xf32> to vector<16x128xf32>
    %643 = arith.mulf %642, %641 : vector<16x128xf32>
    %644 = arith.addf %638, %643 : vector<16x128xf32>
    %645 = vector.extract_strided_slice %621 {offsets = [4, 0], sizes = [1, 128], strides = [1, 1]} : vector<16x128xf32> to vector<1x128xf32>
    %c1_394 = arith.constant 1 : index
    %c4_395 = arith.constant 4 : index
    %c0_396 = arith.constant 0 : index
    %c0_397 = arith.constant 0 : index
    %646 = vector.load %arg4[%c1_394, %c4_395, %c0_396, %c0_397] : memref<2x9x16x128xf32, #tpu.memory_space<vmem>>, vector<1x1x16x128xf32>
    %647 = vector.shape_cast %646 : vector<1x1x16x128xf32> to vector<16x128xf32>
    %648 = vector.broadcast %645 : vector<1x128xf32> to vector<16x128xf32>
    %649 = arith.mulf %648, %647 : vector<16x128xf32>
    %650 = arith.addf %644, %649 : vector<16x128xf32>
    %651 = vector.extract_strided_slice %621 {offsets = [5, 0], sizes = [1, 128], strides = [1, 1]} : vector<16x128xf32> to vector<1x128xf32>
    %c1_398 = arith.constant 1 : index
    %c5_399 = arith.constant 5 : index
    %c0_400 = arith.constant 0 : index
    %c0_401 = arith.constant 0 : index
    %652 = vector.load %arg4[%c1_398, %c5_399, %c0_400, %c0_401] : memref<2x9x16x128xf32, #tpu.memory_space<vmem>>, vector<1x1x16x128xf32>
    %653 = vector.shape_cast %652 : vector<1x1x16x128xf32> to vector<16x128xf32>
    %654 = vector.broadcast %651 : vector<1x128xf32> to vector<16x128xf32>
    %655 = arith.mulf %654, %653 : vector<16x128xf32>
    %656 = arith.addf %650, %655 : vector<16x128xf32>
    %657 = vector.extract_strided_slice %621 {offsets = [6, 0], sizes = [1, 128], strides = [1, 1]} : vector<16x128xf32> to vector<1x128xf32>
    %c1_402 = arith.constant 1 : index
    %c6_403 = arith.constant 6 : index
    %c0_404 = arith.constant 0 : index
    %c0_405 = arith.constant 0 : index
    %658 = vector.load %arg4[%c1_402, %c6_403, %c0_404, %c0_405] : memref<2x9x16x128xf32, #tpu.memory_space<vmem>>, vector<1x1x16x128xf32>
    %659 = vector.shape_cast %658 : vector<1x1x16x128xf32> to vector<16x128xf32>
    %660 = vector.broadcast %657 : vector<1x128xf32> to vector<16x128xf32>
    %661 = arith.mulf %660, %659 : vector<16x128xf32>
    %662 = arith.addf %656, %661 : vector<16x128xf32>
    %663 = vector.extract_strided_slice %621 {offsets = [7, 0], sizes = [1, 128], strides = [1, 1]} : vector<16x128xf32> to vector<1x128xf32>
    %c1_406 = arith.constant 1 : index
    %c7_407 = arith.constant 7 : index
    %c0_408 = arith.constant 0 : index
    %c0_409 = arith.constant 0 : index
    %664 = vector.load %arg4[%c1_406, %c7_407, %c0_408, %c0_409] : memref<2x9x16x128xf32, #tpu.memory_space<vmem>>, vector<1x1x16x128xf32>
    %665 = vector.shape_cast %664 : vector<1x1x16x128xf32> to vector<16x128xf32>
    %666 = vector.broadcast %663 : vector<1x128xf32> to vector<16x128xf32>
    %667 = arith.mulf %666, %665 : vector<16x128xf32>
    %668 = arith.addf %662, %667 : vector<16x128xf32>
    %669 = vector.extract_strided_slice %621 {offsets = [8, 0], sizes = [1, 128], strides = [1, 1]} : vector<16x128xf32> to vector<1x128xf32>
    %c1_410 = arith.constant 1 : index
    %c8_411 = arith.constant 8 : index
    %c0_412 = arith.constant 0 : index
    %c0_413 = arith.constant 0 : index
    %670 = vector.load %arg4[%c1_410, %c8_411, %c0_412, %c0_413] : memref<2x9x16x128xf32, #tpu.memory_space<vmem>>, vector<1x1x16x128xf32>
    %671 = vector.shape_cast %670 : vector<1x1x16x128xf32> to vector<16x128xf32>
    %672 = vector.broadcast %669 : vector<1x128xf32> to vector<16x128xf32>
    %673 = arith.mulf %672, %671 : vector<16x128xf32>
    %674 = arith.addf %668, %673 : vector<16x128xf32>
    %c1_414 = arith.constant 1 : index
    %c0_415 = arith.constant 0 : index
    %c0_416 = arith.constant 0 : index
    %c0_417 = arith.constant 0 : index
    %675 = vector.load %arg5[%c1_414, %c0_415, %c0_416, %c0_417] : memref<2x9x16x128xf32, #tpu.memory_space<vmem>>, vector<1x1x16x128xf32>
    %676 = vector.shape_cast %675 : vector<1x1x16x128xf32> to vector<16x128xf32>
    %677 = vector.shape_cast %674 : vector<16x128xf32> to vector<1x1x16x128xf32>
    tpu.vector_store %arg5[%c1_414, %c0_415, %c0_416, %c0_417], %677 {strides = array<i32>} : memref<2x9x16x128xf32, #tpu.memory_space<vmem>>, vector<1x1x16x128xf32>,
    %678 = vector.extract_strided_slice %7 {offsets = [160, 0], sizes = [16, 128], strides = [1, 1]} : vector<288x128xf32> to vector<16x128xf32>
    %cst_418 = arith.constant dense<0xFF800000> : vector<128xf32>
    %679 = vector.multi_reduction <maximumf>, %678, %cst_418 [0] : vector<16x128xf32> to vector<128xf32>
    %680 = vector.shape_cast %679 : vector<128xf32> to vector<1x128xf32>
    %681 = vector.broadcast %680 : vector<1x128xf32> to vector<16x128xf32>
    %682 = arith.subf %678, %681 : vector<16x128xf32>
    %683 = math.exp %682 : vector<16x128xf32>
    %cst_419 = arith.constant dense<0.000000e+00> : vector<128xf32>
    %684 = vector.multi_reduction <add>, %683, %cst_419 [0] : vector<16x128xf32> to vector<128xf32>
    %685 = vector.shape_cast %684 : vector<128xf32> to vector<1x128xf32>
    %686 = tpu.reciprocal %685 {approx = true} : vector<1x128xf32> -> vector<1x128xf32>
    %687 = vector.broadcast %686 : vector<1x128xf32> to vector<16x128xf32>
    %688 = arith.mulf %683, %687 : vector<16x128xf32>
    %689 = vector.extract_strided_slice %688 {offsets = [0, 0], sizes = [1, 128], strides = [1, 1]} : vector<16x128xf32> to vector<1x128xf32>
    %c1_420 = arith.constant 1 : index
    %c0_421 = arith.constant 0 : index
    %c0_422 = arith.constant 0 : index
    %c0_423 = arith.constant 0 : index
    %690 = vector.load %arg4[%c1_420, %c0_421, %c0_422, %c0_423] : memref<2x9x16x128xf32, #tpu.memory_space<vmem>>, vector<1x1x16x128xf32>
    %691 = vector.shape_cast %690 : vector<1x1x16x128xf32> to vector<16x128xf32>
    %692 = vector.broadcast %689 : vector<1x128xf32> to vector<16x128xf32>
    %693 = arith.mulf %692, %691 : vector<16x128xf32>
    %694 = vector.extract_strided_slice %688 {offsets = [1, 0], sizes = [1, 128], strides = [1, 1]} : vector<16x128xf32> to vector<1x128xf32>
    %c1_424 = arith.constant 1 : index
    %c1_425 = arith.constant 1 : index
    %c0_426 = arith.constant 0 : index
    %c0_427 = arith.constant 0 : index
    %695 = vector.load %arg4[%c1_424, %c1_425, %c0_426, %c0_427] : memref<2x9x16x128xf32, #tpu.memory_space<vmem>>, vector<1x1x16x128xf32>
    %696 = vector.shape_cast %695 : vector<1x1x16x128xf32> to vector<16x128xf32>
    %697 = vector.broadcast %694 : vector<1x128xf32> to vector<16x128xf32>
    %698 = arith.mulf %697, %696 : vector<16x128xf32>
    %699 = arith.addf %693, %698 : vector<16x128xf32>
    %700 = vector.extract_strided_slice %688 {offsets = [2, 0], sizes = [1, 128], strides = [1, 1]} : vector<16x128xf32> to vector<1x128xf32>
    %c1_428 = arith.constant 1 : index
    %c2_429 = arith.constant 2 : index
    %c0_430 = arith.constant 0 : index
    %c0_431 = arith.constant 0 : index
    %701 = vector.load %arg4[%c1_428, %c2_429, %c0_430, %c0_431] : memref<2x9x16x128xf32, #tpu.memory_space<vmem>>, vector<1x1x16x128xf32>
    %702 = vector.shape_cast %701 : vector<1x1x16x128xf32> to vector<16x128xf32>
    %703 = vector.broadcast %700 : vector<1x128xf32> to vector<16x128xf32>
    %704 = arith.mulf %703, %702 : vector<16x128xf32>
    %705 = arith.addf %699, %704 : vector<16x128xf32>
    %706 = vector.extract_strided_slice %688 {offsets = [3, 0], sizes = [1, 128], strides = [1, 1]} : vector<16x128xf32> to vector<1x128xf32>
    %c1_432 = arith.constant 1 : index
    %c3_433 = arith.constant 3 : index
    %c0_434 = arith.constant 0 : index
    %c0_435 = arith.constant 0 : index
    %707 = vector.load %arg4[%c1_432, %c3_433, %c0_434, %c0_435] : memref<2x9x16x128xf32, #tpu.memory_space<vmem>>, vector<1x1x16x128xf32>
    %708 = vector.shape_cast %707 : vector<1x1x16x128xf32> to vector<16x128xf32>
    %709 = vector.broadcast %706 : vector<1x128xf32> to vector<16x128xf32>
    %710 = arith.mulf %709, %708 : vector<16x128xf32>
    %711 = arith.addf %705, %710 : vector<16x128xf32>
    %712 = vector.extract_strided_slice %688 {offsets = [4, 0], sizes = [1, 128], strides = [1, 1]} : vector<16x128xf32> to vector<1x128xf32>
    %c1_436 = arith.constant 1 : index
    %c4_437 = arith.constant 4 : index
    %c0_438 = arith.constant 0 : index
    %c0_439 = arith.constant 0 : index
    %713 = vector.load %arg4[%c1_436, %c4_437, %c0_438, %c0_439] : memref<2x9x16x128xf32, #tpu.memory_space<vmem>>, vector<1x1x16x128xf32>
    %714 = vector.shape_cast %713 : vector<1x1x16x128xf32> to vector<16x128xf32>
    %715 = vector.broadcast %712 : vector<1x128xf32> to vector<16x128xf32>
    %716 = arith.mulf %715, %714 : vector<16x128xf32>
    %717 = arith.addf %711, %716 : vector<16x128xf32>
    %718 = vector.extract_strided_slice %688 {offsets = [5, 0], sizes = [1, 128], strides = [1, 1]} : vector<16x128xf32> to vector<1x128xf32>
    %c1_440 = arith.constant 1 : index
    %c5_441 = arith.constant 5 : index
    %c0_442 = arith.constant 0 : index
    %c0_443 = arith.constant 0 : index
    %719 = vector.load %arg4[%c1_440, %c5_441, %c0_442, %c0_443] : memref<2x9x16x128xf32, #tpu.memory_space<vmem>>, vector<1x1x16x128xf32>
    %720 = vector.shape_cast %719 : vector<1x1x16x128xf32> to vector<16x128xf32>
    %721 = vector.broadcast %718 : vector<1x128xf32> to vector<16x128xf32>
    %722 = arith.mulf %721, %720 : vector<16x128xf32>
    %723 = arith.addf %717, %722 : vector<16x128xf32>
    %724 = vector.extract_strided_slice %688 {offsets = [6, 0], sizes = [1, 128], strides = [1, 1]} : vector<16x128xf32> to vector<1x128xf32>
    %c1_444 = arith.constant 1 : index
    %c6_445 = arith.constant 6 : index
    %c0_446 = arith.constant 0 : index
    %c0_447 = arith.constant 0 : index
    %725 = vector.load %arg4[%c1_444, %c6_445, %c0_446, %c0_447] : memref<2x9x16x128xf32, #tpu.memory_space<vmem>>, vector<1x1x16x128xf32>
    %726 = vector.shape_cast %725 : vector<1x1x16x128xf32> to vector<16x128xf32>
    %727 = vector.broadcast %724 : vector<1x128xf32> to vector<16x128xf32>
    %728 = arith.mulf %727, %726 : vector<16x128xf32>
    %729 = arith.addf %723, %728 : vector<16x128xf32>
    %730 = vector.extract_strided_slice %688 {offsets = [7, 0], sizes = [1, 128], strides = [1, 1]} : vector<16x128xf32> to vector<1x128xf32>
    %c1_448 = arith.constant 1 : index
    %c7_449 = arith.constant 7 : index
    %c0_450 = arith.constant 0 : index
    %c0_451 = arith.constant 0 : index
    %731 = vector.load %arg4[%c1_448, %c7_449, %c0_450, %c0_451] : memref<2x9x16x128xf32, #tpu.memory_space<vmem>>, vector<1x1x16x128xf32>
    %732 = vector.shape_cast %731 : vector<1x1x16x128xf32> to vector<16x128xf32>
    %733 = vector.broadcast %730 : vector<1x128xf32> to vector<16x128xf32>
    %734 = arith.mulf %733, %732 : vector<16x128xf32>
    %735 = arith.addf %729, %734 : vector<16x128xf32>
    %736 = vector.extract_strided_slice %688 {offsets = [8, 0], sizes = [1, 128], strides = [1, 1]} : vector<16x128xf32> to vector<1x128xf32>
    %c1_452 = arith.constant 1 : index
    %c8_453 = arith.constant 8 : index
    %c0_454 = arith.constant 0 : index
    %c0_455 = arith.constant 0 : index
    %737 = vector.load %arg4[%c1_452, %c8_453, %c0_454, %c0_455] : memref<2x9x16x128xf32, #tpu.memory_space<vmem>>, vector<1x1x16x128xf32>
    %738 = vector.shape_cast %737 : vector<1x1x16x128xf32> to vector<16x128xf32>
    %739 = vector.broadcast %736 : vector<1x128xf32> to vector<16x128xf32>
    %740 = arith.mulf %739, %738 : vector<16x128xf32>
    %741 = arith.addf %735, %740 : vector<16x128xf32>
    %c1_456 = arith.constant 1 : index
    %c1_457 = arith.constant 1 : index
    %c0_458 = arith.constant 0 : index
    %c0_459 = arith.constant 0 : index
    %742 = vector.load %arg5[%c1_456, %c1_457, %c0_458, %c0_459] : memref<2x9x16x128xf32, #tpu.memory_space<vmem>>, vector<1x1x16x128xf32>
    %743 = vector.shape_cast %742 : vector<1x1x16x128xf32> to vector<16x128xf32>
    %744 = vector.shape_cast %741 : vector<16x128xf32> to vector<1x1x16x128xf32>
    tpu.vector_store %arg5[%c1_456, %c1_457, %c0_458, %c0_459], %744 {strides = array<i32>} : memref<2x9x16x128xf32, #tpu.memory_space<vmem>>, vector<1x1x16x128xf32>,
    %745 = vector.extract_strided_slice %7 {offsets = [176, 0], sizes = [16, 128], strides = [1, 1]} : vector<288x128xf32> to vector<16x128xf32>
    %cst_460 = arith.constant dense<0xFF800000> : vector<128xf32>
    %746 = vector.multi_reduction <maximumf>, %745, %cst_460 [0] : vector<16x128xf32> to vector<128xf32>
    %747 = vector.shape_cast %746 : vector<128xf32> to vector<1x128xf32>
    %748 = vector.broadcast %747 : vector<1x128xf32> to vector<16x128xf32>
    %749 = arith.subf %745, %748 : vector<16x128xf32>
    %750 = math.exp %749 : vector<16x128xf32>
    %cst_461 = arith.constant dense<0.000000e+00> : vector<128xf32>
    %751 = vector.multi_reduction <add>, %750, %cst_461 [0] : vector<16x128xf32> to vector<128xf32>
    %752 = vector.shape_cast %751 : vector<128xf32> to vector<1x128xf32>
    %753 = tpu.reciprocal %752 {approx = true} : vector<1x128xf32> -> vector<1x128xf32>
    %754 = vector.broadcast %753 : vector<1x128xf32> to vector<16x128xf32>
    %755 = arith.mulf %750, %754 : vector<16x128xf32>
    %756 = vector.extract_strided_slice %755 {offsets = [0, 0], sizes = [1, 128], strides = [1, 1]} : vector<16x128xf32> to vector<1x128xf32>
    %c1_462 = arith.constant 1 : index
    %c0_463 = arith.constant 0 : index
    %c0_464 = arith.constant 0 : index
    %c0_465 = arith.constant 0 : index
    %757 = vector.load %arg4[%c1_462, %c0_463, %c0_464, %c0_465] : memref<2x9x16x128xf32, #tpu.memory_space<vmem>>, vector<1x1x16x128xf32>
    %758 = vector.shape_cast %757 : vector<1x1x16x128xf32> to vector<16x128xf32>
    %759 = vector.broadcast %756 : vector<1x128xf32> to vector<16x128xf32>
    %760 = arith.mulf %759, %758 : vector<16x128xf32>
    %761 = vector.extract_strided_slice %755 {offsets = [1, 0], sizes = [1, 128], strides = [1, 1]} : vector<16x128xf32> to vector<1x128xf32>
    %c1_466 = arith.constant 1 : index
    %c1_467 = arith.constant 1 : index
    %c0_468 = arith.constant 0 : index
    %c0_469 = arith.constant 0 : index
    %762 = vector.load %arg4[%c1_466, %c1_467, %c0_468, %c0_469] : memref<2x9x16x128xf32, #tpu.memory_space<vmem>>, vector<1x1x16x128xf32>
    %763 = vector.shape_cast %762 : vector<1x1x16x128xf32> to vector<16x128xf32>
    %764 = vector.broadcast %761 : vector<1x128xf32> to vector<16x128xf32>
    %765 = arith.mulf %764, %763 : vector<16x128xf32>
    %766 = arith.addf %760, %765 : vector<16x128xf32>
    %767 = vector.extract_strided_slice %755 {offsets = [2, 0], sizes = [1, 128], strides = [1, 1]} : vector<16x128xf32> to vector<1x128xf32>
    %c1_470 = arith.constant 1 : index
    %c2_471 = arith.constant 2 : index
    %c0_472 = arith.constant 0 : index
    %c0_473 = arith.constant 0 : index
    %768 = vector.load %arg4[%c1_470, %c2_471, %c0_472, %c0_473] : memref<2x9x16x128xf32, #tpu.memory_space<vmem>>, vector<1x1x16x128xf32>
    %769 = vector.shape_cast %768 : vector<1x1x16x128xf32> to vector<16x128xf32>
    %770 = vector.broadcast %767 : vector<1x128xf32> to vector<16x128xf32>
    %771 = arith.mulf %770, %769 : vector<16x128xf32>
    %772 = arith.addf %766, %771 : vector<16x128xf32>
    %773 = vector.extract_strided_slice %755 {offsets = [3, 0], sizes = [1, 128], strides = [1, 1]} : vector<16x128xf32> to vector<1x128xf32>
    %c1_474 = arith.constant 1 : index
    %c3_475 = arith.constant 3 : index
    %c0_476 = arith.constant 0 : index
    %c0_477 = arith.constant 0 : index
    %774 = vector.load %arg4[%c1_474, %c3_475, %c0_476, %c0_477] : memref<2x9x16x128xf32, #tpu.memory_space<vmem>>, vector<1x1x16x128xf32>
    %775 = vector.shape_cast %774 : vector<1x1x16x128xf32> to vector<16x128xf32>
    %776 = vector.broadcast %773 : vector<1x128xf32> to vector<16x128xf32>
    %777 = arith.mulf %776, %775 : vector<16x128xf32>
    %778 = arith.addf %772, %777 : vector<16x128xf32>
    %779 = vector.extract_strided_slice %755 {offsets = [4, 0], sizes = [1, 128], strides = [1, 1]} : vector<16x128xf32> to vector<1x128xf32>
    %c1_478 = arith.constant 1 : index
    %c4_479 = arith.constant 4 : index
    %c0_480 = arith.constant 0 : index
    %c0_481 = arith.constant 0 : index
    %780 = vector.load %arg4[%c1_478, %c4_479, %c0_480, %c0_481] : memref<2x9x16x128xf32, #tpu.memory_space<vmem>>, vector<1x1x16x128xf32>
    %781 = vector.shape_cast %780 : vector<1x1x16x128xf32> to vector<16x128xf32>
    %782 = vector.broadcast %779 : vector<1x128xf32> to vector<16x128xf32>
    %783 = arith.mulf %782, %781 : vector<16x128xf32>
    %784 = arith.addf %778, %783 : vector<16x128xf32>
    %785 = vector.extract_strided_slice %755 {offsets = [5, 0], sizes = [1, 128], strides = [1, 1]} : vector<16x128xf32> to vector<1x128xf32>
    %c1_482 = arith.constant 1 : index
    %c5_483 = arith.constant 5 : index
    %c0_484 = arith.constant 0 : index
    %c0_485 = arith.constant 0 : index
    %786 = vector.load %arg4[%c1_482, %c5_483, %c0_484, %c0_485] : memref<2x9x16x128xf32, #tpu.memory_space<vmem>>, vector<1x1x16x128xf32>
    %787 = vector.shape_cast %786 : vector<1x1x16x128xf32> to vector<16x128xf32>
    %788 = vector.broadcast %785 : vector<1x128xf32> to vector<16x128xf32>
    %789 = arith.mulf %788, %787 : vector<16x128xf32>
    %790 = arith.addf %784, %789 : vector<16x128xf32>
    %791 = vector.extract_strided_slice %755 {offsets = [6, 0], sizes = [1, 128], strides = [1, 1]} : vector<16x128xf32> to vector<1x128xf32>
    %c1_486 = arith.constant 1 : index
    %c6_487 = arith.constant 6 : index
    %c0_488 = arith.constant 0 : index
    %c0_489 = arith.constant 0 : index
    %792 = vector.load %arg4[%c1_486, %c6_487, %c0_488, %c0_489] : memref<2x9x16x128xf32, #tpu.memory_space<vmem>>, vector<1x1x16x128xf32>
    %793 = vector.shape_cast %792 : vector<1x1x16x128xf32> to vector<16x128xf32>
    %794 = vector.broadcast %791 : vector<1x128xf32> to vector<16x128xf32>
    %795 = arith.mulf %794, %793 : vector<16x128xf32>
    %796 = arith.addf %790, %795 : vector<16x128xf32>
    %797 = vector.extract_strided_slice %755 {offsets = [7, 0], sizes = [1, 128], strides = [1, 1]} : vector<16x128xf32> to vector<1x128xf32>
    %c1_490 = arith.constant 1 : index
    %c7_491 = arith.constant 7 : index
    %c0_492 = arith.constant 0 : index
    %c0_493 = arith.constant 0 : index
    %798 = vector.load %arg4[%c1_490, %c7_491, %c0_492, %c0_493] : memref<2x9x16x128xf32, #tpu.memory_space<vmem>>, vector<1x1x16x128xf32>
    %799 = vector.shape_cast %798 : vector<1x1x16x128xf32> to vector<16x128xf32>
    %800 = vector.broadcast %797 : vector<1x128xf32> to vector<16x128xf32>
    %801 = arith.mulf %800, %799 : vector<16x128xf32>
    %802 = arith.addf %796, %801 : vector<16x128xf32>
    %803 = vector.extract_strided_slice %755 {offsets = [8, 0], sizes = [1, 128], strides = [1, 1]} : vector<16x128xf32> to vector<1x128xf32>
    %c1_494 = arith.constant 1 : index
    %c8_495 = arith.constant 8 : index
    %c0_496 = arith.constant 0 : index
    %c0_497 = arith.constant 0 : index
    %804 = vector.load %arg4[%c1_494, %c8_495, %c0_496, %c0_497] : memref<2x9x16x128xf32, #tpu.memory_space<vmem>>, vector<1x1x16x128xf32>
    %805 = vector.shape_cast %804 : vector<1x1x16x128xf32> to vector<16x128xf32>
    %806 = vector.broadcast %803 : vector<1x128xf32> to vector<16x128xf32>
    %807 = arith.mulf %806, %805 : vector<16x128xf32>
    %808 = arith.addf %802, %807 : vector<16x128xf32>
    %c1_498 = arith.constant 1 : index
    %c2_499 = arith.constant 2 : index
    %c0_500 = arith.constant 0 : index
    %c0_501 = arith.constant 0 : index
    %809 = vector.load %arg5[%c1_498, %c2_499, %c0_500, %c0_501] : memref<2x9x16x128xf32, #tpu.memory_space<vmem>>, vector<1x1x16x128xf32>
    %810 = vector.shape_cast %809 : vector<1x1x16x128xf32> to vector<16x128xf32>
    %811 = vector.shape_cast %808 : vector<16x128xf32> to vector<1x1x16x128xf32>
    tpu.vector_store %arg5[%c1_498, %c2_499, %c0_500, %c0_501], %811 {strides = array<i32>} : memref<2x9x16x128xf32, #tpu.memory_space<vmem>>, vector<1x1x16x128xf32>,
    %812 = vector.extract_strided_slice %7 {offsets = [192, 0], sizes = [16, 128], strides = [1, 1]} : vector<288x128xf32> to vector<16x128xf32>
    %cst_502 = arith.constant dense<0xFF800000> : vector<128xf32>
    %813 = vector.multi_reduction <maximumf>, %812, %cst_502 [0] : vector<16x128xf32> to vector<128xf32>
    %814 = vector.shape_cast %813 : vector<128xf32> to vector<1x128xf32>
    %815 = vector.broadcast %814 : vector<1x128xf32> to vector<16x128xf32>
    %816 = arith.subf %812, %815 : vector<16x128xf32>
    %817 = math.exp %816 : vector<16x128xf32>
    %cst_503 = arith.constant dense<0.000000e+00> : vector<128xf32>
    %818 = vector.multi_reduction <add>, %817, %cst_503 [0] : vector<16x128xf32> to vector<128xf32>
    %819 = vector.shape_cast %818 : vector<128xf32> to vector<1x128xf32>
    %820 = tpu.reciprocal %819 {approx = true} : vector<1x128xf32> -> vector<1x128xf32>
    %821 = vector.broadcast %820 : vector<1x128xf32> to vector<16x128xf32>
    %822 = arith.mulf %817, %821 : vector<16x128xf32>
    %823 = vector.extract_strided_slice %822 {offsets = [0, 0], sizes = [1, 128], strides = [1, 1]} : vector<16x128xf32> to vector<1x128xf32>
    %c1_504 = arith.constant 1 : index
    %c0_505 = arith.constant 0 : index
    %c0_506 = arith.constant 0 : index
    %c0_507 = arith.constant 0 : index
    %824 = vector.load %arg4[%c1_504, %c0_505, %c0_506, %c0_507] : memref<2x9x16x128xf32, #tpu.memory_space<vmem>>, vector<1x1x16x128xf32>
    %825 = vector.shape_cast %824 : vector<1x1x16x128xf32> to vector<16x128xf32>
    %826 = vector.broadcast %823 : vector<1x128xf32> to vector<16x128xf32>
    %827 = arith.mulf %826, %825 : vector<16x128xf32>
    %828 = vector.extract_strided_slice %822 {offsets = [1, 0], sizes = [1, 128], strides = [1, 1]} : vector<16x128xf32> to vector<1x128xf32>
    %c1_508 = arith.constant 1 : index
    %c1_509 = arith.constant 1 : index
    %c0_510 = arith.constant 0 : index
    %c0_511 = arith.constant 0 : index
    %829 = vector.load %arg4[%c1_508, %c1_509, %c0_510, %c0_511] : memref<2x9x16x128xf32, #tpu.memory_space<vmem>>, vector<1x1x16x128xf32>
    %830 = vector.shape_cast %829 : vector<1x1x16x128xf32> to vector<16x128xf32>
    %831 = vector.broadcast %828 : vector<1x128xf32> to vector<16x128xf32>
    %832 = arith.mulf %831, %830 : vector<16x128xf32>
    %833 = arith.addf %827, %832 : vector<16x128xf32>
    %834 = vector.extract_strided_slice %822 {offsets = [2, 0], sizes = [1, 128], strides = [1, 1]} : vector<16x128xf32> to vector<1x128xf32>
    %c1_512 = arith.constant 1 : index
    %c2_513 = arith.constant 2 : index
    %c0_514 = arith.constant 0 : index
    %c0_515 = arith.constant 0 : index
    %835 = vector.load %arg4[%c1_512, %c2_513, %c0_514, %c0_515] : memref<2x9x16x128xf32, #tpu.memory_space<vmem>>, vector<1x1x16x128xf32>
    %836 = vector.shape_cast %835 : vector<1x1x16x128xf32> to vector<16x128xf32>
    %837 = vector.broadcast %834 : vector<1x128xf32> to vector<16x128xf32>
    %838 = arith.mulf %837, %836 : vector<16x128xf32>
    %839 = arith.addf %833, %838 : vector<16x128xf32>
    %840 = vector.extract_strided_slice %822 {offsets = [3, 0], sizes = [1, 128], strides = [1, 1]} : vector<16x128xf32> to vector<1x128xf32>
    %c1_516 = arith.constant 1 : index
    %c3_517 = arith.constant 3 : index
    %c0_518 = arith.constant 0 : index
    %c0_519 = arith.constant 0 : index
    %841 = vector.load %arg4[%c1_516, %c3_517, %c0_518, %c0_519] : memref<2x9x16x128xf32, #tpu.memory_space<vmem>>, vector<1x1x16x128xf32>
    %842 = vector.shape_cast %841 : vector<1x1x16x128xf32> to vector<16x128xf32>
    %843 = vector.broadcast %840 : vector<1x128xf32> to vector<16x128xf32>
    %844 = arith.mulf %843, %842 : vector<16x128xf32>
    %845 = arith.addf %839, %844 : vector<16x128xf32>
    %846 = vector.extract_strided_slice %822 {offsets = [4, 0], sizes = [1, 128], strides = [1, 1]} : vector<16x128xf32> to vector<1x128xf32>
    %c1_520 = arith.constant 1 : index
    %c4_521 = arith.constant 4 : index
    %c0_522 = arith.constant 0 : index
    %c0_523 = arith.constant 0 : index
    %847 = vector.load %arg4[%c1_520, %c4_521, %c0_522, %c0_523] : memref<2x9x16x128xf32, #tpu.memory_space<vmem>>, vector<1x1x16x128xf32>
    %848 = vector.shape_cast %847 : vector<1x1x16x128xf32> to vector<16x128xf32>
    %849 = vector.broadcast %846 : vector<1x128xf32> to vector<16x128xf32>
    %850 = arith.mulf %849, %848 : vector<16x128xf32>
    %851 = arith.addf %845, %850 : vector<16x128xf32>
    %852 = vector.extract_strided_slice %822 {offsets = [5, 0], sizes = [1, 128], strides = [1, 1]} : vector<16x128xf32> to vector<1x128xf32>
    %c1_524 = arith.constant 1 : index
    %c5_525 = arith.constant 5 : index
    %c0_526 = arith.constant 0 : index
    %c0_527 = arith.constant 0 : index
    %853 = vector.load %arg4[%c1_524, %c5_525, %c0_526, %c0_527] : memref<2x9x16x128xf32, #tpu.memory_space<vmem>>, vector<1x1x16x128xf32>
    %854 = vector.shape_cast %853 : vector<1x1x16x128xf32> to vector<16x128xf32>
    %855 = vector.broadcast %852 : vector<1x128xf32> to vector<16x128xf32>
    %856 = arith.mulf %855, %854 : vector<16x128xf32>
    %857 = arith.addf %851, %856 : vector<16x128xf32>
    %858 = vector.extract_strided_slice %822 {offsets = [6, 0], sizes = [1, 128], strides = [1, 1]} : vector<16x128xf32> to vector<1x128xf32>
    %c1_528 = arith.constant 1 : index
    %c6_529 = arith.constant 6 : index
    %c0_530 = arith.constant 0 : index
    %c0_531 = arith.constant 0 : index
    %859 = vector.load %arg4[%c1_528, %c6_529, %c0_530, %c0_531] : memref<2x9x16x128xf32, #tpu.memory_space<vmem>>, vector<1x1x16x128xf32>
    %860 = vector.shape_cast %859 : vector<1x1x16x128xf32> to vector<16x128xf32>
    %861 = vector.broadcast %858 : vector<1x128xf32> to vector<16x128xf32>
    %862 = arith.mulf %861, %860 : vector<16x128xf32>
    %863 = arith.addf %857, %862 : vector<16x128xf32>
    %864 = vector.extract_strided_slice %822 {offsets = [7, 0], sizes = [1, 128], strides = [1, 1]} : vector<16x128xf32> to vector<1x128xf32>
    %c1_532 = arith.constant 1 : index
    %c7_533 = arith.constant 7 : index
    %c0_534 = arith.constant 0 : index
    %c0_535 = arith.constant 0 : index
    %865 = vector.load %arg4[%c1_532, %c7_533, %c0_534, %c0_535] : memref<2x9x16x128xf32, #tpu.memory_space<vmem>>, vector<1x1x16x128xf32>
    %866 = vector.shape_cast %865 : vector<1x1x16x128xf32> to vector<16x128xf32>
    %867 = vector.broadcast %864 : vector<1x128xf32> to vector<16x128xf32>
    %868 = arith.mulf %867, %866 : vector<16x128xf32>
    %869 = arith.addf %863, %868 : vector<16x128xf32>
    %870 = vector.extract_strided_slice %822 {offsets = [8, 0], sizes = [1, 128], strides = [1, 1]} : vector<16x128xf32> to vector<1x128xf32>
    %c1_536 = arith.constant 1 : index
    %c8_537 = arith.constant 8 : index
    %c0_538 = arith.constant 0 : index
    %c0_539 = arith.constant 0 : index
    %871 = vector.load %arg4[%c1_536, %c8_537, %c0_538, %c0_539] : memref<2x9x16x128xf32, #tpu.memory_space<vmem>>, vector<1x1x16x128xf32>
    %872 = vector.shape_cast %871 : vector<1x1x16x128xf32> to vector<16x128xf32>
    %873 = vector.broadcast %870 : vector<1x128xf32> to vector<16x128xf32>
    %874 = arith.mulf %873, %872 : vector<16x128xf32>
    %875 = arith.addf %869, %874 : vector<16x128xf32>
    %c1_540 = arith.constant 1 : index
    %c3_541 = arith.constant 3 : index
    %c0_542 = arith.constant 0 : index
    %c0_543 = arith.constant 0 : index
    %876 = vector.load %arg5[%c1_540, %c3_541, %c0_542, %c0_543] : memref<2x9x16x128xf32, #tpu.memory_space<vmem>>, vector<1x1x16x128xf32>
    %877 = vector.shape_cast %876 : vector<1x1x16x128xf32> to vector<16x128xf32>
    %878 = vector.shape_cast %875 : vector<16x128xf32> to vector<1x1x16x128xf32>
    tpu.vector_store %arg5[%c1_540, %c3_541, %c0_542, %c0_543], %878 {strides = array<i32>} : memref<2x9x16x128xf32, #tpu.memory_space<vmem>>, vector<1x1x16x128xf32>,
    %879 = vector.extract_strided_slice %7 {offsets = [208, 0], sizes = [16, 128], strides = [1, 1]} : vector<288x128xf32> to vector<16x128xf32>
    %cst_544 = arith.constant dense<0xFF800000> : vector<128xf32>
    %880 = vector.multi_reduction <maximumf>, %879, %cst_544 [0] : vector<16x128xf32> to vector<128xf32>
    %881 = vector.shape_cast %880 : vector<128xf32> to vector<1x128xf32>
    %882 = vector.broadcast %881 : vector<1x128xf32> to vector<16x128xf32>
    %883 = arith.subf %879, %882 : vector<16x128xf32>
    %884 = math.exp %883 : vector<16x128xf32>
    %cst_545 = arith.constant dense<0.000000e+00> : vector<128xf32>
    %885 = vector.multi_reduction <add>, %884, %cst_545 [0] : vector<16x128xf32> to vector<128xf32>
    %886 = vector.shape_cast %885 : vector<128xf32> to vector<1x128xf32>
    %887 = tpu.reciprocal %886 {approx = true} : vector<1x128xf32> -> vector<1x128xf32>
    %888 = vector.broadcast %887 : vector<1x128xf32> to vector<16x128xf32>
    %889 = arith.mulf %884, %888 : vector<16x128xf32>
    %890 = vector.extract_strided_slice %889 {offsets = [0, 0], sizes = [1, 128], strides = [1, 1]} : vector<16x128xf32> to vector<1x128xf32>
    %c1_546 = arith.constant 1 : index
    %c0_547 = arith.constant 0 : index
    %c0_548 = arith.constant 0 : index
    %c0_549 = arith.constant 0 : index
    %891 = vector.load %arg4[%c1_546, %c0_547, %c0_548, %c0_549] : memref<2x9x16x128xf32, #tpu.memory_space<vmem>>, vector<1x1x16x128xf32>
    %892 = vector.shape_cast %891 : vector<1x1x16x128xf32> to vector<16x128xf32>
    %893 = vector.broadcast %890 : vector<1x128xf32> to vector<16x128xf32>
    %894 = arith.mulf %893, %892 : vector<16x128xf32>
    %895 = vector.extract_strided_slice %889 {offsets = [1, 0], sizes = [1, 128], strides = [1, 1]} : vector<16x128xf32> to vector<1x128xf32>
    %c1_550 = arith.constant 1 : index
    %c1_551 = arith.constant 1 : index
    %c0_552 = arith.constant 0 : index
    %c0_553 = arith.constant 0 : index
    %896 = vector.load %arg4[%c1_550, %c1_551, %c0_552, %c0_553] : memref<2x9x16x128xf32, #tpu.memory_space<vmem>>, vector<1x1x16x128xf32>
    %897 = vector.shape_cast %896 : vector<1x1x16x128xf32> to vector<16x128xf32>
    %898 = vector.broadcast %895 : vector<1x128xf32> to vector<16x128xf32>
    %899 = arith.mulf %898, %897 : vector<16x128xf32>
    %900 = arith.addf %894, %899 : vector<16x128xf32>
    %901 = vector.extract_strided_slice %889 {offsets = [2, 0], sizes = [1, 128], strides = [1, 1]} : vector<16x128xf32> to vector<1x128xf32>
    %c1_554 = arith.constant 1 : index
    %c2_555 = arith.constant 2 : index
    %c0_556 = arith.constant 0 : index
    %c0_557 = arith.constant 0 : index
    %902 = vector.load %arg4[%c1_554, %c2_555, %c0_556, %c0_557] : memref<2x9x16x128xf32, #tpu.memory_space<vmem>>, vector<1x1x16x128xf32>
    %903 = vector.shape_cast %902 : vector<1x1x16x128xf32> to vector<16x128xf32>
    %904 = vector.broadcast %901 : vector<1x128xf32> to vector<16x128xf32>
    %905 = arith.mulf %904, %903 : vector<16x128xf32>
    %906 = arith.addf %900, %905 : vector<16x128xf32>
    %907 = vector.extract_strided_slice %889 {offsets = [3, 0], sizes = [1, 128], strides = [1, 1]} : vector<16x128xf32> to vector<1x128xf32>
    %c1_558 = arith.constant 1 : index
    %c3_559 = arith.constant 3 : index
    %c0_560 = arith.constant 0 : index
    %c0_561 = arith.constant 0 : index
    %908 = vector.load %arg4[%c1_558, %c3_559, %c0_560, %c0_561] : memref<2x9x16x128xf32, #tpu.memory_space<vmem>>, vector<1x1x16x128xf32>
    %909 = vector.shape_cast %908 : vector<1x1x16x128xf32> to vector<16x128xf32>
    %910 = vector.broadcast %907 : vector<1x128xf32> to vector<16x128xf32>
    %911 = arith.mulf %910, %909 : vector<16x128xf32>
    %912 = arith.addf %906, %911 : vector<16x128xf32>
    %913 = vector.extract_strided_slice %889 {offsets = [4, 0], sizes = [1, 128], strides = [1, 1]} : vector<16x128xf32> to vector<1x128xf32>
    %c1_562 = arith.constant 1 : index
    %c4_563 = arith.constant 4 : index
    %c0_564 = arith.constant 0 : index
    %c0_565 = arith.constant 0 : index
    %914 = vector.load %arg4[%c1_562, %c4_563, %c0_564, %c0_565] : memref<2x9x16x128xf32, #tpu.memory_space<vmem>>, vector<1x1x16x128xf32>
    %915 = vector.shape_cast %914 : vector<1x1x16x128xf32> to vector<16x128xf32>
    %916 = vector.broadcast %913 : vector<1x128xf32> to vector<16x128xf32>
    %917 = arith.mulf %916, %915 : vector<16x128xf32>
    %918 = arith.addf %912, %917 : vector<16x128xf32>
    %919 = vector.extract_strided_slice %889 {offsets = [5, 0], sizes = [1, 128], strides = [1, 1]} : vector<16x128xf32> to vector<1x128xf32>
    %c1_566 = arith.constant 1 : index
    %c5_567 = arith.constant 5 : index
    %c0_568 = arith.constant 0 : index
    %c0_569 = arith.constant 0 : index
    %920 = vector.load %arg4[%c1_566, %c5_567, %c0_568, %c0_569] : memref<2x9x16x128xf32, #tpu.memory_space<vmem>>, vector<1x1x16x128xf32>
    %921 = vector.shape_cast %920 : vector<1x1x16x128xf32> to vector<16x128xf32>
    %922 = vector.broadcast %919 : vector<1x128xf32> to vector<16x128xf32>
    %923 = arith.mulf %922, %921 : vector<16x128xf32>
    %924 = arith.addf %918, %923 : vector<16x128xf32>
    %925 = vector.extract_strided_slice %889 {offsets = [6, 0], sizes = [1, 128], strides = [1, 1]} : vector<16x128xf32> to vector<1x128xf32>
    %c1_570 = arith.constant 1 : index
    %c6_571 = arith.constant 6 : index
    %c0_572 = arith.constant 0 : index
    %c0_573 = arith.constant 0 : index
    %926 = vector.load %arg4[%c1_570, %c6_571, %c0_572, %c0_573] : memref<2x9x16x128xf32, #tpu.memory_space<vmem>>, vector<1x1x16x128xf32>
    %927 = vector.shape_cast %926 : vector<1x1x16x128xf32> to vector<16x128xf32>
    %928 = vector.broadcast %925 : vector<1x128xf32> to vector<16x128xf32>
    %929 = arith.mulf %928, %927 : vector<16x128xf32>
    %930 = arith.addf %924, %929 : vector<16x128xf32>
    %931 = vector.extract_strided_slice %889 {offsets = [7, 0], sizes = [1, 128], strides = [1, 1]} : vector<16x128xf32> to vector<1x128xf32>
    %c1_574 = arith.constant 1 : index
    %c7_575 = arith.constant 7 : index
    %c0_576 = arith.constant 0 : index
    %c0_577 = arith.constant 0 : index
    %932 = vector.load %arg4[%c1_574, %c7_575, %c0_576, %c0_577] : memref<2x9x16x128xf32, #tpu.memory_space<vmem>>, vector<1x1x16x128xf32>
    %933 = vector.shape_cast %932 : vector<1x1x16x128xf32> to vector<16x128xf32>
    %934 = vector.broadcast %931 : vector<1x128xf32> to vector<16x128xf32>
    %935 = arith.mulf %934, %933 : vector<16x128xf32>
    %936 = arith.addf %930, %935 : vector<16x128xf32>
    %937 = vector.extract_strided_slice %889 {offsets = [8, 0], sizes = [1, 128], strides = [1, 1]} : vector<16x128xf32> to vector<1x128xf32>
    %c1_578 = arith.constant 1 : index
    %c8_579 = arith.constant 8 : index
    %c0_580 = arith.constant 0 : index
    %c0_581 = arith.constant 0 : index
    %938 = vector.load %arg4[%c1_578, %c8_579, %c0_580, %c0_581] : memref<2x9x16x128xf32, #tpu.memory_space<vmem>>, vector<1x1x16x128xf32>
    %939 = vector.shape_cast %938 : vector<1x1x16x128xf32> to vector<16x128xf32>
    %940 = vector.broadcast %937 : vector<1x128xf32> to vector<16x128xf32>
    %941 = arith.mulf %940, %939 : vector<16x128xf32>
    %942 = arith.addf %936, %941 : vector<16x128xf32>
    %c1_582 = arith.constant 1 : index
    %c4_583 = arith.constant 4 : index
    %c0_584 = arith.constant 0 : index
    %c0_585 = arith.constant 0 : index
    %943 = vector.load %arg5[%c1_582, %c4_583, %c0_584, %c0_585] : memref<2x9x16x128xf32, #tpu.memory_space<vmem>>, vector<1x1x16x128xf32>
    %944 = vector.shape_cast %943 : vector<1x1x16x128xf32> to vector<16x128xf32>
    %945 = vector.shape_cast %942 : vector<16x128xf32> to vector<1x1x16x128xf32>
    tpu.vector_store %arg5[%c1_582, %c4_583, %c0_584, %c0_585], %945 {strides = array<i32>} : memref<2x9x16x128xf32, #tpu.memory_space<vmem>>, vector<1x1x16x128xf32>,
    %946 = vector.extract_strided_slice %7 {offsets = [224, 0], sizes = [16, 128], strides = [1, 1]} : vector<288x128xf32> to vector<16x128xf32>
    %cst_586 = arith.constant dense<0xFF800000> : vector<128xf32>
    %947 = vector.multi_reduction <maximumf>, %946, %cst_586 [0] : vector<16x128xf32> to vector<128xf32>
    %948 = vector.shape_cast %947 : vector<128xf32> to vector<1x128xf32>
    %949 = vector.broadcast %948 : vector<1x128xf32> to vector<16x128xf32>
    %950 = arith.subf %946, %949 : vector<16x128xf32>
    %951 = math.exp %950 : vector<16x128xf32>
    %cst_587 = arith.constant dense<0.000000e+00> : vector<128xf32>
    %952 = vector.multi_reduction <add>, %951, %cst_587 [0] : vector<16x128xf32> to vector<128xf32>
    %953 = vector.shape_cast %952 : vector<128xf32> to vector<1x128xf32>
    %954 = tpu.reciprocal %953 {approx = true} : vector<1x128xf32> -> vector<1x128xf32>
    %955 = vector.broadcast %954 : vector<1x128xf32> to vector<16x128xf32>
    %956 = arith.mulf %951, %955 : vector<16x128xf32>
    %957 = vector.extract_strided_slice %956 {offsets = [0, 0], sizes = [1, 128], strides = [1, 1]} : vector<16x128xf32> to vector<1x128xf32>
    %c1_588 = arith.constant 1 : index
    %c0_589 = arith.constant 0 : index
    %c0_590 = arith.constant 0 : index
    %c0_591 = arith.constant 0 : index
    %958 = vector.load %arg4[%c1_588, %c0_589, %c0_590, %c0_591] : memref<2x9x16x128xf32, #tpu.memory_space<vmem>>, vector<1x1x16x128xf32>
    %959 = vector.shape_cast %958 : vector<1x1x16x128xf32> to vector<16x128xf32>
    %960 = vector.broadcast %957 : vector<1x128xf32> to vector<16x128xf32>
    %961 = arith.mulf %960, %959 : vector<16x128xf32>
    %962 = vector.extract_strided_slice %956 {offsets = [1, 0], sizes = [1, 128], strides = [1, 1]} : vector<16x128xf32> to vector<1x128xf32>
    %c1_592 = arith.constant 1 : index
    %c1_593 = arith.constant 1 : index
    %c0_594 = arith.constant 0 : index
    %c0_595 = arith.constant 0 : index
    %963 = vector.load %arg4[%c1_592, %c1_593, %c0_594, %c0_595] : memref<2x9x16x128xf32, #tpu.memory_space<vmem>>, vector<1x1x16x128xf32>
    %964 = vector.shape_cast %963 : vector<1x1x16x128xf32> to vector<16x128xf32>
    %965 = vector.broadcast %962 : vector<1x128xf32> to vector<16x128xf32>
    %966 = arith.mulf %965, %964 : vector<16x128xf32>
    %967 = arith.addf %961, %966 : vector<16x128xf32>
    %968 = vector.extract_strided_slice %956 {offsets = [2, 0], sizes = [1, 128], strides = [1, 1]} : vector<16x128xf32> to vector<1x128xf32>
    %c1_596 = arith.constant 1 : index
    %c2_597 = arith.constant 2 : index
    %c0_598 = arith.constant 0 : index
    %c0_599 = arith.constant 0 : index
    %969 = vector.load %arg4[%c1_596, %c2_597, %c0_598, %c0_599] : memref<2x9x16x128xf32, #tpu.memory_space<vmem>>, vector<1x1x16x128xf32>
    %970 = vector.shape_cast %969 : vector<1x1x16x128xf32> to vector<16x128xf32>
    %971 = vector.broadcast %968 : vector<1x128xf32> to vector<16x128xf32>
    %972 = arith.mulf %971, %970 : vector<16x128xf32>
    %973 = arith.addf %967, %972 : vector<16x128xf32>
    %974 = vector.extract_strided_slice %956 {offsets = [3, 0], sizes = [1, 128], strides = [1, 1]} : vector<16x128xf32> to vector<1x128xf32>
    %c1_600 = arith.constant 1 : index
    %c3_601 = arith.constant 3 : index
    %c0_602 = arith.constant 0 : index
    %c0_603 = arith.constant 0 : index
    %975 = vector.load %arg4[%c1_600, %c3_601, %c0_602, %c0_603] : memref<2x9x16x128xf32, #tpu.memory_space<vmem>>, vector<1x1x16x128xf32>
    %976 = vector.shape_cast %975 : vector<1x1x16x128xf32> to vector<16x128xf32>
    %977 = vector.broadcast %974 : vector<1x128xf32> to vector<16x128xf32>
    %978 = arith.mulf %977, %976 : vector<16x128xf32>
    %979 = arith.addf %973, %978 : vector<16x128xf32>
    %980 = vector.extract_strided_slice %956 {offsets = [4, 0], sizes = [1, 128], strides = [1, 1]} : vector<16x128xf32> to vector<1x128xf32>
    %c1_604 = arith.constant 1 : index
    %c4_605 = arith.constant 4 : index
    %c0_606 = arith.constant 0 : index
    %c0_607 = arith.constant 0 : index
    %981 = vector.load %arg4[%c1_604, %c4_605, %c0_606, %c0_607] : memref<2x9x16x128xf32, #tpu.memory_space<vmem>>, vector<1x1x16x128xf32>
    %982 = vector.shape_cast %981 : vector<1x1x16x128xf32> to vector<16x128xf32>
    %983 = vector.broadcast %980 : vector<1x128xf32> to vector<16x128xf32>
    %984 = arith.mulf %983, %982 : vector<16x128xf32>
    %985 = arith.addf %979, %984 : vector<16x128xf32>
    %986 = vector.extract_strided_slice %956 {offsets = [5, 0], sizes = [1, 128], strides = [1, 1]} : vector<16x128xf32> to vector<1x128xf32>
    %c1_608 = arith.constant 1 : index
    %c5_609 = arith.constant 5 : index
    %c0_610 = arith.constant 0 : index
    %c0_611 = arith.constant 0 : index
    %987 = vector.load %arg4[%c1_608, %c5_609, %c0_610, %c0_611] : memref<2x9x16x128xf32, #tpu.memory_space<vmem>>, vector<1x1x16x128xf32>
    %988 = vector.shape_cast %987 : vector<1x1x16x128xf32> to vector<16x128xf32>
    %989 = vector.broadcast %986 : vector<1x128xf32> to vector<16x128xf32>
    %990 = arith.mulf %989, %988 : vector<16x128xf32>
    %991 = arith.addf %985, %990 : vector<16x128xf32>
    %992 = vector.extract_strided_slice %956 {offsets = [6, 0], sizes = [1, 128], strides = [1, 1]} : vector<16x128xf32> to vector<1x128xf32>
    %c1_612 = arith.constant 1 : index
    %c6_613 = arith.constant 6 : index
    %c0_614 = arith.constant 0 : index
    %c0_615 = arith.constant 0 : index
    %993 = vector.load %arg4[%c1_612, %c6_613, %c0_614, %c0_615] : memref<2x9x16x128xf32, #tpu.memory_space<vmem>>, vector<1x1x16x128xf32>
    %994 = vector.shape_cast %993 : vector<1x1x16x128xf32> to vector<16x128xf32>
    %995 = vector.broadcast %992 : vector<1x128xf32> to vector<16x128xf32>
    %996 = arith.mulf %995, %994 : vector<16x128xf32>
    %997 = arith.addf %991, %996 : vector<16x128xf32>
    %998 = vector.extract_strided_slice %956 {offsets = [7, 0], sizes = [1, 128], strides = [1, 1]} : vector<16x128xf32> to vector<1x128xf32>
    %c1_616 = arith.constant 1 : index
    %c7_617 = arith.constant 7 : index
    %c0_618 = arith.constant 0 : index
    %c0_619 = arith.constant 0 : index
    %999 = vector.load %arg4[%c1_616, %c7_617, %c0_618, %c0_619] : memref<2x9x16x128xf32, #tpu.memory_space<vmem>>, vector<1x1x16x128xf32>
    %1000 = vector.shape_cast %999 : vector<1x1x16x128xf32> to vector<16x128xf32>
    %1001 = vector.broadcast %998 : vector<1x128xf32> to vector<16x128xf32>
    %1002 = arith.mulf %1001, %1000 : vector<16x128xf32>
    %1003 = arith.addf %997, %1002 : vector<16x128xf32>
    %1004 = vector.extract_strided_slice %956 {offsets = [8, 0], sizes = [1, 128], strides = [1, 1]} : vector<16x128xf32> to vector<1x128xf32>
    %c1_620 = arith.constant 1 : index
    %c8_621 = arith.constant 8 : index
    %c0_622 = arith.constant 0 : index
    %c0_623 = arith.constant 0 : index
    %1005 = vector.load %arg4[%c1_620, %c8_621, %c0_622, %c0_623] : memref<2x9x16x128xf32, #tpu.memory_space<vmem>>, vector<1x1x16x128xf32>
    %1006 = vector.shape_cast %1005 : vector<1x1x16x128xf32> to vector<16x128xf32>
    %1007 = vector.broadcast %1004 : vector<1x128xf32> to vector<16x128xf32>
    %1008 = arith.mulf %1007, %1006 : vector<16x128xf32>
    %1009 = arith.addf %1003, %1008 : vector<16x128xf32>
    %c1_624 = arith.constant 1 : index
    %c5_625 = arith.constant 5 : index
    %c0_626 = arith.constant 0 : index
    %c0_627 = arith.constant 0 : index
    %1010 = vector.load %arg5[%c1_624, %c5_625, %c0_626, %c0_627] : memref<2x9x16x128xf32, #tpu.memory_space<vmem>>, vector<1x1x16x128xf32>
    %1011 = vector.shape_cast %1010 : vector<1x1x16x128xf32> to vector<16x128xf32>
    %1012 = vector.shape_cast %1009 : vector<16x128xf32> to vector<1x1x16x128xf32>
    tpu.vector_store %arg5[%c1_624, %c5_625, %c0_626, %c0_627], %1012 {strides = array<i32>} : memref<2x9x16x128xf32, #tpu.memory_space<vmem>>, vector<1x1x16x128xf32>,
    %1013 = vector.extract_strided_slice %7 {offsets = [240, 0], sizes = [16, 128], strides = [1, 1]} : vector<288x128xf32> to vector<16x128xf32>
    %cst_628 = arith.constant dense<0xFF800000> : vector<128xf32>
    %1014 = vector.multi_reduction <maximumf>, %1013, %cst_628 [0] : vector<16x128xf32> to vector<128xf32>
    %1015 = vector.shape_cast %1014 : vector<128xf32> to vector<1x128xf32>
    %1016 = vector.broadcast %1015 : vector<1x128xf32> to vector<16x128xf32>
    %1017 = arith.subf %1013, %1016 : vector<16x128xf32>
    %1018 = math.exp %1017 : vector<16x128xf32>
    %cst_629 = arith.constant dense<0.000000e+00> : vector<128xf32>
    %1019 = vector.multi_reduction <add>, %1018, %cst_629 [0] : vector<16x128xf32> to vector<128xf32>
    %1020 = vector.shape_cast %1019 : vector<128xf32> to vector<1x128xf32>
    %1021 = tpu.reciprocal %1020 {approx = true} : vector<1x128xf32> -> vector<1x128xf32>
    %1022 = vector.broadcast %1021 : vector<1x128xf32> to vector<16x128xf32>
    %1023 = arith.mulf %1018, %1022 : vector<16x128xf32>
    %1024 = vector.extract_strided_slice %1023 {offsets = [0, 0], sizes = [1, 128], strides = [1, 1]} : vector<16x128xf32> to vector<1x128xf32>
    %c1_630 = arith.constant 1 : index
    %c0_631 = arith.constant 0 : index
    %c0_632 = arith.constant 0 : index
    %c0_633 = arith.constant 0 : index
    %1025 = vector.load %arg4[%c1_630, %c0_631, %c0_632, %c0_633] : memref<2x9x16x128xf32, #tpu.memory_space<vmem>>, vector<1x1x16x128xf32>
    %1026 = vector.shape_cast %1025 : vector<1x1x16x128xf32> to vector<16x128xf32>
    %1027 = vector.broadcast %1024 : vector<1x128xf32> to vector<16x128xf32>
    %1028 = arith.mulf %1027, %1026 : vector<16x128xf32>
    %1029 = vector.extract_strided_slice %1023 {offsets = [1, 0], sizes = [1, 128], strides = [1, 1]} : vector<16x128xf32> to vector<1x128xf32>
    %c1_634 = arith.constant 1 : index
    %c1_635 = arith.constant 1 : index
    %c0_636 = arith.constant 0 : index
    %c0_637 = arith.constant 0 : index
    %1030 = vector.load %arg4[%c1_634, %c1_635, %c0_636, %c0_637] : memref<2x9x16x128xf32, #tpu.memory_space<vmem>>, vector<1x1x16x128xf32>
    %1031 = vector.shape_cast %1030 : vector<1x1x16x128xf32> to vector<16x128xf32>
    %1032 = vector.broadcast %1029 : vector<1x128xf32> to vector<16x128xf32>
    %1033 = arith.mulf %1032, %1031 : vector<16x128xf32>
    %1034 = arith.addf %1028, %1033 : vector<16x128xf32>
    %1035 = vector.extract_strided_slice %1023 {offsets = [2, 0], sizes = [1, 128], strides = [1, 1]} : vector<16x128xf32> to vector<1x128xf32>
    %c1_638 = arith.constant 1 : index
    %c2_639 = arith.constant 2 : index
    %c0_640 = arith.constant 0 : index
    %c0_641 = arith.constant 0 : index
    %1036 = vector.load %arg4[%c1_638, %c2_639, %c0_640, %c0_641] : memref<2x9x16x128xf32, #tpu.memory_space<vmem>>, vector<1x1x16x128xf32>
    %1037 = vector.shape_cast %1036 : vector<1x1x16x128xf32> to vector<16x128xf32>
    %1038 = vector.broadcast %1035 : vector<1x128xf32> to vector<16x128xf32>
    %1039 = arith.mulf %1038, %1037 : vector<16x128xf32>
    %1040 = arith.addf %1034, %1039 : vector<16x128xf32>
    %1041 = vector.extract_strided_slice %1023 {offsets = [3, 0], sizes = [1, 128], strides = [1, 1]} : vector<16x128xf32> to vector<1x128xf32>
    %c1_642 = arith.constant 1 : index
    %c3_643 = arith.constant 3 : index
    %c0_644 = arith.constant 0 : index
    %c0_645 = arith.constant 0 : index
    %1042 = vector.load %arg4[%c1_642, %c3_643, %c0_644, %c0_645] : memref<2x9x16x128xf32, #tpu.memory_space<vmem>>, vector<1x1x16x128xf32>
    %1043 = vector.shape_cast %1042 : vector<1x1x16x128xf32> to vector<16x128xf32>
    %1044 = vector.broadcast %1041 : vector<1x128xf32> to vector<16x128xf32>
    %1045 = arith.mulf %1044, %1043 : vector<16x128xf32>
    %1046 = arith.addf %1040, %1045 : vector<16x128xf32>
    %1047 = vector.extract_strided_slice %1023 {offsets = [4, 0], sizes = [1, 128], strides = [1, 1]} : vector<16x128xf32> to vector<1x128xf32>
    %c1_646 = arith.constant 1 : index
    %c4_647 = arith.constant 4 : index
    %c0_648 = arith.constant 0 : index
    %c0_649 = arith.constant 0 : index
    %1048 = vector.load %arg4[%c1_646, %c4_647, %c0_648, %c0_649] : memref<2x9x16x128xf32, #tpu.memory_space<vmem>>, vector<1x1x16x128xf32>
    %1049 = vector.shape_cast %1048 : vector<1x1x16x128xf32> to vector<16x128xf32>
    %1050 = vector.broadcast %1047 : vector<1x128xf32> to vector<16x128xf32>
    %1051 = arith.mulf %1050, %1049 : vector<16x128xf32>
    %1052 = arith.addf %1046, %1051 : vector<16x128xf32>
    %1053 = vector.extract_strided_slice %1023 {offsets = [5, 0], sizes = [1, 128], strides = [1, 1]} : vector<16x128xf32> to vector<1x128xf32>
    %c1_650 = arith.constant 1 : index
    %c5_651 = arith.constant 5 : index
    %c0_652 = arith.constant 0 : index
    %c0_653 = arith.constant 0 : index
    %1054 = vector.load %arg4[%c1_650, %c5_651, %c0_652, %c0_653] : memref<2x9x16x128xf32, #tpu.memory_space<vmem>>, vector<1x1x16x128xf32>
    %1055 = vector.shape_cast %1054 : vector<1x1x16x128xf32> to vector<16x128xf32>
    %1056 = vector.broadcast %1053 : vector<1x128xf32> to vector<16x128xf32>
    %1057 = arith.mulf %1056, %1055 : vector<16x128xf32>
    %1058 = arith.addf %1052, %1057 : vector<16x128xf32>
    %1059 = vector.extract_strided_slice %1023 {offsets = [6, 0], sizes = [1, 128], strides = [1, 1]} : vector<16x128xf32> to vector<1x128xf32>
    %c1_654 = arith.constant 1 : index
    %c6_655 = arith.constant 6 : index
    %c0_656 = arith.constant 0 : index
    %c0_657 = arith.constant 0 : index
    %1060 = vector.load %arg4[%c1_654, %c6_655, %c0_656, %c0_657] : memref<2x9x16x128xf32, #tpu.memory_space<vmem>>, vector<1x1x16x128xf32>
    %1061 = vector.shape_cast %1060 : vector<1x1x16x128xf32> to vector<16x128xf32>
    %1062 = vector.broadcast %1059 : vector<1x128xf32> to vector<16x128xf32>
    %1063 = arith.mulf %1062, %1061 : vector<16x128xf32>
    %1064 = arith.addf %1058, %1063 : vector<16x128xf32>
    %1065 = vector.extract_strided_slice %1023 {offsets = [7, 0], sizes = [1, 128], strides = [1, 1]} : vector<16x128xf32> to vector<1x128xf32>
    %c1_658 = arith.constant 1 : index
    %c7_659 = arith.constant 7 : index
    %c0_660 = arith.constant 0 : index
    %c0_661 = arith.constant 0 : index
    %1066 = vector.load %arg4[%c1_658, %c7_659, %c0_660, %c0_661] : memref<2x9x16x128xf32, #tpu.memory_space<vmem>>, vector<1x1x16x128xf32>
    %1067 = vector.shape_cast %1066 : vector<1x1x16x128xf32> to vector<16x128xf32>
    %1068 = vector.broadcast %1065 : vector<1x128xf32> to vector<16x128xf32>
    %1069 = arith.mulf %1068, %1067 : vector<16x128xf32>
    %1070 = arith.addf %1064, %1069 : vector<16x128xf32>
    %1071 = vector.extract_strided_slice %1023 {offsets = [8, 0], sizes = [1, 128], strides = [1, 1]} : vector<16x128xf32> to vector<1x128xf32>
    %c1_662 = arith.constant 1 : index
    %c8_663 = arith.constant 8 : index
    %c0_664 = arith.constant 0 : index
    %c0_665 = arith.constant 0 : index
    %1072 = vector.load %arg4[%c1_662, %c8_663, %c0_664, %c0_665] : memref<2x9x16x128xf32, #tpu.memory_space<vmem>>, vector<1x1x16x128xf32>
    %1073 = vector.shape_cast %1072 : vector<1x1x16x128xf32> to vector<16x128xf32>
    %1074 = vector.broadcast %1071 : vector<1x128xf32> to vector<16x128xf32>
    %1075 = arith.mulf %1074, %1073 : vector<16x128xf32>
    %1076 = arith.addf %1070, %1075 : vector<16x128xf32>
    %c1_666 = arith.constant 1 : index
    %c6_667 = arith.constant 6 : index
    %c0_668 = arith.constant 0 : index
    %c0_669 = arith.constant 0 : index
    %1077 = vector.load %arg5[%c1_666, %c6_667, %c0_668, %c0_669] : memref<2x9x16x128xf32, #tpu.memory_space<vmem>>, vector<1x1x16x128xf32>
    %1078 = vector.shape_cast %1077 : vector<1x1x16x128xf32> to vector<16x128xf32>
    %1079 = vector.shape_cast %1076 : vector<16x128xf32> to vector<1x1x16x128xf32>
    tpu.vector_store %arg5[%c1_666, %c6_667, %c0_668, %c0_669], %1079 {strides = array<i32>} : memref<2x9x16x128xf32, #tpu.memory_space<vmem>>, vector<1x1x16x128xf32>,
    %1080 = vector.extract_strided_slice %7 {offsets = [256, 0], sizes = [16, 128], strides = [1, 1]} : vector<288x128xf32> to vector<16x128xf32>
    %cst_670 = arith.constant dense<0xFF800000> : vector<128xf32>
    %1081 = vector.multi_reduction <maximumf>, %1080, %cst_670 [0] : vector<16x128xf32> to vector<128xf32>
    %1082 = vector.shape_cast %1081 : vector<128xf32> to vector<1x128xf32>
    %1083 = vector.broadcast %1082 : vector<1x128xf32> to vector<16x128xf32>
    %1084 = arith.subf %1080, %1083 : vector<16x128xf32>
    %1085 = math.exp %1084 : vector<16x128xf32>
    %cst_671 = arith.constant dense<0.000000e+00> : vector<128xf32>
    %1086 = vector.multi_reduction <add>, %1085, %cst_671 [0] : vector<16x128xf32> to vector<128xf32>
    %1087 = vector.shape_cast %1086 : vector<128xf32> to vector<1x128xf32>
    %1088 = tpu.reciprocal %1087 {approx = true} : vector<1x128xf32> -> vector<1x128xf32>
    %1089 = vector.broadcast %1088 : vector<1x128xf32> to vector<16x128xf32>
    %1090 = arith.mulf %1085, %1089 : vector<16x128xf32>
    %1091 = vector.extract_strided_slice %1090 {offsets = [0, 0], sizes = [1, 128], strides = [1, 1]} : vector<16x128xf32> to vector<1x128xf32>
    %c1_672 = arith.constant 1 : index
    %c0_673 = arith.constant 0 : index
    %c0_674 = arith.constant 0 : index
    %c0_675 = arith.constant 0 : index
    %1092 = vector.load %arg4[%c1_672, %c0_673, %c0_674, %c0_675] : memref<2x9x16x128xf32, #tpu.memory_space<vmem>>, vector<1x1x16x128xf32>
    %1093 = vector.shape_cast %1092 : vector<1x1x16x128xf32> to vector<16x128xf32>
    %1094 = vector.broadcast %1091 : vector<1x128xf32> to vector<16x128xf32>
    %1095 = arith.mulf %1094, %1093 : vector<16x128xf32>
    %1096 = vector.extract_strided_slice %1090 {offsets = [1, 0], sizes = [1, 128], strides = [1, 1]} : vector<16x128xf32> to vector<1x128xf32>
    %c1_676 = arith.constant 1 : index
    %c1_677 = arith.constant 1 : index
    %c0_678 = arith.constant 0 : index
    %c0_679 = arith.constant 0 : index
    %1097 = vector.load %arg4[%c1_676, %c1_677, %c0_678, %c0_679] : memref<2x9x16x128xf32, #tpu.memory_space<vmem>>, vector<1x1x16x128xf32>
    %1098 = vector.shape_cast %1097 : vector<1x1x16x128xf32> to vector<16x128xf32>
    %1099 = vector.broadcast %1096 : vector<1x128xf32> to vector<16x128xf32>
    %1100 = arith.mulf %1099, %1098 : vector<16x128xf32>
    %1101 = arith.addf %1095, %1100 : vector<16x128xf32>
    %1102 = vector.extract_strided_slice %1090 {offsets = [2, 0], sizes = [1, 128], strides = [1, 1]} : vector<16x128xf32> to vector<1x128xf32>
    %c1_680 = arith.constant 1 : index
    %c2_681 = arith.constant 2 : index
    %c0_682 = arith.constant 0 : index
    %c0_683 = arith.constant 0 : index
    %1103 = vector.load %arg4[%c1_680, %c2_681, %c0_682, %c0_683] : memref<2x9x16x128xf32, #tpu.memory_space<vmem>>, vector<1x1x16x128xf32>
    %1104 = vector.shape_cast %1103 : vector<1x1x16x128xf32> to vector<16x128xf32>
    %1105 = vector.broadcast %1102 : vector<1x128xf32> to vector<16x128xf32>
    %1106 = arith.mulf %1105, %1104 : vector<16x128xf32>
    %1107 = arith.addf %1101, %1106 : vector<16x128xf32>
    %1108 = vector.extract_strided_slice %1090 {offsets = [3, 0], sizes = [1, 128], strides = [1, 1]} : vector<16x128xf32> to vector<1x128xf32>
    %c1_684 = arith.constant 1 : index
    %c3_685 = arith.constant 3 : index
    %c0_686 = arith.constant 0 : index
    %c0_687 = arith.constant 0 : index
    %1109 = vector.load %arg4[%c1_684, %c3_685, %c0_686, %c0_687] : memref<2x9x16x128xf32, #tpu.memory_space<vmem>>, vector<1x1x16x128xf32>
    %1110 = vector.shape_cast %1109 : vector<1x1x16x128xf32> to vector<16x128xf32>
    %1111 = vector.broadcast %1108 : vector<1x128xf32> to vector<16x128xf32>
    %1112 = arith.mulf %1111, %1110 : vector<16x128xf32>
    %1113 = arith.addf %1107, %1112 : vector<16x128xf32>
    %1114 = vector.extract_strided_slice %1090 {offsets = [4, 0], sizes = [1, 128], strides = [1, 1]} : vector<16x128xf32> to vector<1x128xf32>
    %c1_688 = arith.constant 1 : index
    %c4_689 = arith.constant 4 : index
    %c0_690 = arith.constant 0 : index
    %c0_691 = arith.constant 0 : index
    %1115 = vector.load %arg4[%c1_688, %c4_689, %c0_690, %c0_691] : memref<2x9x16x128xf32, #tpu.memory_space<vmem>>, vector<1x1x16x128xf32>
    %1116 = vector.shape_cast %1115 : vector<1x1x16x128xf32> to vector<16x128xf32>
    %1117 = vector.broadcast %1114 : vector<1x128xf32> to vector<16x128xf32>
    %1118 = arith.mulf %1117, %1116 : vector<16x128xf32>
    %1119 = arith.addf %1113, %1118 : vector<16x128xf32>
    %1120 = vector.extract_strided_slice %1090 {offsets = [5, 0], sizes = [1, 128], strides = [1, 1]} : vector<16x128xf32> to vector<1x128xf32>
    %c1_692 = arith.constant 1 : index
    %c5_693 = arith.constant 5 : index
    %c0_694 = arith.constant 0 : index
    %c0_695 = arith.constant 0 : index
    %1121 = vector.load %arg4[%c1_692, %c5_693, %c0_694, %c0_695] : memref<2x9x16x128xf32, #tpu.memory_space<vmem>>, vector<1x1x16x128xf32>
    %1122 = vector.shape_cast %1121 : vector<1x1x16x128xf32> to vector<16x128xf32>
    %1123 = vector.broadcast %1120 : vector<1x128xf32> to vector<16x128xf32>
    %1124 = arith.mulf %1123, %1122 : vector<16x128xf32>
    %1125 = arith.addf %1119, %1124 : vector<16x128xf32>
    %1126 = vector.extract_strided_slice %1090 {offsets = [6, 0], sizes = [1, 128], strides = [1, 1]} : vector<16x128xf32> to vector<1x128xf32>
    %c1_696 = arith.constant 1 : index
    %c6_697 = arith.constant 6 : index
    %c0_698 = arith.constant 0 : index
    %c0_699 = arith.constant 0 : index
    %1127 = vector.load %arg4[%c1_696, %c6_697, %c0_698, %c0_699] : memref<2x9x16x128xf32, #tpu.memory_space<vmem>>, vector<1x1x16x128xf32>
    %1128 = vector.shape_cast %1127 : vector<1x1x16x128xf32> to vector<16x128xf32>
    %1129 = vector.broadcast %1126 : vector<1x128xf32> to vector<16x128xf32>
    %1130 = arith.mulf %1129, %1128 : vector<16x128xf32>
    %1131 = arith.addf %1125, %1130 : vector<16x128xf32>
    %1132 = vector.extract_strided_slice %1090 {offsets = [7, 0], sizes = [1, 128], strides = [1, 1]} : vector<16x128xf32> to vector<1x128xf32>
    %c1_700 = arith.constant 1 : index
    %c7_701 = arith.constant 7 : index
    %c0_702 = arith.constant 0 : index
    %c0_703 = arith.constant 0 : index
    %1133 = vector.load %arg4[%c1_700, %c7_701, %c0_702, %c0_703] : memref<2x9x16x128xf32, #tpu.memory_space<vmem>>, vector<1x1x16x128xf32>
    %1134 = vector.shape_cast %1133 : vector<1x1x16x128xf32> to vector<16x128xf32>
    %1135 = vector.broadcast %1132 : vector<1x128xf32> to vector<16x128xf32>
    %1136 = arith.mulf %1135, %1134 : vector<16x128xf32>
    %1137 = arith.addf %1131, %1136 : vector<16x128xf32>
    %1138 = vector.extract_strided_slice %1090 {offsets = [8, 0], sizes = [1, 128], strides = [1, 1]} : vector<16x128xf32> to vector<1x128xf32>
    %c1_704 = arith.constant 1 : index
    %c8_705 = arith.constant 8 : index
    %c0_706 = arith.constant 0 : index
    %c0_707 = arith.constant 0 : index
    %1139 = vector.load %arg4[%c1_704, %c8_705, %c0_706, %c0_707] : memref<2x9x16x128xf32, #tpu.memory_space<vmem>>, vector<1x1x16x128xf32>
    %1140 = vector.shape_cast %1139 : vector<1x1x16x128xf32> to vector<16x128xf32>
    %1141 = vector.broadcast %1138 : vector<1x128xf32> to vector<16x128xf32>
    %1142 = arith.mulf %1141, %1140 : vector<16x128xf32>
    %1143 = arith.addf %1137, %1142 : vector<16x128xf32>
    %c1_708 = arith.constant 1 : index
    %c7_709 = arith.constant 7 : index
    %c0_710 = arith.constant 0 : index
    %c0_711 = arith.constant 0 : index
    %1144 = vector.load %arg5[%c1_708, %c7_709, %c0_710, %c0_711] : memref<2x9x16x128xf32, #tpu.memory_space<vmem>>, vector<1x1x16x128xf32>
    %1145 = vector.shape_cast %1144 : vector<1x1x16x128xf32> to vector<16x128xf32>
    %1146 = vector.shape_cast %1143 : vector<16x128xf32> to vector<1x1x16x128xf32>
    tpu.vector_store %arg5[%c1_708, %c7_709, %c0_710, %c0_711], %1146 {strides = array<i32>} : memref<2x9x16x128xf32, #tpu.memory_space<vmem>>, vector<1x1x16x128xf32>,
    %1147 = vector.extract_strided_slice %7 {offsets = [272, 0], sizes = [16, 128], strides = [1, 1]} : vector<288x128xf32> to vector<16x128xf32>
    %cst_712 = arith.constant dense<0xFF800000> : vector<128xf32>
    %1148 = vector.multi_reduction <maximumf>, %1147, %cst_712 [0] : vector<16x128xf32> to vector<128xf32>
    %1149 = vector.shape_cast %1148 : vector<128xf32> to vector<1x128xf32>
    %1150 = vector.broadcast %1149 : vector<1x128xf32> to vector<16x128xf32>
    %1151 = arith.subf %1147, %1150 : vector<16x128xf32>
    %1152 = math.exp %1151 : vector<16x128xf32>
    %cst_713 = arith.constant dense<0.000000e+00> : vector<128xf32>
    %1153 = vector.multi_reduction <add>, %1152, %cst_713 [0] : vector<16x128xf32> to vector<128xf32>
    %1154 = vector.shape_cast %1153 : vector<128xf32> to vector<1x128xf32>
    %1155 = tpu.reciprocal %1154 {approx = true} : vector<1x128xf32> -> vector<1x128xf32>
    %1156 = vector.broadcast %1155 : vector<1x128xf32> to vector<16x128xf32>
    %1157 = arith.mulf %1152, %1156 : vector<16x128xf32>
    %1158 = vector.extract_strided_slice %1157 {offsets = [0, 0], sizes = [1, 128], strides = [1, 1]} : vector<16x128xf32> to vector<1x128xf32>
    %c1_714 = arith.constant 1 : index
    %c0_715 = arith.constant 0 : index
    %c0_716 = arith.constant 0 : index
    %c0_717 = arith.constant 0 : index
    %1159 = vector.load %arg4[%c1_714, %c0_715, %c0_716, %c0_717] : memref<2x9x16x128xf32, #tpu.memory_space<vmem>>, vector<1x1x16x128xf32>
    %1160 = vector.shape_cast %1159 : vector<1x1x16x128xf32> to vector<16x128xf32>
    %1161 = vector.broadcast %1158 : vector<1x128xf32> to vector<16x128xf32>
    %1162 = arith.mulf %1161, %1160 : vector<16x128xf32>
    %1163 = vector.extract_strided_slice %1157 {offsets = [1, 0], sizes = [1, 128], strides = [1, 1]} : vector<16x128xf32> to vector<1x128xf32>
    %c1_718 = arith.constant 1 : index
    %c1_719 = arith.constant 1 : index
    %c0_720 = arith.constant 0 : index
    %c0_721 = arith.constant 0 : index
    %1164 = vector.load %arg4[%c1_718, %c1_719, %c0_720, %c0_721] : memref<2x9x16x128xf32, #tpu.memory_space<vmem>>, vector<1x1x16x128xf32>
    %1165 = vector.shape_cast %1164 : vector<1x1x16x128xf32> to vector<16x128xf32>
    %1166 = vector.broadcast %1163 : vector<1x128xf32> to vector<16x128xf32>
    %1167 = arith.mulf %1166, %1165 : vector<16x128xf32>
    %1168 = arith.addf %1162, %1167 : vector<16x128xf32>
    %1169 = vector.extract_strided_slice %1157 {offsets = [2, 0], sizes = [1, 128], strides = [1, 1]} : vector<16x128xf32> to vector<1x128xf32>
    %c1_722 = arith.constant 1 : index
    %c2_723 = arith.constant 2 : index
    %c0_724 = arith.constant 0 : index
    %c0_725 = arith.constant 0 : index
    %1170 = vector.load %arg4[%c1_722, %c2_723, %c0_724, %c0_725] : memref<2x9x16x128xf32, #tpu.memory_space<vmem>>, vector<1x1x16x128xf32>
    %1171 = vector.shape_cast %1170 : vector<1x1x16x128xf32> to vector<16x128xf32>
    %1172 = vector.broadcast %1169 : vector<1x128xf32> to vector<16x128xf32>
    %1173 = arith.mulf %1172, %1171 : vector<16x128xf32>
    %1174 = arith.addf %1168, %1173 : vector<16x128xf32>
    %1175 = vector.extract_strided_slice %1157 {offsets = [3, 0], sizes = [1, 128], strides = [1, 1]} : vector<16x128xf32> to vector<1x128xf32>
    %c1_726 = arith.constant 1 : index
    %c3_727 = arith.constant 3 : index
    %c0_728 = arith.constant 0 : index
    %c0_729 = arith.constant 0 : index
    %1176 = vector.load %arg4[%c1_726, %c3_727, %c0_728, %c0_729] : memref<2x9x16x128xf32, #tpu.memory_space<vmem>>, vector<1x1x16x128xf32>
    %1177 = vector.shape_cast %1176 : vector<1x1x16x128xf32> to vector<16x128xf32>
    %1178 = vector.broadcast %1175 : vector<1x128xf32> to vector<16x128xf32>
    %1179 = arith.mulf %1178, %1177 : vector<16x128xf32>
    %1180 = arith.addf %1174, %1179 : vector<16x128xf32>
    %1181 = vector.extract_strided_slice %1157 {offsets = [4, 0], sizes = [1, 128], strides = [1, 1]} : vector<16x128xf32> to vector<1x128xf32>
    %c1_730 = arith.constant 1 : index
    %c4_731 = arith.constant 4 : index
    %c0_732 = arith.constant 0 : index
    %c0_733 = arith.constant 0 : index
    %1182 = vector.load %arg4[%c1_730, %c4_731, %c0_732, %c0_733] : memref<2x9x16x128xf32, #tpu.memory_space<vmem>>, vector<1x1x16x128xf32>
    %1183 = vector.shape_cast %1182 : vector<1x1x16x128xf32> to vector<16x128xf32>
    %1184 = vector.broadcast %1181 : vector<1x128xf32> to vector<16x128xf32>
    %1185 = arith.mulf %1184, %1183 : vector<16x128xf32>
    %1186 = arith.addf %1180, %1185 : vector<16x128xf32>
    %1187 = vector.extract_strided_slice %1157 {offsets = [5, 0], sizes = [1, 128], strides = [1, 1]} : vector<16x128xf32> to vector<1x128xf32>
    %c1_734 = arith.constant 1 : index
    %c5_735 = arith.constant 5 : index
    %c0_736 = arith.constant 0 : index
    %c0_737 = arith.constant 0 : index
    %1188 = vector.load %arg4[%c1_734, %c5_735, %c0_736, %c0_737] : memref<2x9x16x128xf32, #tpu.memory_space<vmem>>, vector<1x1x16x128xf32>
    %1189 = vector.shape_cast %1188 : vector<1x1x16x128xf32> to vector<16x128xf32>
    %1190 = vector.broadcast %1187 : vector<1x128xf32> to vector<16x128xf32>
    %1191 = arith.mulf %1190, %1189 : vector<16x128xf32>
    %1192 = arith.addf %1186, %1191 : vector<16x128xf32>
    %1193 = vector.extract_strided_slice %1157 {offsets = [6, 0], sizes = [1, 128], strides = [1, 1]} : vector<16x128xf32> to vector<1x128xf32>
    %c1_738 = arith.constant 1 : index
    %c6_739 = arith.constant 6 : index
    %c0_740 = arith.constant 0 : index
    %c0_741 = arith.constant 0 : index
    %1194 = vector.load %arg4[%c1_738, %c6_739, %c0_740, %c0_741] : memref<2x9x16x128xf32, #tpu.memory_space<vmem>>, vector<1x1x16x128xf32>
    %1195 = vector.shape_cast %1194 : vector<1x1x16x128xf32> to vector<16x128xf32>
    %1196 = vector.broadcast %1193 : vector<1x128xf32> to vector<16x128xf32>
    %1197 = arith.mulf %1196, %1195 : vector<16x128xf32>
    %1198 = arith.addf %1192, %1197 : vector<16x128xf32>
    %1199 = vector.extract_strided_slice %1157 {offsets = [7, 0], sizes = [1, 128], strides = [1, 1]} : vector<16x128xf32> to vector<1x128xf32>
    %c1_742 = arith.constant 1 : index
    %c7_743 = arith.constant 7 : index
    %c0_744 = arith.constant 0 : index
    %c0_745 = arith.constant 0 : index
    %1200 = vector.load %arg4[%c1_742, %c7_743, %c0_744, %c0_745] : memref<2x9x16x128xf32, #tpu.memory_space<vmem>>, vector<1x1x16x128xf32>
    %1201 = vector.shape_cast %1200 : vector<1x1x16x128xf32> to vector<16x128xf32>
    %1202 = vector.broadcast %1199 : vector<1x128xf32> to vector<16x128xf32>
    %1203 = arith.mulf %1202, %1201 : vector<16x128xf32>
    %1204 = arith.addf %1198, %1203 : vector<16x128xf32>
    %1205 = vector.extract_strided_slice %1157 {offsets = [8, 0], sizes = [1, 128], strides = [1, 1]} : vector<16x128xf32> to vector<1x128xf32>
    %c1_746 = arith.constant 1 : index
    %c8_747 = arith.constant 8 : index
    %c0_748 = arith.constant 0 : index
    %c0_749 = arith.constant 0 : index
    %1206 = vector.load %arg4[%c1_746, %c8_747, %c0_748, %c0_749] : memref<2x9x16x128xf32, #tpu.memory_space<vmem>>, vector<1x1x16x128xf32>
    %1207 = vector.shape_cast %1206 : vector<1x1x16x128xf32> to vector<16x128xf32>
    %1208 = vector.broadcast %1205 : vector<1x128xf32> to vector<16x128xf32>
    %1209 = arith.mulf %1208, %1207 : vector<16x128xf32>
    %1210 = arith.addf %1204, %1209 : vector<16x128xf32>
    %c1_750 = arith.constant 1 : index
    %c8_751 = arith.constant 8 : index
    %c0_752 = arith.constant 0 : index
    %c0_753 = arith.constant 0 : index
    %1211 = vector.load %arg5[%c1_750, %c8_751, %c0_752, %c0_753] : memref<2x9x16x128xf32, #tpu.memory_space<vmem>>, vector<1x1x16x128xf32>
    %1212 = vector.shape_cast %1211 : vector<1x1x16x128xf32> to vector<16x128xf32>
    %1213 = vector.shape_cast %1210 : vector<16x128xf32> to vector<1x1x16x128xf32>
    tpu.vector_store %arg5[%c1_750, %c8_751, %c0_752, %c0_753], %1213 {strides = array<i32>} : memref<2x9x16x128xf32, #tpu.memory_space<vmem>>, vector<1x1x16x128xf32>,
    return
  }
  func.func @transform_0(%arg0: i32) -> (i32, i32) {
    %c0_i32 = arith.constant 0 : i32
    %c0_i32_0 = arith.constant 0 : i32
    return %c0_i32, %arg0 : i32, i32
  }
  func.func @transform_1(%arg0: i32) -> (i32, i32) {
    %c0_i32 = arith.constant 0 : i32
    %c0_i32_0 = arith.constant 0 : i32
    %c0_i32_1 = arith.constant 0 : i32
    return %c0_i32, %c0_i32_0 : i32, i32
  }
  func.func @transform_2(%arg0: i32) -> (i32, i32) {
    %c0_i32 = arith.constant 0 : i32
    %c0_i32_0 = arith.constant 0 : i32
    %c0_i32_1 = arith.constant 0 : i32
    return %c0_i32, %c0_i32_0 : i32, i32
  }
  func.func @transform_3(%arg0: i32) -> (i32, i32, i32, i32) {
    %c0_i32 = arith.constant 0 : i32
    %c0_i32_0 = arith.constant 0 : i32
    %c0_i32_1 = arith.constant 0 : i32
    %c0_i32_2 = arith.constant 0 : i32
    return %c0_i32, %c0_i32_0, %c0_i32_1, %arg0 : i32, i32, i32, i32
  }
  func.func @transform_4(%arg0: i32) -> (i32, i32, i32, i32) {
    %c0_i32 = arith.constant 0 : i32
    %c0_i32_0 = arith.constant 0 : i32
    %c0_i32_1 = arith.constant 0 : i32
    %c0_i32_2 = arith.constant 0 : i32
    return %c0_i32, %c0_i32_0, %c0_i32_1, %arg0 : i32, i32, i32, i32
  }
}

module attributes {stable_mosaic.version = 11 : i64} {
  func.func @_linear_kernel(%arg0: i32, %arg1: memref<64x32xf32, #tpu.memory_space<vmem>>, %arg2: memref<32x32xf32, #tpu.memory_space<vmem>>, %arg3: memref<1x32xf32, #tpu.memory_space<vmem>>, %arg4: memref<64x32xf32, #tpu.memory_space<vmem>>) attributes {dimension_semantics = [#tpu.dimension_semantics<parallel>], iteration_bounds = array<i64: 2>, scalar_prefetch = 0 : i64, scratch_operands = 0 : i64, tpu.core_type = #tpu.core_type<tc>, window_params = [{transform_indices = @transform_0, window_bounds = array<i64: 64, 32>}, {pipeline_mode = #tpu.pipeline_mode<synchronous>, transform_indices = @transform_1, window_bounds = array<i64: 32, 32>}, {pipeline_mode = #tpu.pipeline_mode<synchronous>, transform_indices = @transform_2, window_bounds = array<i64: 1, 32>}, {transform_indices = @transform_3, window_bounds = array<i64: 64, 32>}]} {
    %c0 = arith.constant 0 : index
    %c0_0 = arith.constant 0 : index
    %0 = vector.load %arg1[%c0, %c0_0] : memref<64x32xf32, #tpu.memory_space<vmem>>, vector<64x32xf32>
    %c0_1 = arith.constant 0 : index
    %c0_2 = arith.constant 0 : index
    %1 = vector.load %arg2[%c0_1, %c0_2] : memref<32x32xf32, #tpu.memory_space<vmem>>, vector<32x32xf32>
    %cst = arith.constant dense<0.000000e+00> : vector<64x32xf32>
    %2 = tpu.matmul %0, %1, %cst {dimension_numbers = #tpu.dot_dimension_numbers<[1], [0], [0], [1], [0, 0, 1, 1], [], []>} : vector<64x32xf32>, vector<32x32xf32>, vector<64x32xf32> -> vector<64x32xf32>
    %c0_3 = arith.constant 0 : index
    %c0_4 = arith.constant 0 : index
    %3 = vector.load %arg3[%c0_3, %c0_4] : memref<1x32xf32, #tpu.memory_space<vmem>>, vector<1x32xf32>
    %4 = vector.broadcast %3 : vector<1x32xf32> to vector<64x32xf32>
    %5 = arith.addf %2, %4 : vector<64x32xf32>
    %c0_5 = arith.constant 0 : index
    %c0_6 = arith.constant 0 : index
    %6 = vector.load %arg4[%c0_5, %c0_6] : memref<64x32xf32, #tpu.memory_space<vmem>>, vector<64x32xf32>
    tpu.vector_store %arg4[%c0_5, %c0_6], %5 {strides = array<i32>} : memref<64x32xf32, #tpu.memory_space<vmem>>, vector<64x32xf32>,
    return
  }
  func.func @transform_0(%arg0: i32) -> (i32, i32) {
    %c0_i32 = arith.constant 0 : i32
    %c0_i32_0 = arith.constant 0 : i32
    return %arg0, %c0_i32 : i32, i32
  }
  func.func @transform_1(%arg0: i32) -> (i32, i32) {
    %c0_i32 = arith.constant 0 : i32
    %c0_i32_0 = arith.constant 0 : i32
    %c0_i32_1 = arith.constant 0 : i32
    return %c0_i32, %c0_i32_0 : i32, i32
  }
  func.func @transform_2(%arg0: i32) -> (i32, i32) {
    %c0_i32 = arith.constant 0 : i32
    %c0_i32_0 = arith.constant 0 : i32
    %c0_i32_1 = arith.constant 0 : i32
    return %c0_i32, %c0_i32_0 : i32, i32
  }
  func.func @transform_3(%arg0: i32) -> (i32, i32) {
    %c0_i32 = arith.constant 0 : i32
    %c0_i32_0 = arith.constant 0 : i32
    return %arg0, %c0_i32 : i32, i32
  }
}

</mosaic_0001>

<bundles_post_ra>
// kernel: outlook_attention_forward.3
= control target key start
LH: loop header
LB: loop body
LE: loop exit
PB: predicated region body
PF: predicated region fallthrough
CT: control target
= control target key end

     0   :  { %8 = vsyncpa [#allocation3], 0  ;;  %s958_s0 = inlined_call_operand.hbm [shape: f32[128,32], index: 0, kind: input, shape index: {}]   ;;  %s959_s1 = inlined_call_operand.hbm [shape: f32[32,32], index: 1, kind: input, shape index: {}]   ;;  %s960_s2 = inlined_call_operand.hbm [shape: f32[1,32], index: 2, kind: input, shape index: {}]   ;;  %s961_s3 = inlined_call_operand.vmem [shape: f32[128,32], index: 3, kind: output, shape index: {}]  }
   0x1   :  { %10 = vsyncpa [#allocation3 + $0x1], 0 }
   0x2   :  { %11 = vsyncpa [#allocation5], 0  ;;  %s747_s12 = smov 0   ;;  %s749_s13 = smov 0  }
   0x3   :  { %s751_s14 = smov 0   ;;  %s753_s15 = smov 0  }
   0x4 LB: > { %s463_s16 = sadd.s32 4294967295, %s720_s15   ;;  %p37_p0 = scmp.ne.s32.totalorder %s712_s13, %s708_s12  ;;  %s720_s15 = sphi %s753_s15, %s977_s15   ;;  %s716_s14 = sphi %s751_s14, %s976_s14   ;;  %s712_s13 = sphi %s749_s13, %s975_s13   ;;  %s708_s12 = sphi %s747_s12, %s974_s12  }
   0x5   : > { %p769_p1 = scmp.eq.s32.totalorder %s463_s16, 0  ;;  %p465_p2 = scmp.ge.s32.totalorder %s720_s15, 1 }
   0x6   : > { %p116_p3 = scmp.lt.s32.totalorder %s720_s15, 3  ;;  %s722_s20 = smov [#allocation4]  }
   0x7   : > { %s966_s17 = scalar_select %p769_p1, 1, 0 }
   0x8   : > { %p777_p4 = por %p769_p1, %p37_p0  ;;  %p781_p5 = pnand %p465_p2, %p116_p3 }
   0x9   : > { %s128_s21 = sshll.u32 %s722_s20, 4  ;;  %s723_s23 = smov [#allocation6]   ;;  %s129_s21 = int_to_ptr.vmem [resolvable:$true] %s128_s21 }
   0xa   : > { %s967_s18 = scalar_select %p777_p4, 1, 0 }
   0xb   : > { %s968_s19 = scalar_select %p781_p5, 1, 0 }
   0xc   : > { %p544_p6 = pneg %p781_p5  ;;  %s142_s24 = sshll.u32 %s723_s23, 4  ;;  %s793_s24 = int_to_ptr.vmem [resolvable:$true] %s142_s24 }
   0xd   : > { %s596_s27 = scalar_lea.hbm %s959_s1, 512 }
   0xe   : > { %p789_p7 = pnand %p544_p6, %p769_p1  ;;  %p597_p8 = scmp.ne.s32.totalorder %s959_s1, %s596_s27 }
   0xf   : > { %p603_p12 = scmp.lt.u32.totalorder %s596_s27, %s959_s1 }
  0x10   : > { %p598_p9 = pneg %p789_p7 }
  0x12   : > { %p599_p10 = pnand %p598_p9, %p597_p8 }
  0x14   : > { %p600_p11 = pneg %p599_p10 }
  0x16   : > { %p605_p13 = pnand %p603_p12, %p600_p11 }
  0x18   : > { %608 = shalt.err (!%p605_p13)
}
  0x19   : > { %s609_s5 = scalar_lea.vmem %s129_s21, 512  ;;  %p617_p6 = scmp.lt.s32.totalorder %s129_s21, %s129_s21 }
  0x1a   : > { %p610_p0 = scmp.ne.s32.totalorder %s129_s21, %s609_s5  ;;  %p618_p1 = scmp.lt.s32.totalorder %s609_s5, %s609_s5 }
  0x1c   : > { %p612_p2 = pnand %p610_p0, %p598_p9  ;;  %p619_p4 = por %p618_p1, %p617_p6 }
  0x1e   : > { %p613_p3 = pneg %p612_p2 }
  0x20   : > { %p620_p5 = pnand %p619_p4, %p613_p3 }
  0x22   : > { %623 = shalt.err (!%p620_p5)
}
  0x23   : > { %s724_s6 = smov 128   ;;  %s725_s7 = smov 8  }
  0x24   : > { %547 = dma.hbm_to_vmem [thread:$0]  (!%p789_p7), %s959_s1, 512, %s129_s21, [#allocation5], %s724_s6, %s724_s6, %s725_s7  }
  0x25   : > { %s624_s12 = scalar_lea.hbm %s960_s2, 16 }
  0x26   : > { %p625_p1 = scmp.ne.s32.totalorder %s960_s2, %s624_s12  ;;  %p631_p8 = scmp.lt.u32.totalorder %s624_s12, %s960_s2 }
  0x28   : > { %p627_p4 = pnand %p625_p1, %p598_p9 }
  0x2a   : > { %p628_p5 = pneg %p627_p4 }
  0x2c   : > { %p633_p10 = pnand %p631_p8, %p628_p5 }
  0x2e   : > { %636 = shalt.err (!%p633_p10)
}
  0x2f   : > { %s637_s21 = scalar_lea.vmem %s793_s24, 16  ;;  %s644_s27 = scalar_lea.vmem %s793_s24, 32 }
  0x30   : > { %p638_p11 = scmp.ne.s32.totalorder %s793_s24, %s637_s21  ;;  %p645_p0 = scmp.lt.s32.totalorder %s793_s24, %s793_s24 }
  0x31   : > { %p646_p2 = scmp.lt.s32.totalorder %s644_s27, %s637_s21 }
  0x32   : > { %p640_p12 = pnand %p638_p11, %p598_p9 }
  0x33   : > { %p647_p3 = por %p646_p2, %p645_p0 }
  0x34   : > { %p641_p13 = pneg %p640_p12 }
  0x36   : > { %p648_p6 = pnand %p647_p3, %p641_p13 }
  0x38   : > { %651 = shalt.err (!%p648_p6)
}
  0x39   : > { %550 = dma.hbm_to_vmem [thread:$0]  (!%p789_p7), %s960_s2, 16, %s793_s24, [#allocation5]  }
  0x3a   : > { %s847_s30 = sadd.s32 1, %s720_s15   ;;  %s24_s4 = sadd.s32 1, %s716_s14 }
  0x3b   : > { %s21_s22 = ssub.s32 %s720_s15, %s847_s30  ;;  %p31_p9 = scmp.ne.s32.totalorder %s716_s14, %s712_s13 }
  0x3c   : > { %p22_p1 = scmp.eq.s32.totalorder %s21_s22, 0  ;;  %p32_p4 = scmp.eq.s32.totalorder %s720_s15, 0 }
  0x3d   : > { %p557_p5 = scmp.lt.s32.totalorder %s720_s15, 2  ;;  %s153_s5 = sand.u32 1, %s716_s14  }
  0x3e   : > { %s858_s8 = scalar_select %p22_p1, %s716_s14, %s24_s4  }
  0x3f   : > { %p33_p8 = por %p32_p4, %p31_p9  ;;  %s469_s9 = sshll.u32 %s153_s5, 6 }
  0x40   : > { %s489_s10 = sshll.u32 %s720_s15, 10  ;;  %s157_s24 = scalar_lea.vmem [#allocation2], %s469_s9 }
  0x41   : > { %s864_s20 = scalar_lea.hbm %s958_s0, %s489_s10  ;;  %s164_s23 = sshll.u32 %s157_s24, 4  ;;  %s870_s23 = int_to_ptr.vmem [resolvable:$true] %s164_s23 }
  0x42   : > { %p866_p7 = pnand %p557_p5, %p33_p8  ;;  %s872_s26 = scalar_lea.sflag [#allocation3], %s153_s5 }
  0x43   : > { %s652_s21 = scalar_lea.hbm %s864_s20, 1024  ;;  %s657_s29 = scalar_lea.hbm %s958_s0, 2048 }
  0x44   : > { %p653_p10 = scmp.ne.s32.totalorder %s864_s20, %s652_s21  ;;  %p654_p11 = pneg %p866_p7 }
  0x45   : > { %p658_p0 = scmp.lt.u32.totalorder %s864_s20, %s958_s0  ;;  %p659_p2 = scmp.lt.u32.totalorder %s657_s29, %s652_s21 }
  0x46   : > { %p655_p12 = pnand %p654_p11, %p653_p10  ;;  %p661_p6 = scmp.lt.u32.totalorder %s652_s21, %s864_s20 }
  0x47   : > { %p660_p3 = por %p659_p2, %p658_p0 }
  0x48   : > { %p656_p13 = pneg %p655_p12 }
  0x49   : > { %p662_p9 = por %p661_p6, %p660_p3 }
  0x4b   : > { %p663_p1 = pnand %p662_p9, %p656_p13 }
  0x4d   : > { %666 = shalt.err (!%p663_p1)
}
  0x4e   : > { %s667_s5 = scalar_lea.vmem %s870_s23, 1024  ;;  %s726_s9 = smov [#allocation2]  }
  0x4f   : > { %p668_p4 = scmp.ne.s32.totalorder %s870_s23, %s667_s5  ;;  %s672_s10 = sshll.u32 %s726_s9, 4  ;;  %s673_s10 = int_to_ptr.vmem [resolvable:$false] %s672_s10 }
  0x50   : > { %s674_s11 = scalar_lea.vmem %s673_s10, 2048  ;;  %p675_p10 = scmp.lt.s32.totalorder %s870_s23, %s673_s10 }
  0x51   : > { %p670_p5 = pnand %p668_p4, %p654_p11  ;;  %p676_p12 = scmp.lt.s32.totalorder %s674_s11, %s667_s5 }
  0x53   : > { %p671_p8 = pneg %p670_p5  ;;  %p677_p0 = por %p676_p12, %p675_p10 }
  0x55   : > { %p678_p2 = pnand %p677_p0, %p671_p8 }
  0x57   : > { %681 = shalt.err (!%p678_p2)
}
  0x58   : > { %554 = dma.hbm_to_vmem [thread:$0]  (!%p866_p7), %s864_s20, 1024, %s870_s23, %s872_s26, %s724_s6, %s724_s6, %s725_s7  }
  0x59   : > { %p971_p11 = scmp.ne.s32.totalorder %s968_s19, 0 }
  0x5a   : > { %s178_s12 = sand.u32 (!%p971_p11), 1, %s712_s13   ;;  %p972_p13 = scmp.ne.s32.totalorder (!%p971_p11), %s967_s18, 0 }
  0x5b   : > { %176 = sbr.rel (%p971_p11) target bundleno = 334 (0x14e), region = 32  ;;  %s473_s24 = sshll.u32 (!%p971_p11), %s178_s12, 6 }
  0x5c   : > { %s179_s21 = scalar_lea.sflag (!%p971_p11), [#allocation3], %s178_s12  ;;  %s906_s27 = scalar_lea.vmem (!%p971_p11), [#allocation2], %s473_s24 }
  0x62   : > { %699 = dma.done.wait (%p972_p13), %s179_s21, 1024  }
  0x63   : > { %701 = vsyncadd (%p972_p13), %s179_s21, 4294966272  ;;  %p973_p3 = scmp.ne.s32.totalorder %s966_s17, 0 }
  0x65   : > { %703 = dma.done.wait (%p973_p3), [#allocation5], 528  }
  0x66   : > { %705 = vsyncadd (%p973_p3), [#allocation5], 4294966768  ;;  %vm239_vm0 = vcmask 261120   ;;  %v228_v0 = vld [vmem:[#allocation4] sm:$0xff]  ;;  %v229_v1 = vld [vmem:[#allocation4 + $0x8] sm:$0xff]  ;;  %s476_s17 = sshll.u32 %s463_s16, 3 }
  0x67   : > { %v230_v2 = vld [vmem:[#allocation4 + $0x10] sm:$0xff]  ;;  %v522_v3 = vpack.c.bf16 %v229_v1, %v228_v0  ;;  %v231_v4 = vld [vmem:[#allocation4 + $0x18] sm:$0xff]  ;;  %v220_v5 = vld [vmem:[%s906_s27] sm:$0xff]  ;;  %p215_p7 = scmp.lt.s32.totalorder %s476_s17, 15 }
  0x68   : > { %v224_v6 = vld [vmem:[%s906_s27 + $0x20] sm:$0xff]  ;;  %v526_v7 = vpack.c.bf16 %v231_v4, %v230_v2  ;;  %510 = vmatprep.mubr.msk.f32.mxu0 %vm239_vm0, %v220_v5  ;;  %v221_v8 = vld [vmem:[%s906_s27 + $0x8] sm:$0xff]  ;;  %v222_v10 = vld [vmem:[%s906_s27 + $0x10] sm:$0xff] }
  0x69   : > { %516 = vmatprep.mubr.msk.f32.mxu1 %vm239_vm0, %v224_v6  ;;  %523 = vmatprep.subr.bf16.mxu0 %v522_v3  ;;  %v225_v9 = vld [vmem:[%s906_s27 + $0x28] sm:$0xff]  ;;  %v226_v11 = vld [vmem:[%s906_s27 + $0x30] sm:$0xff]  ;;  %v223_v12 = vld [vmem:[%s906_s27 + $0x18] sm:$0xff]  ;;  %s979_s17 = smov (!%p215_p7, %s476_s17), 15 }
  0x6a   : > { %530 = vmatprep.subr.bf16.mxu1 %v522_v3  ;;  %525 = vmatpush3.bf16.msra.mxu0 %v522_v3  ;;  %v227_v13 = vld [vmem:[%s906_s27 + $0x38] sm:$0xff]  ;;  %s477_s18 = sshll.u32 %s979_s17, 3  ;;  %v478_v14 = vld [vmem:[#allocation6] ss:$0 sm:$0xff] }
  0x6b   : > { %532 = vmatpush3.bf16.msra.mxu1 %v522_v3  ;;  %527 = vmatprep.subr.bf16.mxu0 %v526_v7  ;;  %s218_s7 = scalar_lea.vmem %s961_s3, %s477_s18 }
  0x6c   : > { %531 = vmatprep.subr.bf16.mxu1 %v526_v7 }
  0x6e   : > { %529 = vmatpush3.bf16.msra.mxu0 %v526_v7 }
  0x6f   : > { %533 = vmatpush3.bf16.msra.mxu1 %v526_v7 }
  0x71   : > { %511 = vmatmul.mubr.msk.f32.vlgmr.msra.gmra.mrb[0].mxu0 %vm239_vm0, %v221_v8 }
  0x72   : > { %517 = vmatmul.mubr.msk.f32.vlgmr.msra.gmra.mrb[0].mxu1 %vm239_vm0, %v225_v9  ;;  %513 = vmatprep.mubr.msk.f32.mxu0 %vm239_vm0, %v222_v10 }
  0x73   : > { %519 = vmatprep.mubr.msk.f32.mxu1 %vm239_vm0, %v226_v11 }
  0x75   : > { %514 = vmatmul.mubr.msk.f32.gmra.mrb[2].mxu0 %vm239_vm0, %v223_v12 }
  0x76   : > { %520 = vmatmul.mubr.msk.f32.gmra.mrb[2].mxu1 %vm239_vm0, %v227_v13 }
 0x144   : > { %v512_v15 = vpop.f32.mrb[0].mxu0 }
 0x145   : > { %v518_v16 = vpop.f32.mrb[0].mxu1  ;;  %v336_v17 = vadd.f32 %v512_v15, %v478_v14  ;;  %v330_v19 = vpop.f32.mrb[1].mxu0 }
 0x146   : > { %v356_v18 = vadd.f32 %v518_v16, %v478_v14  ;;  %v350_v20 = vpop.f32.mrb[1].mxu1  ;;  %v331_v21 = vadd.f32 %v478_v14, %v330_v19 }
 0x147   : > { %v351_v22 = vadd.f32 %v478_v14, %v350_v20  ;;  %370 = vst.msk [vmem:[%s218_s7 + $0x8] sm:$0xff] %vm239_vm0, %v336_v17 }
 0x148   : > { %374 = vst.msk [vmem:[%s218_s7 + $0x28] sm:$0xff] %vm239_vm0, %v356_v18  ;;  %369 = vst.msk [vmem:[%s218_s7] sm:$0xff] %vm239_vm0, %v331_v21  ;;  %v515_v23 = vpop.f32.mrb[2].mxu0 }
 0x149   : > { %373 = vst.msk [vmem:[%s218_s7 + $0x20] sm:$0xff] %vm239_vm0, %v351_v22  ;;  %v521_v24 = vpop.f32.mrb[2].mxu1  ;;  %v346_v25 = vadd.f32 %v515_v23, %v478_v14  ;;  %v340_v27 = vpop.f32.mrb[3].mxu0 }
 0x14a   : > { %v366_v26 = vadd.f32 %v521_v24, %v478_v14  ;;  %v360_v28 = vpop.f32.mrb[3].mxu1  ;;  %v341_v29 = vadd.f32 %v478_v14, %v340_v27 }
 0x14b   : > { %v361_v30 = vadd.f32 %v478_v14, %v360_v28  ;;  %372 = vst.msk [vmem:[%s218_s7 + $0x18] sm:$0xff] %vm239_vm0, %v346_v25 }
 0x14c   : > { %376 = vst.msk [vmem:[%s218_s7 + $0x38] sm:$0xff] %vm239_vm0, %v366_v26  ;;  %371 = vst.msk [vmem:[%s218_s7 + $0x10] sm:$0xff] %vm239_vm0, %v341_v29 }
 0x14d   : > { %375 = vst.msk [vmem:[%s218_s7 + $0x30] sm:$0xff] %vm239_vm0, %v361_v30 }
 0x14e PF: > { %p14_p6 = scmp.ge.s32.totalorder %s847_s30, 4   ;;  %s974_s12 = smov %s712_s13 }
 0x14f   : > { %s975_s13 = smov %s716_s14  ;;  %s976_s14 = smov %s858_s8 }
 0x150   : > { %s977_s15 = smov %s847_s30  ;;  %16 = sbr.rel (!%p14_p6) target bundleno = 4 (0x4), region = 80 }
 0x157   :  { %399 = vsyncpa [#allocation3], 1 }
 0x158   :  { %401 = vsyncpa [#allocation3 + $0x1], 1 }
 0x159   :  { %402 = vsyncpa [#allocation5], 1 }

// kernel: outlook_attention_forward.5
= control target key start
LH: loop header
LB: loop body
LE: loop exit
PB: predicated region body
PF: predicated region fallthrough
CT: control target
= control target key end

     0   :  { %8 = vsyncpa [#allocation3], 0  ;;  %s736_s0 = inlined_call_operand.vmem [shape: f32[128,32], index: 0, kind: input, shape index: {}]   ;;  %s737_s1 = inlined_call_operand.vmem [shape: f32[32,32], index: 1, kind: input, shape index: {}]   ;;  %s738_s2 = inlined_call_operand.vmem [shape: f32[1,32], index: 2, kind: input, shape index: {}]   ;;  %s739_s3 = inlined_call_operand.hbm [shape: f32[128,32], index: 3, kind: output, shape index: {}]  }
   0x1   :  { %10 = vsyncpa [#allocation3 + $0x1], 0  ;;  %s599_s12 = smov 0   ;;  %s601_s13 = smov 0  }
   0x2   :  { %s603_s14 = smov 0   ;;  %s605_s15 = smov 0  }
   0x3 LB: > { %s620_s16 = sadd.s32 4294967295, %s574_s15   ;;  %s405_s17 = sadd.s32 4294967294, %s574_s15   ;;  %s574_s15 = sphi %s605_s15, %s745_s15   ;;  %s570_s14 = sphi %s603_s14, %s744_s14   ;;  %s566_s13 = sphi %s601_s13, %s743_s13   ;;  %s562_s12 = sphi %s599_s12, %s742_s12  }
   0x4   : > { %s624_s18 = sadd.s32 1, %s574_s15   ;;  %s91_s19 = sadd.s32 1, %s570_s14 }
   0x5   : > { %s88_s20 = ssub.s32 %s574_s15, %s624_s18  ;;  %p101_p0 = scmp.ne.s32.totalorder %s570_s14, %s566_s13 }
   0x6   : > { %p89_p1 = scmp.eq.s32.totalorder %s88_s20, 0  ;;  %p102_p2 = scmp.eq.s32.totalorder %s620_s16, 1 }
   0x7   : > { %p107_p3 = scmp.ne.s32.totalorder %s566_s13, %s562_s12  ;;  %p108_p4 = scmp.eq.s32.totalorder %s405_s17, 1 }
   0x8   : > { %s635_s21 = scalar_select %p89_p1, %s570_s14, %s91_s19  }
   0x9   : > { %p637_p5 = por %p102_p2, %p101_p0  ;;  %p641_p6 = por %p108_p4, %p107_p3 }
   0xa   : > { %p408_p7 = scmp.ge.s32.totalorder %s574_s15, 1  ;;  %p141_p8 = scmp.lt.s32.totalorder %s574_s15, 3 }
   0xc   : > { %p142_p9 = pnand %p408_p7, %p141_p8 }
   0xd   : > { %v180_v0 = vld [vmem:[%s737_s1] sm:$0xff] (!%p142_p9)  ;;  %v181_v1 = vld [vmem:[%s737_s1 + $0x8] sm:$0xff] (!%p142_p9)  ;;  %v182_v2 = vld [vmem:[%s737_s1 + $0x10] sm:$0xff] (!%p142_p9)  ;;  %s410_s30 = sshll.u32 (!%p142_p9), %s620_s16, 3  ;;  %vm191_vm0 = vcmask (!%p142_p9), 261120   ;;  %s162_s10 = sand.u32 (!%p142_p9), 1, %s566_s13  }
   0xe   : > { %145 = sbr.rel (%p142_p9) target bundleno = 261 (0x105), region = 32  ;;  %v459_v3 = vpack.c.bf16 (!%p142_p9), %v181_v1, %v180_v0  ;;  %v183_v4 = vld [vmem:[%s737_s1 + $0x18] sm:$0xff] (!%p142_p9)  ;;  %p166_p10 = scmp.lt.s32.totalorder (!%p142_p9), %s410_s30, 15  ;;  %v412_v14 = vld [vmem:[%s738_s2] ss:$0 sm:$0xff] (!%p142_p9) }
   0xf   : > { %v463_v5 = vpack.c.bf16 (!%p142_p9), %v183_v4, %v182_v2  ;;  %s409_s11 = sshll.u32 (!%p142_p9), %s162_s10, 6  ;;  %s426_s20 = sshll.u32 (!%p142_p9), %s620_s16, 10 }
  0x10   : > { %460 = vmatprep.subr.bf16.mxu0 (!%p142_p9), %v459_v3  ;;  %467 = vmatprep.subr.bf16.mxu1 (!%p142_p9), %v459_v3  ;;  %s164_s24 = scalar_lea.vmem (!%p142_p9), [#allocation2], %s409_s11  ;;  %s685_s27 = scalar_lea.hbm (!%p142_p9), %s739_s3, %s426_s20 }
  0x11   : > { %462 = vmatpush3.bf16.msra.mxu0 (!%p142_p9), %v459_v3  ;;  %469 = vmatpush3.bf16.msra.mxu1 (!%p142_p9), %v459_v3  ;;  %s343_s25 = sshll.u32 (!%p142_p9), %s164_s24, 4  ;;  %s695_s28 = scalar_lea.sflag (!%p142_p9), [#allocation3], %s162_s10  ;;  %s687_s25 = int_to_ptr.vmem [resolvable:$true] %s343_s25 }
  0x12   : > { %464 = vmatprep.subr.bf16.mxu0 (!%p142_p9), %v463_v5  ;;  %468 = vmatprep.subr.bf16.mxu1 (!%p142_p9), %v463_v5  ;;  %s512_s29 = scalar_lea.vmem (!%p142_p9), %s687_s25, 1024 }
  0x13   : > { %p513_p11 = scmp.ne.s32.totalorder (!%p142_p9), %s687_s25, %s512_s29 }
  0x15   : > { %s747_s30 = smov (!%p166_p10, %s410_s30), 15  ;;  %466 = vmatpush3.bf16.msra.mxu0 %v463_v5  ;;  %470 = vmatpush3.bf16.msra.mxu1 %v463_v5  ;;  %p514_p12 = pnand %p513_p11, %p637_p5 }
  0x16   : > { %s411_s6 = sshll.u32 %s747_s30, 3  ;;  %s576_s30 = smov [#allocation2]  }
  0x17   : > { %s169_s9 = scalar_lea.vmem %s736_s0, %s411_s6  ;;  %p515_p13 = pneg %p514_p12 }
  0x18   : > { %v172_v6 = vld [vmem:[%s169_s9] sm:$0xff]  ;;  %v173_v8 = vld [vmem:[%s169_s9 + $0x8] sm:$0xff]  ;;  %v174_v10 = vld [vmem:[%s169_s9 + $0x10] sm:$0xff]  ;;  %s516_s4 = sshll.u32 %s576_s30, 4  ;;  %s517_s4 = int_to_ptr.vmem [resolvable:$false] %s516_s4 }
  0x19   : > { %v176_v7 = vld [vmem:[%s169_s9 + $0x20] sm:$0xff]  ;;  %v177_v9 = vld [vmem:[%s169_s9 + $0x28] sm:$0xff]  ;;  %447 = vmatprep.mubr.msk.f32.mxu0 %vm191_vm0, %v172_v6  ;;  %v178_v11 = vld [vmem:[%s169_s9 + $0x30] sm:$0xff]  ;;  %s518_s5 = scalar_lea.vmem %s517_s4, 2048  ;;  %p519_p0 = scmp.lt.s32.totalorder %s687_s25, %s517_s4 }
  0x1a   : > { %453 = vmatprep.mubr.msk.f32.mxu1 %vm191_vm0, %v176_v7  ;;  %448 = vmatmul.mubr.msk.f32.vlgmr.msra.gmra.mrb[0].mxu0 %vm191_vm0, %v173_v8  ;;  %v175_v12 = vld [vmem:[%s169_s9 + $0x18] sm:$0xff]  ;;  %p520_p1 = scmp.lt.s32.totalorder %s518_s5, %s512_s29 }
  0x1b   : > { %454 = vmatmul.mubr.msk.f32.vlgmr.msra.gmra.mrb[0].mxu1 %vm191_vm0, %v177_v9  ;;  %450 = vmatprep.mubr.msk.f32.mxu0 %vm191_vm0, %v174_v10  ;;  %v179_v13 = vld [vmem:[%s169_s9 + $0x38] sm:$0xff] }
  0x1c   : > { %456 = vmatprep.mubr.msk.f32.mxu1 %vm191_vm0, %v178_v11  ;;  %p521_p2 = por %p520_p1, %p519_p0 }
  0x1e   : > { %451 = vmatmul.mubr.msk.f32.gmra.mrb[2].mxu0 %vm191_vm0, %v175_v12  ;;  %p522_p3 = pnand %p521_p2, %p515_p13 }
  0x1f   : > { %457 = vmatmul.mubr.msk.f32.gmra.mrb[2].mxu1 %vm191_vm0, %v179_v13 }
  0xed   : > { %v449_v15 = vpop.f32.mrb[0].mxu0 }
  0xee   : > { %v455_v16 = vpop.f32.mrb[0].mxu1  ;;  %v288_v17 = vadd.f32 %v449_v15, %v412_v14  ;;  %v282_v19 = vpop.f32.mrb[1].mxu0 }
  0xef   : > { %v308_v18 = vadd.f32 %v455_v16, %v412_v14  ;;  %v302_v20 = vpop.f32.mrb[1].mxu1  ;;  %v283_v21 = vadd.f32 %v412_v14, %v282_v19 }
  0xf0   : > { %v303_v22 = vadd.f32 %v412_v14, %v302_v20  ;;  %322 = vst.msk [vmem:[%s164_s24 + $0x8] sm:$0xff] %vm191_vm0, %v288_v17 }
  0xf1   : > { %326 = vst.msk [vmem:[%s164_s24 + $0x28] sm:$0xff] %vm191_vm0, %v308_v18  ;;  %321 = vst.msk [vmem:[%s164_s24] sm:$0xff] %vm191_vm0, %v283_v21  ;;  %v452_v23 = vpop.f32.mrb[2].mxu0 }
  0xf2   : > { %325 = vst.msk [vmem:[%s164_s24 + $0x20] sm:$0xff] %vm191_vm0, %v303_v22  ;;  %v458_v24 = vpop.f32.mrb[2].mxu1  ;;  %v298_v25 = vadd.f32 %v452_v23, %v412_v14  ;;  %v292_v27 = vpop.f32.mrb[3].mxu0 }
  0xf3   : > { %v318_v26 = vadd.f32 %v458_v24, %v412_v14  ;;  %v312_v28 = vpop.f32.mrb[3].mxu1  ;;  %v293_v29 = vadd.f32 %v412_v14, %v292_v27 }
  0xf4   : > { %v313_v30 = vadd.f32 %v412_v14, %v312_v28  ;;  %324 = vst.msk [vmem:[%s164_s24 + $0x18] sm:$0xff] %vm191_vm0, %v298_v25 }
  0xf5   : > { %328 = vst.msk [vmem:[%s164_s24 + $0x38] sm:$0xff] %vm191_vm0, %v318_v26  ;;  %323 = vst.msk [vmem:[%s164_s24 + $0x10] sm:$0xff] %vm191_vm0, %v293_v29 }
  0xf6   : > { %327 = vst.msk [vmem:[%s164_s24 + $0x30] sm:$0xff] %vm191_vm0, %v313_v30 }
  0xf7   : > { %525 = shalt.err (!%p522_p3)
}
  0xf8   : > { %s526_s6 = scalar_lea.hbm %s685_s27, 1024  ;;  %s530_s9 = scalar_lea.hbm %s739_s3, 2048 }
  0xf9   : > { %p527_p4 = scmp.ne.s32.totalorder %s685_s27, %s526_s6  ;;  %p531_p9 = scmp.lt.u32.totalorder %s685_s27, %s739_s3 }
  0xfa   : > { %p532_p10 = scmp.lt.u32.totalorder %s530_s9, %s526_s6  ;;  %p534_p12 = scmp.lt.u32.totalorder %s526_s6, %s685_s27 }
  0xfb   : > { %p528_p7 = pnand %p527_p4, %p637_p5 }
  0xfc   : > { %p533_p11 = por %p532_p10, %p531_p9 }
  0xfd   : > { %p529_p8 = pneg %p528_p7 }
  0xfe   : > { %p535_p13 = por %p534_p12, %p533_p11 }
 0x100   : > { %p536_p0 = pnand %p535_p13, %p529_p8 }
 0x102   : > { %539 = shalt.err (!%p536_p0)
}
 0x103   : > { %s577_s17 = smov 128   ;;  %s578_s19 = smov 8  }
 0x104   : > { %471 = dma.vmem_to_hbm [thread:$0]  (%p637_p5), %s687_s25, 1024, %s685_s27, %s695_s28, %s577_s17, %s577_s17, %s578_s19  }
 0x105 PF: > { %p477_p1 = scmp.ge.s32.totalorder %s574_s15, 2  ;;  %s358_s20 = sand.u32 1, %s562_s12  }
 0x106   : > { %s359_s24 = scalar_lea.sflag [#allocation3], %s358_s20 }
 0x107   : > { %p474_p2 = pnand %p477_p1, %p641_p6 }
 0x109   : > { %557 = dma.done.wait (!%p474_p2), %s359_s24, 1024  }
 0x10a   : > { %559 = vsyncadd (!%p474_p2), %s359_s24, 4294966272  ;;  %p13_p3 = scmp.ge.s32.totalorder %s624_s18, 4   ;;  %s742_s12 = smov %s566_s13 }
 0x10b   : > { %s743_s13 = smov %s570_s14  ;;  %s744_s14 = smov %s635_s21 }
 0x10c   : > { %s745_s15 = smov %s624_s18  ;;  %15 = sbr.rel (!%p13_p3) target bundleno = 3 (0x3), region = 67 }
 0x113   :  { %364 = vsyncpa [#allocation3], 1 }
 0x114   :  { %366 = vsyncpa [#allocation3 + $0x1], 1 }

// kernel: outlook_attention_forward.4
= control target key start
LH: loop header
LB: loop body
LE: loop exit
PB: predicated region body
PF: predicated region fallthrough
CT: control target
= control target key end

     0   :  { %v3336_v0 = vmov 0   ;;  %vm273_vm0 = vcmask 261120   ;;  %s5332_s2 = inlined_call_operand.vmem [shape: f32[288,1], index: 2, kind: input, shape index: {}]   ;;  %s5333_s0 = inlined_call_operand.vmem [shape: f32[32,128], index: 0, kind: input, shape index: {}]   ;;  %s5334_s1 = inlined_call_operand.vmem [shape: f32[288,32], index: 1, kind: input, shape index: {}]   ;;  %s5335_s3 = inlined_call_operand.vmem [shape: f32[2,9,16,128], index: 3, kind: input, shape index: {}]   ;;  %s5336_s4 = inlined_call_operand.vmem [shape: f32[2,9,16,128], index: 4, kind: output, shape index: {}]  }
   0x1   :  { %3227 = vset.pattern.permute.xlu1 %v3336_v0  ;;  %3226 = vset.pattern.permute.xlu0 %v3336_v0  ;;  %v59_v1 = vld [vmem:[%s5332_s2 + $0x10] sm:$0xff]  ;;  %v57_v2 = vld [vmem:[%s5332_s2] sm:$0xff]  ;;  %v18_v4 = vld [vmem:[%s5333_s0 + $0x8] sm:$0xff] }
   0x2   :  { %v17_v3 = vld [vmem:[%s5333_s0] sm:$0xff]  ;;  %105 = vperm.xlu1 %3227, %v59_v1   ;;  %95 = vperm.xlu0 %3226, %v57_v2   ;;  %v19_v6 = vld [vmem:[%s5333_s0 + $0x10] sm:$0xff]  ;;  %v20_v7 = vld [vmem:[%s5333_s0 + $0x18] sm:$0xff] }
   0x3   :  { %v3213_v5 = vpack.c.bf16 %v18_v4, %v17_v3  ;;  %v60_v8 = vld [vmem:[%s5332_s2 + $0x18] sm:$0xff]  ;;  %v58_v9 = vld [vmem:[%s5332_s2 + $0x8] sm:$0xff]  ;;  %v3217_v10 = vpack.c.bf16 %v20_v7, %v19_v6  ;;  %v21_v11 = vld [vmem:[%s5334_s1] sm:$0xff] }
   0x4   :  { %v39_v12 = vld [vmem:[%s5334_s1 + $0x90] sm:$0xff]  ;;  %v62_v13 = vld [vmem:[%s5332_s2 + $0x28] sm:$0xff]  ;;  %v61_v14 = vld [vmem:[%s5332_s2 + $0x20] sm:$0xff]  ;;  %3159 = vmatprep.mubr.msk.f32.mxu0 %vm273_vm0, %v21_v11 }
   0x5   :  { %3214 = vmatprep.subr.bf16.mxu0 %v3213_v5  ;;  %3221 = vmatprep.subr.bf16.mxu1 %v3213_v5  ;;  %v22_v15 = vld [vmem:[%s5334_s1 + $0x8] sm:$0xff]  ;;  %v40_v16 = vld [vmem:[%s5334_s1 + $0x98] sm:$0xff]  ;;  %v23_v17 = vld [vmem:[%s5334_s1 + $0x10] sm:$0xff] }
   0x6   :  { %3216 = vmatpush3.bf16.msra.mxu0 %v3213_v5  ;;  %3223 = vmatpush3.bf16.msra.mxu1 %v3213_v5  ;;  %v41_v18 = vld [vmem:[%s5334_s1 + $0xa0] sm:$0xff]  ;;  %v64_v19 = vld [vmem:[%s5332_s2 + $0x38] sm:$0xff]  ;;  %v63_v20 = vld [vmem:[%s5332_s2 + $0x30] sm:$0xff] }
   0x7   :  { %110 = vperm.xlu1 %3227, %v60_v8   ;;  %100 = vperm.xlu0 %3226, %v58_v9   ;;  %v24_v21 = vld [vmem:[%s5334_s1 + $0x18] sm:$0xff]  ;;  %v42_v22 = vld [vmem:[%s5334_s1 + $0xa8] sm:$0xff]  ;;  %v25_v23 = vld [vmem:[%s5334_s1 + $0x20] sm:$0xff] }
   0x8   :  { %3218 = vmatprep.subr.bf16.mxu0 %v3217_v10  ;;  %3222 = vmatprep.subr.bf16.mxu1 %v3217_v10  ;;  %v43_v24 = vld [vmem:[%s5334_s1 + $0xb0] sm:$0xff]  ;;  %v66_v25 = vld [vmem:[%s5332_s2 + $0x48] sm:$0xff]  ;;  %v65_v26 = vld [vmem:[%s5332_s2 + $0x40] sm:$0xff] }
   0x9   :  { %3186 = vmatprep.mubr.msk.f32.mxu1 %vm273_vm0, %v39_v12  ;;  %v26_v27 = vld [vmem:[%s5334_s1 + $0x28] sm:$0xff]  ;;  %v44_v28 = vld [vmem:[%s5334_s1 + $0xb8] sm:$0xff]  ;;  %v27_v29 = vld [vmem:[%s5334_s1 + $0x30] sm:$0xff] }
   0xa   :  { %3220 = vmatpush3.bf16.msra.mxu0 %v3217_v10  ;;  %3224 = vmatpush3.bf16.msra.mxu1 %v3217_v10  ;;  %v45_v30 = vld [vmem:[%s5334_s1 + $0xc0] sm:$0xff]  ;;  %v68_v31 = vld [vmem:[%s5332_s2 + $0x58] sm:$0xff]  ;;  %v67_v32 = vld [vmem:[%s5332_s2 + $0x50] sm:$0xff] }
   0xb   :  { %120 = vperm.xlu1 %3227, %v62_v13   ;;  %115 = vperm.xlu0 %3226, %v61_v14   ;;  %v28_v33 = vld [vmem:[%s5334_s1 + $0x38] sm:$0xff]  ;;  %v46_v34 = vld [vmem:[%s5334_s1 + $0xc8] sm:$0xff]  ;;  %v29_v35 = vld [vmem:[%s5334_s1 + $0x40] sm:$0xff] }
   0xc   :  { %v47_v36 = vld [vmem:[%s5334_s1 + $0xd0] sm:$0xff]  ;;  %v70_v37 = vld [vmem:[%s5332_s2 + $0x68] sm:$0xff]  ;;  %v69_v38 = vld [vmem:[%s5332_s2 + $0x60] sm:$0xff] }
   0xd   :  { %3160 = vmatmul.mubr.msk.f32.vlgmr.msra.gmra.mrb[0].mxu0 %vm273_vm0, %v22_v15  ;;  %3187 = vmatmul.mubr.msk.f32.vlgmr.msra.gmra.mrb[0].mxu1 %vm273_vm0, %v40_v16  ;;  %v30_v39 = vld [vmem:[%s5334_s1 + $0x48] sm:$0xff]  ;;  %v48_v40 = vld [vmem:[%s5334_s1 + $0xd8] sm:$0xff]  ;;  %v31_v41 = vld [vmem:[%s5334_s1 + $0x50] sm:$0xff] }
   0xe   :  { %3162 = vmatprep.mubr.msk.f32.mxu0 %vm273_vm0, %v23_v17  ;;  %3189 = vmatprep.mubr.msk.f32.mxu1 %vm273_vm0, %v41_v18  ;;  %v49_v42 = vld [vmem:[%s5334_s1 + $0xe0] sm:$0xff]  ;;  %v72_v43 = vld [vmem:[%s5332_s2 + $0x78] sm:$0xff]  ;;  %v71_v44 = vld [vmem:[%s5332_s2 + $0x70] sm:$0xff] }
   0xf   :  { %130 = vperm.xlu1 %3227, %v64_v19   ;;  %125 = vperm.xlu0 %3226, %v63_v20   ;;  %v32_v45 = vld [vmem:[%s5334_s1 + $0x58] sm:$0xff]  ;;  %v50_v46 = vld [vmem:[%s5334_s1 + $0xe8] sm:$0xff]  ;;  %v33_v47 = vld [vmem:[%s5334_s1 + $0x60] sm:$0xff] }
  0x10   :  { %v51_v48 = vld [vmem:[%s5334_s1 + $0xf0] sm:$0xff]  ;;  %v74_v49 = vld [vmem:[%s5332_s2 + $0x88] sm:$0xff]  ;;  %v73_v50 = vld [vmem:[%s5332_s2 + $0x80] sm:$0xff] }
  0x11   :  { %3163 = vmatmul.mubr.msk.f32.gmra.mrb[2].mxu0 %vm273_vm0, %v24_v21  ;;  %3190 = vmatmul.mubr.msk.f32.gmra.mrb[2].mxu1 %vm273_vm0, %v42_v22  ;;  %v34_v51 = vld [vmem:[%s5334_s1 + $0x68] sm:$0xff]  ;;  %v52_v52 = vld [vmem:[%s5334_s1 + $0xf8] sm:$0xff]  ;;  %v35_v53 = vld [vmem:[%s5334_s1 + $0x70] sm:$0xff] }
  0x12   :  { %3165 = vmatprep.mubr.msk.f32.mxu0 %vm273_vm0, %v25_v23  ;;  %3192 = vmatprep.mubr.msk.f32.mxu1 %vm273_vm0, %v43_v24  ;;  %v53_v54 = vld [vmem:[%s5334_s1 + $0x100] sm:$0xff]  ;;  %v76_v55 = vld [vmem:[%s5332_s2 + $0x98] sm:$0xff]  ;;  %v75_v56 = vld [vmem:[%s5332_s2 + $0x90] sm:$0xff] }
  0x13   :  { %140 = vperm.xlu1 %3227, %v66_v25   ;;  %135 = vperm.xlu0 %3226, %v65_v26   ;;  %v36_v57 = vld [vmem:[%s5334_s1 + $0x78] sm:$0xff]  ;;  %v54_v58 = vld [vmem:[%s5334_s1 + $0x108] sm:$0xff]  ;;  %v37_v59 = vld [vmem:[%s5334_s1 + $0x80] sm:$0xff] }
  0x14   :  { %v55_v60 = vld [vmem:[%s5334_s1 + $0x110] sm:$0xff]  ;;  %v78_v61 = vld [vmem:[%s5332_s2 + $0xa8] sm:$0xff]  ;;  %v77_v62 = vld [vmem:[%s5332_s2 + $0xa0] sm:$0xff] }
  0x15   :  { %3166 = vmatmul.mubr.msk.f32.gmra.mrb[4].mxu0 %vm273_vm0, %v26_v27  ;;  %3193 = vmatmul.mubr.msk.f32.gmra.mrb[4].mxu1 %vm273_vm0, %v44_v28  ;;  %v38_v63 = vld [vmem:[%s5334_s1 + $0x88] sm:$0xff]  ;;  %v56_v0 = vld [vmem:[%s5334_s1 + $0x118] sm:$0xff]  ;;  %v79_v2 = vld [vmem:[%s5332_s2 + $0xb0] sm:$0xff] }
  0x16   :  { %3168 = vmatprep.mubr.msk.f32.mxu0 %vm273_vm0, %v27_v29  ;;  %3195 = vmatprep.mubr.msk.f32.mxu1 %vm273_vm0, %v45_v30  ;;  %v80_v1 = vld [vmem:[%s5332_s2 + $0xb8] sm:$0xff]  ;;  %v82_v3 = vld [vmem:[%s5332_s2 + $0xc8] sm:$0xff]  ;;  %v81_v4 = vld [vmem:[%s5332_s2 + $0xc0] sm:$0xff] }
  0x17   :  { %150 = vperm.xlu1 %3227, %v68_v31   ;;  %145 = vperm.xlu0 %3226, %v67_v32   ;;  %v84_v5 = vld [vmem:[%s5332_s2 + $0xd8] sm:$0xff]  ;;  %v83_v6 = vld [vmem:[%s5332_s2 + $0xd0] sm:$0xff]  ;;  %v86_v7 = vld [vmem:[%s5332_s2 + $0xe8] sm:$0xff] }
  0x18   :  { %v85_v8 = vld [vmem:[%s5332_s2 + $0xe0] sm:$0xff]  ;;  %v88_v9 = vld [vmem:[%s5332_s2 + $0xf8] sm:$0xff]  ;;  %v87_v10 = vld [vmem:[%s5332_s2 + $0xf0] sm:$0xff] }
  0x19   :  { %3169 = vmatmul.mubr.msk.f32.gmra.mrb[6].mxu0 %vm273_vm0, %v28_v33  ;;  %3196 = vmatmul.mubr.msk.f32.gmra.mrb[6].mxu1 %vm273_vm0, %v46_v34  ;;  %v90_v11 = vld [vmem:[%s5332_s2 + $0x108] sm:$0xff]  ;;  %v89_v12 = vld [vmem:[%s5332_s2 + $0x100] sm:$0xff]  ;;  %v92_v13 = vld [vmem:[%s5332_s2 + $0x118] sm:$0xff]  ;;  %v688_v34 = vlaneseq }
  0x1a   :  { %3171 = vmatprep.mubr.msk.f32.mxu0 %vm273_vm0, %v29_v35  ;;  %3198 = vmatprep.mubr.msk.f32.mxu1 %vm273_vm0, %v47_v36  ;;  %v91_v14 = vld [vmem:[%s5332_s2 + $0x110] sm:$0xff] }
  0x1b   :  { %160 = vperm.xlu1 %3227, %v70_v37   ;;  %155 = vperm.xlu0 %3226, %v69_v38  }
  0x1d   :  { %3172 = vmatmul.mubr.msk.f32.gmra.mrb[8].mxu0 %vm273_vm0, %v30_v39  ;;  %3199 = vmatmul.mubr.msk.f32.gmra.mrb[8].mxu1 %vm273_vm0, %v48_v40  ;;  %v689_v39 = vshrl.u32 %v688_v34, 7 }
  0x1e   :  { %3174 = vmatprep.mubr.msk.f32.mxu0 %vm273_vm0, %v31_v41  ;;  %3201 = vmatprep.mubr.msk.f32.mxu1 %vm273_vm0, %v49_v42 }
  0x1f   :  { %170 = vperm.xlu1 %3227, %v72_v43   ;;  %165 = vperm.xlu0 %3226, %v71_v44  }
  0x21   :  { %3175 = vmatmul.mubr.msk.f32.gmra.mrb[10].mxu0 %vm273_vm0, %v32_v45  ;;  %3202 = vmatmul.mubr.msk.f32.gmra.mrb[10].mxu1 %vm273_vm0, %v50_v46 }
  0x22   :  { %3177 = vmatprep.mubr.msk.f32.mxu0 %vm273_vm0, %v33_v47  ;;  %3204 = vmatprep.mubr.msk.f32.mxu1 %vm273_vm0, %v51_v48 }
  0x23   :  { %180 = vperm.xlu1 %3227, %v74_v49   ;;  %175 = vperm.xlu0 %3226, %v73_v50  }
  0x25   :  { %3178 = vmatmul.mubr.msk.f32.gmra.mrb[12].mxu0 %vm273_vm0, %v34_v51  ;;  %3205 = vmatmul.mubr.msk.f32.gmra.mrb[12].mxu1 %vm273_vm0, %v52_v52  ;;  %v3658_v51 = vsub.s32 0, %v689_v39  ;;  %v3660_v52 = vsub.s32 1, %v689_v39 }
  0x26   :  { %3180 = vmatprep.mubr.msk.f32.mxu0 %vm273_vm0, %v35_v53  ;;  %3207 = vmatprep.mubr.msk.f32.mxu1 %vm273_vm0, %v53_v54 }
  0x27   :  { %190 = vperm.xlu1 %3227, %v76_v55   ;;  %185 = vperm.xlu0 %3226, %v75_v56   ;;  %v3664_v56 = vsub.s32 2, %v689_v39 }
  0x29   :  { %3181 = vmatmul.mubr.msk.f32.gmra.mrb[14].mxu0 %vm273_vm0, %v36_v57  ;;  %3208 = vmatmul.mubr.msk.f32.gmra.mrb[14].mxu1 %vm273_vm0, %v54_v58  ;;  %v3666_v57 = vsub.s32 3, %v689_v39 }
  0x2a   :  { %3183 = vmatprep.mubr.msk.f32.mxu0 %vm273_vm0, %v37_v59  ;;  %3210 = vmatprep.mubr.msk.f32.mxu1 %vm273_vm0, %v55_v60 }
  0x2b   :  { %200 = vperm.xlu1 %3227, %v78_v61   ;;  %195 = vperm.xlu0 %3226, %v77_v62  }
  0x2d   :  { %3184 = vmatmul.mubr.msk.f32.gmra.mrb[16].mxu0 %vm273_vm0, %v38_v63  ;;  %3211 = vmatmul.mubr.msk.f32.gmra.mrb[16].mxu1 %vm273_vm0, %v56_v0 }
  0x2f   :  { %210 = vperm.xlu1 %3227, %v80_v1   ;;  %205 = vperm.xlu0 %3226, %v79_v2   ;;  %v3672_v2 = vsub.s32 4, %v689_v39 }
  0x33   :  { %220 = vperm.xlu1 %3227, %v82_v3   ;;  %215 = vperm.xlu0 %3226, %v81_v4   ;;  %v3674_v3 = vsub.s32 5, %v689_v39 }
  0x37   :  { %230 = vperm.xlu1 %3227, %v84_v5   ;;  %225 = vperm.xlu0 %3226, %v83_v6  }
  0x3b   :  { %240 = vperm.xlu1 %3227, %v86_v7   ;;  %235 = vperm.xlu0 %3226, %v85_v8  }
  0x3f   :  { %250 = vperm.xlu1 %3227, %v88_v9   ;;  %245 = vperm.xlu0 %3226, %v87_v10  }
  0x43   :  { %260 = vperm.xlu1 %3227, %v90_v11   ;;  %255 = vperm.xlu0 %3226, %v89_v12   ;;  %v3684_v12 = vsub.s32 6, %v689_v39 }
  0x47   :  { %270 = vperm.xlu1 %3227, %v92_v13   ;;  %265 = vperm.xlu0 %3226, %v91_v14   ;;  %v3686_v13 = vsub.s32 7, %v689_v39 }
  0x49   :  { %5479 = vst [vmem:[#allocation8_spill] sm:$0xff] %v3686_v13 }
  0x81   :  { %v106_v15 = vpop.permute.xlu1 %105  ;;  %v96_v16 = vpop.permute.xlu0 %95 }
  0x86   :  { %v111_v17 = vpop.permute.xlu1 %110  ;;  %v101_v18 = vpop.permute.xlu0 %100 }
  0x8a   :  { %v121_v19 = vpop.permute.xlu1 %120  ;;  %v3626_v20 = vpop.permute.xlu0 %115 }
  0x8e   :  { %v3628_v21 = vpop.permute.xlu1 %130  ;;  %v3630_v22 = vpop.permute.xlu0 %125 }
  0x92   :  { %v3632_v23 = vpop.permute.xlu1 %140  ;;  %v3634_v24 = vpop.permute.xlu0 %135 }
  0x96   :  { %v3636_v25 = vpop.permute.xlu1 %150  ;;  %v3638_v26 = vpop.permute.xlu0 %145 }
  0x9a   :  { %v3640_v27 = vpop.permute.xlu1 %160  ;;  %v3642_v28 = vpop.permute.xlu0 %155 }
  0x9b   :  { %5473 = vst [vmem:[#allocation2_spill] sm:$0xff] %v3640_v27  ;;  %5474 = vst [vmem:[#allocation3_spill] sm:$0xff] %v3642_v28 }
  0x9e   :  { %v3644_v29 = vpop.permute.xlu1 %170  ;;  %v3646_v30 = vpop.permute.xlu0 %165 }
  0x9f   :  { %5475 = vst [vmem:[#allocation4_spill] sm:$0xff] %v3644_v29  ;;  %5476 = vst [vmem:[#allocation5_spill] sm:$0xff] %v3646_v30  ;;  %v3942_v30 = vld [vmem:[%s5335_s3 + $0x70] sm:$0xff]  ;;  %v3947_v29 = vld [vmem:[%s5335_s3 + $0x78] sm:$0xff] }
  0xa0   :  { %5503 = vst [vmem:[#allocation32_spill] sm:$0xff] %v3947_v29 }
  0xa2   :  { %v3648_v31 = vpop.permute.xlu1 %180  ;;  %v3650_v32 = vpop.permute.xlu0 %175 }
  0xa3   :  { %5477 = vst [vmem:[#allocation6_spill] sm:$0xff] %v3648_v31  ;;  %5478 = vst [vmem:[#allocation7_spill] sm:$0xff] %v3650_v32 }
  0xa6   :  { %v191_v33 = vpop.permute.xlu1 %190  ;;  %v186_v35 = vpop.permute.xlu0 %185 }
  0xaa   :  { %v201_v36 = vpop.permute.xlu1 %200  ;;  %v196_v46 = vpop.permute.xlu0 %195 }
  0xae   :  { %v211_v47 = vpop.permute.xlu1 %210 }
  0xe0   :  { %v3161_v37 = vpop.f32.mrb[0].mxu0  ;;  %v3188_v38 = vpop.f32.mrb[0].mxu1 }
  0xe1   :  { %v454_v40 = vadd.f32 %v3161_v37, %v101_v18  ;;  %v544_v41 = vadd.f32 %v3188_v38, %v191_v33  ;;  %v448_v42 = vpop.f32.mrb[1].mxu0  ;;  %v538_v43 = vpop.f32.mrb[1].mxu1 }
  0xe2   :  { %v449_v44 = vadd.f32 %v448_v42, %v96_v16  ;;  %v539_v45 = vadd.f32 %v538_v43, %v186_v35  ;;  %v206_v18 = vpop.permute.xlu0 %205  ;;  %v221_v37 = vpop.permute.xlu1 %220 }
  0xe3   :  { %v3652_v48 = vmul.f32 0.25, %v454_v40  ;;  %v3654_v49 = vmul.f32 0.25, %v544_v41 }
  0xe4   :  { %v3656_v50 = vmul.f32 0.25, %v449_v44  ;;  %v3662_v53 = vmul.f32 0.25, %v539_v45  ;;  %v3164_v54 = vpop.f32.mrb[2].mxu0  ;;  %v3191_v55 = vpop.f32.mrb[2].mxu1 }
  0xe5   :  { %v464_v58 = vadd.f32 %v3164_v54, %v111_v17  ;;  %v554_v59 = vadd.f32 %v3191_v55, %v201_v36  ;;  %v458_v60 = vpop.f32.mrb[3].mxu0  ;;  %v548_v61 = vpop.f32.mrb[3].mxu1 }
  0xe6   :  { %v663_v62 = vmax.f32 %v3656_v50, %v3652_v48  ;;  %v1696_v63 = vmax.f32 %v3662_v53, %v3654_v49  ;;  %v459_v0 = vadd.f32 %v458_v60, %v106_v15  ;;  %v549_v1 = vadd.f32 %v548_v61, %v196_v46 }
  0xe7   :  { %v3676_v4 = vmul.f32 0.25, %v464_v58  ;;  %v3678_v5 = vmul.f32 0.25, %v554_v59 }
  0xe8   :  { %v664_v6 = vrot.slane %v663_v62, 4  ;;  %v1697_v7 = vrot.slane %v1696_v63, 4  ;;  %v3680_v8 = vmul.f32 0.25, %v459_v0  ;;  %v3682_v9 = vmul.f32 0.25, %v549_v1  ;;  %v3167_v10 = vpop.f32.mrb[4].mxu0  ;;  %v3194_v11 = vpop.f32.mrb[4].mxu1 }
  0xe9   :  { %v474_v14 = vadd.f32 %v3167_v10, %v121_v19  ;;  %v564_v15 = vadd.f32 %v3194_v11, %v211_v47  ;;  %v468_v16 = vpop.f32.mrb[5].mxu0  ;;  %v558_v17 = vpop.f32.mrb[5].mxu1 }
  0xea   :  { %v665_v33 = vmax.f32 %v663_v62, %v664_v6  ;;  %v1698_v34 = vmax.f32 %v1696_v63, %v1697_v7  ;;  %v784_v35 = vmax.f32 %v3680_v8, %v3676_v4  ;;  %v1819_v36 = vmax.f32 %v3682_v9, %v3678_v5  ;;  %v216_v10 = vpop.permute.xlu0 %215 }
  0xeb   :  { %v3692_v38 = vmul.f32 0.25, %v474_v14  ;;  %v3694_v40 = vmul.f32 0.25, %v564_v15  ;;  %v469_v39 = vadd.f32 %v468_v16, %v3626_v20  ;;  %v559_v19 = vadd.f32 %v558_v17, %v206_v18 }
  0xec   :  { %v666_v41 = vrot.slane %v665_v33, 2  ;;  %v1699_v42 = vrot.slane %v1698_v34, 2  ;;  %v785_v43 = vrot.slane %v784_v35, 4  ;;  %v1820_v44 = vrot.slane %v1819_v36, 4  ;;  %v3170_v45 = vpop.f32.mrb[6].mxu0  ;;  %v3197_v46 = vpop.f32.mrb[6].mxu1 }
  0xed   :  { %v3697_v47 = vmul.f32 0.25, %v469_v39  ;;  %v3699_v54 = vmul.f32 0.25, %v559_v19  ;;  %v484_v55 = vadd.f32 %v3170_v45, %v3628_v21  ;;  %v574_v58 = vadd.f32 %v3197_v46, %v221_v37  ;;  %v478_v59 = vpop.f32.mrb[7].mxu0  ;;  %v568_v60 = vpop.f32.mrb[7].mxu1 }
  0xee   :  { %v667_v61 = vmax.f32 %v665_v33, %v666_v41  ;;  %v1700_v62 = vmax.f32 %v1698_v34, %v1699_v42  ;;  %v786_v63 = vmax.f32 %v784_v35, %v785_v43  ;;  %v1821_v20 = vmax.f32 %v1819_v36, %v1820_v44 }
  0xef   :  { %v898_v0 = vmax.f32 %v3697_v47, %v3692_v38  ;;  %v1933_v1 = vmax.f32 %v3699_v54, %v3694_v40  ;;  %v3706_v6 = vmul.f32 0.25, %v484_v55  ;;  %v3708_v7 = vmul.f32 0.25, %v574_v58 }
  0xf0   :  { %v668_v11 = vrot.slane %v667_v61, 1  ;;  %v1701_v21 = vrot.slane %v1700_v62, 1  ;;  %v787_v14 = vrot.slane %v786_v63, 2  ;;  %v1822_v15 = vrot.slane %v1821_v20, 2  ;;  %v3173_v34 = vpop.f32.mrb[8].mxu0  ;;  %v3200_v35 = vpop.f32.mrb[8].mxu1 }
  0xf1   :  { %v899_v16 = vrot.slane %v898_v0, 4  ;;  %v1934_v17 = vrot.slane %v1933_v1, 4  ;;  %v479_v18 = vadd.f32 %v478_v59, %v3630_v22  ;;  %v569_v33 = vadd.f32 %v568_v60, %v216_v10  ;;  %v3711_v41 = vpop.f32.mrb[9].mxu0  ;;  %v3713_v42 = vpop.f32.mrb[9].mxu1 }
  0xf2   :  { %v669_v36 = vmax.f32 %v667_v61, %v668_v11  ;;  %v1702_v37 = vmax.f32 %v1700_v62, %v1701_v21  ;;  %v788_v39 = vmax.f32 %v786_v63, %v787_v14  ;;  %v1823_v19 = vmax.f32 %v1821_v20, %v1822_v15 }
  0xf3   :  { %v900_v43 = vmax.f32 %v898_v0, %v899_v16  ;;  %v1935_v44 = vmax.f32 %v1933_v1, %v1934_v17  ;;  %v3715_v45 = vmul.f32 0.25, %v479_v18  ;;  %v3717_v46 = vmul.f32 0.25, %v569_v33 }
  0xf4   :  { %v670_v55 = vsub.f32 %v3656_v50, %v669_v36  ;;  %v671_v22 = vsub.f32 %v3652_v48, %v669_v36  ;;  %v1703_v58 = vsub.f32 %v3662_v53, %v1702_v37  ;;  %v1704_v59 = vsub.f32 %v3654_v49, %v1702_v37  ;;  %v3723_v60 = vpop.f32.mrb[10].mxu0  ;;  %v3725_v61 = vpop.f32.mrb[10].mxu1 }
  0xf5   :  { %v789_v62 = vrot.slane %v788_v39, 1  ;;  %v1824_v63 = vrot.slane %v1823_v19, 1  ;;  %v901_v20 = vrot.slane %v900_v43, 2  ;;  %v1936_v0 = vrot.slane %v1935_v44, 2  ;;  %v3729_v15 = vpop.f32.mrb[11].mxu0 }
  0xf6   :  { %v672_v1 = vmul.f32 1.442695, %v670_v55  ;;  %v674_v10 = vmul.f32 1.442695, %v671_v22  ;;  %v1705_v11 = vmul.f32 1.442695, %v1703_v58  ;;  %v1012_v50 = vmax.f32 %v3715_v45, %v3706_v6  ;;  %v231_v22 = vpop.permute.xlu1 %230 }
  0xf7   :  { %v1707_v21 = vmul.f32 1.442695, %v1704_v59  ;;  %v790_v48 = vmax.f32 %v788_v39, %v789_v62  ;;  %v1825_v14 = vmax.f32 %v1823_v19, %v1824_v63  ;;  %v902_v53 = vmax.f32 %v900_v43, %v901_v20 }
  0xf8   :  { %3228 = vpow2.f32 %v672_v1  ;;  %v1937_v49 = vmax.f32 %v1935_v44, %v1936_v0  ;;  %v1013_v16 = vrot.slane %v1012_v50, 4  ;;  %v2047_v17 = vmax.f32 %v3717_v46, %v3708_v7 }
  0xf9   :  { %3230 = vpow2.f32 %v674_v10  ;;  %v791_v18 = vsub.f32 %v3680_v8, %v790_v48  ;;  %v792_v33 = vsub.f32 %v3676_v4, %v790_v48  ;;  %v1826_v36 = vsub.f32 %v3682_v9, %v1825_v14 }
  0xfa   :  { %3232 = vpow2.f32 %v1705_v11  ;;  %v1827_v37 = vsub.f32 %v3678_v5, %v1825_v14  ;;  %v903_v39 = vrot.slane %v902_v53, 1  ;;  %v1938_v19 = vrot.slane %v1937_v49, 1  ;;  %v226_v14 = vpop.permute.xlu0 %225 }
  0xfb   :  { %3234 = vpow2.f32 %v1707_v21  ;;  %v793_v43 = vmul.f32 1.442695, %v791_v18  ;;  %v795_v55 = vmul.f32 1.442695, %v792_v33  ;;  %v1828_v44 = vmul.f32 1.442695, %v1826_v36 }
  0xfc   :  { %v1830_v58 = vmul.f32 1.442695, %v1827_v37  ;;  %v904_v59 = vmax.f32 %v902_v53, %v903_v39  ;;  %v1939_v62 = vmax.f32 %v1937_v49, %v1938_v19  ;;  %v1014_v63 = vmax.f32 %v1012_v50, %v1013_v16 }
  0xfd   :  { %3236 = vpow2.f32 %v793_v43  ;;  %v2048_v8 = vrot.slane %v2047_v17, 4  ;;  %v494_v4 = vadd.f32 %v3173_v34, %v3632_v23  ;;  %v584_v20 = vadd.f32 %v3200_v35, %v231_v22  ;;  %v241_v43 = vpop.permute.xlu1 %240 }
  0xfe   :  { %3238 = vpow2.f32 %v795_v55  ;;  %v905_v9 = vsub.f32 %v3697_v47, %v904_v59  ;;  %v906_v5 = vsub.f32 %v3692_v38, %v904_v59  ;;  %v1940_v0 = vsub.f32 %v3699_v54, %v1939_v62 }
  0xff   :  { %3240 = vpow2.f32 %v1828_v44  ;;  %v1941_v1 = vsub.f32 %v3694_v40, %v1939_v62  ;;  %v1015_v10 = vrot.slane %v1014_v63, 2  ;;  %v2049_v11 = vmax.f32 %v2047_v17, %v2048_v8  ;;  %v3778_v8 = vpop.f32.mrb[11].mxu1 }
 0x100   :  { %3242 = vpow2.f32 %v1830_v58  ;;  %v907_v21 = vmul.f32 1.442695, %v905_v9  ;;  %v909_v50 = vmul.f32 1.442695, %v906_v5  ;;  %v1942_v48 = vmul.f32 1.442695, %v1940_v0 }
 0x101   :  { %v1944_v53 = vmul.f32 1.442695, %v1941_v1  ;;  %v1016_v23 = vmax.f32 %v1014_v63, %v1015_v10  ;;  %v2050_v34 = vrot.slane %v2049_v11, 2  ;;  %v3742_v35 = vmul.f32 0.25, %v494_v4 }
 0x102   :  { %v3744_v47 = vpop.eup %3228  ;;  %3244 = vpow2.f32 %v907_v21  ;;  %v3746_v38 = vmul.f32 0.25, %v584_v20  ;;  %v489_v40 = vadd.f32 %v3711_v41, %v3634_v24  ;;  %v579_v54 = vadd.f32 %v3713_v42, %v226_v14 }
 0x103   :  { %v3751_v49 = vpop.eup %3230  ;;  %3246 = vpow2.f32 %v909_v50  ;;  %v1017_v16 = vrot.slane %v1016_v23, 1  ;;  %v2051_v17 = vmax.f32 %v2049_v11, %v2050_v34  ;;  %v504_v18 = vadd.f32 %v3723_v60, %v3636_v25 }
 0x104   :  { %v3755_v33 = vpop.eup %3232  ;;  %v676_v36 = vadd.f32 %v3751_v49, %v3744_v47  ;;  %3248 = vpow2.f32 %v1942_v48  ;;  %v3759_v37 = vmul.f32 0.25, %v489_v40  ;;  %v3761_v39 = vmul.f32 0.25, %v579_v54 }
 0x105   :  { %v3763_v24 = vpop.eup %3234  ;;  %3250 = vpow2.f32 %v1944_v53  ;;  %v1018_v41 = vmax.f32 %v1016_v23, %v1017_v16  ;;  %v2052_v42 = vrot.slane %v2051_v17, 1  ;;  %v3765_v19 = vmul.f32 0.25, %v504_v18 }
 0x106   :  { %v677_v55 = vrot.slane %v676_v36, 4  ;;  %v1709_v25 = vadd.f32 %v3763_v24, %v3755_v33  ;;  %v1126_v60 = vmax.f32 %v3759_v37, %v3742_v35  ;;  %v2161_v44 = vmax.f32 %v3761_v39, %v3746_v38 }
 0x107   :  { %5480 = vst [vmem:[#allocation9_spill] sm:$0xff] %v3765_v19  ;;  %v3773_v22 = vpop.eup %3236  ;;  %v1019_v58 = vsub.f32 %v3715_v45, %v1018_v41  ;;  %v1020_v59 = vsub.f32 %v3706_v6, %v1018_v41  ;;  %v2053_v62 = vmax.f32 %v2051_v17, %v2052_v42  ;;  %v594_v63 = vadd.f32 %v3725_v61, %v241_v43 }
 0x108   :  { %v3780_v4 = vpop.eup %3238  ;;  %v678_v20 = vadd.f32 %v677_v55, %v676_v36  ;;  %v1710_v9 = vrot.slane %v1709_v25, 4  ;;  %v1127_v5 = vrot.slane %v1126_v60, 4  ;;  %v2162_v0 = vrot.slane %v2161_v44, 4 }
 0x109   :  { %v3782_v1 = vpop.eup %3240  ;;  %v797_v10 = vadd.f32 %v3780_v4, %v3773_v22  ;;  %v1021_v11 = vmul.f32 1.442695, %v1019_v58  ;;  %v1023_v45 = vmul.f32 1.442695, %v1020_v59  ;;  %v2054_v6 = vsub.f32 %v3717_v46, %v2053_v62 }
 0x10a   :  { %v3787_v21 = vpop.eup %3242  ;;  %v679_v61 = vrot.slane %v678_v20, 2  ;;  %v1711_v50 = vadd.f32 %v1710_v9, %v1709_v25  ;;  %v2055_v48 = vsub.f32 %v3708_v7, %v2053_v62  ;;  %v1128_v14 = vmax.f32 %v1126_v60, %v1127_v5 }
 0x10b   :  { %v798_v53 = vrot.slane %v797_v10, 4  ;;  %v1832_v23 = vadd.f32 %v3787_v21, %v3782_v1  ;;  %3252 = vpow2.f32 %v1021_v11  ;;  %v2056_v34 = vmul.f32 1.442695, %v2054_v6 }
 0x10c   :  { %v3792_v40 = vpop.eup %3244  ;;  %v680_v54 = vadd.f32 %v679_v61, %v678_v20  ;;  %v1712_v16 = vrot.slane %v1711_v50, 2  ;;  %3254 = vpow2.f32 %v1023_v45  ;;  %v2058_v17 = vmul.f32 1.442695, %v2055_v48 }
 0x10d   :  { %5481 = vst [vmem:[#allocation10_spill] sm:$0xff] %v3792_v40  ;;  %v3794_v46 = vpop.eup %3246  ;;  %v799_v18 = vadd.f32 %v798_v53, %v797_v10  ;;  %v1833_v36 = vrot.slane %v1832_v23, 4  ;;  %3256 = vpow2.f32 %v2056_v34  ;;  %v1129_v41 = vrot.slane %v1128_v14, 2 }
 0x10e   :  { %5482 = vst [vmem:[#allocation11_spill] sm:$0xff] %v3794_v46  ;;  %v3796_v7 = vpop.eup %3248  ;;  %v681_v42 = vrot.slane %v680_v54, 1  ;;  %v1713_v43 = vadd.f32 %v1712_v16, %v1711_v50  ;;  %v911_v55 = vadd.f32 %v3794_v46, %v3792_v40  ;;  %3258 = vpow2.f32 %v2058_v17 }
 0x10f   :  { %5483 = vst [vmem:[#allocation12_spill] sm:$0xff] %v3796_v7  ;;  %v3800_v25 = vpop.eup %3250  ;;  %v800_v60 = vrot.slane %v799_v18, 2  ;;  %v1834_v58 = vadd.f32 %v1833_v36, %v1832_v23  ;;  %v1130_v59 = vmax.f32 %v1128_v14, %v1129_v41  ;;  %v2163_v62 = vmax.f32 %v2161_v44, %v2162_v0 }
 0x110   :  { %5484 = vst [vmem:[#allocation13_spill] sm:$0xff] %v3800_v25  ;;  %v682_v20 = vadd.f32 %v681_v42, %v680_v54  ;;  %v1714_v9 = vrot.slane %v1713_v43, 1  ;;  %v912_v5 = vrot.slane %v911_v55, 4  ;;  %v1946_v10 = vadd.f32 %v3800_v25, %v3796_v7 }
 0x111   :  { %v801_v11 = vadd.f32 %v800_v60, %v799_v18  ;;  %v1835_v45 = vrot.slane %v1834_v58, 2  ;;  %v1131_v6 = vrot.slane %v1130_v59, 1  ;;  %v2164_v61 = vrot.slane %v2163_v62, 2 }
 0x112   :  { %3260 = vrcp.f32 %v682_v20  ;;  %v1715_v50 = vadd.f32 %v1714_v9, %v1713_v43  ;;  %v913_v48 = vadd.f32 %v912_v5, %v911_v55  ;;  %v1947_v53 = vrot.slane %v1946_v10, 4  ;;  %v3818_v5 = vpop.f32.mrb[12].mxu0 }
 0x113   :  { %v802_v34 = vrot.slane %v801_v11, 1  ;;  %v1836_v16 = vadd.f32 %v1835_v45, %v1834_v58  ;;  %v1132_v17 = vmax.f32 %v1130_v59, %v1131_v6  ;;  %v2165_v23 = vmax.f32 %v2163_v62, %v2164_v61  ;;  %5489 = vst [vmem:[#allocation18_spill] sm:$0xff] %v3818_v5  ;;  %v3824_v61 = vpop.f32.mrb[13].mxu0 }
 0x114   :  { %3262 = vrcp.f32 %v1715_v50  ;;  %v914_v44 = vrot.slane %v913_v48, 2  ;;  %v1948_v0 = vadd.f32 %v1947_v53, %v1946_v10  ;;  %v3804_v14 = vmul.f32 0.25, %v594_v63  ;;  %5492 = vst [vmem:[#allocation21_spill] sm:$0xff] %v3824_v61 }
 0x115   :  { %v3806_v54 = vpop.eup %3252  ;;  %v803_v36 = vadd.f32 %v802_v34, %v801_v11  ;;  %v1837_v18 = vrot.slane %v1836_v16, 1  ;;  %v1133_v41 = vsub.f32 %v3759_v37, %v1132_v17  ;;  %v1134_v42 = vsub.f32 %v3742_v35, %v1132_v17  ;;  %v3820_v37 = vpop.f32.mrb[12].mxu1 }
 0x116   :  { %5485 = vst [vmem:[#allocation14_spill] sm:$0xff] %v3804_v14  ;;  %5486 = vst [vmem:[#allocation15_spill] sm:$0xff] %v3806_v54  ;;  %v3810_v43 = vpop.eup %3254  ;;  %v915_v55 = vadd.f32 %v914_v44, %v913_v48  ;;  %v1949_v60 = vrot.slane %v1948_v0, 2  ;;  %v2166_v58 = vrot.slane %v2165_v23, 1  ;;  %v499_v59 = vadd.f32 %v3729_v15, %v3638_v26 }
 0x117   :  { %5487 = vst [vmem:[#allocation16_spill] sm:$0xff] %v3810_v43  ;;  %v3814_v62 = vpop.eup %3256  ;;  %3264 = vrcp.f32 %v803_v36  ;;  %v1838_v63 = vadd.f32 %v1837_v18, %v1836_v16  ;;  %v1025_v20 = vadd.f32 %v3810_v43, %v3806_v54  ;;  %v1135_v9 = vmul.f32 1.442695, %v1133_v41  ;;  %5490 = vst [vmem:[#allocation19_spill] sm:$0xff] %v3820_v37  ;;  %v236_v41 = vpop.permute.xlu0 %235  ;;  %v3923_v43 = vld [vmem:[%s5335_s3 + $0x58] sm:$0xff]  ;;  %v3928_v54 = vld [vmem:[%s5335_s3 + $0x60] sm:$0xff] }
 0x118   :  { %5488 = vst [vmem:[#allocation17_spill] sm:$0xff] %v3814_v62  ;;  %v3822_v35 = vpop.eup %3258  ;;  %v916_v10 = vrot.slane %v915_v55, 1  ;;  %v1950_v11 = vadd.f32 %v1949_v60, %v1948_v0  ;;  %v1137_v45 = vmul.f32 1.442695, %v1134_v42  ;;  %v2167_v6 = vmax.f32 %v2165_v23, %v2166_v58  ;;  %v3855_v60 = vld [vmem:[%s5335_s3 + $0x10] sm:$0xff] }
 0x119   :  { %5491 = vst [vmem:[#allocation20_spill] sm:$0xff] %v3822_v35  ;;  %3266 = vrcp.f32 %v1838_v63  ;;  %v1026_v26 = vrot.slane %v1025_v20, 4  ;;  %v2060_v15 = vadd.f32 %v3822_v35, %v3814_v62  ;;  %v3828_v50 = vmul.f32 0.25, %v499_v59  ;;  %v3863_v59 = vld [vmem:[%s5335_s3 + $0x18] sm:$0xff]  ;;  %v3868_v63 = vld [vmem:[%s5335_s3 + $0x20] sm:$0xff] }
 0x11a   :  { %v917_v48 = vadd.f32 %v916_v10, %v915_v55  ;;  %v1951_v53 = vrot.slane %v1950_v11, 1  ;;  %3268 = vpow2.f32 %v1135_v9  ;;  %v2168_v34 = vsub.f32 %v3761_v39, %v2167_v6  ;;  %v3845_v55 = vld [vmem:[%s5335_s3] sm:$0xff] }
 0x11b   :  { %5493 = vst [vmem:[#allocation22_spill] sm:$0xff] %v3828_v50  ;;  %v3831_v16 = vadd.f32 %v1026_v26, %v1025_v20  ;;  %v2061_v17 = vrot.slane %v2060_v15, 4  ;;  %3270 = vpow2.f32 %v1137_v45  ;;  %v2169_v23 = vsub.f32 %v3746_v38, %v2167_v6  ;;  %5497 = vst [vmem:[#allocation26_spill] sm:$0xff] %v3845_v55  ;;  %v3850_v38 = vld [vmem:[%s5335_s3 + $0x8] sm:$0xff] }
 0x11c   :  { %v3261_v44 = vpop.eup %3260  ;;  %3272 = vrcp.f32 %v917_v48  ;;  %v1952_v0 = vadd.f32 %v1951_v53, %v1950_v11  ;;  %v3834_v36 = vmul.f32 1.442695, %v2168_v34  ;;  %v3838_v18 = vmax.f32 %v3828_v50, %v3765_v19  ;;  %v3876_v11 = vpop.f32.mrb[13].mxu1  ;;  %v3883_v26 = vld [vmem:[%s5335_s3 + $0x28] sm:$0xff]  ;;  %v3889_v48 = vld [vmem:[%s5335_s3 + $0x30] sm:$0xff]  ;;  %v3900_v34 = vld [vmem:[%s5335_s3 + $0x40] sm:$0xff] }
 0x11d   :  { %5494 = vst [vmem:[#allocation23_spill] sm:$0xff] %v3831_v16  ;;  %v684_v42 = vmul.f32 %v3261_v44, %v3744_v47  ;;  %v685_v39 = vmul.f32 %v3261_v44, %v3751_v49  ;;  %v3858_v47 = vadd.f32 %v2061_v17, %v2060_v15  ;;  %v3870_v20 = vmul.f32 1.442695, %v2169_v23  ;;  %5501 = vst [vmem:[#allocation30_spill] sm:$0xff] %v3876_v11  ;;  %v3905_v17 = vld [vmem:[%s5335_s3 + $0x48] sm:$0xff]  ;;  %v3911_v44 = vld [vmem:[%s5335_s3 + $0x50] sm:$0xff] }
 0x11e   :  { %5495 = vst [vmem:[#allocation24_spill] sm:$0xff] %v3834_v36  ;;  %5496 = vst [vmem:[#allocation25_spill] sm:$0xff] %v3838_v18  ;;  %v3263_v49 = vpop.eup %3262  ;;  %3274 = vrcp.f32 %v1952_v0  ;;  %v3874_v10 = vadd.f32 %v3778_v8, %v236_v41  ;;  %v3894_v8 = vld [vmem:[%s5335_s3 + $0x38] sm:$0xff]  ;;  %v4035_v16 = vld [vmem:[%s5335_s3 + $0xc8] sm:$0xff] }
 0x11f   :  { %5498 = vst [vmem:[#allocation27_spill] sm:$0xff] %v3858_v47  ;;  %5499 = vst [vmem:[#allocation28_spill] sm:$0xff] %v3870_v20  ;;  %v691_v45 = vrot.slane %v684_v42, %v3658_v51  ;;  %v700_v6 = vrot.slane %v684_v42, %v3660_v52  ;;  %v711_v15 = vrot.slane %v684_v42, %v3664_v56 }
 0x120   :  { %5500 = vst [vmem:[#allocation29_spill] sm:$0xff] %v3874_v10  ;;  %5502 = vst [vmem:[#allocation31_spill] sm:$0xff] %v3889_v48  ;;  %v722_v53 = vrot.slane %v684_v42, %v3666_v57  ;;  %v733_v23 = vrot.slane %v684_v42, %v3672_v2  ;;  %v744_v0 = vrot.slane %v684_v42, %v3674_v3 }
 0x121   :  { %v755_v41 = vrot.slane %v684_v42, %v3684_v12  ;;  %v766_v9 = vrot.slane %v684_v42, %v3686_v13  ;;  %v3265_v58 = vpop.eup %3264  ;;  %v692_v32 = vmul.f32 %v691_v45, %v3845_v55  ;;  %v693_v31 = vmul.f32 %v691_v45, %v3850_v38  ;;  %v3933_v42 = vld [vmem:[%s5335_s3 + $0x68] sm:$0xff]  ;;  %5517 = vst [vmem:[#allocation46_spill] sm:$0xff] %v4035_v16 }
 0x122   :  { %v701_v35 = vmul.f32 %v3855_v60, %v700_v6  ;;  %v702_v62 = vmul.f32 %v3863_v59, %v700_v6  ;;  %v712_v45 = vmul.f32 %v3868_v63, %v711_v15  ;;  %v713_v19 = vmul.f32 %v3883_v26, %v711_v15 }
 0x123   :  { %v723_v6 = vmul.f32 %v3889_v48, %v722_v53  ;;  %v724_v50 = vmul.f32 %v3894_v8, %v722_v53  ;;  %v3949_v11 = vpop.eup %3266  ;;  %v734_v15 = vmul.f32 %v3900_v34, %v733_v23  ;;  %v735_v37 = vmul.f32 %v3905_v17, %v733_v23 }
 0x124   :  { %v703_v61 = vadd.f32 %v701_v35, %v692_v32  ;;  %v704_v28 = vadd.f32 %v702_v62, %v693_v31  ;;  %v3953_v14 = vpop.eup %3268  ;;  %v745_v53 = vmul.f32 %v3911_v44, %v744_v0  ;;  %v746_v5 = vmul.f32 %v3923_v43, %v744_v0  ;;  %v3966_v62 = vld [vmem:[%s5335_s3 + $0x80] sm:$0xff]  ;;  %v3971_v35 = vld [vmem:[%s5335_s3 + $0x88] sm:$0xff] }
 0x125   :  { %5504 = vst [vmem:[#allocation33_spill] sm:$0xff] %v3953_v14  ;;  %v756_v27 = vmul.f32 %v3928_v54, %v755_v41  ;;  %v757_v10 = vmul.f32 %v3933_v42, %v755_v41  ;;  %v3959_v18 = vpop.eup %3270  ;;  %v767_v31 = vmul.f32 %v3942_v30, %v766_v9  ;;  %v768_v32 = vmul.f32 %v3947_v29, %v766_v9  ;;  %v4019_v14 = vld [vmem:[%s5335_s3 + $0xb0] sm:$0xff] }
 0x126   :  { %5505 = vst [vmem:[#allocation34_spill] sm:$0xff] %v3959_v18  ;;  %v714_v20 = vadd.f32 %v712_v45, %v703_v61  ;;  %v715_v36 = vadd.f32 %v713_v19, %v704_v28  ;;  %5506 = vst [vmem:[#allocation35_spill] sm:$0xff] %v3966_v62  ;;  %v3973_v23 = vpop.eup %3272  ;;  %v777_v0 = vrot.slane %v685_v39, %v3658_v51  ;;  %v3983_v61 = vld [vmem:[%s5335_s3 + $0x90] sm:$0xff]  ;;  %v3991_v18 = vld [vmem:[%s5335_s3 + $0x98] sm:$0xff] }
 0x127   :  { %5507 = vst [vmem:[#allocation36_spill] sm:$0xff] %v3971_v35  ;;  %5508 = vst [vmem:[#allocation37_spill] sm:$0xff] %v3973_v23  ;;  %v1717_v28 = vmul.f32 %v3263_v49, %v3755_v33  ;;  %v3978_v19 = vmul.f32 %v3263_v49, %v3763_v24  ;;  %v3986_v9 = vmul.f32 %v3265_v58, %v3773_v22  ;;  %v3996_v33 = vld [vmem:[%s5335_s3 + $0xa0] sm:$0xff]  ;;  %v4001_v24 = vld [vmem:[%s5335_s3 + $0xa8] sm:$0xff] }
 0x128   :  { %5509 = vst [vmem:[#allocation38_spill] sm:$0xff] %v3983_v61  ;;  %v725_v41 = vadd.f32 %v723_v6, %v714_v20  ;;  %v726_v45 = vadd.f32 %v724_v50, %v715_v36  ;;  %5510 = vst [vmem:[#allocation39_spill] sm:$0xff] %v3991_v18  ;;  %v4004_v22 = vmul.f32 %v3265_v58, %v3780_v4  ;;  %v4010_v36 = vpop.eup %3274  ;;  %v4024_v4 = vld [vmem:[%s5335_s3 + $0xb8] sm:$0xff] }
 0x129   :  { %5511 = vst [vmem:[#allocation40_spill] sm:$0xff] %v3996_v33  ;;  %5512 = vst [vmem:[#allocation41_spill] sm:$0xff] %v4001_v24  ;;  %v4008_v50 = vmul.f32 %v3949_v11, %v3782_v1  ;;  %v778_v39 = vmul.f32 %v3966_v62, %v777_v0  ;;  %v779_v49 = vmul.f32 %v3971_v35, %v777_v0  ;;  %v4030_v0 = vld [vmem:[%s5335_s3 + $0xc0] sm:$0xff] }
 0x12a   :  { %5513 = vst [vmem:[#allocation42_spill] sm:$0xff] %v4010_v36  ;;  %v1725_v20 = vrot.slane %v1717_v28, %v3658_v51  ;;  %v1734_v6 = vrot.slane %v1717_v28, %v3660_v52  ;;  %5514 = vst [vmem:[#allocation43_spill] sm:$0xff] %v4019_v14  ;;  %v736_v1 = vadd.f32 %v734_v15, %v725_v41 }
 0x12b   :  { %5515 = vst [vmem:[#allocation44_spill] sm:$0xff] %v4024_v4  ;;  %v737_v58 = vadd.f32 %v735_v37, %v726_v45  ;;  %v1745_v47 = vrot.slane %v1717_v28, %v3664_v56  ;;  %5516 = vst [vmem:[#allocation45_spill] sm:$0xff] %v4030_v0  ;;  %v1756_v25 = vrot.slane %v1717_v28, %v3666_v57 }
 0x12c   :  { %v1726_v36 = vmul.f32 %v3983_v61, %v1725_v20  ;;  %v1727_v7 = vmul.f32 %v3991_v18, %v1725_v20  ;;  %v1735_v37 = vmul.f32 %v3996_v33, %v1734_v6  ;;  %v1736_v15 = vmul.f32 %v4001_v24, %v1734_v6  ;;  %v4049_v20 = vld [vmem:[%s5335_s3 + $0xd0] sm:$0xff] }
 0x12d   :  { %v747_v41 = vadd.f32 %v745_v53, %v736_v1  ;;  %v748_v45 = vadd.f32 %v746_v5, %v737_v58  ;;  %v1746_v46 = vmul.f32 %v4019_v14, %v1745_v47  ;;  %v1747_v23 = vmul.f32 %v4024_v4, %v1745_v47  ;;  %5518 = vst [vmem:[#allocation47_spill] sm:$0xff] %v4049_v20  ;;  %v4054_v53 = vld [vmem:[%s5335_s3 + $0xd8] sm:$0xff]  ;;  %v4068_v1 = vpop.f32.mrb[14].mxu0  ;;  %v4070_v58 = vpop.f32.mrb[14].mxu1 }
 0x12e   :  { %v1737_v40 = vadd.f32 %v1735_v37, %v1726_v36  ;;  %v1738_v35 = vadd.f32 %v1736_v15, %v1727_v7  ;;  %v1757_v62 = vmul.f32 %v4030_v0, %v1756_v25  ;;  %v1758_v29 = vmul.f32 %v4035_v16, %v1756_v25  ;;  %5519 = vst [vmem:[#allocation48_spill] sm:$0xff] %v4054_v53  ;;  %v4060_v7 = vld [vmem:[%s5335_s3 + $0xe0] sm:$0xff]  ;;  %v4065_v25 = vld [vmem:[%s5335_s3 + $0xe8] sm:$0xff]  ;;  %v4075_v37 = vld [vmem:[%s5335_s3 + $0xf0] sm:$0xff]  ;;  %v4084_v16 = vpop.f32.mrb[15].mxu0 }
 0x12f   :  { %v758_v5 = vadd.f32 %v756_v27, %v747_v41  ;;  %v759_v6 = vadd.f32 %v757_v10, %v748_v45  ;;  %v1767_v47 = vrot.slane %v1717_v28, %v3672_v2  ;;  %v1778_v36 = vrot.slane %v1717_v28, %v3674_v3  ;;  %5520 = vst [vmem:[#allocation49_spill] sm:$0xff] %v4068_v1  ;;  %v4080_v15 = vld [vmem:[%s5335_s3 + $0xf8] sm:$0xff] }
 0x130   :  { %5521 = vst [vmem:[#allocation50_spill] sm:$0xff] %v4070_v58  ;;  %v1748_v27 = vadd.f32 %v1746_v46, %v1737_v40  ;;  %v1749_v10 = vadd.f32 %v1747_v23, %v1738_v35  ;;  %v1789_v41 = vrot.slane %v1717_v28, %v3684_v12  ;;  %v1800_v45 = vrot.slane %v1717_v28, %v3686_v13  ;;  %v4091_v35 = vld [vmem:[%s5335_s3 + $0x100] sm:$0xff]  ;;  %v4096_v23 = vld [vmem:[%s5335_s3 + $0x108] sm:$0xff] }
 0x131   :  { %5522 = vst [vmem:[#allocation51_spill] sm:$0xff] %v4084_v16  ;;  %v769_v1 = vadd.f32 %v767_v31, %v758_v5  ;;  %v770_v58 = vadd.f32 %v768_v32, %v759_v6  ;;  %v1768_v40 = vmul.f32 %v4049_v20, %v1767_v47  ;;  %v1769_v46 = vmul.f32 %v4054_v53, %v1767_v47 }
 0x132   :  { %v1759_v0 = vadd.f32 %v1757_v62, %v1748_v27  ;;  %v1760_v28 = vadd.f32 %v1758_v29, %v1749_v10  ;;  %v1779_v16 = vmul.f32 %v4060_v7, %v1778_v36  ;;  %v1780_v31 = vmul.f32 %v4065_v25, %v1778_v36  ;;  %v4107_v29 = vld [vmem:[%s5335_s3 + $0x110] sm:$0xff]  ;;  %v4112_v62 = vld [vmem:[%s5335_s3 + $0x118] sm:$0xff] }
 0x133   :  { %v780_v32 = vadd.f32 %v778_v39, %v769_v1  ;;  %v781_v5 = vadd.f32 %v779_v49, %v770_v58  ;;  %v1790_v6 = vmul.f32 %v4075_v37, %v1789_v41  ;;  %v1791_v47 = vmul.f32 %v4080_v15, %v1789_v41  ;;  %5523 = vst [vmem:[#allocation52_spill] sm:$0xff] %v4107_v29 }
 0x134   :  { %v1770_v53 = vadd.f32 %v1768_v40, %v1759_v0  ;;  %v1771_v20 = vadd.f32 %v1769_v46, %v1760_v28  ;;  %v1801_v4 = vmul.f32 %v4091_v35, %v1800_v45  ;;  %v1802_v14 = vmul.f32 %v4096_v23, %v1800_v45  ;;  %5524 = vst [vmem:[#allocation53_spill] sm:$0xff] %v4112_v62 }
 0x135   :  { %782 = vst [vmem:[%s5336_s4] sm:$0xff] %v780_v32  ;;  %783 = vst [vmem:[%s5336_s4 + $0x8] sm:$0xff] %v781_v5  ;;  %v1811_v39 = vrot.slane %v3978_v19, %v3658_v51  ;;  %v812_v49 = vrot.slane %v3986_v9, %v3658_v51  ;;  %v820_v0 = vrot.slane %v3986_v9, %v3660_v52 }
 0x136   :  { %v830_v36 = vrot.slane %v3986_v9, %v3664_v56  ;;  %v1781_v1 = vadd.f32 %v1779_v16, %v1770_v53  ;;  %v1782_v58 = vadd.f32 %v1780_v31, %v1771_v20  ;;  %v840_v27 = vrot.slane %v3986_v9, %v3666_v57 }
 0x137   :  { %v850_v10 = vrot.slane %v3986_v9, %v3672_v2  ;;  %v1812_v41 = vmul.f32 %v4107_v29, %v1811_v39  ;;  %v1813_v19 = vmul.f32 %v4112_v62, %v1811_v39  ;;  %v813_v45 = vmul.f32 %v812_v49, %v3845_v55 }
 0x138   :  { %v814_v40 = vmul.f32 %v812_v49, %v3850_v38  ;;  %v1792_v46 = vadd.f32 %v1790_v6, %v1781_v1  ;;  %v1793_v28 = vadd.f32 %v1791_v47, %v1782_v58  ;;  %v821_v32 = vmul.f32 %v3855_v60, %v820_v0 }
 0x139   :  { %v822_v16 = vmul.f32 %v3863_v59, %v820_v0  ;;  %v831_v20 = vmul.f32 %v3868_v63, %v830_v36  ;;  %v832_v53 = vmul.f32 %v3883_v26, %v830_v36  ;;  %v841_v31 = vmul.f32 %v3889_v48, %v840_v27 }
 0x13a   :  { %v842_v5 = vmul.f32 %v3894_v8, %v840_v27  ;;  %v1803_v29 = vadd.f32 %v1801_v4, %v1792_v46  ;;  %v1804_v39 = vadd.f32 %v1802_v14, %v1793_v28  ;;  %v823_v62 = vadd.f32 %v821_v32, %v813_v45 }
 0x13b   :  { %v824_v55 = vadd.f32 %v822_v16, %v814_v40  ;;  %v851_v49 = vmul.f32 %v3900_v34, %v850_v10  ;;  %v852_v6 = vmul.f32 %v3905_v17, %v850_v10  ;;  %v860_v47 = vrot.slane %v3986_v9, %v3674_v3 }
 0x13c   :  { %v870_v0 = vrot.slane %v3986_v9, %v3684_v12  ;;  %v1814_v1 = vadd.f32 %v1812_v41, %v1803_v29  ;;  %v1815_v36 = vadd.f32 %v1813_v19, %v1804_v39  ;;  %v833_v58 = vadd.f32 %v831_v20, %v823_v62  ;;  %v5526_v20 = vld [vmem:[#allocation35_spill] sm:$0xff] }
 0x13d   :  { %v834_v48 = vadd.f32 %v832_v53, %v824_v55  ;;  %v861_v27 = vmul.f32 %v3911_v44, %v860_v47  ;;  %v862_v14 = vmul.f32 %v3923_v43, %v860_v47  ;;  %v880_v55 = vrot.slane %v3986_v9, %v3686_v13  ;;  %v5525_v9 = vld [vmem:[#allocation32_spill] sm:$0xff] }
 0x13e   :  { %v871_v4 = vmul.f32 %v3928_v54, %v870_v0  ;;  %v872_v45 = vmul.f32 %v3933_v42, %v870_v0  ;;  %2949 = vst [vmem:[%s5336_s4 + $0x90] sm:$0xff] %v1814_v1  ;;  %2950 = vst [vmem:[%s5336_s4 + $0x98] sm:$0xff] %v1815_v36  ;;  %v843_v29 = vadd.f32 %v841_v31, %v833_v58  ;;  %v5527_v53 = vld [vmem:[#allocation36_spill] sm:$0xff] }
 0x13f   :  { %v844_v10 = vadd.f32 %v842_v5, %v834_v48  ;;  %v890_v62 = vrot.slane %v4004_v22, %v3658_v51  ;;  %v1841_v41 = vmul.f32 %v3949_v11, %v3787_v21  ;;  %v1847_v19 = vrot.slane %v4008_v50, %v3658_v51  ;;  %v5529_v1 = vld [vmem:[#allocation44_spill] sm:$0xff] }
 0x140   :  { %v1855_v40 = vrot.slane %v4008_v50, %v3660_v52  ;;  %v1865_v46 = vrot.slane %v4008_v50, %v3664_v56  ;;  %v853_v28 = vadd.f32 %v851_v49, %v843_v29  ;;  %v881_v32 = vmul.f32 %v3942_v30, %v880_v55  ;;  %v5528_v49 = vld [vmem:[#allocation43_spill] sm:$0xff] }
 0x141   :  { %v854_v48 = vadd.f32 %v852_v6, %v844_v10  ;;  %v882_v16 = vmul.f32 %v5525_v9, %v880_v55  ;;  %v891_v22 = vmul.f32 %v5526_v20, %v890_v62  ;;  %v892_v31 = vmul.f32 %v5527_v53, %v890_v62  ;;  %v4184_v10 = vpop.f32.mrb[15].mxu1 }
 0x142   :  { %v1848_v21 = vmul.f32 %v3983_v61, %v1847_v19  ;;  %v1849_v11 = vmul.f32 %v3991_v18, %v1847_v19  ;;  %v863_v5 = vadd.f32 %v861_v27, %v853_v28  ;;  %v1856_v47 = vmul.f32 %v3996_v33, %v1855_v40  ;;  %5530 = vst [vmem:[#allocation32_spill] sm:$0xff] %v4184_v10  ;;  %v5531_v19 = vld [vmem:[#allocation45_spill] sm:$0xff]  ;;  %v5534_v33 = vld [vmem:[#allocation48_spill] sm:$0xff] }
 0x143   :  { %v864_v39 = vadd.f32 %v862_v14, %v854_v48  ;;  %v1857_v0 = vmul.f32 %v4001_v24, %v1855_v40  ;;  %v1866_v6 = vmul.f32 %v5528_v49, %v1865_v46  ;;  %v1867_v36 = vmul.f32 %v5529_v1, %v1865_v46  ;;  %v5532_v48 = vld [vmem:[#allocation46_spill] sm:$0xff]  ;;  %v5533_v24 = vld [vmem:[#allocation47_spill] sm:$0xff] }
 0x144   :  { %v1875_v58 = vrot.slane %v4008_v50, %v3666_v57  ;;  %v1885_v29 = vrot.slane %v4008_v50, %v3672_v2  ;;  %v873_v55 = vadd.f32 %v871_v4, %v863_v5  ;;  %v1858_v27 = vadd.f32 %v1856_v47, %v1848_v21 }
 0x145   :  { %v874_v62 = vadd.f32 %v872_v45, %v864_v39  ;;  %v1859_v14 = vadd.f32 %v1857_v0, %v1849_v11  ;;  %v1895_v20 = vrot.slane %v4008_v50, %v3674_v3  ;;  %v1905_v4 = vrot.slane %v4008_v50, %v3684_v12 }
 0x146   :  { %v1876_v28 = vmul.f32 %v5531_v19, %v1875_v58  ;;  %v1877_v40 = vmul.f32 %v5532_v48, %v1875_v58  ;;  %v1886_v49 = vmul.f32 %v5533_v24, %v1885_v29  ;;  %v1887_v46 = vmul.f32 %v5534_v33, %v1885_v29  ;;  %v5539_v29 = vld [vmem:[#allocation11_spill] sm:$0xff] }
 0x147   :  { %v883_v1 = vadd.f32 %v881_v32, %v873_v55  ;;  %v884_v18 = vadd.f32 %v882_v16, %v874_v62  ;;  %v1868_v61 = vadd.f32 %v1866_v6, %v1858_v27  ;;  %v1869_v53 = vadd.f32 %v1867_v36, %v1859_v14  ;;  %v5538_v36 = vld [vmem:[#allocation37_spill] sm:$0xff]  ;;  %v5540_v14 = vld [vmem:[#allocation12_spill] sm:$0xff] }
 0x148   :  { %v1915_v45 = vrot.slane %v4008_v50, %v3686_v13  ;;  %v1925_v21 = vrot.slane %v1841_v41, %v3658_v51  ;;  %v1896_v32 = vmul.f32 %v4060_v7, %v1895_v20  ;;  %v1897_v16 = vmul.f32 %v4065_v25, %v1895_v20 }
 0x149   :  { %v893_v11 = vadd.f32 %v891_v22, %v883_v1  ;;  %v894_v5 = vadd.f32 %v892_v31, %v884_v18  ;;  %v1878_v39 = vadd.f32 %v1876_v28, %v1868_v61  ;;  %v1879_v47 = vadd.f32 %v1877_v40, %v1869_v53  ;;  %v5535_v22 = vld [vmem:[#allocation52_spill] sm:$0xff]  ;;  %v5536_v53 = vld [vmem:[#allocation53_spill] sm:$0xff]  ;;  %v5537_v1 = vld [vmem:[#allocation10_spill] sm:$0xff] }
 0x14a   :  { %v1906_v0 = vmul.f32 %v4075_v37, %v1905_v4  ;;  %v1907_v6 = vmul.f32 %v4080_v15, %v1905_v4  ;;  %v1916_v61 = vmul.f32 %v4091_v35, %v1915_v45  ;;  %v1917_v41 = vmul.f32 %v4096_v23, %v1915_v45  ;;  %v5541_v28 = vld [vmem:[#allocation42_spill] sm:$0xff]  ;;  %v5542_v40 = vld [vmem:[#allocation13_spill] sm:$0xff] }
 0x14b   :  { %2803 = vst [vmem:[%s5336_s4 + $0x10] sm:$0xff] %v893_v11  ;;  %2804 = vst [vmem:[%s5336_s4 + $0x18] sm:$0xff] %v894_v5  ;;  %v1888_v50 = vadd.f32 %v1886_v49, %v1878_v39  ;;  %v1889_v18 = vadd.f32 %v1887_v46, %v1879_v47  ;;  %v1926_v20 = vmul.f32 %v5535_v22, %v1925_v21 }
 0x14c   :  { %v1927_v31 = vmul.f32 %v5536_v53, %v1925_v21  ;;  %v919_v58 = vmul.f32 %v5538_v36, %v5537_v1  ;;  %v920_v55 = vmul.f32 %v5538_v36, %v5539_v29  ;;  %v4217_v49 = vmul.f32 %v5541_v28, %v5540_v14  ;;  %v4237_v53 = vpop.f32.mrb[16].mxu0 }
 0x14d   :  { %v1898_v62 = vadd.f32 %v1896_v32, %v1888_v50  ;;  %v1899_v27 = vadd.f32 %v1897_v16, %v1889_v18  ;;  %v4221_v46 = vmul.f32 %v5541_v28, %v5542_v40  ;;  %v5543_v16 = vld [vmem:[#allocation26_spill] sm:$0xff]  ;;  %5545 = vst [vmem:[#allocation45_spill] sm:$0xff] %v4237_v53  ;;  %v4556_v53 = vld [vmem:[%s5335_s3 + $0xc8] sm:$0xff] }
 0x14e   :  { %v926_v4 = vrot.slane %v919_v58, %v3658_v51  ;;  %v934_v45 = vrot.slane %v919_v58, %v3660_v52  ;;  %v944_v21 = vrot.slane %v919_v58, %v3664_v56  ;;  %v954_v11 = vrot.slane %v919_v58, %v3666_v57 }
 0x14f   :  { %v1908_v5 = vadd.f32 %v1906_v0, %v1898_v62  ;;  %v1909_v39 = vadd.f32 %v1907_v6, %v1899_v27  ;;  %v964_v47 = vrot.slane %v919_v58, %v3672_v2  ;;  %v974_v32 = vrot.slane %v919_v58, %v3674_v3  ;;  %v5544_v62 = vld [vmem:[#allocation31_spill] sm:$0xff] }
 0x150   :  { %v927_v50 = vmul.f32 %v926_v4, %v5543_v16  ;;  %v928_v18 = vmul.f32 %v926_v4, %v3850_v38  ;;  %v935_v1 = vmul.f32 %v3855_v60, %v934_v45  ;;  %v936_v36 = vmul.f32 %v3863_v59, %v934_v45  ;;  %v4239_v16 = vpop.f32.mrb[16].mxu1 }
 0x151   :  { %v1918_v29 = vadd.f32 %v1916_v61, %v1908_v5  ;;  %v1919_v14 = vadd.f32 %v1917_v41, %v1909_v39  ;;  %v945_v28 = vmul.f32 %v3868_v63, %v944_v21  ;;  %v946_v40 = vmul.f32 %v3883_v26, %v944_v21  ;;  %5546 = vst [vmem:[#allocation46_spill] sm:$0xff] %v4239_v16  ;;  %v4243_v41 = vpop.f32.mrb[17].mxu0  ;;  %v4515_v16 = vld [vmem:[%s5335_s3 + $0x98] sm:$0xff] }
 0x152   :  { %v937_v0 = vadd.f32 %v935_v1, %v927_v50  ;;  %v938_v6 = vadd.f32 %v936_v36, %v928_v18  ;;  %v955_v27 = vmul.f32 %v5544_v62, %v954_v11  ;;  %v956_v10 = vmul.f32 %v3894_v8, %v954_v11  ;;  %5547 = vst [vmem:[#allocation47_spill] sm:$0xff] %v4243_v41  ;;  %v5549_v18 = vld [vmem:[#allocation36_spill] sm:$0xff]  ;;  %v5550_v1 = vld [vmem:[#allocation38_spill] sm:$0xff]  ;;  %v5554_v62 = vld [vmem:[#allocation43_spill] sm:$0xff] }
 0x153   :  { %v1928_v38 = vadd.f32 %v1926_v20, %v1918_v29  ;;  %v1929_v60 = vadd.f32 %v1927_v31, %v1919_v14  ;;  %v965_v59 = vmul.f32 %v3900_v34, %v964_v47  ;;  %v966_v61 = vmul.f32 %v3905_v17, %v964_v47  ;;  %v5551_v29 = vld [vmem:[#allocation39_spill] sm:$0xff] }
 0x154   :  { %v947_v63 = vadd.f32 %v945_v28, %v937_v0  ;;  %v948_v26 = vadd.f32 %v946_v40, %v938_v6  ;;  %v975_v4 = vmul.f32 %v3911_v44, %v974_v32  ;;  %v976_v45 = vmul.f32 %v3923_v43, %v974_v32  ;;  %v5548_v32 = vld [vmem:[#allocation35_spill] sm:$0xff]  ;;  %v5552_v28 = vld [vmem:[#allocation40_spill] sm:$0xff]  ;;  %v5553_v0 = vld [vmem:[#allocation41_spill] sm:$0xff] }
 0x155   :  { %2969 = vst [vmem:[%s5336_s4 + $0xa0] sm:$0xff] %v1928_v38  ;;  %2970 = vst [vmem:[%s5336_s4 + $0xa8] sm:$0xff] %v1929_v60  ;;  %v984_v8 = vrot.slane %v919_v58, %v3684_v12  ;;  %v994_v34 = vrot.slane %v919_v58, %v3686_v13  ;;  %v1004_v17 = vrot.slane %v920_v55, %v3658_v51 }
 0x156   :  { %v1961_v20 = vrot.slane %v4217_v49, %v3658_v51  ;;  %v957_v44 = vadd.f32 %v955_v27, %v947_v63  ;;  %v958_v31 = vadd.f32 %v956_v10, %v948_v26  ;;  %v1969_v43 = vrot.slane %v4217_v49, %v3660_v52  ;;  %v5555_v27 = vld [vmem:[#allocation44_spill] sm:$0xff] }
 0x157   :  { %v1979_v21 = vrot.slane %v4217_v49, %v3664_v56  ;;  %v985_v11 = vmul.f32 %v3928_v54, %v984_v8  ;;  %v986_v5 = vmul.f32 %v3933_v42, %v984_v8  ;;  %v995_v39 = vmul.f32 %v3942_v30, %v994_v34 }
 0x158   :  { %v996_v58 = vmul.f32 %v5525_v9, %v994_v34  ;;  %v967_v55 = vadd.f32 %v965_v59, %v957_v44  ;;  %v968_v47 = vadd.f32 %v966_v61, %v958_v31  ;;  %v1005_v50 = vmul.f32 %v5548_v32, %v1004_v17 }
 0x159   :  { %v1006_v10 = vmul.f32 %v5549_v18, %v1004_v17  ;;  %v1962_v36 = vmul.f32 %v5550_v1, %v1961_v20  ;;  %v1963_v14 = vmul.f32 %v5551_v29, %v1961_v20  ;;  %v1970_v40 = vmul.f32 %v5552_v28, %v1969_v43 }
 0x15a   :  { %v1971_v54 = vmul.f32 %v5553_v0, %v1969_v43  ;;  %v977_v6 = vadd.f32 %v975_v4, %v967_v55  ;;  %v978_v42 = vadd.f32 %v976_v45, %v968_v47  ;;  %v1980_v30 = vmul.f32 %v5554_v62, %v1979_v21  ;;  %v5562_v0 = vld [vmem:[#allocation53_spill] sm:$0xff]  ;;  %v251_v62 = vpop.permute.xlu1 %250 }
 0x15b   :  { %v1981_v9 = vmul.f32 %v5555_v27, %v1979_v21  ;;  %v1972_v38 = vadd.f32 %v1970_v40, %v1962_v36  ;;  %v1989_v59 = vrot.slane %v4217_v49, %v3666_v57  ;;  %v1999_v61 = vrot.slane %v4217_v49, %v3672_v2 }
 0x15c   :  { %v1973_v60 = vadd.f32 %v1971_v54, %v1963_v14  ;;  %v987_v63 = vadd.f32 %v985_v11, %v977_v6  ;;  %v988_v26 = vadd.f32 %v986_v5, %v978_v42  ;;  %v2009_v8 = vrot.slane %v4217_v49, %v3674_v3 }
 0x15d   :  { %v2019_v4 = vrot.slane %v4217_v49, %v3684_v12  ;;  %v1982_v45 = vadd.f32 %v1980_v30, %v1972_v38  ;;  %v1990_v17 = vmul.f32 %v5531_v19, %v1989_v59  ;;  %v1991_v20 = vmul.f32 %v5532_v48, %v1989_v59  ;;  %v5563_v38 = vld [vmem:[#allocation28_spill] sm:$0xff] }
 0x15e   :  { %v1983_v34 = vadd.f32 %v1981_v9, %v1973_v60  ;;  %v997_v44 = vadd.f32 %v995_v39, %v987_v63  ;;  %v998_v31 = vadd.f32 %v996_v58, %v988_v26  ;;  %v2000_v43 = vmul.f32 %v5533_v24, %v1999_v61  ;;  %v5556_v24 = vld [vmem:[#allocation23_spill] sm:$0xff]  ;;  %v5559_v58 = vld [vmem:[#allocation33_spill] sm:$0xff] }
 0x15f   :  { %v2001_v21 = vmul.f32 %v5534_v33, %v1999_v61  ;;  %v1992_v11 = vadd.f32 %v1990_v17, %v1982_v45  ;;  %v2010_v55 = vmul.f32 %v4060_v7, %v2009_v8  ;;  %v2011_v47 = vmul.f32 %v4065_v25, %v2009_v8  ;;  %v5564_v61 = vld [vmem:[#allocation25_spill] sm:$0xff]  ;;  %v5567_v45 = vld [vmem:[#allocation2_spill] sm:$0xff] }
 0x160   :  { %v1993_v5 = vadd.f32 %v1991_v20, %v1983_v34  ;;  %v1007_v32 = vadd.f32 %v1005_v50, %v997_v44  ;;  %v1008_v18 = vadd.f32 %v1006_v10, %v998_v31  ;;  %v2020_v1 = vmul.f32 %v4075_v37, %v2019_v4  ;;  %v5558_v37 = vld [vmem:[#allocation27_spill] sm:$0xff]  ;;  %v5560_v50 = vld [vmem:[#allocation34_spill] sm:$0xff]  ;;  %v5561_v10 = vld [vmem:[#allocation24_spill] sm:$0xff]  ;;  %v246_v20 = vpop.permute.xlu0 %245 }
 0x161   :  { %v2021_v19 = vmul.f32 %v4080_v15, %v2019_v4  ;;  %v2002_v36 = vadd.f32 %v2000_v43, %v1992_v11  ;;  %v2029_v39 = vrot.slane %v4217_v49, %v3686_v13  ;;  %v2039_v33 = vrot.slane %v4221_v46, %v3658_v51  ;;  %v5568_v34 = vld [vmem:[#allocation18_spill] sm:$0xff] }
 0x162   :  { %v2003_v48 = vadd.f32 %v2001_v21, %v1993_v5  ;;  %2821 = vst [vmem:[%s5336_s4 + $0x20] sm:$0xff] %v1007_v32  ;;  %2822 = vst [vmem:[%s5336_s4 + $0x28] sm:$0xff] %v1008_v18  ;;  %v5557_v7 = vrot.slane %v5556_v24, 2  ;;  %v2063_v15 = vrot.slane %v5558_v37, 2  ;;  %v1139_v49 = vadd.f32 %v5560_v50, %v5559_v58  ;;  %v5569_v43 = vld [vmem:[#allocation14_spill] sm:$0xff] }
 0x163   :  { %3276 = vpow2.f32 %v5561_v10  ;;  %v2012_v46 = vadd.f32 %v2010_v55, %v2002_v36  ;;  %v2030_v14 = vmul.f32 %v4091_v35, %v2029_v39  ;;  %v2031_v28 = vmul.f32 %v4096_v23, %v2029_v39  ;;  %v5566_v23 = vld [vmem:[#allocation29_spill] sm:$0xff]  ;;  %v261_v36 = vpop.permute.xlu1 %260  ;;  %v5572_v39 = vld [vmem:[#allocation3_spill] sm:$0xff] }
 0x164   :  { %v1029_v25 = vadd.f32 %v5557_v7, %v5556_v24  ;;  %v2013_v29 = vadd.f32 %v2011_v47, %v2003_v48  ;;  %v2040_v40 = vmul.f32 %v5535_v22, %v2039_v33  ;;  %v2041_v54 = vmul.f32 %v5562_v0, %v2039_v33  ;;  %v5573_v33 = vld [vmem:[#allocation21_spill] sm:$0xff]  ;;  %v5574_v7 = vld [vmem:[#allocation30_spill] sm:$0xff]  ;;  %v4342_v0 = vpop.f32.mrb[17].mxu1 }
 0x165   :  { %v2064_v42 = vadd.f32 %v2063_v15, %v5558_v37  ;;  %v2022_v30 = vadd.f32 %v2020_v1, %v2012_v46  ;;  %v1140_v9 = vrot.slane %v1139_v49, 4  ;;  %3278 = vpow2.f32 %v5563_v38  ;;  %v5571_v1 = vld [vmem:[#allocation19_spill] sm:$0xff]  ;;  %v5575_v37 = vld [vmem:[#allocation4_spill] sm:$0xff]  ;;  %v5576_v15 = vld [vmem:[#allocation49_spill] sm:$0xff]  ;;  %5580 = vst [vmem:[#allocation37_spill] sm:$0xff] %v4342_v0 }
 0x166   :  { %v1030_v6 = vrot.slane %v1029_v25, 1  ;;  %v2023_v27 = vadd.f32 %v2021_v19, %v2013_v29  ;;  %v5565_v63 = vrot.slane %v5564_v61, 4  ;;  %v4317_v26 = vmul.f32 0.25, %v5566_v23  ;;  %5620 = vst [vmem:[#allocation49_spill] sm:$0xff] %v4556_v53 }
 0x167   :  { %v2065_v59 = vrot.slane %v2064_v42, 1  ;;  %v2032_v22 = vadd.f32 %v2030_v14, %v2022_v30  ;;  %v1141_v4 = vadd.f32 %v1140_v9, %v1139_v49  ;;  %v514_v17 = vadd.f32 %v5568_v34, %v5567_v45  ;;  %v256_v30 = vpop.permute.xlu0 %255  ;;  %v5590_v34 = vld [vmem:[#allocation22_spill] sm:$0xff] }
 0x168   :  { %v1031_v60 = vadd.f32 %v1030_v6, %v1029_v25  ;;  %v1242_v35 = vmax.f32 %v5564_v61, %v5565_v63  ;;  %v2033_v8 = vadd.f32 %v2031_v28, %v2023_v27  ;;  %v2275_v21 = vmax.f32 %v4317_v26, %v5569_v43  ;;  %v5579_v28 = vld [vmem:[#allocation50_spill] sm:$0xff] }
 0x169   :  { %v2066_v44 = vadd.f32 %v2065_v59, %v2064_v42  ;;  %v2042_v11 = vadd.f32 %v2040_v40, %v2032_v22  ;;  %v1142_v55 = vrot.slane %v1141_v4, 2  ;;  %v4323_v47 = vmul.f32 0.25, %v514_v17  ;;  %v5586_v59 = vld [vmem:[#allocation51_spill] sm:$0xff] }
 0x16a   :  { %3280 = vrcp.f32 %v1031_v60  ;;  %v1243_v31 = vrot.slane %v1242_v35, 2  ;;  %v2043_v5 = vadd.f32 %v2041_v54, %v2033_v8  ;;  %v2276_v18 = vrot.slane %v2275_v21, 4  ;;  %v5585_v60 = vld [vmem:[#allocation5_spill] sm:$0xff]  ;;  %v5588_v8 = vld [vmem:[#allocation32_spill] sm:$0xff] }
 0x16b   :  { %5570 = vst [vmem:[#allocation48_spill] sm:$0xff] %v4323_v47  ;;  %3282 = vrcp.f32 %v2066_v44  ;;  %v604_v19 = vadd.f32 %v5571_v1, %v251_v62  ;;  %2989 = vst [vmem:[%s5336_s4 + $0xb0] sm:$0xff] %v2042_v11  ;;  %v1143_v48 = vadd.f32 %v1142_v55, %v1141_v4  ;;  %v509_v24 = vadd.f32 %v5573_v33, %v5572_v39  ;;  %v5594_v39 = vld [vmem:[#allocation16_spill] sm:$0xff] }
 0x16c   :  { %v1244_v32 = vmax.f32 %v1242_v35, %v1243_v31  ;;  %2990 = vst [vmem:[%s5336_s4 + $0xb8] sm:$0xff] %v2043_v5  ;;  %v599_v25 = vadd.f32 %v5574_v7, %v246_v20  ;;  %v524_v49 = vadd.f32 %v5576_v15, %v5575_v37  ;;  %v2277_v29 = vmax.f32 %v2275_v21, %v2276_v18  ;;  %v5591_v20 = vld [vmem:[#allocation9_spill] sm:$0xff]  ;;  %v4381_v7 = vld [vmem:[%s5335_s3 + $0x8] sm:$0xff] }
 0x16d   :  { %v4337_v10 = vpop.eup %3276  ;;  %v4339_v14 = vmul.f32 0.25, %v604_v19  ;;  %v614_v40 = vadd.f32 %v5579_v28, %v261_v36  ;;  %v1144_v54 = vrot.slane %v1143_v48, 1  ;;  %v4344_v6 = vmul.f32 0.25, %v509_v24  ;;  %v5593_v36 = vld [vmem:[#allocation15_spill] sm:$0xff]  ;;  %v4376_v24 = vld [vmem:[%s5335_s3] sm:$0xff] }
 0x16e   :  { %5577 = vst [vmem:[#allocation52_spill] sm:$0xff] %v4337_v10  ;;  %v1245_v46 = vrot.slane %v1244_v32, 1  ;;  %v4346_v42 = vmul.f32 0.25, %v599_v25  ;;  %v4348_v62 = vmul.f32 0.25, %v524_v49  ;;  %v2278_v9 = vrot.slane %v2277_v29, 2  ;;  %5595 = vst [vmem:[#allocation36_spill] sm:$0xff] %v4376_v24 }
 0x16f   :  { %5578 = vst [vmem:[#allocation10_spill] sm:$0xff] %v4339_v14  ;;  %5581 = vst [vmem:[#allocation11_spill] sm:$0xff] %v4344_v6  ;;  %v4350_v38 = vmul.f32 0.25, %v614_v40  ;;  %v519_v61 = vadd.f32 %v5586_v59, %v5585_v60  ;;  %v4354_v63 = vpop.eup %3278  ;;  %v1145_v35 = vadd.f32 %v1144_v54, %v1143_v48  ;;  %v1354_v23 = vmax.f32 %v4344_v6, %v4323_v47  ;;  %v4390_v49 = vld [vmem:[%s5335_s3 + $0x10] sm:$0xff] }
 0x170   :  { %5582 = vst [vmem:[#allocation12_spill] sm:$0xff] %v4346_v42  ;;  %5583 = vst [vmem:[#allocation42_spill] sm:$0xff] %v4348_v62  ;;  %v1246_v27 = vmax.f32 %v1244_v32, %v1245_v46  ;;  %v2389_v22 = vmax.f32 %v4346_v42, %v4339_v14  ;;  %v4361_v4 = vadd.f32 %v5588_v8, %v256_v30  ;;  %v4395_v46 = vld [vmem:[%s5335_s3 + $0x18] sm:$0xff]  ;;  %v4421_v59 = vld [vmem:[%s5335_s3 + $0x30] sm:$0xff] }
 0x171   :  { %5584 = vst [vmem:[#allocation13_spill] sm:$0xff] %v4350_v38  ;;  %5587 = vst [vmem:[#allocation26_spill] sm:$0xff] %v4354_v63  ;;  %v2174_v45 = vadd.f32 %v4354_v63, %v4337_v10  ;;  %v2279_v31 = vmax.f32 %v2277_v29, %v2278_v9  ;;  %3284 = vrcp.f32 %v1145_v35  ;;  %v1355_v21 = vrot.slane %v1354_v23, 4  ;;  %v4400_v29 = vld [vmem:[%s5335_s3 + $0x20] sm:$0xff]  ;;  %v4415_v9 = vld [vmem:[%s5335_s3 + $0x28] sm:$0xff] }
 0x172   :  { %5589 = vst [vmem:[#allocation31_spill] sm:$0xff] %v4361_v4  ;;  %v1247_v17 = vsub.f32 %v5590_v34, %v1246_v27  ;;  %v1248_v44 = vsub.f32 %v5591_v20, %v1246_v27  ;;  %v2390_v11 = vrot.slane %v2389_v22, 4  ;;  %v4367_v5 = vmul.f32 0.25, %v519_v61  ;;  %5599 = vst [vmem:[#allocation41_spill] sm:$0xff] %v4421_v59  ;;  %v4426_v61 = vld [vmem:[%s5335_s3 + $0x38] sm:$0xff]  ;;  %v4540_v38 = vld [vmem:[%s5335_s3 + $0xb0] sm:$0xff] }
 0x173   :  { %v2175_v32 = vrot.slane %v2174_v45, 4  ;;  %v2280_v19 = vrot.slane %v2279_v31, 1  ;;  %v4383_v25 = vmax.f32 %v1354_v23, %v1355_v21  ;;  %5600 = vst [vmem:[#allocation43_spill] sm:$0xff] %v4426_v61  ;;  %v4432_v23 = vld [vmem:[%s5335_s3 + $0x40] sm:$0xff]  ;;  %5617 = vst [vmem:[#allocation21_spill] sm:$0xff] %v4540_v38 }
 0x174   :  { %5592 = vst [vmem:[#allocation35_spill] sm:$0xff] %v4367_v5  ;;  %v3281_v55 = vpop.eup %3280  ;;  %v1249_v18 = vmul.f32 1.442695, %v1247_v17  ;;  %v4369_v1 = vmul.f32 1.442695, %v1248_v44  ;;  %v4385_v37 = vmax.f32 %v2389_v22, %v2390_v11  ;;  %v4408_v54 = vmax.f32 %v4367_v5, %v4348_v62  ;;  %5601 = vst [vmem:[#allocation44_spill] sm:$0xff] %v4432_v23 }
 0x175   :  { %v1033_v48 = vmul.f32 %v3281_v55, %v5593_v36  ;;  %v1034_v33 = vmul.f32 %v3281_v55, %v5594_v39  ;;  %5596 = vst [vmem:[#allocation38_spill] sm:$0xff] %v4383_v25  ;;  %v3283_v15 = vpop.eup %3282  ;;  %v4402_v28 = vadd.f32 %v2175_v32, %v2174_v45  ;;  %v4404_v40 = vmax.f32 %v2279_v31, %v2280_v19  ;;  %v4437_v22 = vld [vmem:[%s5335_s3 + $0x48] sm:$0xff]  ;;  %v4443_v45 = vld [vmem:[%s5335_s3 + $0x50] sm:$0xff]  ;;  %v4455_v55 = vld [vmem:[%s5335_s3 + $0x58] sm:$0xff] }
 0x176   :  { %5597 = vst [vmem:[#allocation39_spill] sm:$0xff] %v4385_v37  ;;  %3286 = vpow2.f32 %v1249_v18  ;;  %5598 = vst [vmem:[#allocation40_spill] sm:$0xff] %v4408_v54  ;;  %v4460_v32 = vld [vmem:[%s5335_s3 + $0x60] sm:$0xff]  ;;  %v4465_v18 = vld [vmem:[%s5335_s3 + $0x68] sm:$0xff] }
 0x177   :  { %v1040_v30 = vrot.slane %v1033_v48, %v3658_v51  ;;  %v1048_v27 = vrot.slane %v1033_v48, %v3660_v52  ;;  %v1058_v60 = vrot.slane %v1033_v48, %v3664_v56  ;;  %v1068_v35 = vrot.slane %v1033_v48, %v3666_v57  ;;  %5602 = vst [vmem:[#allocation23_spill] sm:$0xff] %v4437_v22 }
 0x178   :  { %v1078_v8 = vrot.slane %v1033_v48, %v3672_v2  ;;  %5603 = vst [vmem:[#allocation27_spill] sm:$0xff] %v4443_v45  ;;  %v1088_v34 = vrot.slane %v1033_v48, %v3674_v3  ;;  %v1098_v17 = vrot.slane %v1033_v48, %v3684_v12  ;;  %v1108_v20 = vrot.slane %v1033_v48, %v3686_v13 }
 0x179   :  { %v1041_v44 = vmul.f32 %v1040_v30, %v4376_v24  ;;  %v1042_v31 = vmul.f32 %v1040_v30, %v4381_v7  ;;  %v1049_v21 = vmul.f32 %v4390_v49, %v1048_v27  ;;  %v1050_v11 = vmul.f32 %v4395_v46, %v1048_v27  ;;  %5604 = vst [vmem:[#allocation33_spill] sm:$0xff] %v4455_v55  ;;  %v4474_v30 = vld [vmem:[%s5335_s3 + $0x70] sm:$0xff]  ;;  %v4479_v27 = vld [vmem:[%s5335_s3 + $0x78] sm:$0xff] }
 0x17a   :  { %5605 = vst [vmem:[#allocation34_spill] sm:$0xff] %v4460_v32  ;;  %5606 = vst [vmem:[#allocation24_spill] sm:$0xff] %v4465_v18  ;;  %v1059_v19 = vmul.f32 %v4400_v29, %v1058_v60  ;;  %v1060_v36 = vmul.f32 %v4415_v9, %v1058_v60  ;;  %v1069_v48 = vmul.f32 %v4421_v59, %v1068_v35  ;;  %3288 = vpow2.f32 %v4369_v1 }
 0x17b   :  { %v1070_v39 = vmul.f32 %v4426_v61, %v1068_v35  ;;  %5607 = vst [vmem:[#allocation53_spill] sm:$0xff] %v4474_v30  ;;  %5608 = vst [vmem:[#allocation28_spill] sm:$0xff] %v4479_v27  ;;  %v1051_v63 = vadd.f32 %v1049_v21, %v1041_v44  ;;  %v1052_v10 = vadd.f32 %v1050_v11, %v1042_v31  ;;  %v3285_v42 = vpop.eup %3284  ;;  %v4492_v31 = vld [vmem:[%s5335_s3 + $0x80] sm:$0xff] }
 0x17c   :  { %v1079_v62 = vmul.f32 %v4432_v23, %v1078_v8  ;;  %v1080_v60 = vmul.f32 %v4437_v22, %v1078_v8  ;;  %v1089_v5 = vmul.f32 %v4443_v45, %v1088_v34  ;;  %v1090_v35 = vmul.f32 %v4455_v55, %v1088_v34  ;;  %5609 = vst [vmem:[#allocation25_spill] sm:$0xff] %v4492_v31  ;;  %v4497_v8 = vld [vmem:[%s5335_s3 + $0x88] sm:$0xff] }
 0x17d   :  { %v1099_v0 = vmul.f32 %v4460_v32, %v1098_v17  ;;  %v1100_v14 = vmul.f32 %v4465_v18, %v1098_v17  ;;  %v1061_v41 = vadd.f32 %v1059_v19, %v1051_v63  ;;  %v1062_v47 = vadd.f32 %v1060_v36, %v1052_v10  ;;  %5610 = vst [vmem:[#allocation29_spill] sm:$0xff] %v4497_v8  ;;  %v5611_v17 = vld [vmem:[#allocation17_spill] sm:$0xff]  ;;  %v5612_v63 = vld [vmem:[#allocation20_spill] sm:$0xff] }
 0x17e   :  { %v1109_v6 = vmul.f32 %v4474_v30, %v1108_v20  ;;  %v1110_v44 = vmul.f32 %v4479_v27, %v1108_v20  ;;  %v1118_v34 = vrot.slane %v1034_v33, %v3658_v51  ;;  %v2068_v21 = vmul.f32 %v3283_v15, %v5611_v17  ;;  %v4507_v20 = vld [vmem:[%s5335_s3 + $0x90] sm:$0xff]  ;;  %v4520_v33 = vld [vmem:[%s5335_s3 + $0xa0] sm:$0xff] }
 0x17f   :  { %v4502_v10 = vmul.f32 %v3283_v15, %v5612_v63  ;;  %5613 = vst [vmem:[#allocation2_spill] sm:$0xff] %v4507_v20  ;;  %v4510_v11 = vmul.f32 %v3285_v42, %v5559_v58  ;;  %v1071_v19 = vadd.f32 %v1069_v48, %v1061_v41  ;;  %v1072_v36 = vadd.f32 %v1070_v39, %v1062_v47  ;;  %v4525_v15 = vld [vmem:[%s5335_s3 + $0xa8] sm:$0xff] }
 0x180   :  { %5614 = vst [vmem:[#allocation18_spill] sm:$0xff] %v4520_v33  ;;  %5615 = vst [vmem:[#allocation19_spill] sm:$0xff] %v4525_v15  ;;  %v4528_v58 = vmul.f32 %v3285_v42, %v5560_v50  ;;  %v4531_v47 = vpop.eup %3286  ;;  %v1119_v48 = vmul.f32 %v4492_v31, %v1118_v34  ;;  %v1120_v39 = vmul.f32 %v4497_v8, %v1118_v34  ;;  %v4545_v50 = vld [vmem:[%s5335_s3 + $0xb8] sm:$0xff]  ;;  %v4551_v34 = vld [vmem:[%s5335_s3 + $0xc0] sm:$0xff] }
 0x181   :  { %5616 = vst [vmem:[#allocation3_spill] sm:$0xff] %v4531_v47  ;;  %v2075_v17 = vrot.slane %v2068_v21, %v3658_v51  ;;  %v2083_v63 = vrot.slane %v2068_v21, %v3660_v52  ;;  %5618 = vst [vmem:[#allocation30_spill] sm:$0xff] %v4545_v50  ;;  %v1081_v42 = vadd.f32 %v1079_v62, %v1071_v19 }
 0x182   :  { %v1082_v41 = vadd.f32 %v1080_v60, %v1072_v36  ;;  %v2093_v47 = vrot.slane %v2068_v21, %v3664_v56  ;;  %5619 = vst [vmem:[#allocation4_spill] sm:$0xff] %v4551_v34  ;;  %v2103_v4 = vrot.slane %v2068_v21, %v3666_v57 }
 0x183   :  { %v2076_v54 = vmul.f32 %v4507_v20, %v2075_v17  ;;  %v2077_v37 = vmul.f32 %v4515_v16, %v2075_v17  ;;  %v2084_v62 = vmul.f32 %v4520_v33, %v2083_v63  ;;  %v2085_v60 = vmul.f32 %v4525_v15, %v2083_v63  ;;  %v4570_v17 = vld [vmem:[%s5335_s3 + $0xd0] sm:$0xff] }
 0x184   :  { %v1091_v19 = vadd.f32 %v1089_v5, %v1081_v42  ;;  %v1092_v36 = vadd.f32 %v1090_v35, %v1082_v41  ;;  %v2094_v25 = vmul.f32 %v4540_v38, %v2093_v47  ;;  %v2095_v8 = vmul.f32 %v4545_v50, %v2093_v47  ;;  %5621 = vst [vmem:[#allocation50_spill] sm:$0xff] %v4570_v17  ;;  %v4575_v5 = vld [vmem:[%s5335_s3 + $0xd8] sm:$0xff] }
 0x185   :  { %v2086_v31 = vadd.f32 %v2084_v62, %v2076_v54  ;;  %v2087_v27 = vadd.f32 %v2085_v60, %v2077_v37  ;;  %v2104_v30 = vmul.f32 %v4551_v34, %v2103_v4  ;;  %v2105_v43 = vmul.f32 %v4556_v53, %v2103_v4  ;;  %5622 = vst [vmem:[#allocation5_spill] sm:$0xff] %v4575_v5  ;;  %v4581_v37 = vld [vmem:[%s5335_s3 + $0xe0] sm:$0xff]  ;;  %v4586_v4 = vld [vmem:[%s5335_s3 + $0xe8] sm:$0xff] }
 0x186   :  { %v1101_v35 = vadd.f32 %v1099_v0, %v1091_v19  ;;  %v1102_v41 = vadd.f32 %v1100_v14, %v1092_v36  ;;  %v2113_v47 = vrot.slane %v2068_v21, %v3672_v2  ;;  %5623 = vst [vmem:[#allocation51_spill] sm:$0xff] %v4586_v4  ;;  %v2123_v54 = vrot.slane %v2068_v21, %v3674_v3  ;;  %v4592_v14 = vld [vmem:[%s5335_s3 + $0xf0] sm:$0xff]  ;;  %v4597_v0 = vld [vmem:[%s5335_s3 + $0xf8] sm:$0xff] }
 0x187   :  { %v2096_v63 = vadd.f32 %v2094_v25, %v2086_v31  ;;  %v2097_v42 = vadd.f32 %v2095_v8, %v2087_v27  ;;  %5624 = vst [vmem:[#allocation32_spill] sm:$0xff] %v4592_v14  ;;  %v2133_v62 = vrot.slane %v2068_v21, %v3684_v12  ;;  %v2143_v60 = vrot.slane %v2068_v21, %v3686_v13  ;;  %v4606_v27 = vld [vmem:[%s5335_s3 + $0x100] sm:$0xff]  ;;  %v4611_v31 = vld [vmem:[%s5335_s3 + $0x108] sm:$0xff] }
 0x188   :  { %v1111_v19 = vadd.f32 %v1109_v6, %v1101_v35  ;;  %v1112_v36 = vadd.f32 %v1110_v44, %v1102_v41  ;;  %v2114_v53 = vmul.f32 %v4570_v17, %v2113_v47  ;;  %v2115_v25 = vmul.f32 %v4575_v5, %v2113_v47  ;;  %5625 = vst [vmem:[#allocation22_spill] sm:$0xff] %v4606_v27 }
 0x189   :  { %5626 = vst [vmem:[#allocation9_spill] sm:$0xff] %v4611_v31  ;;  %v2106_v8 = vadd.f32 %v2104_v30, %v2096_v63  ;;  %v2107_v34 = vadd.f32 %v2105_v43, %v2097_v42  ;;  %v2124_v21 = vmul.f32 %v4581_v37, %v2123_v54  ;;  %v2125_v6 = vmul.f32 %v4586_v4, %v2123_v54  ;;  %v4622_v43 = vld [vmem:[%s5335_s3 + $0x110] sm:$0xff]  ;;  %v4627_v30 = vld [vmem:[%s5335_s3 + $0x118] sm:$0xff] }
 0x18a   :  { %v1121_v44 = vadd.f32 %v1119_v48, %v1111_v19  ;;  %v1122_v35 = vadd.f32 %v1120_v39, %v1112_v36  ;;  %v2134_v41 = vmul.f32 %v4592_v14, %v2133_v62  ;;  %v2135_v47 = vmul.f32 %v4597_v0, %v2133_v62  ;;  %5627 = vst [vmem:[#allocation15_spill] sm:$0xff] %v4622_v43 }
 0x18b   :  { %v2116_v5 = vadd.f32 %v2114_v53, %v2106_v8  ;;  %v2117_v17 = vadd.f32 %v2115_v25, %v2107_v34  ;;  %v2144_v50 = vmul.f32 %v4606_v27, %v2143_v60  ;;  %v2145_v38 = vmul.f32 %v4611_v31, %v2143_v60  ;;  %5628 = vst [vmem:[#allocation16_spill] sm:$0xff] %v4627_v30 }
 0x18c   :  { %2839 = vst [vmem:[%s5336_s4 + $0x30] sm:$0xff] %v1121_v44  ;;  %2840 = vst [vmem:[%s5336_s4 + $0x38] sm:$0xff] %v1122_v35  ;;  %v2153_v53 = vrot.slane %v4502_v10, %v3658_v51  ;;  %v1154_v48 = vrot.slane %v4510_v11, %v3658_v51  ;;  %v1162_v39 = vrot.slane %v4510_v11, %v3660_v52 }
 0x18d   :  { %v1172_v34 = vrot.slane %v4510_v11, %v3664_v56  ;;  %v2126_v54 = vadd.f32 %v2124_v21, %v2116_v5  ;;  %v2127_v63 = vadd.f32 %v2125_v6, %v2117_v17  ;;  %v1182_v42 = vrot.slane %v4510_v11, %v3666_v57 }
 0x18e   :  { %v1192_v62 = vrot.slane %v4510_v11, %v3672_v2  ;;  %v2154_v60 = vmul.f32 %v4622_v43, %v2153_v53  ;;  %v2155_v10 = vmul.f32 %v4627_v30, %v2153_v53  ;;  %v1155_v19 = vmul.f32 %v1154_v48, %v4376_v24 }
 0x18f   :  { %v1156_v36 = vmul.f32 %v1154_v48, %v4381_v7  ;;  %v2136_v25 = vadd.f32 %v2134_v41, %v2126_v54  ;;  %v2137_v8 = vadd.f32 %v2135_v47, %v2127_v63  ;;  %v1163_v44 = vmul.f32 %v4390_v49, %v1162_v39 }
 0x190   :  { %v1164_v17 = vmul.f32 %v4395_v46, %v1162_v39  ;;  %v1173_v5 = vmul.f32 %v4400_v29, %v1172_v34  ;;  %v1174_v21 = vmul.f32 %v4415_v9, %v1172_v34  ;;  %v1183_v6 = vmul.f32 %v4421_v59, %v1182_v42 }
 0x191   :  { %v1184_v35 = vmul.f32 %v4426_v61, %v1182_v42  ;;  %v2146_v43 = vadd.f32 %v2144_v50, %v2136_v25  ;;  %v2147_v53 = vadd.f32 %v2145_v38, %v2137_v8  ;;  %v1165_v30 = vadd.f32 %v1163_v44, %v1155_v19  ;;  %v5630_v25 = vld [vmem:[#allocation14_spill] sm:$0xff] }
 0x192   :  { %v1166_v24 = vadd.f32 %v1164_v17, %v1156_v36  ;;  %v1193_v48 = vmul.f32 %v4432_v23, %v1192_v62  ;;  %v1194_v41 = vmul.f32 %v4437_v22, %v1192_v62  ;;  %v1202_v47 = vrot.slane %v4510_v11, %v3674_v3  ;;  %v5631_v17 = vld [vmem:[#allocation53_spill] sm:$0xff]  ;;  %v5661_v61 = vld [vmem:[#allocation50_spill] sm:$0xff] }
 0x193   :  { %v1212_v39 = vrot.slane %v4510_v11, %v3684_v12  ;;  %v2156_v54 = vadd.f32 %v2154_v60, %v2146_v43  ;;  %v2157_v34 = vadd.f32 %v2155_v10, %v2147_v53  ;;  %v1175_v63 = vadd.f32 %v1173_v5, %v1165_v30 }
 0x194   :  { %v1176_v59 = vadd.f32 %v1174_v21, %v1166_v24  ;;  %v1203_v42 = vmul.f32 %v4443_v45, %v1202_v47  ;;  %v1204_v38 = vmul.f32 %v4455_v55, %v1202_v47  ;;  %v1222_v24 = vrot.slane %v4510_v11, %v3686_v13  ;;  %v5632_v11 = vld [vmem:[#allocation28_spill] sm:$0xff]  ;;  %v5660_v55 = vld [vmem:[#allocation49_spill] sm:$0xff] }
 0x195   :  { %v1213_v50 = vmul.f32 %v4460_v32, %v1212_v39  ;;  %v1214_v19 = vmul.f32 %v4465_v18, %v1212_v39  ;;  %3009 = vst [vmem:[%s5336_s4 + $0xc0] sm:$0xff] %v2156_v54  ;;  %3010 = vst [vmem:[%s5336_s4 + $0xc8] sm:$0xff] %v2157_v34  ;;  %v1185_v43 = vadd.f32 %v1183_v6, %v1175_v63  ;;  %v5629_v60 = vrot.slane %v4402_v28, 2  ;;  %v5633_v6 = vld [vmem:[#allocation25_spill] sm:$0xff]  ;;  %v5635_v34 = vld [vmem:[#allocation38_spill] sm:$0xff] }
 0x196   :  { %v1186_v62 = vadd.f32 %v1184_v35, %v1176_v59  ;;  %v1232_v30 = vrot.slane %v4528_v58, %v3658_v51  ;;  %v2282_v36 = vsub.f32 %v4317_v26, %v4404_v40  ;;  %v2283_v8 = vsub.f32 %v5630_v25, %v4404_v40  ;;  %v5634_v35 = vld [vmem:[#allocation29_spill] sm:$0xff]  ;;  %v5636_v40 = vld [vmem:[#allocation39_spill] sm:$0xff]  ;;  %v271_v25 = vpop.permute.xlu1 %270  ;;  %v5659_v18 = vld [vmem:[#allocation4_spill] sm:$0xff] }
 0x197   :  { %v2178_v10 = vadd.f32 %v5629_v60, %v4402_v28  ;;  %v1195_v44 = vadd.f32 %v1193_v48, %v1185_v43  ;;  %v1223_v5 = vmul.f32 %v5631_v17, %v1222_v24  ;;  %v1224_v21 = vmul.f32 %v5632_v11, %v1222_v24 }
 0x198   :  { %v1196_v59 = vadd.f32 %v1194_v41, %v1186_v62  ;;  %v1233_v58 = vmul.f32 %v5633_v6, %v1232_v30  ;;  %v1234_v53 = vmul.f32 %v5634_v35, %v1232_v30  ;;  %v2284_v28 = vmul.f32 1.442695, %v2282_v36  ;;  %v5637_v41 = vld [vmem:[#allocation40_spill] sm:$0xff] }
 0x199   :  { %v2179_v47 = vrot.slane %v2178_v10, 1  ;;  %v1205_v39 = vadd.f32 %v1203_v42, %v1195_v44  ;;  %v2286_v54 = vmul.f32 1.442695, %v2283_v8  ;;  %v1357_v26 = vrot.slane %v5635_v34, 2 }
 0x19a   :  { %v1206_v1 = vadd.f32 %v1204_v38, %v1196_v59  ;;  %3290 = vpow2.f32 %v2284_v28  ;;  %v2392_v48 = vrot.slane %v5636_v40, 2  ;;  %v1469_v43 = vrot.slane %v5637_v41, 4  ;;  %v5638_v38 = vld [vmem:[#allocation31_spill] sm:$0xff]  ;;  %v5639_v59 = vld [vmem:[#allocation6_spill] sm:$0xff] }
 0x19b   :  { %v2180_v63 = vadd.f32 %v2179_v47, %v2178_v10  ;;  %v1215_v62 = vadd.f32 %v1213_v50, %v1205_v39  ;;  %3292 = vpow2.f32 %v2286_v54  ;;  %v1358_v24 = vmax.f32 %v5635_v34, %v1357_v26  ;;  %v5640_v47 = vld [vmem:[#allocation45_spill] sm:$0xff]  ;;  %v5642_v54 = vld [vmem:[#allocation46_spill] sm:$0xff] }
 0x19c   :  { %v1216_v60 = vadd.f32 %v1214_v19, %v1206_v1  ;;  %v2393_v30 = vmax.f32 %v5636_v40, %v2392_v48  ;;  %v1470_v42 = vmax.f32 %v5637_v41, %v1469_v43  ;;  %v4696_v36 = vmul.f32 0.25, %v5638_v38  ;;  %v5641_v39 = vld [vmem:[#allocation13_spill] sm:$0xff]  ;;  %v4705_v41 = vpop.eup %3288  ;;  %v5645_v38 = vld [vmem:[#allocation48_spill] sm:$0xff] }
 0x19d   :  { %3294 = vrcp.f32 %v2180_v63  ;;  %v1225_v10 = vadd.f32 %v1223_v5, %v1215_v62  ;;  %v1359_v44 = vrot.slane %v1358_v24, 1  ;;  %v534_v28 = vadd.f32 %v5640_v47, %v5639_v59  ;;  %v5649_v59 = vld [vmem:[#allocation10_spill] sm:$0xff] }
 0x19e   :  { %v1226_v8 = vadd.f32 %v1224_v21, %v1216_v60  ;;  %v2394_v50 = vrot.slane %v2393_v30, 1  ;;  %v1471_v19 = vrot.slane %v1470_v42, 2  ;;  %v2503_v1 = vmax.f32 %v4696_v36, %v5641_v39  ;;  %v5644_v60 = vld [vmem:[#allocation11_spill] sm:$0xff] }
 0x19f   :  { %v624_v34 = vadd.f32 %v5642_v54, %v271_v25  ;;  %v1235_v26 = vadd.f32 %v1233_v58, %v1225_v10  ;;  %v1360_v40 = vmax.f32 %v1358_v24, %v1359_v44  ;;  %v4703_v48 = vmul.f32 0.25, %v534_v28  ;;  %v5643_v58 = vld [vmem:[#allocation3_spill] sm:$0xff] }
 0x1a0   :  { %v1236_v63 = vadd.f32 %v1234_v53, %v1226_v8  ;;  %v2395_v5 = vmax.f32 %v2393_v30, %v2394_v50  ;;  %v1472_v21 = vmax.f32 %v1470_v42, %v1471_v19  ;;  %v2504_v43 = vrot.slane %v2503_v1, 4  ;;  %v5646_v30 = vld [vmem:[#allocation7_spill] sm:$0xff]  ;;  %v5648_v8 = vld [vmem:[#allocation12_spill] sm:$0xff] }
 0x1a1   :  { %v4707_v62 = vmul.f32 0.25, %v624_v34  ;;  %2857 = vst [vmem:[%s5336_s4 + $0x40] sm:$0xff] %v1235_v26  ;;  %v1253_v53 = vadd.f32 %v4705_v41, %v5643_v58  ;;  %v1361_v24 = vsub.f32 %v5644_v60, %v1360_v40  ;;  %v1362_v25 = vsub.f32 %v5645_v38, %v1360_v40  ;;  %v5647_v42 = vld [vmem:[#allocation47_spill] sm:$0xff]  ;;  %v266_v60 = vpop.permute.xlu0 %265 }
 0x1a2   :  { %2858 = vst [vmem:[%s5336_s4 + $0x48] sm:$0xff] %v1236_v63  ;;  %v529_v10 = vadd.f32 %v5647_v42, %v5646_v30  ;;  %v2396_v44 = vsub.f32 %v5648_v8, %v2395_v5  ;;  %v2397_v47 = vsub.f32 %v5649_v59, %v2395_v5  ;;  %v1473_v28 = vrot.slane %v1472_v21, 1  ;;  %v5652_v5 = vld [vmem:[#allocation37_spill] sm:$0xff] }
 0x1a3   :  { %v4723_v50 = vmax.f32 %v2503_v1, %v2504_v43  ;;  %v1254_v19 = vrot.slane %v1253_v53, 4  ;;  %v1363_v54 = vmul.f32 1.442695, %v1361_v24  ;;  %v1365_v34 = vmul.f32 1.442695, %v1362_v25 }
 0x1a4   :  { %v4725_v26 = vmul.f32 0.25, %v529_v10  ;;  %v4727_v63 = vpop.eup %3290  ;;  %v2398_v35 = vmul.f32 1.442695, %v2396_v44  ;;  %v2400_v40 = vmul.f32 1.442695, %v2397_v47  ;;  %v1474_v38 = vmax.f32 %v1472_v21, %v1473_v28  ;;  %v5653_v10 = vld [vmem:[#allocation35_spill] sm:$0xff] }
 0x1a5   :  { %5650 = vst [vmem:[#allocation17_spill] sm:$0xff] %v4727_v63  ;;  %v4730_v42 = vpop.eup %3292  ;;  %v1255_v8 = vadd.f32 %v1254_v19, %v1253_v53  ;;  %3296 = vpow2.f32 %v1363_v54  ;;  %v4737_v43 = vadd.f32 %v5652_v5, %v266_v60  ;;  %v5654_v44 = vld [vmem:[#allocation42_spill] sm:$0xff]  ;;  %v5655_v47 = vld [vmem:[#allocation52_spill] sm:$0xff] }
 0x1a6   :  { %5651 = vst [vmem:[#allocation20_spill] sm:$0xff] %v4730_v42  ;;  %v4734_v1 = vmax.f32 %v4725_v26, %v4703_v48  ;;  %v2288_v25 = vadd.f32 %v4730_v42, %v4727_v63  ;;  %3298 = vpow2.f32 %v1365_v34  ;;  %v1475_v21 = vsub.f32 %v5653_v10, %v1474_v38  ;;  %v5656_v53 = vld [vmem:[#allocation26_spill] sm:$0xff] }
 0x1a7   :  { %v3295_v24 = vpop.eup %3294  ;;  %v1476_v59 = vsub.f32 %v5654_v44, %v1474_v38  ;;  %v1256_v54 = vrot.slane %v1255_v8, 2  ;;  %3300 = vpow2.f32 %v2398_v35  ;;  %v5658_v63 = vld [vmem:[#allocation30_spill] sm:$0xff] }
 0x1a8   :  { %v2182_v28 = vmul.f32 %v3295_v24, %v5655_v47  ;;  %v2183_v19 = vmul.f32 %v3295_v24, %v5656_v53  ;;  %v2289_v30 = vrot.slane %v2288_v25, 4  ;;  %3302 = vpow2.f32 %v2400_v40  ;;  %v5657_v53 = vld [vmem:[#allocation21_spill] sm:$0xff] }
 0x1a9   :  { %v1477_v6 = vmul.f32 1.442695, %v1475_v21  ;;  %v1479_v60 = vmul.f32 1.442695, %v1476_v59 }
 0x1aa   :  { %v2189_v5 = vrot.slane %v2182_v28, %v3658_v51  ;;  %v2197_v11 = vrot.slane %v2182_v28, %v3660_v52  ;;  %v2207_v34 = vrot.slane %v2182_v28, %v3664_v56  ;;  %v2217_v10 = vrot.slane %v2182_v28, %v3666_v57 }
 0x1ab   :  { %v2227_v38 = vrot.slane %v2182_v28, %v3672_v2  ;;  %v2237_v44 = vrot.slane %v2182_v28, %v3674_v3  ;;  %v2247_v24 = vrot.slane %v2182_v28, %v3684_v12  ;;  %v2257_v35 = vrot.slane %v2182_v28, %v3686_v13  ;;  %v5662_v13 = vld [vmem:[#allocation5_spill] sm:$0xff] }
 0x1ac   :  { %v2190_v40 = vmul.f32 %v4507_v20, %v2189_v5  ;;  %v2191_v21 = vmul.f32 %v4515_v16, %v2189_v5  ;;  %v2198_v59 = vmul.f32 %v4520_v33, %v2197_v11  ;;  %v2199_v47 = vmul.f32 %v4525_v15, %v2197_v11 }
 0x1ad   :  { %v2208_v42 = vmul.f32 %v5657_v53, %v2207_v34  ;;  %v2209_v17 = vmul.f32 %v5658_v63, %v2207_v34  ;;  %v2218_v32 = vmul.f32 %v5659_v18, %v2217_v10  ;;  %v2219_v45 = vmul.f32 %v5660_v55, %v2217_v10 }
 0x1ae   :  { %v2200_v22 = vadd.f32 %v2198_v59, %v2190_v40  ;;  %v2201_v23 = vadd.f32 %v2199_v47, %v2191_v21  ;;  %v2228_v28 = vmul.f32 %v5661_v61, %v2227_v38  ;;  %v2229_v20 = vmul.f32 %v5662_v13, %v2227_v38 }
 0x1af   :  { %v2238_v5 = vmul.f32 %v4581_v37, %v2237_v44  ;;  %v2239_v33 = vmul.f32 %v4586_v4, %v2237_v44  ;;  %v2248_v11 = vmul.f32 %v4592_v14, %v2247_v24  ;;  %v2249_v53 = vmul.f32 %v4597_v0, %v2247_v24  ;;  %v4767_v15 = vpop.eup %3296 }
 0x1b0   :  { %v2210_v34 = vadd.f32 %v2208_v42, %v2200_v22  ;;  %v2211_v18 = vadd.f32 %v2209_v17, %v2201_v23  ;;  %v2258_v10 = vmul.f32 %v4606_v27, %v2257_v35  ;;  %v2259_v40 = vmul.f32 %v4611_v31, %v2257_v35  ;;  %v4771_v21 = vpop.eup %3298  ;;  %v5664_v22 = vld [vmem:[#allocation15_spill] sm:$0xff]  ;;  %v5665_v42 = vld [vmem:[#allocation16_spill] sm:$0xff] }
 0x1b1   :  { %v2267_v38 = vrot.slane %v2183_v19, %v3658_v51  ;;  %v1257_v59 = vadd.f32 %v1256_v54, %v1255_v8  ;;  %v2290_v47 = vadd.f32 %v2289_v30, %v2288_v25  ;;  %3304 = vpow2.f32 %v1477_v6  ;;  %v4774_v44 = vpop.eup %3300 }
 0x1b2   :  { %v2220_v14 = vadd.f32 %v2218_v32, %v2210_v34  ;;  %v2221_v4 = vadd.f32 %v2219_v45, %v2211_v18  ;;  %v1367_v24 = vadd.f32 %v4771_v21, %v4767_v15  ;;  %3306 = vpow2.f32 %v1479_v60  ;;  %v4778_v23 = vpop.eup %3302 }
 0x1b3   :  { %5663 = vst [vmem:[#allocation14_spill] sm:$0xff] %v4778_v23  ;;  %v2268_v17 = vmul.f32 %v5664_v22, %v2267_v38  ;;  %v2269_v35 = vmul.f32 %v5665_v42, %v2267_v38  ;;  %v1258_v31 = vrot.slane %v1257_v59, 1  ;;  %v2291_v27 = vrot.slane %v2290_v47, 2 }
 0x1b4   :  { %v2230_v19 = vadd.f32 %v2228_v28, %v2220_v14  ;;  %v2231_v8 = vadd.f32 %v2229_v20, %v2221_v4  ;;  %v1368_v30 = vrot.slane %v1367_v24, 4  ;;  %v2402_v6 = vadd.f32 %v4778_v23, %v4774_v44 }
 0x1b5   :  { %v1259_v32 = vadd.f32 %v1258_v31, %v1257_v59  ;;  %v2292_v45 = vadd.f32 %v2291_v27, %v2290_v47  ;;  %v5666_v18 = vrot.slane %v4723_v50, 2  ;;  %v1583_v54 = vrot.slane %v4734_v1, 4 }
 0x1b6   :  { %v2240_v60 = vadd.f32 %v2238_v5, %v2230_v19  ;;  %v2241_v34 = vadd.f32 %v2239_v33, %v2231_v8  ;;  %v1369_v22 = vadd.f32 %v1368_v30, %v1367_v24  ;;  %v2403_v38 = vrot.slane %v2402_v6, 4 }
 0x1b7   :  { %v2507_v25 = vmax.f32 %v4723_v50, %v5666_v18  ;;  %3308 = vrcp.f32 %v1259_v32  ;;  %v2293_v42 = vrot.slane %v2292_v45, 1  ;;  %v1584_v20 = vmax.f32 %v4734_v1, %v1583_v54 }
 0x1b8   :  { %v2250_v4 = vadd.f32 %v2248_v11, %v2240_v60  ;;  %v2251_v28 = vadd.f32 %v2249_v53, %v2241_v34  ;;  %v1370_v23 = vrot.slane %v1369_v22, 2  ;;  %v2404_v31 = vadd.f32 %v2403_v38, %v2402_v6 }
 0x1b9   :  { %v2508_v14 = vrot.slane %v2507_v25, 1  ;;  %v2294_v27 = vadd.f32 %v2293_v42, %v2292_v45  ;;  %v1585_v47 = vrot.slane %v1584_v20, 2  ;;  %v4790_v50 = vmul.f32 0.25, %v4737_v43 }
 0x1ba   :  { %v2260_v18 = vadd.f32 %v2258_v10, %v2250_v4  ;;  %v2261_v5 = vadd.f32 %v2259_v40, %v2251_v28  ;;  %v1371_v33 = vadd.f32 %v1370_v23, %v1369_v22  ;;  %v2405_v24 = vrot.slane %v2404_v31, 2 }
 0x1bb   :  { %v2509_v59 = vmax.f32 %v2507_v25, %v2508_v14  ;;  %v4792_v19 = vpop.eup %3304  ;;  %v1586_v11 = vmax.f32 %v1584_v20, %v1585_v47  ;;  %3310 = vrcp.f32 %v2294_v27  ;;  %v2617_v22 = vmax.f32 %v4790_v50, %v4707_v62 }
 0x1bc   :  { %v4796_v53 = vpop.eup %3306  ;;  %v2270_v30 = vadd.f32 %v2268_v17, %v2260_v18  ;;  %v2271_v42 = vadd.f32 %v2269_v35, %v2261_v5  ;;  %v1372_v6 = vrot.slane %v1371_v33, 1  ;;  %v2406_v32 = vadd.f32 %v2405_v24, %v2404_v31 }
 0x1bd   :  { %v2510_v8 = vsub.f32 %v4696_v36, %v2509_v59  ;;  %v2511_v1 = vsub.f32 %v5641_v39, %v2509_v59  ;;  %v1481_v43 = vadd.f32 %v4796_v53, %v4792_v19  ;;  %v1587_v40 = vrot.slane %v1586_v11, 1 }
 0x1be   :  { %3029 = vst [vmem:[%s5336_s4 + $0xd0] sm:$0xff] %v2270_v30  ;;  %3030 = vst [vmem:[%s5336_s4 + $0xd8] sm:$0xff] %v2271_v42  ;;  %v1373_v36 = vadd.f32 %v1372_v6, %v1371_v33  ;;  %v2407_v39 = vrot.slane %v2406_v32, 1  ;;  %v2618_v34 = vrot.slane %v2617_v22, 4  ;;  %v5668_v42 = vld [vmem:[#allocation8_spill] sm:$0xff] }
 0x1bf   :  { %v2512_v10 = vmul.f32 1.442695, %v2510_v8  ;;  %v2514_v23 = vmul.f32 1.442695, %v2511_v1  ;;  %v1482_v17 = vrot.slane %v1481_v43, 4  ;;  %v4808_v35 = vmax.f32 %v1586_v11, %v1587_v40  ;;  %v5669_v40 = vld [vmem:[#allocation41_spill] sm:$0xff] }
 0x1c0   :  { %3312 = vrcp.f32 %v1373_v36  ;;  %v2408_v45 = vadd.f32 %v2407_v39, %v2406_v32  ;;  %v5670_v39 = vld [vmem:[#allocation43_spill] sm:$0xff] }
 0x1c1   :  { %v3309_v25 = vpop.eup %3308  ;;  %3314 = vpow2.f32 %v2512_v10  ;;  %v1483_v20 = vadd.f32 %v1482_v17, %v1481_v43  ;;  %v5672_v17 = vld [vmem:[#allocation23_spill] sm:$0xff] }
 0x1c2   :  { %v1261_v38 = vmul.f32 %v3309_v25, %v5643_v58  ;;  %v1262_v14 = vmul.f32 %v3309_v25, %v4705_v41  ;;  %3316 = vpow2.f32 %v2514_v23  ;;  %v4823_v58 = vmax.f32 %v2617_v22, %v2618_v34  ;;  %v5667_v41 = vld [vmem:[#allocation36_spill] sm:$0xff]  ;;  %v5674_v25 = vld [vmem:[#allocation33_spill] sm:$0xff] }
 0x1c3   :  { %3318 = vrcp.f32 %v2408_v45  ;;  %v1484_v32 = vrot.slane %v1483_v20, 2  ;;  %v5671_v22 = vld [vmem:[#allocation44_spill] sm:$0xff]  ;;  %v5673_v45 = vld [vmem:[#allocation27_spill] sm:$0xff] }
 0x1c4   :  { %v1268_v4 = vrot.slane %v1261_v38, %v3658_v51  ;;  %v1276_v28 = vrot.slane %v1261_v38, %v3660_v52  ;;  %v1286_v31 = vrot.slane %v1261_v38, %v3664_v56  ;;  %v1296_v27 = vrot.slane %v1261_v38, %v3666_v57 }
 0x1c5   :  { %v1306_v59 = vrot.slane %v1261_v38, %v3672_v2  ;;  %v1316_v47 = vrot.slane %v1261_v38, %v3674_v3  ;;  %v1326_v18 = vrot.slane %v1261_v38, %v3684_v12  ;;  %v3311_v1 = vpop.eup %3310  ;;  %v1336_v6 = vrot.slane %v1261_v38, %v5668_v42 }
 0x1c6   :  { %v1269_v5 = vmul.f32 %v1268_v4, %v5667_v41  ;;  %v1270_v33 = vmul.f32 %v1268_v4, %v4381_v7  ;;  %v1277_v24 = vmul.f32 %v4390_v49, %v1276_v28  ;;  %v1278_v8 = vmul.f32 %v4395_v46, %v1276_v28  ;;  %v5675_v28 = vld [vmem:[#allocation34_spill] sm:$0xff] }
 0x1c7   :  { %v1287_v11 = vmul.f32 %v4400_v29, %v1286_v31  ;;  %v1288_v30 = vmul.f32 %v4415_v9, %v1286_v31  ;;  %v1297_v36 = vmul.f32 %v5669_v40, %v1296_v27  ;;  %v1298_v23 = vmul.f32 %v5670_v39, %v1296_v27  ;;  %v5676_v31 = vld [vmem:[#allocation24_spill] sm:$0xff]  ;;  %v5678_v27 = vld [vmem:[#allocation17_spill] sm:$0xff] }
 0x1c8   :  { %v1279_v43 = vadd.f32 %v1277_v24, %v1269_v5  ;;  %v1280_v10 = vadd.f32 %v1278_v8, %v1270_v33  ;;  %v1307_v7 = vmul.f32 %v5671_v22, %v1306_v59  ;;  %v1308_v49 = vmul.f32 %v5672_v17, %v1306_v59  ;;  %v5677_v33 = vld [vmem:[#allocation53_spill] sm:$0xff]  ;;  %v5679_v40 = vld [vmem:[#allocation20_spill] sm:$0xff] }
 0x1c9   :  { %v1317_v46 = vmul.f32 %v5673_v45, %v1316_v47  ;;  %v1318_v34 = vmul.f32 %v5674_v25, %v1316_v47  ;;  %v1327_v38 = vmul.f32 %v5675_v28, %v1326_v18  ;;  %v1328_v41 = vmul.f32 %v5676_v31, %v1326_v18  ;;  %v5683_v31 = vld [vmem:[#allocation19_spill] sm:$0xff] }
 0x1ca   :  { %v3313_v29 = vpop.eup %3312  ;;  %v1289_v4 = vadd.f32 %v1287_v11, %v1279_v43  ;;  %v1290_v9 = vadd.f32 %v1288_v30, %v1280_v10  ;;  %v1337_v24 = vmul.f32 %v5677_v33, %v1336_v6  ;;  %v2296_v8 = vmul.f32 %v3311_v1, %v5678_v27  ;;  %v5680_v10 = vld [vmem:[#allocation28_spill] sm:$0xff] }
 0x1cb   :  { %v4840_v5 = vpop.eup %3314  ;;  %v2297_v39 = vmul.f32 %v3311_v1, %v5679_v40  ;;  %v4846_v59 = vmul.f32 %v3313_v29, %v4767_v15  ;;  %v1346_v30 = vrot.slane %v1262_v14, %v3658_v51  ;;  %v4852_v43 = vmul.f32 %v3313_v29, %v4771_v21  ;;  %v5681_v14 = vld [vmem:[#allocation2_spill] sm:$0xff]  ;;  %v5684_v40 = vld [vmem:[#allocation25_spill] sm:$0xff] }
 0x1cc   :  { %v4848_v22 = vpop.eup %3316  ;;  %v1299_v47 = vadd.f32 %v1297_v36, %v1289_v4  ;;  %v1300_v11 = vadd.f32 %v1298_v23, %v1290_v9  ;;  %v1338_v17 = vmul.f32 %v5680_v10, %v1336_v6  ;;  %v2303_v45 = vrot.slane %v2296_v8, %v3658_v51  ;;  %v5682_v29 = vld [vmem:[#allocation18_spill] sm:$0xff] }
 0x1cd   :  { %v4854_v18 = vpop.eup %3318  ;;  %v2311_v1 = vrot.slane %v2296_v8, %v3660_v52  ;;  %v4859_v25 = vadd.f32 %v1484_v32, %v1483_v20  ;;  %v2321_v36 = vrot.slane %v2296_v8, %v3664_v56  ;;  %v2331_v23 = vrot.slane %v2296_v8, %v3666_v57  ;;  %v5685_v20 = vld [vmem:[#allocation21_spill] sm:$0xff] }
 0x1ce   :  { %v1309_v15 = vadd.f32 %v1307_v7, %v1299_v47  ;;  %v1310_v28 = vadd.f32 %v1308_v49, %v1300_v11  ;;  %v2304_v4 = vmul.f32 %v5681_v14, %v2303_v45  ;;  %v2305_v21 = vmul.f32 %v4515_v16, %v2303_v45  ;;  %v5686_v11 = vld [vmem:[#allocation4_spill] sm:$0xff] }
 0x1cf   :  { %v2312_v9 = vmul.f32 %v5682_v29, %v2311_v1  ;;  %v2313_v6 = vmul.f32 %v5683_v31, %v2311_v1  ;;  %v1347_v10 = vmul.f32 %v5684_v40, %v1346_v30  ;;  %v2322_v32 = vmul.f32 %v5685_v20, %v2321_v36 }
 0x1d0   :  { %v1319_v33 = vadd.f32 %v1317_v46, %v1309_v15  ;;  %v1320_v27 = vadd.f32 %v1318_v34, %v1310_v28  ;;  %v2323_v47 = vmul.f32 %v5658_v63, %v2321_v36  ;;  %v2332_v60 = vmul.f32 %v5686_v11, %v2331_v23  ;;  %v4921_v11 = vld [vmem:[%s5335_s3 + $0x20] sm:$0xff] }
 0x1d1   :  { %v2314_v7 = vadd.f32 %v2312_v9, %v2304_v4  ;;  %v2315_v49 = vadd.f32 %v2313_v6, %v2305_v21  ;;  %v2341_v16 = vrot.slane %v2296_v8, %v3672_v2  ;;  %v2351_v45 = vrot.slane %v2296_v8, %v3674_v3  ;;  %v5687_v4 = vld [vmem:[#allocation29_spill] sm:$0xff] }
 0x1d2   :  { %v1329_v54 = vadd.f32 %v1327_v38, %v1319_v33  ;;  %v1330_v14 = vadd.f32 %v1328_v41, %v1320_v27  ;;  %v2333_v46 = vmul.f32 %v5660_v55, %v2331_v23  ;;  %v2361_v34 = vrot.slane %v2296_v8, %v3684_v12  ;;  %v5688_v27 = vld [vmem:[#allocation51_spill] sm:$0xff] }
 0x1d3   :  { %v2324_v29 = vadd.f32 %v2322_v32, %v2314_v7  ;;  %v2325_v1 = vadd.f32 %v2323_v47, %v2315_v49  ;;  %v1348_v21 = vmul.f32 %v5687_v4, %v1346_v30  ;;  %v2371_v63 = vrot.slane %v2296_v8, %v5668_v42  ;;  %v4910_v8 = vld [vmem:[%s5335_s3 + $0x18] sm:$0xff]  ;;  %v5690_v32 = vld [vmem:[#allocation22_spill] sm:$0xff]  ;;  %v4939_v4 = vld [vmem:[%s5335_s3 + $0x30] sm:$0xff] }
 0x1d4   :  { %v1339_v15 = vadd.f32 %v1337_v24, %v1329_v54  ;;  %v1340_v28 = vadd.f32 %v1338_v17, %v1330_v14  ;;  %v2342_v38 = vmul.f32 %v5661_v61, %v2341_v16  ;;  %v2343_v41 = vmul.f32 %v5662_v13, %v2341_v16  ;;  %v5689_v54 = vld [vmem:[#allocation32_spill] sm:$0xff]  ;;  %v4891_v13 = vld [vmem:[%s5335_s3 + $0x8] sm:$0xff]  ;;  %v5691_v49 = vld [vmem:[#allocation9_spill] sm:$0xff] }
 0x1d5   :  { %v2334_v36 = vadd.f32 %v2332_v60, %v2324_v29  ;;  %v2335_v9 = vadd.f32 %v2333_v46, %v2325_v1  ;;  %v2352_v33 = vmul.f32 %v4581_v37, %v2351_v45  ;;  %v2353_v55 = vmul.f32 %v5688_v27, %v2351_v45  ;;  %v4886_v60 = vld [vmem:[%s5335_s3] sm:$0xff]  ;;  %v4926_v14 = vld [vmem:[%s5335_s3 + $0x28] sm:$0xff] }
 0x1d6   :  { %v1349_v31 = vadd.f32 %v1347_v10, %v1339_v15  ;;  %v1350_v6 = vadd.f32 %v1348_v21, %v1340_v28  ;;  %v2362_v24 = vmul.f32 %v5689_v54, %v2361_v34  ;;  %v2363_v30 = vmul.f32 %v4597_v0, %v2361_v34  ;;  %v4905_v0 = vld [vmem:[%s5335_s3 + $0x10] sm:$0xff]  ;;  %v4944_v21 = vld [vmem:[%s5335_s3 + $0x38] sm:$0xff] }
 0x1d7   :  { %v2344_v23 = vadd.f32 %v2342_v38, %v2334_v36  ;;  %v2345_v40 = vadd.f32 %v2343_v41, %v2335_v9  ;;  %v2381_v61 = vrot.slane %v2297_v39, %v3658_v51  ;;  %v1382_v37 = vrot.slane %v4846_v59, %v3658_v51  ;;  %v5693_v9 = vld [vmem:[#allocation16_spill] sm:$0xff] }
 0x1d8   :  { %2875 = vst [vmem:[%s5336_s4 + $0x50] sm:$0xff] %v1349_v31  ;;  %2876 = vst [vmem:[%s5336_s4 + $0x58] sm:$0xff] %v1350_v6  ;;  %v1390_v17 = vrot.slane %v4846_v59, %v3660_v52  ;;  %v1400_v10 = vrot.slane %v4846_v59, %v3664_v56  ;;  %v2372_v7 = vmul.f32 %v5690_v32, %v2371_v63  ;;  %v4953_v6 = vld [vmem:[%s5335_s3 + $0x40] sm:$0xff]  ;;  %v4963_v54 = vld [vmem:[%s5335_s3 + $0x50] sm:$0xff] }
 0x1d9   :  { %v2354_v39 = vadd.f32 %v2352_v33, %v2344_v23  ;;  %v2355_v20 = vadd.f32 %v2353_v55, %v2345_v40  ;;  %v2373_v47 = vmul.f32 %v5691_v49, %v2371_v63  ;;  %v1383_v16 = vmul.f32 %v1382_v37, %v4886_v60  ;;  %v5692_v63 = vld [vmem:[#allocation15_spill] sm:$0xff] }
 0x1da   :  { %v1384_v45 = vmul.f32 %v1382_v37, %v4891_v13  ;;  %v1410_v29 = vrot.slane %v4846_v59, %v3666_v57  ;;  %v1420_v1 = vrot.slane %v4846_v59, %v3672_v2  ;;  %v1391_v15 = vmul.f32 %v4905_v0, %v1390_v17  ;;  %v4958_v40 = vld [vmem:[%s5335_s3 + $0x48] sm:$0xff] }
 0x1db   :  { %v2364_v46 = vadd.f32 %v2362_v24, %v2354_v39  ;;  %v2365_v34 = vadd.f32 %v2363_v30, %v2355_v20  ;;  %v1392_v28 = vmul.f32 %v4910_v8, %v1390_v17  ;;  %v2382_v36 = vmul.f32 %v5692_v63, %v2381_v61  ;;  %v4968_v24 = vld [vmem:[%s5335_s3 + $0x58] sm:$0xff]  ;;  %v4977_v17 = vld [vmem:[%s5335_s3 + $0x60] sm:$0xff]  ;;  %v4984_v49 = vld [vmem:[%s5335_s3 + $0x68] sm:$0xff] }
 0x1dc   :  { %v2383_v38 = vmul.f32 %v5693_v9, %v2381_v61  ;;  %v1401_v41 = vmul.f32 %v4921_v11, %v1400_v10  ;;  %v1402_v31 = vmul.f32 %v4926_v14, %v1400_v10  ;;  %v1393_v55 = vadd.f32 %v1391_v15, %v1383_v16  ;;  %5694 = vst [vmem:[#allocation38_spill] sm:$0xff] %v4977_v17 }
 0x1dd   :  { %v2374_v33 = vadd.f32 %v2372_v7, %v2364_v46  ;;  %v2375_v27 = vadd.f32 %v2373_v47, %v2365_v34  ;;  %v1394_v23 = vadd.f32 %v1392_v28, %v1384_v45  ;;  %v1411_v30 = vmul.f32 %v4939_v4, %v1410_v29  ;;  %5695 = vst [vmem:[#allocation39_spill] sm:$0xff] %v4984_v49  ;;  %v5005_v28 = vld [vmem:[%s5335_s3 + $0x78] sm:$0xff] }
 0x1de   :  { %v1412_v61 = vmul.f32 %v4944_v21, %v1410_v29  ;;  %v1430_v37 = vrot.slane %v4846_v59, %v3674_v3  ;;  %v1440_v10 = vrot.slane %v4846_v59, %v3684_v12  ;;  %v1403_v32 = vadd.f32 %v1401_v41, %v1393_v55  ;;  %5697 = vst [vmem:[#allocation31_spill] sm:$0xff] %v5005_v28 }
 0x1df   :  { %v2384_v39 = vadd.f32 %v2382_v36, %v2374_v33  ;;  %v2385_v20 = vadd.f32 %v2383_v38, %v2375_v27  ;;  %v1404_v7 = vadd.f32 %v1402_v31, %v1394_v23  ;;  %v1421_v47 = vmul.f32 %v4953_v6, %v1420_v1  ;;  %v5698_v38 = vld [vmem:[#allocation14_spill] sm:$0xff]  ;;  %v5019_v31 = vld [vmem:[%s5335_s3 + $0x90] sm:$0xff]  ;;  %v5040_v23 = vld [vmem:[%s5335_s3 + $0xa8] sm:$0xff] }
 0x1e0   :  { %v1422_v16 = vmul.f32 %v4958_v40, %v1420_v1  ;;  %v1431_v45 = vmul.f32 %v4963_v54, %v1430_v37  ;;  %v1432_v29 = vmul.f32 %v4968_v24, %v1430_v37  ;;  %v1413_v46 = vadd.f32 %v1411_v30, %v1403_v32  ;;  %v5000_v1 = vld [vmem:[%s5335_s3 + $0x70] sm:$0xff]  ;;  %5699 = vst [vmem:[#allocation6_spill] sm:$0xff] %v5019_v31  ;;  %v5048_v37 = vld [vmem:[%s5335_s3 + $0x80] sm:$0xff] }
 0x1e1   :  { %3049 = vst [vmem:[%s5336_s4 + $0xe0] sm:$0xff] %v2384_v39  ;;  %3050 = vst [vmem:[%s5336_s4 + $0xe8] sm:$0xff] %v2385_v20  ;;  %v1414_v34 = vadd.f32 %v1412_v61, %v1404_v7  ;;  %v1441_v15 = vmul.f32 %v4977_v17, %v1440_v10  ;;  %v1450_v63 = vrot.slane %v4846_v59, %v5668_v42  ;;  %v1486_v30 = vrot.slane %v4859_v25, 1 }
 0x1e2   :  { %5696 = vst [vmem:[#allocation40_spill] sm:$0xff] %v5000_v1  ;;  %v1442_v36 = vmul.f32 %v4984_v49, %v1440_v10  ;;  %v2410_v9 = vmul.f32 %v4854_v18, %v4774_v44  ;;  %v5014_v41 = vmul.f32 %v4854_v18, %v5698_v38  ;;  %v5023_v33 = vadd.f32 %v4848_v22, %v4840_v5  ;;  %v5030_v44 = vld [vmem:[%s5335_s3 + $0x98] sm:$0xff]  ;;  %v5035_v18 = vld [vmem:[%s5335_s3 + $0xa0] sm:$0xff]  ;;  %v5053_v10 = vld [vmem:[%s5335_s3 + $0x88] sm:$0xff] }
 0x1e3   :  { %v1423_v27 = vadd.f32 %v1421_v47, %v1413_v46  ;;  %v1424_v59 = vadd.f32 %v1422_v16, %v1414_v34  ;;  %v1460_v55 = vrot.slane %v4852_v43, %v3658_v51  ;;  %5700 = vst [vmem:[#allocation45_spill] sm:$0xff] %v5030_v44  ;;  %5701 = vst [vmem:[#allocation13_spill] sm:$0xff] %v5035_v18  ;;  %v5060_v47 = vld [vmem:[%s5335_s3 + $0xb0] sm:$0xff]  ;;  %v5065_v16 = vld [vmem:[%s5335_s3 + $0xb8] sm:$0xff] }
 0x1e4   :  { %5702 = vst [vmem:[#allocation46_spill] sm:$0xff] %v5040_v23  ;;  %v1451_v61 = vmul.f32 %v5000_v1, %v1450_v63  ;;  %v1452_v43 = vmul.f32 %v5005_v28, %v1450_v63  ;;  %5703 = vst [vmem:[#allocation3_spill] sm:$0xff] %v5048_v37  ;;  %v2417_v39 = vrot.slane %v2410_v9, %v3658_v51  ;;  %v5078_v49 = vld [vmem:[%s5335_s3 + $0xc0] sm:$0xff] }
 0x1e5   :  { %5704 = vst [vmem:[#allocation11_spill] sm:$0xff] %v5053_v10  ;;  %v2425_v20 = vrot.slane %v2410_v9, %v3660_v52  ;;  %v1433_v32 = vadd.f32 %v1431_v45, %v1423_v27  ;;  %v1434_v7 = vadd.f32 %v1432_v29, %v1424_v59  ;;  %5705 = vst [vmem:[#allocation48_spill] sm:$0xff] %v5065_v16 }
 0x1e6   :  { %v2435_v46 = vrot.slane %v2410_v9, %v3664_v56  ;;  %v2445_v34 = vrot.slane %v2410_v9, %v3666_v57  ;;  %v2418_v63 = vmul.f32 %v5019_v31, %v2417_v39  ;;  %v2419_v38 = vmul.f32 %v5030_v44, %v2417_v39  ;;  %v5083_v31 = vld [vmem:[%s5335_s3 + $0xc8] sm:$0xff] }
 0x1e7   :  { %v2426_v45 = vmul.f32 %v5035_v18, %v2425_v20  ;;  %v2427_v29 = vmul.f32 %v5040_v23, %v2425_v20  ;;  %v1443_v27 = vadd.f32 %v1441_v15, %v1433_v32  ;;  %v1444_v59 = vadd.f32 %v1442_v36, %v1434_v7  ;;  %5706 = vst [vmem:[#allocation7_spill] sm:$0xff] %v5083_v31  ;;  %v5095_v7 = vld [vmem:[%s5335_s3 + $0xd8] sm:$0xff] }
 0x1e8   :  { %v1461_v28 = vmul.f32 %v5048_v37, %v1460_v55  ;;  %v1462_v1 = vmul.f32 %v5053_v10, %v1460_v55  ;;  %v2436_v20 = vmul.f32 %v5060_v47, %v2435_v46  ;;  %v2437_v15 = vmul.f32 %v5065_v16, %v2435_v46  ;;  %v5090_v55 = vld [vmem:[%s5335_s3 + $0xd0] sm:$0xff] }
 0x1e9   :  { %v2428_v39 = vadd.f32 %v2426_v45, %v2418_v63  ;;  %v2429_v18 = vadd.f32 %v2427_v29, %v2419_v38  ;;  %v1453_v36 = vadd.f32 %v1451_v61, %v1443_v27  ;;  %v1454_v32 = vadd.f32 %v1452_v43, %v1444_v59  ;;  %v5104_v43 = vld [vmem:[%s5335_s3 + $0xe0] sm:$0xff]  ;;  %v5109_v59 = vld [vmem:[%s5335_s3 + $0xe8] sm:$0xff] }
 0x1ea   :  { %v2455_v10 = vrot.slane %v2410_v9, %v3672_v2  ;;  %v2465_v63 = vrot.slane %v2410_v9, %v3674_v3  ;;  %v2446_v46 = vmul.f32 %v5078_v49, %v2445_v34  ;;  %v2447_v61 = vmul.f32 %v5083_v31, %v2445_v34  ;;  %5707 = vst [vmem:[#allocation47_spill] sm:$0xff] %v5104_v43 }
 0x1eb   :  { %v2438_v38 = vadd.f32 %v2436_v20, %v2428_v39  ;;  %v2439_v45 = vadd.f32 %v2437_v15, %v2429_v18  ;;  %v1463_v29 = vadd.f32 %v1461_v28, %v1453_v36  ;;  %v1464_v27 = vadd.f32 %v1462_v1, %v1454_v32  ;;  %5708 = vst [vmem:[#allocation12_spill] sm:$0xff] %v5109_v59  ;;  %v5120_v1 = vld [vmem:[%s5335_s3 + $0xf0] sm:$0xff]  ;;  %v5125_v28 = vld [vmem:[%s5335_s3 + $0xf8] sm:$0xff] }
 0x1ec   :  { %v2475_v16 = vrot.slane %v2410_v9, %v3684_v12  ;;  %v5709_v18 = vsub.f32 %v4725_v26, %v4808_v35  ;;  %v2456_v15 = vmul.f32 %v5090_v55, %v2455_v10  ;;  %v2457_v31 = vmul.f32 %v5095_v7, %v2455_v10  ;;  %5710 = vst [vmem:[#allocation10_spill] sm:$0xff] %v5120_v1 }
 0x1ed   :  { %v2448_v20 = vadd.f32 %v2446_v46, %v2438_v38  ;;  %v2449_v34 = vadd.f32 %v2447_v61, %v2439_v45  ;;  %5711 = vst [vmem:[#allocation37_spill] sm:$0xff] %v5125_v28  ;;  %2893 = vst [vmem:[%s5336_s4 + $0x60] sm:$0xff] %v1463_v29  ;;  %v2466_v26 = vmul.f32 %v5104_v43, %v2465_v63  ;;  %v5142_v61 = vld [vmem:[%s5335_s3 + $0x100] sm:$0xff] }
 0x1ee   :  { %v1591_v39 = vmul.f32 1.442695, %v5709_v18  ;;  %2894 = vst [vmem:[%s5336_s4 + $0x68] sm:$0xff] %v1464_v27  ;;  %v2485_v10 = vrot.slane %v2410_v9, %v5668_v42  ;;  %v5712_v36 = vsub.f32 %v4703_v48, %v4808_v35  ;;  %v2467_v46 = vmul.f32 %v5109_v59, %v2465_v63  ;;  %5713 = vst [vmem:[#allocation35_spill] sm:$0xff] %v5142_v61  ;;  %v5150_v48 = vld [vmem:[%s5335_s3 + $0x108] sm:$0xff] }
 0x1ef   :  { %v2458_v38 = vadd.f32 %v2456_v15, %v2448_v20  ;;  %v2459_v45 = vadd.f32 %v2457_v31, %v2449_v34  ;;  %v1487_v29 = vadd.f32 %v1486_v30, %v4859_v25  ;;  %v2476_v27 = vmul.f32 %v5120_v1, %v2475_v16  ;;  %v5160_v30 = vld [vmem:[%s5335_s3 + $0x110] sm:$0xff] }
 0x1f0   :  { %v1593_v32 = vmul.f32 1.442695, %v5712_v36  ;;  %v2477_v18 = vmul.f32 %v5125_v28, %v2475_v16  ;;  %v2517_v35 = vrot.slane %v5023_v33, 4  ;;  %v2620_v9 = vrot.slane %v4823_v58, 2  ;;  %v5165_v16 = vld [vmem:[%s5335_s3 + $0x118] sm:$0xff] }
 0x1f1   :  { %v2468_v31 = vadd.f32 %v2466_v26, %v2458_v38  ;;  %v2469_v63 = vadd.f32 %v2467_v46, %v2459_v45  ;;  %v2495_v20 = vrot.slane %v5014_v41, %v3658_v51  ;;  %3320 = vpow2.f32 %v1591_v39 }
 0x1f2   :  { %v2486_v25 = vmul.f32 %v5142_v61, %v2485_v10  ;;  %3322 = vrcp.f32 %v1487_v29  ;;  %v2518_v34 = vadd.f32 %v2517_v35, %v5023_v33  ;;  %v2621_v15 = vmax.f32 %v4823_v58, %v2620_v9 }
 0x1f3   :  { %v2478_v26 = vadd.f32 %v2476_v27, %v2468_v31  ;;  %v2479_v41 = vadd.f32 %v2477_v18, %v2469_v63  ;;  %v2487_v39 = vmul.f32 %v5150_v48, %v2485_v10  ;;  %3324 = vpow2.f32 %v1593_v32 }
 0x1f4   :  { %v2519_v36 = vrot.slane %v2518_v34, 2  ;;  %v2622_v38 = vrot.slane %v2621_v15, 1  ;;  %v2496_v61 = vmul.f32 %v5160_v30, %v2495_v20  ;;  %v2497_v28 = vmul.f32 %v5165_v16, %v2495_v20 }
 0x1f5   :  { %v2488_v45 = vadd.f32 %v2486_v25, %v2478_v26  ;;  %v2489_v46 = vadd.f32 %v2487_v39, %v2479_v41 }
 0x1f6   :  { %v2520_v1 = vadd.f32 %v2519_v36, %v2518_v34  ;;  %v2623_v59 = vmax.f32 %v2621_v15, %v2622_v38 }
 0x1f7   :  { %v2498_v29 = vadd.f32 %v2496_v61, %v2488_v45  ;;  %v2499_v43 = vadd.f32 %v2497_v28, %v2489_v46 }
 0x1f8   :  { %v2521_v33 = vrot.slane %v2520_v1, 1  ;;  %v2624_v58 = vsub.f32 %v4790_v50, %v2623_v59  ;;  %v2625_v27 = vsub.f32 %v4707_v62, %v2623_v59 }
 0x1f9   :  { %3069 = vst [vmem:[%s5336_s4 + $0xf0] sm:$0xff] %v2498_v29  ;;  %3070 = vst [vmem:[%s5336_s4 + $0xf8] sm:$0xff] %v2499_v43 }
 0x1fa   :  { %v2522_v10 = vadd.f32 %v2521_v33, %v2520_v1  ;;  %v2626_v59 = vmul.f32 1.442695, %v2624_v58  ;;  %v2628_v31 = vmul.f32 1.442695, %v2625_v27 }
 0x1fb   :  { %v5180_v32 = vpop.eup %3320 }
 0x1fc   :  { %v3323_v18 = vpop.eup %3322  ;;  %3326 = vrcp.f32 %v2522_v10 }
 0x1fd   :  { %v5182_v61 = vpop.eup %3324  ;;  %v1489_v28 = vmul.f32 %v3323_v18, %v4792_v19  ;;  %v1490_v50 = vmul.f32 %v3323_v18, %v4796_v53  ;;  %3328 = vpow2.f32 %v2626_v59 }
 0x1fe   :  { %v1595_v62 = vadd.f32 %v5182_v61, %v5180_v32  ;;  %3330 = vpow2.f32 %v2628_v31 }
 0x1ff   :  { %v1496_v35 = vrot.slane %v1489_v28, %v3658_v51  ;;  %v1504_v9 = vrot.slane %v1489_v28, %v3660_v52  ;;  %v1514_v43 = vrot.slane %v1489_v28, %v3664_v56  ;;  %v1524_v1 = vrot.slane %v1489_v28, %v3666_v57 }
 0x200   :  { %v1534_v25 = vrot.slane %v1489_v28, %v3672_v2  ;;  %v1544_v34 = vrot.slane %v1489_v28, %v3674_v3  ;;  %v1554_v36 = vrot.slane %v1489_v28, %v3684_v12  ;;  %v1564_v18 = vrot.slane %v1489_v28, %v5668_v42  ;;  %v5714_v28 = vld [vmem:[#allocation39_spill] sm:$0xff] }
 0x201   :  { %v1497_v63 = vmul.f32 %v1496_v35, %v4886_v60  ;;  %v1498_v20 = vmul.f32 %v1496_v35, %v4891_v13  ;;  %v1505_v19 = vmul.f32 %v4905_v0, %v1504_v9  ;;  %v1506_v53 = vmul.f32 %v4910_v8, %v1504_v9 }
 0x202   :  { %v1515_v41 = vmul.f32 %v4921_v11, %v1514_v43  ;;  %v1516_v39 = vmul.f32 %v4926_v14, %v1514_v43  ;;  %v1525_v46 = vmul.f32 %v4939_v4, %v1524_v1  ;;  %v1526_v29 = vmul.f32 %v4944_v21, %v1524_v1 }
 0x203   :  { %v1507_v15 = vadd.f32 %v1505_v19, %v1497_v63  ;;  %v1508_v26 = vadd.f32 %v1506_v53, %v1498_v20  ;;  %v1535_v58 = vmul.f32 %v4953_v6, %v1534_v25  ;;  %v1536_v27 = vmul.f32 %v4958_v40, %v1534_v25 }
 0x204   :  { %v1545_v10 = vmul.f32 %v4963_v54, %v1544_v34  ;;  %v1546_v31 = vmul.f32 %v4968_v24, %v1544_v34  ;;  %v1555_v63 = vmul.f32 %v4977_v17, %v1554_v36  ;;  %v1574_v1 = vrot.slane %v1490_v50, %v3658_v51 }
 0x205   :  { %v1517_v38 = vadd.f32 %v1515_v41, %v1507_v15  ;;  %v1518_v45 = vadd.f32 %v1516_v39, %v1508_v26  ;;  %v1596_v20 = vrot.slane %v1595_v62, 4  ;;  %v1556_v26 = vmul.f32 %v5714_v28, %v1554_v36  ;;  %v5715_v41 = vld [vmem:[#allocation40_spill] sm:$0xff] }
 0x206   :  { %v3327_v33 = vpop.eup %3326  ;;  %v1565_v39 = vmul.f32 %v5715_v41, %v1564_v18 }
 0x207   :  { %v1527_v59 = vadd.f32 %v1525_v46, %v1517_v38  ;;  %v1528_v35 = vadd.f32 %v1526_v29, %v1518_v45  ;;  %v2524_v9 = vmul.f32 %v3327_v33, %v4840_v5  ;;  %v2525_v43 = vmul.f32 %v3327_v33, %v4848_v22  ;;  %v5716_v5 = vld [vmem:[#allocation31_spill] sm:$0xff]  ;;  %v5717_v46 = vld [vmem:[#allocation6_spill] sm:$0xff]  ;;  %v5220_v33 = vpop.eup %3328 }
 0x208   :  { %v1566_v38 = vmul.f32 %v5716_v5, %v1564_v18 }
 0x209   :  { %v1537_v19 = vadd.f32 %v1535_v58, %v1527_v59  ;;  %v1538_v53 = vadd.f32 %v1536_v27, %v1528_v35  ;;  %v2531_v25 = vrot.slane %v2524_v9, %v3658_v51  ;;  %v2539_v15 = vrot.slane %v2524_v9, %v3660_v52  ;;  %v5718_v27 = vld [vmem:[#allocation13_spill] sm:$0xff] }
 0x20a   :  { %v2549_v22 = vrot.slane %v2524_v9, %v3664_v56  ;;  %v1575_v58 = vmul.f32 %v5048_v37, %v1574_v1  ;;  %v2559_v35 = vrot.slane %v2524_v9, %v3666_v57  ;;  %v2569_v5 = vrot.slane %v2524_v9, %v3672_v2 }
 0x20b   :  { %v1547_v34 = vadd.f32 %v1545_v10, %v1537_v19  ;;  %v1548_v45 = vadd.f32 %v1546_v31, %v1538_v53  ;;  %v2532_v29 = vmul.f32 %v5717_v46, %v2531_v25  ;;  %v2533_v50 = vmul.f32 %v5030_v44, %v2531_v25  ;;  %v5227_v31 = vpop.eup %3330  ;;  %v5719_v44 = vld [vmem:[#allocation48_spill] sm:$0xff] }
 0x20c   :  { %v2540_v59 = vmul.f32 %v5718_v27, %v2539_v15  ;;  %v2541_v36 = vmul.f32 %v5040_v23, %v2539_v15  ;;  %v1597_v10 = vadd.f32 %v1596_v20, %v1595_v62  ;;  %v2550_v25 = vmul.f32 %v5060_v47, %v2549_v22  ;;  %v5720_v27 = vld [vmem:[#allocation11_spill] sm:$0xff] }
 0x20d   :  { %v1557_v41 = vadd.f32 %v1555_v63, %v1547_v34  ;;  %v1558_v18 = vadd.f32 %v1556_v26, %v1548_v45  ;;  %v2551_v46 = vmul.f32 %v5719_v44, %v2549_v22  ;;  %v1576_v17 = vmul.f32 %v5720_v27, %v1574_v1  ;;  %v5721_v34 = vld [vmem:[#allocation7_spill] sm:$0xff] }
 0x20e   :  { %v2542_v19 = vadd.f32 %v2540_v59, %v2532_v29  ;;  %v2543_v53 = vadd.f32 %v2541_v36, %v2533_v50  ;;  %v2579_v15 = vrot.slane %v2524_v9, %v3674_v3  ;;  %v2560_v26 = vmul.f32 %v5078_v49, %v2559_v35  ;;  %v5722_v1 = vld [vmem:[#allocation47_spill] sm:$0xff] }
 0x20f   :  { %v1567_v37 = vadd.f32 %v1565_v39, %v1557_v41  ;;  %v1568_v28 = vadd.f32 %v1566_v38, %v1558_v18  ;;  %v2561_v62 = vmul.f32 %v5721_v34, %v2559_v35  ;;  %v2589_v29 = vrot.slane %v2524_v9, %v3684_v12  ;;  %v5725_v18 = vld [vmem:[#allocation37_spill] sm:$0xff] }
 0x210   :  { %v2552_v23 = vadd.f32 %v2550_v25, %v2542_v19  ;;  %v2553_v63 = vadd.f32 %v2551_v46, %v2543_v53  ;;  %v1598_v50 = vrot.slane %v1597_v10, 2  ;;  %v2570_v41 = vmul.f32 %v5090_v55, %v2569_v5 }
 0x211   :  { %v1577_v20 = vadd.f32 %v1575_v58, %v1567_v37  ;;  %v1578_v45 = vadd.f32 %v1576_v17, %v1568_v28  ;;  %v2571_v39 = vmul.f32 %v5095_v7, %v2569_v5  ;;  %v2580_v37 = vmul.f32 %v5722_v1, %v2579_v15  ;;  %v5723_v17 = vld [vmem:[#allocation12_spill] sm:$0xff]  ;;  %v5724_v58 = vld [vmem:[#allocation10_spill] sm:$0xff] }
 0x212   :  { %v2562_v59 = vadd.f32 %v2560_v26, %v2552_v23  ;;  %v2563_v36 = vadd.f32 %v2561_v62, %v2553_v63  ;;  %v2581_v28 = vmul.f32 %v5723_v17, %v2579_v15  ;;  %v2599_v38 = vrot.slane %v2524_v9, %v5668_v42 }
 0x213   :  { %2911 = vst [vmem:[%s5336_s4 + $0x70] sm:$0xff] %v1577_v20  ;;  %2912 = vst [vmem:[%s5336_s4 + $0x78] sm:$0xff] %v1578_v45  ;;  %v1599_v46 = vadd.f32 %v1598_v50, %v1597_v10  ;;  %v2630_v5 = vadd.f32 %v5227_v31, %v5220_v33  ;;  %v2590_v35 = vmul.f32 %v5724_v58, %v2589_v29  ;;  %v5726_v20 = vld [vmem:[#allocation35_spill] sm:$0xff] }
 0x214   :  { %v2572_v23 = vadd.f32 %v2570_v41, %v2562_v59  ;;  %v2573_v22 = vadd.f32 %v2571_v39, %v2563_v36  ;;  %v2591_v19 = vmul.f32 %v5725_v18, %v2589_v29  ;;  %v2609_v53 = vrot.slane %v2525_v43, %v3658_v51 }
 0x215   :  { %v1600_v26 = vrot.slane %v1599_v46, 1  ;;  %v2631_v62 = vrot.slane %v2630_v5, 4  ;;  %v2600_v15 = vmul.f32 %v5726_v20, %v2599_v38  ;;  %v2601_v9 = vmul.f32 %v5150_v48, %v2599_v38 }
 0x216   :  { %v2582_v25 = vadd.f32 %v2580_v37, %v2572_v23  ;;  %v2583_v63 = vadd.f32 %v2581_v28, %v2573_v22  ;;  %v2610_v36 = vmul.f32 %v5160_v30, %v2609_v53  ;;  %v2611_v41 = vmul.f32 %v5165_v16, %v2609_v53 }
 0x217   :  { %v1601_v10 = vadd.f32 %v1600_v26, %v1599_v46  ;;  %v2632_v50 = vadd.f32 %v2631_v62, %v2630_v5 }
 0x218   :  { %v2592_v45 = vadd.f32 %v2590_v35, %v2582_v25  ;;  %v2593_v59 = vadd.f32 %v2591_v19, %v2583_v63 }
 0x219   :  { %3332 = vrcp.f32 %v1601_v10  ;;  %v2633_v43 = vrot.slane %v2632_v50, 2 }
 0x21a   :  { %v2602_v39 = vadd.f32 %v2600_v15, %v2592_v45  ;;  %v2603_v29 = vadd.f32 %v2601_v9, %v2593_v59 }
 0x21b   :  { %v2634_v23 = vadd.f32 %v2633_v43, %v2632_v50 }
 0x21c   :  { %v2612_v37 = vadd.f32 %v2610_v36, %v2602_v39  ;;  %v2613_v28 = vadd.f32 %v2611_v41, %v2603_v29 }
 0x21d   :  { %v2635_v38 = vrot.slane %v2634_v23, 1 }
 0x21e   :  { %3089 = vst [vmem:[%s5336_s4 + $0x100] sm:$0xff] %v2612_v37  ;;  %3090 = vst [vmem:[%s5336_s4 + $0x108] sm:$0xff] %v2613_v28 }
 0x21f   :  { %v2636_v22 = vadd.f32 %v2635_v38, %v2634_v23  ;;  %v5727_v38 = vld [vmem:[#allocation38_spill] sm:$0xff] }
 0x221   :  { %3334 = vrcp.f32 %v2636_v22 }
 0x223   :  { %v3333_v46 = vpop.eup %3332 }
 0x224   :  { %v1603_v5 = vmul.f32 %v3333_v46, %v5180_v32  ;;  %v1604_v35 = vmul.f32 %v3333_v46, %v5182_v61  ;;  %v5728_v46 = vld [vmem:[#allocation39_spill] sm:$0xff] }
 0x226   :  { %v1610_v19 = vrot.slane %v1603_v5, %v3658_v51  ;;  %v1618_v53 = vrot.slane %v1603_v5, %v3660_v52  ;;  %v1628_v25 = vrot.slane %v1603_v5, %v3664_v56  ;;  %v1638_v63 = vrot.slane %v1603_v5, %v3666_v57 }
 0x227   :  { %v1648_v26 = vrot.slane %v1603_v5, %v3672_v2  ;;  %v1658_v61 = vrot.slane %v1603_v5, %v3674_v3  ;;  %v1668_v45 = vrot.slane %v1603_v5, %v3684_v12  ;;  %v1688_v22 = vrot.slane %v1604_v35, %v3658_v51 }
 0x228   :  { %v1611_v62 = vmul.f32 %v1610_v19, %v4886_v60  ;;  %v1612_v15 = vmul.f32 %v1610_v19, %v4891_v13  ;;  %v1619_v9 = vmul.f32 %v4905_v0, %v1618_v53  ;;  %v1620_v32 = vmul.f32 %v4910_v8, %v1618_v53  ;;  %v5729_v19 = vld [vmem:[#allocation40_spill] sm:$0xff] }
 0x229   :  { %v1629_v50 = vmul.f32 %v4921_v11, %v1628_v25  ;;  %v1630_v36 = vmul.f32 %v4926_v14, %v1628_v25  ;;  %v1639_v39 = vmul.f32 %v4939_v4, %v1638_v63  ;;  %v1640_v60 = vmul.f32 %v4944_v21, %v1638_v63  ;;  %v5730_v25 = vld [vmem:[#allocation6_spill] sm:$0xff] }
 0x22a   :  { %v1621_v59 = vadd.f32 %v1619_v9, %v1611_v62  ;;  %v1622_v10 = vadd.f32 %v1620_v32, %v1612_v15  ;;  %v1678_v13 = vrot.slane %v1603_v5, %v5668_v42  ;;  %v1649_v8 = vmul.f32 %v4953_v6, %v1648_v26  ;;  %v5732_v15 = vld [vmem:[#allocation13_spill] sm:$0xff]  ;;  %v5733_v9 = vld [vmem:[#allocation46_spill] sm:$0xff] }
 0x22b   :  { %v3335_v41 = vpop.eup %3334  ;;  %v1650_v43 = vmul.f32 %v4958_v40, %v1648_v26  ;;  %v1659_v37 = vmul.f32 %v4963_v54, %v1658_v61  ;;  %v1660_v28 = vmul.f32 %v4968_v24, %v1658_v61  ;;  %v1669_v21 = vmul.f32 %v5727_v38, %v1668_v45  ;;  %v5731_v26 = vld [vmem:[#allocation45_spill] sm:$0xff] }
 0x22c   :  { %v1631_v0 = vadd.f32 %v1629_v50, %v1621_v59  ;;  %v1632_v29 = vadd.f32 %v1630_v36, %v1622_v10  ;;  %v2638_v11 = vmul.f32 %v3335_v41, %v5220_v33  ;;  %v2639_v14 = vmul.f32 %v3335_v41, %v5227_v31  ;;  %v5734_v59 = vld [vmem:[#allocation31_spill] sm:$0xff] }
 0x22d   :  { %v1670_v5 = vmul.f32 %v5728_v46, %v1668_v45  ;;  %v1679_v6 = vmul.f32 %v5729_v19, %v1678_v13  ;;  %v1680_v10 = vmul.f32 %v5734_v59, %v1678_v13  ;;  %v5735_v50 = vld [vmem:[#allocation3_spill] sm:$0xff] }
 0x22e   :  { %v1641_v23 = vadd.f32 %v1639_v39, %v1631_v0  ;;  %v1642_v4 = vadd.f32 %v1640_v60, %v1632_v29  ;;  %v2645_v40 = vrot.slane %v2638_v11, %v3658_v51  ;;  %v2653_v54 = vrot.slane %v2638_v11, %v3660_v52 }
 0x22f   :  { %v2663_v33 = vrot.slane %v2638_v11, %v3664_v56  ;;  %v2673_v31 = vrot.slane %v2638_v11, %v3666_v57  ;;  %v1689_v52 = vmul.f32 %v5735_v50, %v1688_v22  ;;  %v2683_v29 = vrot.slane %v2638_v11, %v3672_v2 }
 0x230   :  { %v1651_v53 = vadd.f32 %v1649_v8, %v1641_v23  ;;  %v1652_v24 = vadd.f32 %v1650_v43, %v1642_v4  ;;  %v2646_v63 = vmul.f32 %v5730_v25, %v2645_v40  ;;  %v2647_v62 = vmul.f32 %v5731_v26, %v2645_v40 }
 0x231   :  { %v2654_v35 = vmul.f32 %v5732_v15, %v2653_v54  ;;  %v2655_v32 = vmul.f32 %v5733_v9, %v2653_v54  ;;  %v2664_v56 = vmul.f32 %v5060_v47, %v2663_v33  ;;  %v2665_v57 = vmul.f32 %v5719_v44, %v2663_v33 }
 0x232   :  { %v1661_v61 = vadd.f32 %v1659_v37, %v1651_v53  ;;  %v1662_v45 = vadd.f32 %v1660_v28, %v1652_v24  ;;  %v2674_v0 = vmul.f32 %v5078_v49, %v2673_v31  ;;  %v2675_v37 = vmul.f32 %v5721_v34, %v2673_v31 }
 0x233   :  { %v2656_v36 = vadd.f32 %v2654_v35, %v2646_v63  ;;  %v2657_v41 = vadd.f32 %v2655_v32, %v2647_v62  ;;  %v2693_v13 = vrot.slane %v2638_v11, %v3674_v3  ;;  %v1690_v4 = vmul.f32 %v5720_v27, %v1688_v22 }
 0x234   :  { %v1671_v39 = vadd.f32 %v1669_v21, %v1661_v61  ;;  %v1672_v60 = vadd.f32 %v1670_v5, %v1662_v45  ;;  %v2703_v47 = vrot.slane %v2638_v11, %v3684_v12  ;;  %v2684_v21 = vmul.f32 %v5090_v55, %v2683_v29 }
 0x235   :  { %v2666_v8 = vadd.f32 %v2664_v56, %v2656_v36  ;;  %v2667_v43 = vadd.f32 %v2665_v57, %v2657_v41  ;;  %v2685_v49 = vmul.f32 %v5095_v7, %v2683_v29  ;;  %v2713_v5 = vrot.slane %v2638_v11, %v5668_v42 }
 0x236   :  { %v1681_v28 = vadd.f32 %v1679_v6, %v1671_v39  ;;  %v1682_v23 = vadd.f32 %v1680_v10, %v1672_v60  ;;  %v2694_v3 = vmul.f32 %v5722_v1, %v2693_v13  ;;  %v2695_v6 = vmul.f32 %v5723_v17, %v2693_v13 }
 0x237   :  { %v2676_v38 = vadd.f32 %v2674_v0, %v2666_v8  ;;  %v2677_v44 = vadd.f32 %v2675_v37, %v2667_v43  ;;  %v2704_v12 = vmul.f32 %v5724_v58, %v2703_v47  ;;  %v2705_v42 = vmul.f32 %v5725_v18, %v2703_v47 }
 0x238   :  { %v1691_v46 = vadd.f32 %v1689_v52, %v1681_v28  ;;  %v1692_v2 = vadd.f32 %v1690_v4, %v1682_v23  ;;  %v2723_v27 = vrot.slane %v2639_v14, %v3658_v51  ;;  %v2714_v17 = vmul.f32 %v5726_v20, %v2713_v5 }
 0x239   :  { %v2686_v19 = vadd.f32 %v2684_v21, %v2676_v38  ;;  %v2687_v34 = vadd.f32 %v2685_v49, %v2677_v44  ;;  %v2715_v22 = vmul.f32 %v5150_v48, %v2713_v5 }
 0x23a   :  { %2929 = vst [vmem:[%s5336_s4 + $0x80] sm:$0xff] %v1691_v46  ;;  %2930 = vst [vmem:[%s5336_s4 + $0x88] sm:$0xff] %v1692_v2  ;;  %v2724_v53 = vmul.f32 %v5160_v30, %v2723_v27  ;;  %v2725_v24 = vmul.f32 %v5165_v16, %v2723_v27 }
 0x23b   :  { %v2696_v55 = vadd.f32 %v2694_v3, %v2686_v19  ;;  %v2697_v7 = vadd.f32 %v2695_v6, %v2687_v34 }
 0x23d   :  { %v2706_v11 = vadd.f32 %v2704_v12, %v2696_v55  ;;  %v2707_v1 = vadd.f32 %v2705_v42, %v2697_v7 }
 0x23f   :  { %v2716_v40 = vadd.f32 %v2714_v17, %v2706_v11  ;;  %v2717_v54 = vadd.f32 %v2715_v22, %v2707_v1 }
 0x241   :  { %v2726_v33 = vadd.f32 %v2724_v53, %v2716_v40  ;;  %v2727_v58 = vadd.f32 %v2725_v24, %v2717_v54 }
 0x243   :  { %3109 = vst [vmem:[%s5336_s4 + $0x110] sm:$0xff] %v2726_v33  ;;  %3110 = vst [vmem:[%s5336_s4 + $0x118] sm:$0xff] %v2727_v58 }

</bundles_post_ra>
